<compile_context>
chip_gen: v7x
topology: tpu7x:2x2x1
jax: 0.10.0
libtpu: 0.0.40
codegen_flags: <defaults>
</compile_context>

<pallas_src>
import functools

import jax
import jax.numpy as jnp
import numpy as np
from jax import lax
from jax.experimental import pallas as pl
from jax.experimental.pallas import tpu as pltpu

MAX_PAD = 18  # largest dilation/padding used by the module


def _aspp_kernel(H, W, Cin, depth,
                 xp_ref, wc_ref, w6_ref, w12_ref, w18_ref, wimg_ref, bias_ref,
                 out_ref, acc_ref):
    PAD = MAX_PAD
    x = xp_ref[0]                                   # (Hp, Wp, Cin), zero-padded

    # kx = 0 column, shared by the merged-centre 1x1 conv and all three
    # dilated branches' vertical taps.
    col0 = x[:, PAD:PAD + W, :]                     # (Hp, W, Cin)
    center = col0[PAD:PAD + H].reshape(H * W, Cin)  # (H*W, Cin)

    # Image-pool branch (already fused through its conv_1x1_output chunk):
    # global mean -> 1x1 conv; bilinear upsample of a 1x1 map == broadcast.
    mean_c = jnp.sum(center, axis=0, keepdims=True) * (1.0 / float(H * W))
    img = jnp.dot(mean_c, wimg_ref[...],
                  preferred_element_type=jnp.float32)          # (1, depth)

    # Initialize the single accumulator with:
    #   merged-centre conv (a1 + centre taps of a6/a12/a18, all pre-fused
    #   through the output conv) + broadcast image term + total fused bias.
    acc_ref[...] = (jnp.dot(center, wc_ref[...],
                            preferred_element_type=jnp.float32)
                    + img + bias_ref[...])

    # Dilated 3x3 branches; weights pre-fused through conv_1x1_output.
    # Tap index convention: t = (ky+1)*3 + (kx+1), ky/kx in {-1,0,+1}.
    for w_ref, d in ((w6_ref, 6), (w12_ref, 12), (w18_ref, 18)):
        # kx = 0 column (reuse col0): ky = -1, +1 (ky = 0 is in w_center).
        acc_ref[...] += (
            jnp.dot(col0[PAD - d:PAD - d + H].reshape(H * W, Cin), w_ref[1],
                    preferred_element_type=jnp.float32)
            + jnp.dot(col0[PAD + d:PAD + d + H].reshape(H * W, Cin), w_ref[7],
                      preferred_element_type=jnp.float32))
        # kx = +/-1: one W-shifted column slice per side; the three vertical
        # shifts are free leading-dim offsets of that slice.
        for kx in (-1, 1):
            xs = PAD + kx * d
            col = x[:, xs:xs + W, :]                # (Hp, W, Cin)
            part = jnp.dot(col[PAD - d:PAD - d + H].reshape(H * W, Cin),
                           w_ref[kx + 1], preferred_element_type=jnp.float32)
            part = part + jnp.dot(col[PAD:PAD + H].reshape(H * W, Cin),
                                  w_ref[3 + kx + 1],
                                  preferred_element_type=jnp.float32)
            part = part + jnp.dot(col[PAD + d:PAD + d + H].reshape(H * W, Cin),
                                  w_ref[6 + kx + 1],
                                  preferred_element_type=jnp.float32)
            acc_ref[...] += part

    out_ref[0] = acc_ref[...].reshape(H, W, depth).astype(out_ref.dtype)


def aspp_pallas(x_nchw, fused):
    """x_nchw: (N, Cin, H, W) float32. Returns (N, depth, H, W)."""
    N, Cin, H, W = x_nchw.shape
    depth = fused['bias'].shape[-1]

    # NCHW -> NHWC, zero-pad spatially by MAX_PAD on each side.
    x_nhwc = jnp.transpose(x_nchw, (0, 2, 3, 1)).astype(jnp.float32)
    x_pad = jnp.pad(x_nhwc, ((0, 0), (MAX_PAD, MAX_PAD),
                             (MAX_PAD, MAX_PAD), (0, 0)))
    Hp, Wp = H + 2 * MAX_PAD, W + 2 * MAX_PAD

    kernel = functools.partial(_aspp_kernel, H, W, Cin, depth)

    w_spec = pl.BlockSpec((Cin, depth), lambda n: (0, 0))
    w3_spec = pl.BlockSpec((9, Cin, depth), lambda n: (0, 0, 0))
    b_spec = pl.BlockSpec((1, depth), lambda n: (0, 0))

    # Size the scoped-VMEM limit to the actual blocks (+ headroom), keeping it
    # under v7x's 64 MiB physical VMEM.  Counts: double-buffered input/output
    # blocks, accumulator scratch, and all fused weights.
    block_bytes = (2 * Hp * Wp * Cin            # input block (x2 buffers)
                   + 2 * H * W * depth          # output block (x2 buffers)
                   + H * W * depth              # accumulator scratch
                   + (2 + 3 * 9) * Cin * depth  # fused weights
                   + depth) * 4
    vmem_limit = int(min(2 * block_bytes + (8 << 20), 64 << 20))

    out = pl.pallas_call(
        kernel,
        out_shape=jax.ShapeDtypeStruct((N, H, W, depth), jnp.float32),
        grid_spec=pltpu.PrefetchScalarGridSpec(
            num_scalar_prefetch=0,
            grid=(N,),
            in_specs=[
                pl.BlockSpec((1, Hp, Wp, Cin), lambda n: (n, 0, 0, 0)),
                w_spec,                      # merged-centre 1x1 (fused)
                w3_spec, w3_spec, w3_spec,   # fused a6 / a12 / a18
                w_spec,                      # fused image-pool conv
                b_spec,                      # total fused bias
            ],
            out_specs=pl.BlockSpec((1, H, W, depth), lambda n: (n, 0, 0, 0)),
            scratch_shapes=[pltpu.VMEM((H * W, depth), jnp.float32)],
        ),
        compiler_params=pltpu.CompilerParams(
            dimension_semantics=("parallel",),
            vmem_limit_bytes=vmem_limit),
    )(
        x_pad,
        fused['w_center'],
        fused['w_a6'], fused['w_a12'], fused['w_a18'],
        fused['w_img'],
        fused['bias'],
    )
    # NHWC -> NCHW
    return jnp.transpose(out, (0, 3, 1, 2))


# ----------------------------------------------------------------------------
# Host-side weight preparation: fold conv_1x1_output into every branch.
# ----------------------------------------------------------------------------
def fuse_aspp_params(torch_w, torch_b):
    HI = lax.Precision.HIGHEST

    def w1x1(w):   # (O, I, 1, 1) -> (I, O)
        return jnp.transpose(w[:, :, 0, 0], (1, 0)).astype(jnp.float32)

    def w3x3(w):   # (O, I, 3, 3) -> (9, I, O), tap = kh*3 + kw
        return jnp.transpose(w, (2, 3, 1, 0)).reshape(
            9, w.shape[1], w.shape[0]).astype(jnp.float32)

    depth = torch_b['out'].shape[0]
    # conv_1x1_output split into 5 (depth, depth) chunks in concat order
    # [image, a1, a6, a12, a18]; (I, O) orientation.
    w_out = jnp.transpose(torch_w['out'][:, :, 0, 0], (1, 0)).reshape(
        5, depth, depth).astype(jnp.float32)

    w_img = jnp.dot(w1x1(torch_w['conv']), w_out[0], precision=HI)
    w_a1 = jnp.dot(w1x1(torch_w['a1']), w_out[1], precision=HI)
    w_a6 = jnp.einsum('tio,od->tid', w3x3(torch_w['a6']), w_out[2], precision=HI)
    w_a12 = jnp.einsum('tio,od->tid', w3x3(torch_w['a12']), w_out[3], precision=HI)
    w_a18 = jnp.einsum('tio,od->tid', w3x3(torch_w['a18']), w_out[4], precision=HI)

    # Centre taps of the dilated branches see the identical unshifted input
    # -> merge into the (fused) 1x1 branch weight.
    w_center = w_a1 + w_a6[4] + w_a12[4] + w_a18[4]

    # Fold every branch bias through its output-conv chunk into one bias.
    b_total = (torch_b['out']
               + jnp.dot(torch_b['conv'], w_out[0], precision=HI)
               + jnp.dot(torch_b['a1'], w_out[1], precision=HI)
               + jnp.dot(torch_b['a6'], w_out[2], precision=HI)
               + jnp.dot(torch_b['a12'], w_out[3], precision=HI)
               + jnp.dot(torch_b['a18'], w_out[4], precision=HI))

    return {
        'w_center': w_center,
        'w_img': w_img,
        'w_a6': w_a6, 'w_a12': w_a12, 'w_a18': w_a18,
        'bias': b_total[None, :].astype(jnp.float32),
    }


# ----------------------------------------------------------------------------
# Parameter construction (deterministic, synthetic) + pure-JAX reference.
# ----------------------------------------------------------------------------
def make_params(key, in_channel, depth):
    ks = jax.random.split(key, 12)

    def rn(k, shape, scale=0.1):
        return (scale * jax.random.normal(k, shape)).astype(jnp.float32)

    torch_w = {
        'conv': rn(ks[0], (depth, in_channel, 1, 1)),
        'a1':   rn(ks[1], (depth, in_channel, 1, 1)),
        'a6':   rn(ks[2], (depth, in_channel, 3, 3)),
        'a12':  rn(ks[3], (depth, in_channel, 3, 3)),
        'a18':  rn(ks[4], (depth, in_channel, 3, 3)),
        'out':  rn(ks[5], (depth, depth * 5, 1, 1)),
    }
    torch_b = {
        'conv': rn(ks[6], (depth,)), 'a1': rn(ks[7], (depth,)),
        'a6': rn(ks[8], (depth,)), 'a12': rn(ks[9], (depth,)),
        'a18': rn(ks[10], (depth,)), 'out': rn(ks[11], (depth,)),
    }
    return torch_w, torch_b


def aspp_reference(x, torch_w, torch_b):
    """Pure-JAX (lax.conv) replica of the PyTorch forward, NCHW."""
    dn = ('NCHW', 'OIHW', 'NCHW')
    N, Cin, H, W = x.shape

    def conv(inp, w, b, pad=0, dil=1):
        y = lax.conv_general_dilated(
            inp, w, window_strides=(1, 1),
            padding=[(pad, pad), (pad, pad)],
            rhs_dilation=(dil, dil), dimension_numbers=dn)
        return y + b[None, :, None, None]

    pooled = jnp.mean(x, axis=(2, 3), keepdims=True)
    img = conv(pooled, torch_w['conv'], torch_b['conv'])
    img = jnp.broadcast_to(img, (N, img.shape[1], H, W))  # bilinear of 1x1 = const
    a1 = conv(x, torch_w['a1'], torch_b['a1'])
    a6 = conv(x, torch_w['a6'], torch_b['a6'], pad=6, dil=6)
    a12 = conv(x, torch_w['a12'], torch_b['a12'], pad=12, dil=12)
    a18 = conv(x, torch_w['a18'], torch_b['a18'], pad=18, dil=18)
    cat = jnp.concatenate([img, a1, a6, a12, a18], axis=1)
    return conv(cat, torch_w['out'], torch_b['out'])


if __name__ == "__main__":
    N, Cin, H, W = 2, 4, 16, 16
    depth = 8

    key = jax.random.PRNGKey(0)
    x = jax.random.normal(key, (N, Cin, H, W), dtype=jnp.float32)

    torch_w, torch_b = make_params(jax.random.PRNGKey(1), Cin, depth)
    fused = fuse_aspp_params(torch_w, torch_b)

    out = aspp_pallas(x, fused)
    out = jax.block_until_ready(out)

    ref = jax.block_until_ready(aspp_reference(x, torch_w, torch_b))
    np.testing.assert_allclose(np.asarray(out), np.asarray(ref),
                               rtol=1e-4, atol=1e-4)

    print("KERNEL_OK")
</pallas_src>

<mosaic_0001>
module attributes {stable_mosaic.version = 11 : i64} {
  func.func @_aspp_kernel(%arg0: i32, %arg1: memref<1x52x52x4xf32, #tpu.memory_space<vmem>>, %arg2: memref<4x8xf32, #tpu.memory_space<vmem>>, %arg3: memref<9x4x8xf32, #tpu.memory_space<vmem>>, %arg4: memref<9x4x8xf32, #tpu.memory_space<vmem>>, %arg5: memref<9x4x8xf32, #tpu.memory_space<vmem>>, %arg6: memref<4x8xf32, #tpu.memory_space<vmem>>, %arg7: memref<1x8xf32, #tpu.memory_space<vmem>>, %arg8: memref<1x16x16x8xf32, #tpu.memory_space<vmem>>, %arg9: memref<256x8xf32, #tpu.memory_space<vmem>>) attributes {dimension_semantics = [#tpu.dimension_semantics<parallel>], iteration_bounds = array<i64: 2>, scalar_prefetch = 0 : i64, scratch_operands = 1 : i64, tpu.core_type = #tpu.core_type<tc>, window_params = [{transform_indices = @transform_0, window_bounds = array<i64: 1, 52, 52, 4>}, {pipeline_mode = #tpu.pipeline_mode<synchronous>, transform_indices = @transform_1, window_bounds = array<i64: 4, 8>}, {pipeline_mode = #tpu.pipeline_mode<synchronous>, transform_indices = @transform_2, window_bounds = array<i64: 9, 4, 8>}, {pipeline_mode = #tpu.pipeline_mode<synchronous>, transform_indices = @transform_3, window_bounds = array<i64: 9, 4, 8>}, {pipeline_mode = #tpu.pipeline_mode<synchronous>, transform_indices = @transform_4, window_bounds = array<i64: 9, 4, 8>}, {pipeline_mode = #tpu.pipeline_mode<synchronous>, transform_indices = @transform_5, window_bounds = array<i64: 4, 8>}, {pipeline_mode = #tpu.pipeline_mode<synchronous>, transform_indices = @transform_6, window_bounds = array<i64: 1, 8>}, {transform_indices = @transform_7, window_bounds = array<i64: 1, 16, 16, 8>}]} {
    %c0 = arith.constant 0 : index
    %c0_0 = arith.constant 0 : index
    %c0_1 = arith.constant 0 : index
    %c0_2 = arith.constant 0 : index
    %0 = vector.load %arg1[%c0, %c0_0, %c0_1, %c0_2] : memref<1x52x52x4xf32, #tpu.memory_space<vmem>>, vector<1x52x52x4xf32>
    %1 = vector.shape_cast %0 : vector<1x52x52x4xf32> to vector<52x52x4xf32>
    %2 = vector.extract_strided_slice %1 {offsets = [0, 18, 0], sizes = [52, 16, 4], strides = [1, 1, 1]} : vector<52x52x4xf32> to vector<52x16x4xf32>
    %3 = vector.extract_strided_slice %2 {offsets = [18, 0, 0], sizes = [16, 16, 4], strides = [1, 1, 1]} : vector<52x16x4xf32> to vector<16x16x4xf32>
    %4 = vector.shape_cast %3 : vector<16x16x4xf32> to vector<256x4xf32>
    %cst = arith.constant dense<0.000000e+00> : vector<4xf32>
    %5 = vector.multi_reduction <add>, %4, %cst [0] : vector<256x4xf32> to vector<4xf32>
    %6 = vector.shape_cast %5 : vector<4xf32> to vector<1x4xf32>
    %cst_3 = arith.constant 3.906250e-03 : f32
    %7 = vector.broadcast %cst_3 : f32 to vector<1x4xf32>
    %8 = arith.mulf %6, %7 : vector<1x4xf32>
    %c0_4 = arith.constant 0 : index
    %c0_5 = arith.constant 0 : index
    %9 = vector.load %arg6[%c0_4, %c0_5] : memref<4x8xf32, #tpu.memory_space<vmem>>, vector<4x8xf32>
    %cst_6 = arith.constant dense<0.000000e+00> : vector<1x8xf32>
    %10 = tpu.matmul %8, %9, %cst_6 {dimension_numbers = #tpu.dot_dimension_numbers<[1], [0], [0], [1], [0, 0, 1, 1], [], []>} : vector<1x4xf32>, vector<4x8xf32>, vector<1x8xf32> -> vector<1x8xf32>
    %c0_7 = arith.constant 0 : index
    %c0_8 = arith.constant 0 : index
    %11 = vector.load %arg2[%c0_7, %c0_8] : memref<4x8xf32, #tpu.memory_space<vmem>>, vector<4x8xf32>
    %cst_9 = arith.constant dense<0.000000e+00> : vector<256x8xf32>
    %12 = tpu.matmul %4, %11, %cst_9 {dimension_numbers = #tpu.dot_dimension_numbers<[1], [0], [0], [1], [0, 0, 1, 1], [], []>} : vector<256x4xf32>, vector<4x8xf32>, vector<256x8xf32> -> vector<256x8xf32>
    %13 = vector.broadcast %10 : vector<1x8xf32> to vector<256x8xf32>
    %14 = arith.addf %12, %13 : vector<256x8xf32>
    %c0_10 = arith.constant 0 : index
    %c0_11 = arith.constant 0 : index
    %15 = vector.load %arg7[%c0_10, %c0_11] : memref<1x8xf32, #tpu.memory_space<vmem>>, vector<1x8xf32>
    %16 = vector.broadcast %15 : vector<1x8xf32> to vector<256x8xf32>
    %17 = arith.addf %14, %16 : vector<256x8xf32>
    %c0_12 = arith.constant 0 : index
    %c0_13 = arith.constant 0 : index
    %18 = vector.load %arg9[%c0_12, %c0_13] : memref<256x8xf32, #tpu.memory_space<vmem>>, vector<256x8xf32>
    tpu.vector_store %arg9[%c0_12, %c0_13], %17 {strides = array<i32>} : memref<256x8xf32, #tpu.memory_space<vmem>>, vector<256x8xf32>,
    %c0_14 = arith.constant 0 : index
    %c0_15 = arith.constant 0 : index
    %19 = vector.load %arg9[%c0_14, %c0_15] : memref<256x8xf32, #tpu.memory_space<vmem>>, vector<256x8xf32>
    %20 = vector.extract_strided_slice %2 {offsets = [12, 0, 0], sizes = [16, 16, 4], strides = [1, 1, 1]} : vector<52x16x4xf32> to vector<16x16x4xf32>
    %21 = vector.shape_cast %20 : vector<16x16x4xf32> to vector<256x4xf32>
    %c1 = arith.constant 1 : index
    %c0_16 = arith.constant 0 : index
    %c0_17 = arith.constant 0 : index
    %22 = vector.load %arg3[%c1, %c0_16, %c0_17] : memref<9x4x8xf32, #tpu.memory_space<vmem>>, vector<1x4x8xf32>
    %23 = vector.shape_cast %22 : vector<1x4x8xf32> to vector<4x8xf32>
    %cst_18 = arith.constant dense<0.000000e+00> : vector<256x8xf32>
    %24 = tpu.matmul %21, %23, %cst_18 {dimension_numbers = #tpu.dot_dimension_numbers<[1], [0], [0], [1], [0, 0, 1, 1], [], []>} : vector<256x4xf32>, vector<4x8xf32>, vector<256x8xf32> -> vector<256x8xf32>
    %25 = vector.extract_strided_slice %2 {offsets = [24, 0, 0], sizes = [16, 16, 4], strides = [1, 1, 1]} : vector<52x16x4xf32> to vector<16x16x4xf32>
    %26 = vector.shape_cast %25 : vector<16x16x4xf32> to vector<256x4xf32>
    %c7 = arith.constant 7 : index
    %c0_19 = arith.constant 0 : index
    %c0_20 = arith.constant 0 : index
    %27 = vector.load %arg3[%c7, %c0_19, %c0_20] : memref<9x4x8xf32, #tpu.memory_space<vmem>>, vector<1x4x8xf32>
    %28 = vector.shape_cast %27 : vector<1x4x8xf32> to vector<4x8xf32>
    %cst_21 = arith.constant dense<0.000000e+00> : vector<256x8xf32>
    %29 = tpu.matmul %26, %28, %cst_21 {dimension_numbers = #tpu.dot_dimension_numbers<[1], [0], [0], [1], [0, 0, 1, 1], [], []>} : vector<256x4xf32>, vector<4x8xf32>, vector<256x8xf32> -> vector<256x8xf32>
    %30 = arith.addf %24, %29 : vector<256x8xf32>
    %31 = arith.addf %19, %30 : vector<256x8xf32>
    %c0_22 = arith.constant 0 : index
    %c0_23 = arith.constant 0 : index
    %32 = vector.load %arg9[%c0_22, %c0_23] : memref<256x8xf32, #tpu.memory_space<vmem>>, vector<256x8xf32>
    tpu.vector_store %arg9[%c0_22, %c0_23], %31 {strides = array<i32>} : memref<256x8xf32, #tpu.memory_space<vmem>>, vector<256x8xf32>,
    %33 = vector.extract_strided_slice %1 {offsets = [0, 12, 0], sizes = [52, 16, 4], strides = [1, 1, 1]} : vector<52x52x4xf32> to vector<52x16x4xf32>
    %34 = vector.extract_strided_slice %33 {offsets = [12, 0, 0], sizes = [16, 16, 4], strides = [1, 1, 1]} : vector<52x16x4xf32> to vector<16x16x4xf32>
    %35 = vector.shape_cast %34 : vector<16x16x4xf32> to vector<256x4xf32>
    %c0_24 = arith.constant 0 : index
    %c0_25 = arith.constant 0 : index
    %c0_26 = arith.constant 0 : index
    %36 = vector.load %arg3[%c0_24, %c0_25, %c0_26] : memref<9x4x8xf32, #tpu.memory_space<vmem>>, vector<1x4x8xf32>
    %37 = vector.shape_cast %36 : vector<1x4x8xf32> to vector<4x8xf32>
    %cst_27 = arith.constant dense<0.000000e+00> : vector<256x8xf32>
    %38 = tpu.matmul %35, %37, %cst_27 {dimension_numbers = #tpu.dot_dimension_numbers<[1], [0], [0], [1], [0, 0, 1, 1], [], []>} : vector<256x4xf32>, vector<4x8xf32>, vector<256x8xf32> -> vector<256x8xf32>
    %39 = vector.extract_strided_slice %33 {offsets = [18, 0, 0], sizes = [16, 16, 4], strides = [1, 1, 1]} : vector<52x16x4xf32> to vector<16x16x4xf32>
    %40 = vector.shape_cast %39 : vector<16x16x4xf32> to vector<256x4xf32>
    %c3 = arith.constant 3 : index
    %c0_28 = arith.constant 0 : index
    %c0_29 = arith.constant 0 : index
    %41 = vector.load %arg3[%c3, %c0_28, %c0_29] : memref<9x4x8xf32, #tpu.memory_space<vmem>>, vector<1x4x8xf32>
    %42 = vector.shape_cast %41 : vector<1x4x8xf32> to vector<4x8xf32>
    %cst_30 = arith.constant dense<0.000000e+00> : vector<256x8xf32>
    %43 = tpu.matmul %40, %42, %cst_30 {dimension_numbers = #tpu.dot_dimension_numbers<[1], [0], [0], [1], [0, 0, 1, 1], [], []>} : vector<256x4xf32>, vector<4x8xf32>, vector<256x8xf32> -> vector<256x8xf32>
    %44 = arith.addf %38, %43 : vector<256x8xf32>
    %45 = vector.extract_strided_slice %33 {offsets = [24, 0, 0], sizes = [16, 16, 4], strides = [1, 1, 1]} : vector<52x16x4xf32> to vector<16x16x4xf32>
    %46 = vector.shape_cast %45 : vector<16x16x4xf32> to vector<256x4xf32>
    %c6 = arith.constant 6 : index
    %c0_31 = arith.constant 0 : index
    %c0_32 = arith.constant 0 : index
    %47 = vector.load %arg3[%c6, %c0_31, %c0_32] : memref<9x4x8xf32, #tpu.memory_space<vmem>>, vector<1x4x8xf32>
    %48 = vector.shape_cast %47 : vector<1x4x8xf32> to vector<4x8xf32>
    %cst_33 = arith.constant dense<0.000000e+00> : vector<256x8xf32>
    %49 = tpu.matmul %46, %48, %cst_33 {dimension_numbers = #tpu.dot_dimension_numbers<[1], [0], [0], [1], [0, 0, 1, 1], [], []>} : vector<256x4xf32>, vector<4x8xf32>, vector<256x8xf32> -> vector<256x8xf32>
    %50 = arith.addf %44, %49 : vector<256x8xf32>
    %c0_34 = arith.constant 0 : index
    %c0_35 = arith.constant 0 : index
    %51 = vector.load %arg9[%c0_34, %c0_35] : memref<256x8xf32, #tpu.memory_space<vmem>>, vector<256x8xf32>
    %52 = arith.addf %51, %50 : vector<256x8xf32>
    %c0_36 = arith.constant 0 : index
    %c0_37 = arith.constant 0 : index
    %53 = vector.load %arg9[%c0_36, %c0_37] : memref<256x8xf32, #tpu.memory_space<vmem>>, vector<256x8xf32>
    tpu.vector_store %arg9[%c0_36, %c0_37], %52 {strides = array<i32>} : memref<256x8xf32, #tpu.memory_space<vmem>>, vector<256x8xf32>,
    %54 = vector.extract_strided_slice %1 {offsets = [0, 24, 0], sizes = [52, 16, 4], strides = [1, 1, 1]} : vector<52x52x4xf32> to vector<52x16x4xf32>
    %55 = vector.extract_strided_slice %54 {offsets = [12, 0, 0], sizes = [16, 16, 4], strides = [1, 1, 1]} : vector<52x16x4xf32> to vector<16x16x4xf32>
    %56 = vector.shape_cast %55 : vector<16x16x4xf32> to vector<256x4xf32>
    %c2 = arith.constant 2 : index
    %c0_38 = arith.constant 0 : index
    %c0_39 = arith.constant 0 : index
    %57 = vector.load %arg3[%c2, %c0_38, %c0_39] : memref<9x4x8xf32, #tpu.memory_space<vmem>>, vector<1x4x8xf32>
    %58 = vector.shape_cast %57 : vector<1x4x8xf32> to vector<4x8xf32>
    %cst_40 = arith.constant dense<0.000000e+00> : vector<256x8xf32>
    %59 = tpu.matmul %56, %58, %cst_40 {dimension_numbers = #tpu.dot_dimension_numbers<[1], [0], [0], [1], [0, 0, 1, 1], [], []>} : vector<256x4xf32>, vector<4x8xf32>, vector<256x8xf32> -> vector<256x8xf32>
    %60 = vector.extract_strided_slice %54 {offsets = [18, 0, 0], sizes = [16, 16, 4], strides = [1, 1, 1]} : vector<52x16x4xf32> to vector<16x16x4xf32>
    %61 = vector.shape_cast %60 : vector<16x16x4xf32> to vector<256x4xf32>
    %c5 = arith.constant 5 : index
    %c0_41 = arith.constant 0 : index
    %c0_42 = arith.constant 0 : index
    %62 = vector.load %arg3[%c5, %c0_41, %c0_42] : memref<9x4x8xf32, #tpu.memory_space<vmem>>, vector<1x4x8xf32>
    %63 = vector.shape_cast %62 : vector<1x4x8xf32> to vector<4x8xf32>
    %cst_43 = arith.constant dense<0.000000e+00> : vector<256x8xf32>
    %64 = tpu.matmul %61, %63, %cst_43 {dimension_numbers = #tpu.dot_dimension_numbers<[1], [0], [0], [1], [0, 0, 1, 1], [], []>} : vector<256x4xf32>, vector<4x8xf32>, vector<256x8xf32> -> vector<256x8xf32>
    %65 = arith.addf %59, %64 : vector<256x8xf32>
    %66 = vector.extract_strided_slice %54 {offsets = [24, 0, 0], sizes = [16, 16, 4], strides = [1, 1, 1]} : vector<52x16x4xf32> to vector<16x16x4xf32>
    %67 = vector.shape_cast %66 : vector<16x16x4xf32> to vector<256x4xf32>
    %c8 = arith.constant 8 : index
    %c0_44 = arith.constant 0 : index
    %c0_45 = arith.constant 0 : index
    %68 = vector.load %arg3[%c8, %c0_44, %c0_45] : memref<9x4x8xf32, #tpu.memory_space<vmem>>, vector<1x4x8xf32>
    %69 = vector.shape_cast %68 : vector<1x4x8xf32> to vector<4x8xf32>
    %cst_46 = arith.constant dense<0.000000e+00> : vector<256x8xf32>
    %70 = tpu.matmul %67, %69, %cst_46 {dimension_numbers = #tpu.dot_dimension_numbers<[1], [0], [0], [1], [0, 0, 1, 1], [], []>} : vector<256x4xf32>, vector<4x8xf32>, vector<256x8xf32> -> vector<256x8xf32>
    %71 = arith.addf %65, %70 : vector<256x8xf32>
    %c0_47 = arith.constant 0 : index
    %c0_48 = arith.constant 0 : index
    %72 = vector.load %arg9[%c0_47, %c0_48] : memref<256x8xf32, #tpu.memory_space<vmem>>, vector<256x8xf32>
    %73 = arith.addf %72, %71 : vector<256x8xf32>
    %c0_49 = arith.constant 0 : index
    %c0_50 = arith.constant 0 : index
    %74 = vector.load %arg9[%c0_49, %c0_50] : memref<256x8xf32, #tpu.memory_space<vmem>>, vector<256x8xf32>
    tpu.vector_store %arg9[%c0_49, %c0_50], %73 {strides = array<i32>} : memref<256x8xf32, #tpu.memory_space<vmem>>, vector<256x8xf32>,
    %c0_51 = arith.constant 0 : index
    %c0_52 = arith.constant 0 : index
    %75 = vector.load %arg9[%c0_51, %c0_52] : memref<256x8xf32, #tpu.memory_space<vmem>>, vector<256x8xf32>
    %76 = vector.extract_strided_slice %2 {offsets = [6, 0, 0], sizes = [16, 16, 4], strides = [1, 1, 1]} : vector<52x16x4xf32> to vector<16x16x4xf32>
    %77 = vector.shape_cast %76 : vector<16x16x4xf32> to vector<256x4xf32>
    %c1_53 = arith.constant 1 : index
    %c0_54 = arith.constant 0 : index
    %c0_55 = arith.constant 0 : index
    %78 = vector.load %arg4[%c1_53, %c0_54, %c0_55] : memref<9x4x8xf32, #tpu.memory_space<vmem>>, vector<1x4x8xf32>
    %79 = vector.shape_cast %78 : vector<1x4x8xf32> to vector<4x8xf32>
    %cst_56 = arith.constant dense<0.000000e+00> : vector<256x8xf32>
    %80 = tpu.matmul %77, %79, %cst_56 {dimension_numbers = #tpu.dot_dimension_numbers<[1], [0], [0], [1], [0, 0, 1, 1], [], []>} : vector<256x4xf32>, vector<4x8xf32>, vector<256x8xf32> -> vector<256x8xf32>
    %81 = vector.extract_strided_slice %2 {offsets = [30, 0, 0], sizes = [16, 16, 4], strides = [1, 1, 1]} : vector<52x16x4xf32> to vector<16x16x4xf32>
    %82 = vector.shape_cast %81 : vector<16x16x4xf32> to vector<256x4xf32>
    %c7_57 = arith.constant 7 : index
    %c0_58 = arith.constant 0 : index
    %c0_59 = arith.constant 0 : index
    %83 = vector.load %arg4[%c7_57, %c0_58, %c0_59] : memref<9x4x8xf32, #tpu.memory_space<vmem>>, vector<1x4x8xf32>
    %84 = vector.shape_cast %83 : vector<1x4x8xf32> to vector<4x8xf32>
    %cst_60 = arith.constant dense<0.000000e+00> : vector<256x8xf32>
    %85 = tpu.matmul %82, %84, %cst_60 {dimension_numbers = #tpu.dot_dimension_numbers<[1], [0], [0], [1], [0, 0, 1, 1], [], []>} : vector<256x4xf32>, vector<4x8xf32>, vector<256x8xf32> -> vector<256x8xf32>
    %86 = arith.addf %80, %85 : vector<256x8xf32>
    %87 = arith.addf %75, %86 : vector<256x8xf32>
    %c0_61 = arith.constant 0 : index
    %c0_62 = arith.constant 0 : index
    %88 = vector.load %arg9[%c0_61, %c0_62] : memref<256x8xf32, #tpu.memory_space<vmem>>, vector<256x8xf32>
    tpu.vector_store %arg9[%c0_61, %c0_62], %87 {strides = array<i32>} : memref<256x8xf32, #tpu.memory_space<vmem>>, vector<256x8xf32>,
    %89 = vector.extract_strided_slice %1 {offsets = [0, 6, 0], sizes = [52, 16, 4], strides = [1, 1, 1]} : vector<52x52x4xf32> to vector<52x16x4xf32>
    %90 = vector.extract_strided_slice %89 {offsets = [6, 0, 0], sizes = [16, 16, 4], strides = [1, 1, 1]} : vector<52x16x4xf32> to vector<16x16x4xf32>
    %91 = vector.shape_cast %90 : vector<16x16x4xf32> to vector<256x4xf32>
    %c0_63 = arith.constant 0 : index
    %c0_64 = arith.constant 0 : index
    %c0_65 = arith.constant 0 : index
    %92 = vector.load %arg4[%c0_63, %c0_64, %c0_65] : memref<9x4x8xf32, #tpu.memory_space<vmem>>, vector<1x4x8xf32>
    %93 = vector.shape_cast %92 : vector<1x4x8xf32> to vector<4x8xf32>
    %cst_66 = arith.constant dense<0.000000e+00> : vector<256x8xf32>
    %94 = tpu.matmul %91, %93, %cst_66 {dimension_numbers = #tpu.dot_dimension_numbers<[1], [0], [0], [1], [0, 0, 1, 1], [], []>} : vector<256x4xf32>, vector<4x8xf32>, vector<256x8xf32> -> vector<256x8xf32>
    %95 = vector.extract_strided_slice %89 {offsets = [18, 0, 0], sizes = [16, 16, 4], strides = [1, 1, 1]} : vector<52x16x4xf32> to vector<16x16x4xf32>
    %96 = vector.shape_cast %95 : vector<16x16x4xf32> to vector<256x4xf32>
    %c3_67 = arith.constant 3 : index
    %c0_68 = arith.constant 0 : index
    %c0_69 = arith.constant 0 : index
    %97 = vector.load %arg4[%c3_67, %c0_68, %c0_69] : memref<9x4x8xf32, #tpu.memory_space<vmem>>, vector<1x4x8xf32>
    %98 = vector.shape_cast %97 : vector<1x4x8xf32> to vector<4x8xf32>
    %cst_70 = arith.constant dense<0.000000e+00> : vector<256x8xf32>
    %99 = tpu.matmul %96, %98, %cst_70 {dimension_numbers = #tpu.dot_dimension_numbers<[1], [0], [0], [1], [0, 0, 1, 1], [], []>} : vector<256x4xf32>, vector<4x8xf32>, vector<256x8xf32> -> vector<256x8xf32>
    %100 = arith.addf %94, %99 : vector<256x8xf32>
    %101 = vector.extract_strided_slice %89 {offsets = [30, 0, 0], sizes = [16, 16, 4], strides = [1, 1, 1]} : vector<52x16x4xf32> to vector<16x16x4xf32>
    %102 = vector.shape_cast %101 : vector<16x16x4xf32> to vector<256x4xf32>
    %c6_71 = arith.constant 6 : index
    %c0_72 = arith.constant 0 : index
    %c0_73 = arith.constant 0 : index
    %103 = vector.load %arg4[%c6_71, %c0_72, %c0_73] : memref<9x4x8xf32, #tpu.memory_space<vmem>>, vector<1x4x8xf32>
    %104 = vector.shape_cast %103 : vector<1x4x8xf32> to vector<4x8xf32>
    %cst_74 = arith.constant dense<0.000000e+00> : vector<256x8xf32>
    %105 = tpu.matmul %102, %104, %cst_74 {dimension_numbers = #tpu.dot_dimension_numbers<[1], [0], [0], [1], [0, 0, 1, 1], [], []>} : vector<256x4xf32>, vector<4x8xf32>, vector<256x8xf32> -> vector<256x8xf32>
    %106 = arith.addf %100, %105 : vector<256x8xf32>
    %c0_75 = arith.constant 0 : index
    %c0_76 = arith.constant 0 : index
    %107 = vector.load %arg9[%c0_75, %c0_76] : memref<256x8xf32, #tpu.memory_space<vmem>>, vector<256x8xf32>
    %108 = arith.addf %107, %106 : vector<256x8xf32>
    %c0_77 = arith.constant 0 : index
    %c0_78 = arith.constant 0 : index
    %109 = vector.load %arg9[%c0_77, %c0_78] : memref<256x8xf32, #tpu.memory_space<vmem>>, vector<256x8xf32>
    tpu.vector_store %arg9[%c0_77, %c0_78], %108 {strides = array<i32>} : memref<256x8xf32, #tpu.memory_space<vmem>>, vector<256x8xf32>,
    %110 = vector.extract_strided_slice %1 {offsets = [0, 30, 0], sizes = [52, 16, 4], strides = [1, 1, 1]} : vector<52x52x4xf32> to vector<52x16x4xf32>
    %111 = vector.extract_strided_slice %110 {offsets = [6, 0, 0], sizes = [16, 16, 4], strides = [1, 1, 1]} : vector<52x16x4xf32> to vector<16x16x4xf32>
    %112 = vector.shape_cast %111 : vector<16x16x4xf32> to vector<256x4xf32>
    %c2_79 = arith.constant 2 : index
    %c0_80 = arith.constant 0 : index
    %c0_81 = arith.constant 0 : index
    %113 = vector.load %arg4[%c2_79, %c0_80, %c0_81] : memref<9x4x8xf32, #tpu.memory_space<vmem>>, vector<1x4x8xf32>
    %114 = vector.shape_cast %113 : vector<1x4x8xf32> to vector<4x8xf32>
    %cst_82 = arith.constant dense<0.000000e+00> : vector<256x8xf32>
    %115 = tpu.matmul %112, %114, %cst_82 {dimension_numbers = #tpu.dot_dimension_numbers<[1], [0], [0], [1], [0, 0, 1, 1], [], []>} : vector<256x4xf32>, vector<4x8xf32>, vector<256x8xf32> -> vector<256x8xf32>
    %116 = vector.extract_strided_slice %110 {offsets = [18, 0, 0], sizes = [16, 16, 4], strides = [1, 1, 1]} : vector<52x16x4xf32> to vector<16x16x4xf32>
    %117 = vector.shape_cast %116 : vector<16x16x4xf32> to vector<256x4xf32>
    %c5_83 = arith.constant 5 : index
    %c0_84 = arith.constant 0 : index
    %c0_85 = arith.constant 0 : index
    %118 = vector.load %arg4[%c5_83, %c0_84, %c0_85] : memref<9x4x8xf32, #tpu.memory_space<vmem>>, vector<1x4x8xf32>
    %119 = vector.shape_cast %118 : vector<1x4x8xf32> to vector<4x8xf32>
    %cst_86 = arith.constant dense<0.000000e+00> : vector<256x8xf32>
    %120 = tpu.matmul %117, %119, %cst_86 {dimension_numbers = #tpu.dot_dimension_numbers<[1], [0], [0], [1], [0, 0, 1, 1], [], []>} : vector<256x4xf32>, vector<4x8xf32>, vector<256x8xf32> -> vector<256x8xf32>
    %121 = arith.addf %115, %120 : vector<256x8xf32>
    %122 = vector.extract_strided_slice %110 {offsets = [30, 0, 0], sizes = [16, 16, 4], strides = [1, 1, 1]} : vector<52x16x4xf32> to vector<16x16x4xf32>
    %123 = vector.shape_cast %122 : vector<16x16x4xf32> to vector<256x4xf32>
    %c8_87 = arith.constant 8 : index
    %c0_88 = arith.constant 0 : index
    %c0_89 = arith.constant 0 : index
    %124 = vector.load %arg4[%c8_87, %c0_88, %c0_89] : memref<9x4x8xf32, #tpu.memory_space<vmem>>, vector<1x4x8xf32>
    %125 = vector.shape_cast %124 : vector<1x4x8xf32> to vector<4x8xf32>
    %cst_90 = arith.constant dense<0.000000e+00> : vector<256x8xf32>
    %126 = tpu.matmul %123, %125, %cst_90 {dimension_numbers = #tpu.dot_dimension_numbers<[1], [0], [0], [1], [0, 0, 1, 1], [], []>} : vector<256x4xf32>, vector<4x8xf32>, vector<256x8xf32> -> vector<256x8xf32>
    %127 = arith.addf %121, %126 : vector<256x8xf32>
    %c0_91 = arith.constant 0 : index
    %c0_92 = arith.constant 0 : index
    %128 = vector.load %arg9[%c0_91, %c0_92] : memref<256x8xf32, #tpu.memory_space<vmem>>, vector<256x8xf32>
    %129 = arith.addf %128, %127 : vector<256x8xf32>
    %c0_93 = arith.constant 0 : index
    %c0_94 = arith.constant 0 : index
    %130 = vector.load %arg9[%c0_93, %c0_94] : memref<256x8xf32, #tpu.memory_space<vmem>>, vector<256x8xf32>
    tpu.vector_store %arg9[%c0_93, %c0_94], %129 {strides = array<i32>} : memref<256x8xf32, #tpu.memory_space<vmem>>, vector<256x8xf32>,
    %c0_95 = arith.constant 0 : index
    %c0_96 = arith.constant 0 : index
    %131 = vector.load %arg9[%c0_95, %c0_96] : memref<256x8xf32, #tpu.memory_space<vmem>>, vector<256x8xf32>
    %132 = vector.extract_strided_slice %2 {offsets = [0, 0, 0], sizes = [16, 16, 4], strides = [1, 1, 1]} : vector<52x16x4xf32> to vector<16x16x4xf32>
    %133 = vector.shape_cast %132 : vector<16x16x4xf32> to vector<256x4xf32>
    %c1_97 = arith.constant 1 : index
    %c0_98 = arith.constant 0 : index
    %c0_99 = arith.constant 0 : index
    %134 = vector.load %arg5[%c1_97, %c0_98, %c0_99] : memref<9x4x8xf32, #tpu.memory_space<vmem>>, vector<1x4x8xf32>
    %135 = vector.shape_cast %134 : vector<1x4x8xf32> to vector<4x8xf32>
    %cst_100 = arith.constant dense<0.000000e+00> : vector<256x8xf32>
    %136 = tpu.matmul %133, %135, %cst_100 {dimension_numbers = #tpu.dot_dimension_numbers<[1], [0], [0], [1], [0, 0, 1, 1], [], []>} : vector<256x4xf32>, vector<4x8xf32>, vector<256x8xf32> -> vector<256x8xf32>
    %137 = vector.extract_strided_slice %2 {offsets = [36, 0, 0], sizes = [16, 16, 4], strides = [1, 1, 1]} : vector<52x16x4xf32> to vector<16x16x4xf32>
    %138 = vector.shape_cast %137 : vector<16x16x4xf32> to vector<256x4xf32>
    %c7_101 = arith.constant 7 : index
    %c0_102 = arith.constant 0 : index
    %c0_103 = arith.constant 0 : index
    %139 = vector.load %arg5[%c7_101, %c0_102, %c0_103] : memref<9x4x8xf32, #tpu.memory_space<vmem>>, vector<1x4x8xf32>
    %140 = vector.shape_cast %139 : vector<1x4x8xf32> to vector<4x8xf32>
    %cst_104 = arith.constant dense<0.000000e+00> : vector<256x8xf32>
    %141 = tpu.matmul %138, %140, %cst_104 {dimension_numbers = #tpu.dot_dimension_numbers<[1], [0], [0], [1], [0, 0, 1, 1], [], []>} : vector<256x4xf32>, vector<4x8xf32>, vector<256x8xf32> -> vector<256x8xf32>
    %142 = arith.addf %136, %141 : vector<256x8xf32>
    %143 = arith.addf %131, %142 : vector<256x8xf32>
    %c0_105 = arith.constant 0 : index
    %c0_106 = arith.constant 0 : index
    %144 = vector.load %arg9[%c0_105, %c0_106] : memref<256x8xf32, #tpu.memory_space<vmem>>, vector<256x8xf32>
    tpu.vector_store %arg9[%c0_105, %c0_106], %143 {strides = array<i32>} : memref<256x8xf32, #tpu.memory_space<vmem>>, vector<256x8xf32>,
    %145 = vector.extract_strided_slice %1 {offsets = [0, 0, 0], sizes = [52, 16, 4], strides = [1, 1, 1]} : vector<52x52x4xf32> to vector<52x16x4xf32>
    %146 = vector.extract_strided_slice %145 {offsets = [0, 0, 0], sizes = [16, 16, 4], strides = [1, 1, 1]} : vector<52x16x4xf32> to vector<16x16x4xf32>
    %147 = vector.shape_cast %146 : vector<16x16x4xf32> to vector<256x4xf32>
    %c0_107 = arith.constant 0 : index
    %c0_108 = arith.constant 0 : index
    %c0_109 = arith.constant 0 : index
    %148 = vector.load %arg5[%c0_107, %c0_108, %c0_109] : memref<9x4x8xf32, #tpu.memory_space<vmem>>, vector<1x4x8xf32>
    %149 = vector.shape_cast %148 : vector<1x4x8xf32> to vector<4x8xf32>
    %cst_110 = arith.constant dense<0.000000e+00> : vector<256x8xf32>
    %150 = tpu.matmul %147, %149, %cst_110 {dimension_numbers = #tpu.dot_dimension_numbers<[1], [0], [0], [1], [0, 0, 1, 1], [], []>} : vector<256x4xf32>, vector<4x8xf32>, vector<256x8xf32> -> vector<256x8xf32>
    %151 = vector.extract_strided_slice %145 {offsets = [18, 0, 0], sizes = [16, 16, 4], strides = [1, 1, 1]} : vector<52x16x4xf32> to vector<16x16x4xf32>
    %152 = vector.shape_cast %151 : vector<16x16x4xf32> to vector<256x4xf32>
    %c3_111 = arith.constant 3 : index
    %c0_112 = arith.constant 0 : index
    %c0_113 = arith.constant 0 : index
    %153 = vector.load %arg5[%c3_111, %c0_112, %c0_113] : memref<9x4x8xf32, #tpu.memory_space<vmem>>, vector<1x4x8xf32>
    %154 = vector.shape_cast %153 : vector<1x4x8xf32> to vector<4x8xf32>
    %cst_114 = arith.constant dense<0.000000e+00> : vector<256x8xf32>
    %155 = tpu.matmul %152, %154, %cst_114 {dimension_numbers = #tpu.dot_dimension_numbers<[1], [0], [0], [1], [0, 0, 1, 1], [], []>} : vector<256x4xf32>, vector<4x8xf32>, vector<256x8xf32> -> vector<256x8xf32>
    %156 = arith.addf %150, %155 : vector<256x8xf32>
    %157 = vector.extract_strided_slice %145 {offsets = [36, 0, 0], sizes = [16, 16, 4], strides = [1, 1, 1]} : vector<52x16x4xf32> to vector<16x16x4xf32>
    %158 = vector.shape_cast %157 : vector<16x16x4xf32> to vector<256x4xf32>
    %c6_115 = arith.constant 6 : index
    %c0_116 = arith.constant 0 : index
    %c0_117 = arith.constant 0 : index
    %159 = vector.load %arg5[%c6_115, %c0_116, %c0_117] : memref<9x4x8xf32, #tpu.memory_space<vmem>>, vector<1x4x8xf32>
    %160 = vector.shape_cast %159 : vector<1x4x8xf32> to vector<4x8xf32>
    %cst_118 = arith.constant dense<0.000000e+00> : vector<256x8xf32>
    %161 = tpu.matmul %158, %160, %cst_118 {dimension_numbers = #tpu.dot_dimension_numbers<[1], [0], [0], [1], [0, 0, 1, 1], [], []>} : vector<256x4xf32>, vector<4x8xf32>, vector<256x8xf32> -> vector<256x8xf32>
    %162 = arith.addf %156, %161 : vector<256x8xf32>
    %c0_119 = arith.constant 0 : index
    %c0_120 = arith.constant 0 : index
    %163 = vector.load %arg9[%c0_119, %c0_120] : memref<256x8xf32, #tpu.memory_space<vmem>>, vector<256x8xf32>
    %164 = arith.addf %163, %162 : vector<256x8xf32>
    %c0_121 = arith.constant 0 : index
    %c0_122 = arith.constant 0 : index
    %165 = vector.load %arg9[%c0_121, %c0_122] : memref<256x8xf32, #tpu.memory_space<vmem>>, vector<256x8xf32>
    tpu.vector_store %arg9[%c0_121, %c0_122], %164 {strides = array<i32>} : memref<256x8xf32, #tpu.memory_space<vmem>>, vector<256x8xf32>,
    %166 = vector.extract_strided_slice %1 {offsets = [0, 36, 0], sizes = [52, 16, 4], strides = [1, 1, 1]} : vector<52x52x4xf32> to vector<52x16x4xf32>
    %167 = vector.extract_strided_slice %166 {offsets = [0, 0, 0], sizes = [16, 16, 4], strides = [1, 1, 1]} : vector<52x16x4xf32> to vector<16x16x4xf32>
    %168 = vector.shape_cast %167 : vector<16x16x4xf32> to vector<256x4xf32>
    %c2_123 = arith.constant 2 : index
    %c0_124 = arith.constant 0 : index
    %c0_125 = arith.constant 0 : index
    %169 = vector.load %arg5[%c2_123, %c0_124, %c0_125] : memref<9x4x8xf32, #tpu.memory_space<vmem>>, vector<1x4x8xf32>
    %170 = vector.shape_cast %169 : vector<1x4x8xf32> to vector<4x8xf32>
    %cst_126 = arith.constant dense<0.000000e+00> : vector<256x8xf32>
    %171 = tpu.matmul %168, %170, %cst_126 {dimension_numbers = #tpu.dot_dimension_numbers<[1], [0], [0], [1], [0, 0, 1, 1], [], []>} : vector<256x4xf32>, vector<4x8xf32>, vector<256x8xf32> -> vector<256x8xf32>
    %172 = vector.extract_strided_slice %166 {offsets = [18, 0, 0], sizes = [16, 16, 4], strides = [1, 1, 1]} : vector<52x16x4xf32> to vector<16x16x4xf32>
    %173 = vector.shape_cast %172 : vector<16x16x4xf32> to vector<256x4xf32>
    %c5_127 = arith.constant 5 : index
    %c0_128 = arith.constant 0 : index
    %c0_129 = arith.constant 0 : index
    %174 = vector.load %arg5[%c5_127, %c0_128, %c0_129] : memref<9x4x8xf32, #tpu.memory_space<vmem>>, vector<1x4x8xf32>
    %175 = vector.shape_cast %174 : vector<1x4x8xf32> to vector<4x8xf32>
    %cst_130 = arith.constant dense<0.000000e+00> : vector<256x8xf32>
    %176 = tpu.matmul %173, %175, %cst_130 {dimension_numbers = #tpu.dot_dimension_numbers<[1], [0], [0], [1], [0, 0, 1, 1], [], []>} : vector<256x4xf32>, vector<4x8xf32>, vector<256x8xf32> -> vector<256x8xf32>
    %177 = arith.addf %171, %176 : vector<256x8xf32>
    %178 = vector.extract_strided_slice %166 {offsets = [36, 0, 0], sizes = [16, 16, 4], strides = [1, 1, 1]} : vector<52x16x4xf32> to vector<16x16x4xf32>
    %179 = vector.shape_cast %178 : vector<16x16x4xf32> to vector<256x4xf32>
    %c8_131 = arith.constant 8 : index
    %c0_132 = arith.constant 0 : index
    %c0_133 = arith.constant 0 : index
    %180 = vector.load %arg5[%c8_131, %c0_132, %c0_133] : memref<9x4x8xf32, #tpu.memory_space<vmem>>, vector<1x4x8xf32>
    %181 = vector.shape_cast %180 : vector<1x4x8xf32> to vector<4x8xf32>
    %cst_134 = arith.constant dense<0.000000e+00> : vector<256x8xf32>
    %182 = tpu.matmul %179, %181, %cst_134 {dimension_numbers = #tpu.dot_dimension_numbers<[1], [0], [0], [1], [0, 0, 1, 1], [], []>} : vector<256x4xf32>, vector<4x8xf32>, vector<256x8xf32> -> vector<256x8xf32>
    %183 = arith.addf %177, %182 : vector<256x8xf32>
    %c0_135 = arith.constant 0 : index
    %c0_136 = arith.constant 0 : index
    %184 = vector.load %arg9[%c0_135, %c0_136] : memref<256x8xf32, #tpu.memory_space<vmem>>, vector<256x8xf32>
    %185 = arith.addf %184, %183 : vector<256x8xf32>
    %c0_137 = arith.constant 0 : index
    %c0_138 = arith.constant 0 : index
    %186 = vector.load %arg9[%c0_137, %c0_138] : memref<256x8xf32, #tpu.memory_space<vmem>>, vector<256x8xf32>
    tpu.vector_store %arg9[%c0_137, %c0_138], %185 {strides = array<i32>} : memref<256x8xf32, #tpu.memory_space<vmem>>, vector<256x8xf32>,
    %c0_139 = arith.constant 0 : index
    %c0_140 = arith.constant 0 : index
    %187 = vector.load %arg9[%c0_139, %c0_140] : memref<256x8xf32, #tpu.memory_space<vmem>>, vector<256x8xf32>
    %188 = vector.shape_cast %187 : vector<256x8xf32> to vector<16x16x8xf32>
    %c0_141 = arith.constant 0 : index
    %c0_142 = arith.constant 0 : index
    %c0_143 = arith.constant 0 : index
    %c0_144 = arith.constant 0 : index
    %189 = vector.load %arg8[%c0_141, %c0_142, %c0_143, %c0_144] : memref<1x16x16x8xf32, #tpu.memory_space<vmem>>, vector<1x16x16x8xf32>
    %190 = vector.shape_cast %189 : vector<1x16x16x8xf32> to vector<16x16x8xf32>
    %191 = vector.shape_cast %188 : vector<16x16x8xf32> to vector<1x16x16x8xf32>
    tpu.vector_store %arg8[%c0_141, %c0_142, %c0_143, %c0_144], %191 {strides = array<i32>} : memref<1x16x16x8xf32, #tpu.memory_space<vmem>>, vector<1x16x16x8xf32>,
    return
  }
  func.func @transform_0(%arg0: i32) -> (i32, i32, i32, i32) {
    %c0_i32 = arith.constant 0 : i32
    %c0_i32_0 = arith.constant 0 : i32
    %c0_i32_1 = arith.constant 0 : i32
    %c0_i32_2 = arith.constant 0 : i32
    return %arg0, %c0_i32, %c0_i32_0, %c0_i32_1 : i32, i32, i32, i32
  }
  func.func @transform_1(%arg0: i32) -> (i32, i32) {
    %c0_i32 = arith.constant 0 : i32
    %c0_i32_0 = arith.constant 0 : i32
    %c0_i32_1 = arith.constant 0 : i32
    return %c0_i32, %c0_i32_0 : i32, i32
  }
  func.func @transform_2(%arg0: i32) -> (i32, i32, i32) {
    %c0_i32 = arith.constant 0 : i32
    %c0_i32_0 = arith.constant 0 : i32
    %c0_i32_1 = arith.constant 0 : i32
    %c0_i32_2 = arith.constant 0 : i32
    return %c0_i32, %c0_i32_0, %c0_i32_1 : i32, i32, i32
  }
  func.func @transform_3(%arg0: i32) -> (i32, i32, i32) {
    %c0_i32 = arith.constant 0 : i32
    %c0_i32_0 = arith.constant 0 : i32
    %c0_i32_1 = arith.constant 0 : i32
    %c0_i32_2 = arith.constant 0 : i32
    return %c0_i32, %c0_i32_0, %c0_i32_1 : i32, i32, i32
  }
  func.func @transform_4(%arg0: i32) -> (i32, i32, i32) {
    %c0_i32 = arith.constant 0 : i32
    %c0_i32_0 = arith.constant 0 : i32
    %c0_i32_1 = arith.constant 0 : i32
    %c0_i32_2 = arith.constant 0 : i32
    return %c0_i32, %c0_i32_0, %c0_i32_1 : i32, i32, i32
  }
  func.func @transform_5(%arg0: i32) -> (i32, i32) {
    %c0_i32 = arith.constant 0 : i32
    %c0_i32_0 = arith.constant 0 : i32
    %c0_i32_1 = arith.constant 0 : i32
    return %c0_i32, %c0_i32_0 : i32, i32
  }
  func.func @transform_6(%arg0: i32) -> (i32, i32) {
    %c0_i32 = arith.constant 0 : i32
    %c0_i32_0 = arith.constant 0 : i32
    %c0_i32_1 = arith.constant 0 : i32
    return %c0_i32, %c0_i32_0 : i32, i32
  }
  func.func @transform_7(%arg0: i32) -> (i32, i32, i32, i32) {
    %c0_i32 = arith.constant 0 : i32
    %c0_i32_0 = arith.constant 0 : i32
    %c0_i32_1 = arith.constant 0 : i32
    %c0_i32_2 = arith.constant 0 : i32
    return %arg0, %c0_i32, %c0_i32_0, %c0_i32_1 : i32, i32, i32, i32
  }
}

</mosaic_0001>

<bundles_post_ra>
// kernel: tpu_custom_call.1
= control target key start
LH: loop header
LB: loop body
LE: loop exit
PB: predicated region body
PF: predicated region fallthrough
CT: control target
= control target key end

     0   :  { %s14176_s24 = smov 0   ;;  %s18058_s0 = inlined_call_operand.vmem [shape: f32[2,52,52,4], index: 0, kind: input, shape index: {}]   ;;  %s18059_s1 = inlined_call_operand.vmem [shape: f32[4,8], index: 1, kind: input, shape index: {}]   ;;  %s18060_s2 = inlined_call_operand.vmem [shape: f32[9,4,8], index: 2, kind: input, shape index: {}]   ;;  %s18061_s3 = inlined_call_operand.vmem [shape: f32[9,4,8], index: 3, kind: input, shape index: {}]   ;;  %s18062_s4 = inlined_call_operand.vmem [shape: f32[9,4,8], index: 4, kind: input, shape index: {}]   ;;  %s18063_s5 = inlined_call_operand.vmem [shape: f32[4,8], index: 5, kind: input, shape index: {}]   ;;  %s18064_s6 = inlined_call_operand.vmem [shape: f32[1,8], index: 6, kind: input, shape index: {}]   ;;  %s18065_s7 = inlined_call_operand.vmem [shape: f32[2,16,16,8], index: 7, kind: output, shape index: {}]  }
   0x1 LB: > { %s10355_s25 = sadd.s32 4294967295, %s14132_s24   ;;  %p10359_p0 = scmp.ge.s32.totalorder %s14132_s24, 1  ;;  %s14132_s24 = sphi %s14176_s24, %s17_s24  }
   0x2   : > { %p237_p1 = scmp.lt.s32.totalorder %s14132_s24, 3 }
   0x4   : > { %p238_p2 = pnand %p10359_p0, %p237_p1 }
   0x6   : > { %241 = sbr.rel (%p238_p2) target bundleno = 1125 (0x465), region = 48 }
   0xd   : > { %vm875_vm0 = vcmask 1043456   ;;  %v949_v0 = vld [vmem:[%s18059_s1] sm:$0xf]  ;;  %p269_p3 = scmp.lt.s32.totalorder %s10355_s25, 1  ;;  %v14191_v1 = vld [vmem:[%s18060_s2 + $0x1c] sm:$0xf] }
   0xe   : > { %12047 = vmatprep.subr.msk.mxu1 %vm875_vm0, %v949_v0  ;;  %v871_v2 = vld [vmem:[%s18063_s5] sm:$0xf]  ;;  %v14134_v3 = vmov 0.0   ;;  %vm14135_vm1 = vmmov 0   ;;  %vm687_vm2 = vcmask 1045504   ;;  %vm800_vm3 = vcmask 31744  }
   0xf   : > { %12048 = vmatpush3.msk.msra.mxu1 %vm875_vm0, %v949_v0  ;;  %s18427_s25 = smov (!%p269_p3, %s10355_s25), 1  ;;  %12042 = vmatprep.subr.mxu0 %v14134_v3  ;;  %v14262_v29 = vld [vmem:[%s18060_s2 + $0xc] sm:$0xf]  ;;  %vm1285_vm4 = vcmask 64512   ;;  %vm4767_vm5 = vcmask 1041408  }
  0x10   : > { %13297 = vmatprep.subr.msk.mxu1 %vm875_vm0, %v14191_v1  ;;  %12043 = vmatpush3.msk.msra.mxu0 %vm875_vm0, %v871_v2  ;;  %s13779_s9 = smul.u32 2912, %s18427_s25 }
  0x11   : > { %12044 = vmatprep.mubr.msk.f32.mxu0 %vm14135_vm1, %v14134_v3  ;;  %12097 = vmatprep.subr.msk.mxu0 %vm875_vm0, %v14191_v1 }
  0x12   : > { %s14208_s12 = scalar_lea.vmem %s18058_s0, %s13779_s9 }
  0x13   : > { %v14211_v4 = vld [vmem:[%s14208_s12 + $0x400] sm:$0xff]  ;;  %v14214_v5 = vld [vmem:[%s14208_s12 + $0x408] sm:$0xff]  ;;  %v407_v6 = vld [vmem:[%s14208_s12 + $0x410] sm:$0xff] }
  0x14   : > { %v688_v7 = vrot.slane %v14211_v4, 2  ;;  %v689_v8 = vrot.slane %v14214_v5, 2  ;;  %v691_v9 = vrot.slane %v407_v6, 2  ;;  %v14220_v10 = vld [vmem:[%s14208_s12 + $0x438] sm:$0xff]  ;;  %v14223_v11 = vld [vmem:[%s14208_s12 + $0x440] sm:$0xff]  ;;  %v414_v14 = vld [vmem:[%s14208_s12 + $0x448] sm:$0xff] }
  0x15   : > { %v693_v12 = vrot.slane %v14220_v10, 2  ;;  %v694_v13 = vrot.slane %v14223_v11, 2  ;;  %v14229_v15 = vld [vmem:[%s14208_s12 + $0x470] sm:$0xff]  ;;  %v14232_v16 = vld [vmem:[%s14208_s12 + $0x478] sm:$0xff]  ;;  %v696_v19 = vrot.slane %v414_v14, 2  ;;  %v421_v21 = vld [vmem:[%s14208_s12 + $0x480] sm:$0xff] }
  0x16   : > { %v14235_v17 = vsel %vm687_vm2, %v688_v7, %v689_v8  ;;  %v14238_v18 = vsel %vm687_vm2, %v689_v8, %v691_v9  ;;  %v698_v20 = vrot.slane %v14229_v15, 2  ;;  %v14243_v22 = vld [vmem:[%s14208_s12 + $0x4a8] sm:$0xff]  ;;  %v14246_v23 = vld [vmem:[%s14208_s12 + $0x4b0] sm:$0xff]  ;;  %v699_v27 = vrot.slane %v14232_v16, 2  ;;  %v428_v28 = vld [vmem:[%s14208_s12 + $0x4b8] sm:$0xff] }
  0x17   : > { %18200 = vst [vmem:[#allocation3_spill] sm:$0xff] %v14235_v17  ;;  %18201 = vst [vmem:[#allocation4_spill] sm:$0xff] %v14238_v18  ;;  %v801_v24 = vsel %vm800_vm3, %v14235_v17, 0.0  ;;  %12049 = vmatprep.mubr.msk.f32.mxu1 %vm800_vm3, %v14235_v17  ;;  %v802_v25 = vsel %vm800_vm3, %v14238_v18, 0.0  ;;  %v14255_v26 = vsel %vm687_vm2, %v693_v12, %v694_v13  ;;  %v14269_v32 = vsel %vm687_vm2, %v694_v13, %v696_v19  ;;  %v14281_v38 = vld [vmem:[%s14208_s12 + $0x4e0] sm:$0xff]  ;;  %v14284_v39 = vld [vmem:[%s14208_s12 + $0x4e8] sm:$0xff] }
  0x18   : > { %18202 = vst [vmem:[#allocation5_spill] sm:$0xff] %v14255_v26  ;;  %v803_v30 = vadd.f32 %v802_v25, %v801_v24  ;;  %12050 = vmatmul.mubr.msk.f32.vlgmr.msra.gmra.mrb[0].mxu1 %vm800_vm3, %v14238_v18  ;;  %v804_v31 = vsel %vm800_vm3, %v14255_v26, 0.0  ;;  %18203 = vst [vmem:[#allocation6_spill] sm:$0xff] %v14269_v32  ;;  %v701_v33 = vrot.slane %v421_v21, 2  ;;  %v806_v34 = vsel %vm800_vm3, %v14269_v32, 0.0  ;;  %v435_v44 = vld [vmem:[%s14208_s12 + $0x4f0] sm:$0xff] }
  0x19   : > { %12052 = vmatprep.mubr.msk.f32.mxu1 %vm800_vm3, %v14255_v26  ;;  %v14276_v35 = vsel %vm687_vm2, %v698_v20, %v699_v27  ;;  %v703_v36 = vrot.slane %v14243_v22, 2  ;;  %v704_v37 = vrot.slane %v14246_v23, 2  ;;  %13298 = vmatpush3.msk.msra.mxu1 %vm875_vm0, %v14191_v1  ;;  %v706_v42 = vrot.slane %v428_v28, 2  ;;  %v14308_v50 = vld [vmem:[%s14208_s12 + $0x518] sm:$0xff]  ;;  %v14311_v51 = vld [vmem:[%s14208_s12 + $0x520] sm:$0xff]  ;;  %v442_v56 = vld [vmem:[%s14208_s12 + $0x528] sm:$0xff] }
  0x1a   : > { %18204 = vst [vmem:[#allocation7_spill] sm:$0xff] %v14276_v35  ;;  %v805_v40 = vadd.f32 %v804_v31, %v803_v30  ;;  %v14289_v41 = vsel %vm687_vm2, %v699_v27, %v701_v33  ;;  %12197 = vmatprep.subr.msk.mxu1 %vm875_vm0, %v14262_v29  ;;  %v808_v43 = vsel %vm800_vm3, %v14276_v35, 0.0  ;;  %v708_v47 = vrot.slane %v14281_v38, 2  ;;  %v14331_v62 = vld [vmem:[%s14208_s12 + $0x550] sm:$0xff]  ;;  %v14334_v63 = vld [vmem:[%s14208_s12 + $0x558] sm:$0xff]  ;;  %v449_v7 = vld [vmem:[%s14208_s12 + $0x560] sm:$0xff] }
  0x1b   : > { %18205 = vst [vmem:[#allocation8_spill] sm:$0xff] %v14289_v41  ;;  %v14299_v46 = vsel %vm687_vm2, %v703_v36, %v704_v37  ;;  %v709_v48 = vrot.slane %v14284_v39, 2  ;;  %v810_v49 = vsel %vm800_vm3, %v14289_v41, 0.0  ;;  %v14314_v53 = vsel %vm687_vm2, %v704_v37, %v706_v42  ;;  %v14354_v19 = vld [vmem:[%s14208_s12 + $0x588] sm:$0xff]  ;;  %v14357_v20 = vld [vmem:[%s14208_s12 + $0x590] sm:$0xff]  ;;  %v456_v28 = vld [vmem:[%s14208_s12 + $0x598] sm:$0xff] }
  0x1c   : > { %v807_v45 = vadd.f32 %v806_v34, %v805_v40  ;;  %12053 = vmatmul.mubr.msk.f32.gmra.mrb[2].mxu1 %vm800_vm3, %v14269_v32  ;;  %18206 = vst [vmem:[#allocation9_spill] sm:$0xff] %v14299_v46  ;;  %18207 = vst [vmem:[#allocation10_spill] sm:$0xff] %v14314_v53  ;;  %v711_v54 = vrot.slane %v435_v44, 2  ;;  %v812_v55 = vsel %vm800_vm3, %v14299_v46, 0.0  ;;  %v713_v59 = vrot.slane %v14308_v50, 2  ;;  %v14377_v37 = vld [vmem:[%s14208_s12 + $0x5c0] sm:$0xff] }
  0x1d   : > { %12055 = vmatprep.mubr.msk.f32.mxu1 %vm800_vm3, %v14276_v35  ;;  %v14322_v58 = vsel %vm687_vm2, %v708_v47, %v709_v48  ;;  %v714_v60 = vrot.slane %v14311_v51, 2  ;;  %v814_v61 = vsel %vm800_vm3, %v14314_v53, 0.0  ;;  %v716_v3 = vrot.slane %v442_v56, 2  ;;  %v14380_v40 = vld [vmem:[%s14208_s12 + $0x5c8] sm:$0xff]  ;;  %v463_v47 = vld [vmem:[%s14208_s12 + $0x5d0] sm:$0xff]  ;;  %v14400_v56 = vld [vmem:[%s14208_s12 + $0x5f8] sm:$0xff] }
  0x1e   : > { %v809_v52 = vadd.f32 %v808_v43, %v807_v45  ;;  %18208 = vst [vmem:[#allocation11_spill] sm:$0xff] %v14322_v58  ;;  %v14337_v2 = vsel %vm687_vm2, %v709_v48, %v711_v54  ;;  %v816_v6 = vsel %vm800_vm3, %v14322_v58, 0.0  ;;  %v718_v12 = vrot.slane %v14331_v62, 2 }
  0x1f   : > { %18209 = vst [vmem:[#allocation12_spill] sm:$0xff] %v14337_v2  ;;  %v14345_v9 = vsel %vm687_vm2, %v713_v59, %v714_v60  ;;  %v719_v13 = vrot.slane %v14334_v63, 2  ;;  %v818_v14 = vsel %vm800_vm3, %v14337_v2, 0.0  ;;  %v14360_v24 = vsel %vm687_vm2, %v714_v60, %v716_v3  ;;  %v470_v3 = vld [vmem:[%s14208_s12 + $0x608] sm:$0xff] }
  0x20   : > { %v811_v57 = vadd.f32 %v810_v49, %v809_v52  ;;  %12056 = vmatmul.mubr.msk.f32.gmra.mrb[4].mxu1 %vm800_vm3, %v14289_v41  ;;  %18210 = vst [vmem:[#allocation13_spill] sm:$0xff] %v14345_v9  ;;  %18211 = vst [vmem:[#allocation14_spill] sm:$0xff] %v14360_v24  ;;  %v721_v25 = vrot.slane %v449_v7, 2  ;;  %v820_v27 = vsel %vm800_vm3, %v14345_v9, 0.0  ;;  %v723_v33 = vrot.slane %v14354_v19, 2 }
  0x21   : > { %12058 = vmatprep.mubr.msk.f32.mxu1 %vm800_vm3, %v14299_v46  ;;  %v14368_v31 = vsel %vm687_vm2, %v718_v12, %v719_v13  ;;  %v724_v34 = vrot.slane %v14357_v20, 2  ;;  %v822_v36 = vsel %vm800_vm3, %v14360_v24, 0.0  ;;  %v726_v44 = vrot.slane %v456_v28, 2  ;;  %v14538_v46 = vld [vmem:[%s14208_s12 + $0x720] sm:$0xff] }
  0x22   : > { %v813_v0 = vadd.f32 %v812_v55, %v811_v57  ;;  %v14383_v43 = vsel %vm687_vm2, %v719_v13, %v721_v25  ;;  %v824_v45 = vsel %vm800_vm3, %v14368_v31, 0.0  ;;  %v728_v52 = vrot.slane %v14377_v37, 2  ;;  %v14403_v57 = vld [vmem:[%s14208_s12 + $0x600] sm:$0xff]  ;;  %18223 = vst [vmem:[#allocation26_spill] sm:$0xff] %v14538_v46 }
  0x23   : > { %v14391_v49 = vsel %vm687_vm2, %v723_v33, %v724_v34  ;;  %v729_v54 = vrot.slane %v14380_v40, 2  ;;  %v826_v55 = vsel %vm800_vm3, %v14383_v43, 0.0  ;;  %v14406_v60 = vsel %vm687_vm2, %v724_v34, %v726_v44  ;;  %v14434_v33 = vld [vmem:[%s14208_s12 + $0x640] sm:$0xff] }
  0x24   : > { %v815_v8 = vadd.f32 %v814_v61, %v813_v0  ;;  %12059 = vmatmul.mubr.msk.f32.gmra.mrb[6].mxu1 %vm800_vm3, %v14314_v53  ;;  %v731_v61 = vrot.slane %v463_v47, 2  ;;  %v828_v0 = vsel %vm800_vm3, %v14391_v49, 0.0  ;;  %v734_v12 = vrot.slane %v14403_v57, 2  ;;  %18212 = vst [vmem:[#allocation15_spill] sm:$0xff] %v14434_v33  ;;  %v14448_v47 = vld [vmem:[%s14208_s12 + $0x668] sm:$0xff] }
  0x25   : > { %12061 = vmatprep.mubr.msk.f32.mxu1 %vm800_vm3, %v14322_v58  ;;  %v14414_v7 = vsel %vm687_vm2, %v728_v52, %v729_v54  ;;  %v830_v13 = vsel %vm800_vm3, %v14406_v60, 0.0  ;;  %v736_v28 = vrot.slane %v470_v3, 2 }
  0x26   : > { %v817_v21 = vadd.f32 %v816_v6, %v815_v8  ;;  %v733_v8 = vrot.slane %v14400_v56, 2 }
  0x28   : > { %v819_v30 = vadd.f32 %v818_v14, %v817_v21  ;;  %12062 = vmatmul.mubr.msk.f32.gmra.mrb[8].mxu1 %vm800_vm3, %v14337_v2  ;;  %v14423_v14 = vld [vmem:[%s14208_s12 + $0x630] sm:$0xff]  ;;  %v14426_v21 = vld [vmem:[%s14208_s12 + $0x638] sm:$0xff] }
  0x29   : > { %12064 = vmatprep.mubr.msk.f32.mxu1 %vm800_vm3, %v14345_v9  ;;  %v739_v44 = vrot.slane %v14426_v21, 2  ;;  %v14512_v9 = vld [vmem:[%s14208_s12 + $0x6e8] sm:$0xff] }
  0x2a   : > { %v821_v42 = vadd.f32 %v820_v27, %v819_v30  ;;  %v14429_v27 = vsel %vm687_vm2, %v729_v54, %v731_v61  ;;  %v832_v30 = vsel %vm800_vm3, %v14414_v7, 0.0  ;;  %v14454_v54 = vsel %vm687_vm2, %v734_v12, %v736_v28  ;;  %v14460_v61 = vld [vmem:[%s14208_s12 + $0x678] sm:$0xff]  ;;  %18218 = vst [vmem:[#allocation21_spill] sm:$0xff] %v14512_v9 }
  0x2b   : > { %18213 = vst [vmem:[#allocation16_spill] sm:$0xff] %v14460_v61 }
  0x2c   : > { %v823_v48 = vadd.f32 %v822_v36, %v821_v42  ;;  %12065 = vmatmul.mubr.msk.f32.gmra.mrb[10].mxu1 %vm800_vm3, %v14360_v24  ;;  %v14439_v36 = vsel %vm687_vm2, %v733_v8, %v734_v12  ;;  %v738_v42 = vrot.slane %v14423_v14, 2  ;;  %v838_v12 = vsel %vm800_vm3, %v14454_v54, 0.0 }
  0x2d   : > { %12067 = vmatprep.mubr.msk.f32.mxu1 %vm800_vm3, %v14368_v31 }
  0x2e   : > { %v825_v59 = vadd.f32 %v824_v45, %v823_v48  ;;  %v834_v45 = vsel %vm800_vm3, %v14429_v27, 0.0  ;;  %v14451_v48 = vld [vmem:[%s14208_s12 + $0x670] sm:$0xff]  ;;  %v14465_v3 = vsel %vm687_vm2, %v738_v42, %v739_v44 }
  0x2f   : > { %v744_v8 = vrot.slane %v14451_v48, 2  ;;  %v840_v42 = vsel %vm800_vm3, %v14465_v3, 0.0 }
  0x30   : > { %v827_v6 = vadd.f32 %v826_v55, %v825_v59  ;;  %12068 = vmatmul.mubr.msk.f32.gmra.mrb[12].mxu1 %vm800_vm3, %v14383_v43  ;;  %v741_v55 = vrot.slane %v14434_v33, 2  ;;  %v836_v59 = vsel %vm800_vm3, %v14439_v36, 0.0 }
  0x31   : > { %12070 = vmatprep.mubr.msk.f32.mxu1 %vm800_vm3, %v14391_v49 }
  0x32   : > { %v829_v25 = vadd.f32 %v828_v0, %v827_v6  ;;  %v743_v6 = vrot.slane %v14448_v47, 2 }
  0x34   : > { %v831_v34 = vadd.f32 %v830_v13, %v829_v25  ;;  %12071 = vmatmul.mubr.msk.f32.gmra.mrb[14].mxu1 %vm800_vm3, %v14406_v60  ;;  %v14474_v13 = vld [vmem:[%s14208_s12 + $0x6a0] sm:$0xff]  ;;  %v14477_v25 = vld [vmem:[%s14208_s12 + $0x6a8] sm:$0xff]  ;;  %v14491_v33 = vsel %vm687_vm2, %v743_v6, %v744_v8 }
  0x35   : > { %12073 = vmatprep.mubr.msk.f32.mxu1 %vm800_vm3, %v14414_v7  ;;  %18214 = vst [vmem:[#allocation17_spill] sm:$0xff] %v14477_v25  ;;  %v844_v24 = vsel %vm800_vm3, %v14491_v33, 0.0 }
  0x36   : > { %v833_v52 = vadd.f32 %v832_v30, %v831_v34  ;;  %v14480_v30 = vsel %vm687_vm2, %v739_v44, %v741_v55  ;;  %v746_v34 = vrot.slane %v14460_v61, 2  ;;  %v749_v44 = vrot.slane %v14477_v25, 2 }
  0x37   : > { %v842_v55 = vsel %vm800_vm3, %v14480_v30, 0.0 }
  0x38   : > { %v835_v0 = vadd.f32 %v834_v45, %v833_v52  ;;  %12074 = vmatmul.mubr.msk.f32.gmra.mrb[16].mxu1 %vm800_vm3, %v14429_v27  ;;  %v14486_v45 = vld [vmem:[%s14208_s12 + $0x6b0] sm:$0xff]  ;;  %v14506_v6 = vsel %vm687_vm2, %v744_v8, %v746_v34 }
  0x39   : > { %12076 = vmatprep.mubr.msk.f32.mxu1 %vm800_vm3, %v14439_v36  ;;  %18215 = vst [vmem:[#allocation18_spill] sm:$0xff] %v14486_v45  ;;  %v751_v61 = vrot.slane %v14486_v45, 2  ;;  %v846_v34 = vsel %vm800_vm3, %v14506_v6, 0.0  ;;  %v756_v45 = vrot.slane %v14512_v9, 2  ;;  %v14555_v9 = vld [vmem:[%s14208_s12 + $0x750] sm:$0xff] }
  0x3a   : > { %v837_v28 = vadd.f32 %v836_v59, %v835_v0  ;;  %v748_v59 = vrot.slane %v14474_v13, 2  ;;  %v14500_v0 = vld [vmem:[%s14208_s12 + $0x6d8] sm:$0xff]  ;;  %18226 = vst [vmem:[#allocation29_spill] sm:$0xff] %v14555_v9 }
  0x3b   : > { %18216 = vst [vmem:[#allocation19_spill] sm:$0xff] %v14500_v0 }
  0x3c   : > { %v839_v52 = vadd.f32 %v838_v12, %v837_v28  ;;  %12077 = vmatmul.mubr.msk.f32.gmra.mrb[18].mxu1 %vm800_vm3, %v14454_v54  ;;  %v14503_v12 = vld [vmem:[%s14208_s12 + $0x6e0] sm:$0xff]  ;;  %v14517_v58 = vsel %vm687_vm2, %v748_v59, %v749_v44  ;;  %v14532_v59 = vsel %vm687_vm2, %v749_v44, %v751_v61  ;;  %v14552_v44 = vld [vmem:[%s14208_s12 + $0x748] sm:$0xff] }
  0x3d   : > { %12079 = vmatprep.mubr.msk.f32.mxu1 %vm800_vm3, %v14465_v3  ;;  %18217 = vst [vmem:[#allocation20_spill] sm:$0xff] %v14503_v12  ;;  %18219 = vst [vmem:[#allocation22_spill] sm:$0xff] %v14517_v58  ;;  %v754_v8 = vrot.slane %v14503_v12, 2  ;;  %v848_v53 = vsel %vm800_vm3, %v14517_v58, 0.0  ;;  %v850_v61 = vsel %vm800_vm3, %v14532_v59, 0.0 }
  0x3e   : > { %v841_v28 = vadd.f32 %v840_v42, %v839_v52  ;;  %v753_v42 = vrot.slane %v14500_v0, 2  ;;  %v14526_v52 = vld [vmem:[%s14208_s12 + $0x710] sm:$0xff]  ;;  %18222 = vst [vmem:[#allocation25_spill] sm:$0xff] %v14532_v59  ;;  %18225 = vst [vmem:[#allocation28_spill] sm:$0xff] %v14552_v44  ;;  %v763_v0 = vrot.slane %v14552_v44, 2 }
  0x3f   : > { %18220 = vst [vmem:[#allocation23_spill] sm:$0xff] %v14526_v52 }
  0x40   : > { %v843_v2 = vadd.f32 %v842_v55, %v841_v28  ;;  %12080 = vmatmul.mubr.msk.f32.gmra.mrb[20].mxu1 %vm800_vm3, %v14480_v30  ;;  %v14529_v55 = vld [vmem:[%s14208_s12 + $0x718] sm:$0xff]  ;;  %v14543_v12 = vsel %vm687_vm2, %v753_v42, %v754_v8  ;;  %v761_v42 = vrot.slane %v14538_v46, 2 }
  0x41   : > { %12082 = vmatprep.mubr.msk.f32.mxu1 %vm800_vm3, %v14491_v33  ;;  %18221 = vst [vmem:[#allocation24_spill] sm:$0xff] %v14529_v55  ;;  %18224 = vst [vmem:[#allocation27_spill] sm:$0xff] %v14543_v12 }
  0x42   : > { %v845_v28 = vadd.f32 %v844_v24, %v843_v2  ;;  %v758_v2 = vrot.slane %v14526_v52, 2  ;;  %v759_v24 = vrot.slane %v14529_v55, 2  ;;  %v852_v52 = vsel %vm800_vm3, %v14543_v12, 0.0  ;;  %v14564_v55 = vld [vmem:[%s14208_s12 + $0x758] sm:$0xff] }
  0x43   : > { %18228 = vst [vmem:[#allocation31_spill] sm:$0xff] %v14564_v55 }
  0x44   : > { %v847_v41 = vadd.f32 %v846_v34, %v845_v28  ;;  %12083 = vmatmul.mubr.msk.f32.gmra.mrb[22].mxu1 %vm800_vm3, %v14506_v6  ;;  %v14558_v28 = vsel %vm687_vm2, %v754_v8, %v756_v45  ;;  %v14569_v32 = vsel %vm687_vm2, %v758_v2, %v759_v24  ;;  %v14578_v8 = vsel %vm687_vm2, %v759_v24, %v761_v42 }
  0x45   : > { %12085 = vmatprep.mubr.msk.f32.mxu1 %vm800_vm3, %v14517_v58  ;;  %18227 = vst [vmem:[#allocation30_spill] sm:$0xff] %v14558_v28  ;;  %18229 = vst [vmem:[#allocation32_spill] sm:$0xff] %v14569_v32  ;;  %v856_v2 = vsel %vm800_vm3, %v14569_v32, 0.0 }
  0x46   : > { %v849_v34 = vadd.f32 %v848_v53, %v847_v41  ;;  %v764_v41 = vrot.slane %v14555_v9, 2  ;;  %v854_v53 = vsel %vm800_vm3, %v14558_v28, 0.0  ;;  %18230 = vst [vmem:[#allocation33_spill] sm:$0xff] %v14578_v8  ;;  %v14617_v9 = vld [vmem:[%s14208_s12 + $0x7b8] sm:$0xff] }
  0x47   : > { %18235 = vst [vmem:[#allocation38_spill] sm:$0xff] %v14617_v9 }
  0x48   : > { %v851_v35 = vadd.f32 %v850_v61, %v849_v34  ;;  %12086 = vmatmul.mubr.msk.f32.gmra.mrb[24].mxu1 %vm800_vm3, %v14532_v59  ;;  %v766_v61 = vrot.slane %v14564_v55, 2  ;;  %v14586_v46 = vsel %vm687_vm2, %v763_v0, %v764_v41  ;;  %v519_v55 = vld [vmem:[%s14208_s12 + $0x790] sm:$0xff] }
  0x49   : > { %12088 = vmatprep.mubr.msk.f32.mxu1 %vm800_vm3, %v14543_v12  ;;  %18231 = vst [vmem:[#allocation34_spill] sm:$0xff] %v14586_v46  ;;  %v860_v42 = vsel %vm800_vm3, %v14586_v46, 0.0 }
  0x4a   : > { %v853_v45 = vadd.f32 %v852_v52, %v851_v35  ;;  %v858_v35 = vsel %vm800_vm3, %v14578_v8, 0.0  ;;  %v14593_v24 = vsel %vm687_vm2, %v764_v41, %v766_v61  ;;  %v14607_v41 = vld [vmem:[%s14208_s12 + $0x788] sm:$0xff] }
  0x4b   : > { %18232 = vst [vmem:[#allocation35_spill] sm:$0xff] %v14593_v24  ;;  %v862_v0 = vsel %vm800_vm3, %v14593_v24, 0.0  ;;  %18234 = vst [vmem:[#allocation37_spill] sm:$0xff] %v14607_v41 }
  0x4c   : > { %v855_v34 = vadd.f32 %v854_v53, %v853_v45  ;;  %12089 = vmatmul.mubr.msk.f32.gmra.mrb[26].mxu1 %vm800_vm3, %v14558_v28 }
  0x4d   : > { %12091 = vmatprep.mubr.msk.f32.mxu1 %vm800_vm3, %v14569_v32 }
  0x4e   : > { %v857_v52 = vadd.f32 %v856_v2, %v855_v34  ;;  %v14604_v2 = vld [vmem:[%s14208_s12 + $0x780] sm:$0xff] }
  0x4f   : > { %18233 = vst [vmem:[#allocation36_spill] sm:$0xff] %v14604_v2 }
  0x50   : > { %v859_v53 = vadd.f32 %v858_v35, %v857_v52  ;;  %12092 = vmatmul.mubr.msk.f32.gmra.mrb[28].mxu1 %vm800_vm3, %v14578_v8  ;;  %v1418_v35 = vrot.slane %v14604_v2, 2  ;;  %v1419_v52 = vrot.slane %v14607_v41, 2  ;;  %v1423_v41 = vrot.slane %v14617_v9, 2  ;;  %v531_v9 = vld [vmem:[%s14208_s12 + $0x800] sm:$0xff] }
  0x51   : > { %12094 = vmatprep.mubr.msk.f32.mxu1 %vm800_vm3, %v14586_v46 }
  0x52   : > { %v861_v45 = vadd.f32 %v860_v42, %v859_v53  ;;  %v14620_v42 = vld [vmem:[%s14208_s12 + $0x7c0] sm:$0xff] }
  0x53   : > { %18236 = vst [vmem:[#allocation39_spill] sm:$0xff] %v14620_v42  ;;  %v14625_v53 = vld [vmem:[%s18060_s2] sm:$0xf]  ;;  %v1424_v2 = vrot.slane %v14620_v42, 2 }
  0x54   : > { %v863_v61 = vadd.f32 %v862_v0, %v861_v45  ;;  %12095 = vmatmul.mubr.msk.f32.gmra.mrb[30].mxu1 %vm800_vm3, %v14593_v24  ;;  %v1421_v45 = vrot.slane %v519_v55, 2 }
  0x55   : > { %12123 = vmatprep.mubr.msk.f32.mxu1 %vm800_vm3, %v14569_v32  ;;  %v14634_v32 = vsel %vm687_vm2, %v1418_v35, %v1419_v52 }
  0x56   : > { %v864_v34 = vrot.slane %v863_v61, 4  ;;  %18237 = vst [vmem:[#allocation40_spill] sm:$0xff] %v14634_v32  ;;  %v14652_v35 = vsel %vm687_vm2, %v1419_v52, %v1421_v45  ;;  %v14666_v52 = vld [vmem:[%s14208_s12 + $0x830] sm:$0xff]  ;;  %v1431_v45 = vrot.slane %v531_v9, 2 }
  0x57   : > { %18240 = vst [vmem:[#allocation43_spill] sm:$0xff] %v14652_v35  ;;  %18243 = vst [vmem:[#allocation46_spill] sm:$0xff] %v14666_v52 }
  0x58   : > { %v865_v0 = vadd.f32 %v864_v34, %v863_v61  ;;  %12124 = vmatmul.mubr.msk.f32.vlgmr.msra.gmra.mrb[32].mxu1 %vm800_vm3, %v14578_v8  ;;  %v525_v61 = vld [vmem:[%s14208_s12 + $0x7c8] sm:$0xff]  ;;  %v14647_v34 = vld [vmem:[%s14208_s12 + $0x7f8] sm:$0xff]  ;;  %v14655_v8 = vsel %vm687_vm2, %v1423_v41, %v1424_v2 }
  0x59   : > { %12126 = vmatprep.mubr.msk.f32.mxu1 %vm800_vm3, %v14586_v46  ;;  %12198 = vmatpush3.msk.msra.mxu1 %vm875_vm0, %v14262_v29  ;;  %v14644_v29 = vld [vmem:[%s14208_s12 + $0x7f0] sm:$0xff]  ;;  %18239 = vst [vmem:[#allocation42_spill] sm:$0xff] %v14647_v34  ;;  %v1426_v46 = vrot.slane %v525_v61, 2  ;;  %18241 = vst [vmem:[#allocation44_spill] sm:$0xff] %v14655_v8 }
  0x5a   : > { %v866_v44 = vrot.slane %v865_v0, 2  ;;  %12247 = vmatprep.subr.msk.mxu1 %vm875_vm0, %v14625_v53  ;;  %18238 = vst [vmem:[#allocation41_spill] sm:$0xff] %v14644_v29 }
  0x5b   : > { %v14671_v41 = vsel %vm687_vm2, %v1424_v2, %v1426_v46  ;;  %v14686_v46 = vld [vmem:[%s14208_s12 + $0x868] sm:$0xff] }
  0x5c   : > { %12127 = vmatmul.mubr.msk.f32.gmra.mrb[34].mxu1 %vm800_vm3, %v14593_v24  ;;  %v867_v55 = vadd.f32 %v866_v44, %v865_v0  ;;  %v1428_v44 = vrot.slane %v14644_v29, 2  ;;  %v1429_v0 = vrot.slane %v14647_v34, 2  ;;  %v14663_v24 = vld [vmem:[%s14208_s12 + $0x828] sm:$0xff]  ;;  %18244 = vst [vmem:[#allocation47_spill] sm:$0xff] %v14671_v41  ;;  %v538_v29 = vld [vmem:[%s14208_s12 + $0x838] sm:$0xff]  ;;  %18247 = vst [vmem:[#allocation50_spill] sm:$0xff] %v14686_v46 }
  0x5d   : > { %12129 = vmatprep.mubr.msk.f32.mxu1 %vm800_vm3, %v14634_v32  ;;  %18242 = vst [vmem:[#allocation45_spill] sm:$0xff] %v14663_v24  ;;  %v1436_v9 = vrot.slane %v538_v29, 2  ;;  %v14716_v29 = vld [vmem:[%s18060_s2 + $0x14] sm:$0xf] }
  0x5e   : > { %v868_v42 = vrot.slane %v867_v55, 1  ;;  %v14675_v25 = vsel %vm687_vm2, %v1428_v44, %v1429_v0  ;;  %v1439_v44 = vrot.slane %v14686_v46, 2 }
  0x5f   : > { %18245 = vst [vmem:[#allocation48_spill] sm:$0xff] %v14675_v25 }
  0x60   : > { %12130 = vmatmul.mubr.msk.f32.gmra.mrb[36].mxu1 %vm800_vm3, %v14652_v35  ;;  %v869_v32 = vadd.f32 %v868_v42, %v867_v55  ;;  %v10399_v42 = vld [vmem:[%s18060_s2 + $0x4] sm:$0xf]  ;;  %v1433_v55 = vrot.slane %v14663_v24, 2  ;;  %v1434_v35 = vrot.slane %v14666_v52, 2 }
  0x61   : > { %12132 = vmatprep.mubr.msk.f32.mxu1 %vm800_vm3, %v14655_v8  ;;  %v14683_v8 = vld [vmem:[%s14208_s12 + $0x860] sm:$0xff] }
  0x62   : > { %v870_v61 = vmul.f32 0.00390625, %v869_v32  ;;  %18246 = vst [vmem:[#allocation49_spill] sm:$0xff] %v14683_v8  ;;  %v14696_v32 = vsel %vm687_vm2, %v1429_v0, %v1431_v45  ;;  %v1438_v2 = vrot.slane %v14683_v8, 2  ;;  %v14711_v0 = vld [vmem:[%s14208_s12 + $0x8a0] sm:$0xff]  ;;  %v14726_v45 = vsel %vm687_vm2, %v1434_v35, %v1436_v9  ;;  %v552_v8 = vld [vmem:[%s14208_s12 + $0x8a8] sm:$0xff] }
  0x63   : > { %18248 = vst [vmem:[#allocation51_spill] sm:$0xff] %v14696_v32  ;;  %18251 = vst [vmem:[#allocation54_spill] sm:$0xff] %v14711_v0  ;;  %v1446_v9 = vrot.slane %v552_v8, 2  ;;  %v453_v52 = vld [vmem:[%s14208_s12 + $0x580] sm:$0xff] }
  0x64   : > { %12045 = vmatmul.mubr.msk.f32.vlgmr.msra.gmra.mrb[0].mxu0 %vm800_vm3, %v870_v61  ;;  %12133 = vmatmul.mubr.msk.f32.gmra.mrb[38].mxu1 %vm800_vm3, %v14671_v41  ;;  %v545_v61 = vld [vmem:[%s14208_s12 + $0x870] sm:$0xff]  ;;  %v14708_v41 = vld [vmem:[%s14208_s12 + $0x898] sm:$0xff]  ;;  %18252 = vst [vmem:[#allocation55_spill] sm:$0xff] %v14726_v45 }
  0x65   : > { %12098 = vmatpush3.msk.msra.mxu0 %vm875_vm0, %v14191_v1  ;;  %12099 = vmatprep.mubr.msk.f32.mxu0 %vm800_vm3, %v14368_v31  ;;  %v14705_v1 = vsel %vm687_vm2, %v1433_v55, %v1434_v35  ;;  %18250 = vst [vmem:[#allocation53_spill] sm:$0xff] %v14708_v41  ;;  %v1441_v55 = vrot.slane %v545_v61, 2  ;;  %v1443_v46 = vrot.slane %v14708_v41, 2 }
  0x66   : > { %12135 = vmatprep.mubr.msk.f32.mxu1 %vm800_vm3, %v14675_v25  ;;  %12147 = vmatprep.subr.msk.mxu0 %vm875_vm0, %v10399_v42  ;;  %18249 = vst [vmem:[#allocation52_spill] sm:$0xff] %v14705_v1  ;;  %v14731_v25 = vsel %vm687_vm2, %v1438_v2, %v1439_v44 }
  0x67   : > { %18253 = vst [vmem:[#allocation56_spill] sm:$0xff] %v14731_v25  ;;  %v14748_v35 = vsel %vm687_vm2, %v1439_v44, %v1441_v55  ;;  %v2070_v55 = vrot.slane %v14220_v10, 4 }
  0x68   : > { %12100 = vmatmul.mubr.msk.f32.vlgmr.msra.gmra.mrb[2].mxu0 %vm800_vm3, %v14383_v43  ;;  %12136 = vmatmul.mubr.msk.f32.gmra.mrb[40].mxu1 %vm800_vm3, %v14696_v32  ;;  %v1444_v32 = vrot.slane %v14711_v0, 2  ;;  %18254 = vst [vmem:[#allocation57_spill] sm:$0xff] %v14748_v35  ;;  %v411_v0 = vld [vmem:[%s14208_s12 + $0x430] sm:$0xff] }
  0x69   : > { %12148 = vmatpush3.msk.msra.mxu0 %vm875_vm0, %v10399_v42  ;;  %12102 = vmatprep.mubr.msk.f32.mxu0 %vm800_vm3, %v14391_v49  ;;  %v404_v42 = vld [vmem:[%s14208_s12 + $0x3f8] sm:$0xff]  ;;  %v2069_v44 = vrot.slane %v411_v0, 4 }
  0x6a   : > { %12138 = vmatprep.mubr.msk.f32.mxu1 %vm800_vm3, %v14705_v1  ;;  %12347 = vmatprep.subr.msk.mxu0 %vm875_vm0, %v14716_v29  ;;  %v14751_v2 = vsel %vm687_vm2, %v1443_v46, %v1444_v32  ;;  %v2064_v61 = vrot.slane %v404_v42, 4  ;;  %v2065_v1 = vrot.slane %v14211_v4, 4  ;;  %v14764_v8 = vsel %vm687_vm2, %v1444_v32, %v1446_v9  ;;  %v418_v42 = vld [vmem:[%s14208_s12 + $0x468] sm:$0xff] }
  0x6b   : > { %18255 = vst [vmem:[#allocation58_spill] sm:$0xff] %v14751_v2  ;;  %18256 = vst [vmem:[#allocation59_spill] sm:$0xff] %v14764_v8  ;;  %v2067_v46 = vrot.slane %v14214_v5, 4  ;;  %v2072_v32 = vrot.slane %v14223_v11, 4  ;;  %v14785_v10 = vsel %vm875_vm0, %v2069_v44, %v2070_v55  ;;  %v2074_v0 = vrot.slane %v418_v42, 4  ;;  %v14811_v44 = vld [vmem:[%s14208_s12 + $0x2b0] sm:$0xff] }
  0x6c   : > { %12103 = vmatmul.mubr.msk.f32.gmra.mrb[4].mxu0 %vm800_vm3, %v14406_v60  ;;  %12139 = vmatmul.mubr.msk.f32.gmra.mrb[42].mxu1 %vm800_vm3, %v14726_v45  ;;  %v14768_v4 = vsel %vm875_vm0, %v2064_v61, %v2065_v1  ;;  %v2075_v9 = vrot.slane %v14229_v15, 4  ;;  %v425_v61 = vld [vmem:[%s14208_s12 + $0x4a0] sm:$0xff]  ;;  %v2077_v15 = vrot.slane %v14232_v16, 4 }
  0x6d   : > { %12105 = vmatprep.mubr.msk.f32.mxu0 %vm800_vm3, %v14414_v7  ;;  %12141 = vmatprep.mubr.msk.f32.mxu1 %vm800_vm3, %v14731_v25  ;;  %v14781_v5 = vsel %vm875_vm0, %v2065_v1, %v2067_v46  ;;  %v14803_v11 = vsel %vm875_vm0, %v2070_v55, %v2072_v32  ;;  %v2079_v1 = vrot.slane %v425_v61, 4  ;;  %v2080_v46 = vrot.slane %v14243_v22, 4  ;;  %v432_v55 = vld [vmem:[%s14208_s12 + $0x4d8] sm:$0xff]  ;;  %v14835_v42 = vld [vmem:[%s14208_s12 + $0x2c0] sm:$0xff] }
  0x6e   : > { %v14830_v16 = vsel %vm875_vm0, %v2075_v9, %v2077_v15  ;;  %v2082_v22 = vrot.slane %v14246_v23, 4  ;;  %18257 = vst [vmem:[#allocation60_spill] sm:$0xff] %v14835_v42  ;;  %v2085_v61 = vrot.slane %v14281_v38, 4  ;;  %v1371_v23 = vrot.slane %v14835_v42, 2  ;;  %v14874_v45 = vld [vmem:[%s14208_s12 + $0x320] sm:$0xff] }
  0x6f   : > { %v2087_v15 = vrot.slane %v14284_v39, 4  ;;  %v2105_v42 = vrot.slane %v14377_v37, 4 }
  0x70   : > { %12106 = vmatmul.mubr.msk.f32.gmra.mrb[6].mxu0 %vm800_vm3, %v14429_v27  ;;  %12142 = vmatmul.mubr.msk.f32.gmra.mrb[44].mxu1 %vm800_vm3, %v14748_v35  ;;  %v14860_v38 = vsel %vm875_vm0, %v2080_v46, %v2082_v22  ;;  %v2090_v22 = vrot.slane %v14308_v50, 4  ;;  %v1378_v50 = vrot.slane %v14874_v45, 2 }
  0x71   : > { %12108 = vmatprep.mubr.msk.f32.mxu0 %vm800_vm3, %v14439_v36  ;;  %12144 = vmatprep.mubr.msk.f32.mxu1 %vm800_vm3, %v14751_v2 }
  0x74   : > { %12109 = vmatmul.mubr.msk.f32.gmra.mrb[8].mxu0 %vm800_vm3, %v14454_v54  ;;  %12145 = vmatmul.mubr.msk.f32.gmra.mrb[46].mxu1 %vm800_vm3, %v14764_v8  ;;  %v14843_v8 = vld [vmem:[%s14208_s12 + $0x2e8] sm:$0xff] }
  0x75   : > { %12111 = vmatprep.mubr.msk.f32.mxu0 %vm800_vm3, %v14465_v3  ;;  %12199 = vmatprep.mubr.msk.f32.mxu1 %vm800_vm3, %v14768_v4  ;;  %v14796_v3 = vld [vmem:[%s18060_s2 + $0x18] sm:$0xf]  ;;  %v1373_v39 = vrot.slane %v14843_v8, 2 }
  0x78   : > { %12112 = vmatmul.mubr.msk.f32.gmra.mrb[10].mxu0 %vm800_vm3, %v14480_v30  ;;  %12200 = vmatmul.mubr.msk.f32.vlgmr.msra.gmra.mrb[48].mxu1 %vm800_vm3, %v14781_v5  ;;  %v14807_v30 = vsel %vm875_vm0, %v2074_v0, %v2075_v9  ;;  %v2084_v0 = vrot.slane %v432_v55, 4  ;;  %v14846_v9 = vld [vmem:[%s14208_s12 + $0x2f0] sm:$0xff]  ;;  %v14863_v55 = vld [vmem:[%s14208_s12 + $0x2f8] sm:$0xff] }
  0x79   : > { %12114 = vmatprep.mubr.msk.f32.mxu0 %vm800_vm3, %v14491_v33  ;;  %12202 = vmatprep.mubr.msk.f32.mxu1 %vm800_vm3, %v14785_v10  ;;  %v14816_v33 = vld [vmem:[%s14208_s12 + $0x2b8] sm:$0xff]  ;;  %18258 = vst [vmem:[#allocation61_spill] sm:$0xff] %v14863_v55  ;;  %v1374_v25 = vrot.slane %v14846_v9, 2 }
  0x7a   : > { %12248 = vmatpush3.msk.msra.mxu1 %vm875_vm0, %v14625_v53  ;;  %v1368_v53 = vrot.slane %v14811_v44, 2  ;;  %v1369_v32 = vrot.slane %v14816_v33, 2  ;;  %v14869_v35 = vsel %vm875_vm0, %v2084_v0, %v2085_v61  ;;  %v14889_v0 = vsel %vm875_vm0, %v2085_v61, %v2087_v15 }
  0x7b   : > { %12297 = vmatprep.subr.msk.mxu1 %vm875_vm0, %v14796_v3  ;;  %v14901_v61 = vsel %vm687_vm2, %v1373_v39, %v1374_v25 }
  0x7c   : > { %12115 = vmatmul.mubr.msk.f32.gmra.mrb[12].mxu0 %vm800_vm3, %v14506_v6  ;;  %12203 = vmatmul.mubr.msk.f32.gmra.mrb[50].mxu1 %vm800_vm3, %v14803_v11  ;;  %v14838_v6 = vsel %vm875_vm0, %v2079_v1, %v2080_v46  ;;  %v439_v1 = vld [vmem:[%s14208_s12 + $0x510] sm:$0xff]  ;;  %v14866_v2 = vsel %vm687_vm2, %v1368_v53, %v1369_v32  ;;  %v14886_v53 = vsel %vm687_vm2, %v1369_v32, %v1371_v23  ;;  %v2095_v32 = vrot.slane %v14331_v62, 4 }
  0x7d   : > { %12117 = vmatprep.mubr.msk.f32.mxu0 %vm800_vm3, %v14517_v58  ;;  %12205 = vmatprep.mubr.msk.f32.mxu1 %vm800_vm3, %v14807_v30  ;;  %18259 = vst [vmem:[#allocation62_spill] sm:$0xff] %v14866_v2  ;;  %v2089_v46 = vrot.slane %v439_v1, 4  ;;  %18260 = vst [vmem:[#allocation63_spill] sm:$0xff] %v14886_v53  ;;  %v1376_v58 = vrot.slane %v14863_v55, 2  ;;  %v2092_v1 = vrot.slane %v14311_v51, 4  ;;  %v14904_v23 = vld [vmem:[%s14208_s12 + $0x330] sm:$0xff] }
  0x7e   : > { %18261 = vst [vmem:[#allocation64_spill] sm:$0xff] %v14901_v61  ;;  %18262 = vst [vmem:[#allocation65_spill] sm:$0xff] %v14904_v23  ;;  %v14907_v51 = vld [vmem:[%s14208_s12 + $0x358] sm:$0xff]  ;;  %v1381_v24 = vrot.slane %v14904_v23, 2 }
  0x7f   : > { %v14910_v15 = vsel %vm875_vm0, %v2089_v46, %v2090_v22  ;;  %v14926_v62 = vsel %vm687_vm2, %v1374_v25, %v1376_v58  ;;  %v14929_v39 = vsel %vm875_vm0, %v2090_v22, %v2092_v1  ;;  %v2097_v58 = vrot.slane %v14334_v63, 4  ;;  %v14944_v25 = vld [vmem:[%s14208_s12 + $0x368] sm:$0xff]  ;;  %v460_v63 = vld [vmem:[%s14208_s12 + $0x5b8] sm:$0xff] }
  0x80   : > { %12118 = vmatmul.mubr.msk.f32.gmra.mrb[14].mxu0 %vm800_vm3, %v14532_v59  ;;  %12206 = vmatmul.mubr.msk.f32.gmra.mrb[52].mxu1 %vm800_vm3, %v14830_v16  ;;  %v446_v59 = vld [vmem:[%s14208_s12 + $0x548] sm:$0xff]  ;;  %18263 = vst [vmem:[#allocation66_spill] sm:$0xff] %v14926_v62  ;;  %18266 = vst [vmem:[#allocation69_spill] sm:$0xff] %v14944_v25  ;;  %v2099_v1 = vrot.slane %v453_v52, 4  ;;  %v2102_v52 = vrot.slane %v14357_v20, 4 }
  0x81   : > { %12120 = vmatprep.mubr.msk.f32.mxu0 %vm800_vm3, %v14543_v12  ;;  %12208 = vmatprep.mubr.msk.f32.mxu1 %vm800_vm3, %v14838_v6  ;;  %v14877_v12 = vld [vmem:[%s14208_s12 + $0x328] sm:$0xff]  ;;  %v2094_v41 = vrot.slane %v446_v59, 4 }
  0x82   : > { %v14919_v59 = vld [vmem:[%s18060_s2 + $0x8] sm:$0xf] }
  0x84   : > { %12121 = vmatmul.mubr.msk.f32.gmra.mrb[16].mxu0 %vm800_vm3, %v14558_v28  ;;  %12209 = vmatmul.mubr.msk.f32.gmra.mrb[54].mxu1 %vm800_vm3, %v14860_v38  ;;  %v1379_v28 = vrot.slane %v14877_v12, 2 }
  0x85   : > { %12149 = vmatprep.mubr.msk.f32.mxu0 %vm800_vm3, %v14866_v2  ;;  %12211 = vmatprep.mubr.msk.f32.mxu1 %vm800_vm3, %v14869_v35  ;;  %v14913_v2 = vld [vmem:[%s14208_s12 + $0x360] sm:$0xff] }
  0x86   : > { %v14936_v46 = vsel %vm687_vm2, %v1378_v50, %v1379_v28  ;;  %v1384_v22 = vrot.slane %v14913_v2, 2  ;;  %v2100_v50 = vrot.slane %v14354_v19, 4  ;;  %v1386_v19 = vrot.slane %v14944_v25, 2 }
  0x87   : > { %18264 = vst [vmem:[#allocation67_spill] sm:$0xff] %v14936_v46  ;;  %v14971_v34 = vsel %vm687_vm2, %v1379_v28, %v1381_v24  ;;  %v14989_v28 = vld [vmem:[%s14208_s12 + $0x3c8] sm:$0xff]  ;;  %v14992_v24 = vld [vmem:[%s14208_s12 + $0x3d0] sm:$0xff] }
  0x88   : > { %12150 = vmatmul.mubr.msk.f32.vlgmr.msra.gmra.mrb[2].mxu0 %vm800_vm3, %v14886_v53  ;;  %12212 = vmatmul.mubr.msk.f32.gmra.mrb[56].mxu1 %vm800_vm3, %v14889_v0  ;;  %v14939_v53 = vsel %vm875_vm0, %v2094_v41, %v2095_v32  ;;  %v14955_v41 = vld [vmem:[%s14208_s12 + $0x398] sm:$0xff]  ;;  %18267 = vst [vmem:[#allocation70_spill] sm:$0xff] %v14971_v34  ;;  %v14982_v20 = vsel %vm875_vm0, %v2099_v1, %v2100_v50 }
  0x89   : > { %12348 = vmatpush3.msk.msra.mxu0 %vm875_vm0, %v14716_v29  ;;  %12152 = vmatprep.mubr.msk.f32.mxu0 %vm800_vm3, %v14901_v61  ;;  %18265 = vst [vmem:[#allocation68_spill] sm:$0xff] %v14939_v53  ;;  %v1383_v29 = vrot.slane %v14907_v51, 2  ;;  %v14952_v61 = vld [vmem:[%s14208_s12 + $0x390] sm:$0xff]  ;;  %v1389_v55 = vrot.slane %v14955_v41, 2  ;;  %18269 = vst [vmem:[#allocation72_spill] sm:$0xff] %v14982_v20  ;;  %v15003_v37 = vsel %vm875_vm0, %v2100_v50, %v2102_v52  ;;  %v1394_v50 = vrot.slane %v14992_v24, 2 }
  0x8a   : > { %12214 = vmatprep.mubr.msk.f32.mxu1 %vm800_vm3, %v14910_v15  ;;  %12397 = vmatprep.subr.msk.mxu0 %vm875_vm0, %v14919_v59  ;;  %v1388_v23 = vrot.slane %v14952_v61, 2  ;;  %v2110_v52 = vrot.slane %v14400_v56, 4 }
  0x8b   : > { %v14979_v25 = vsel %vm687_vm2, %v1383_v29, %v1384_v22 }
  0x8c   : > { %12153 = vmatmul.mubr.msk.f32.gmra.mrb[4].mxu0 %vm800_vm3, %v14926_v62  ;;  %12215 = vmatmul.mubr.msk.f32.gmra.mrb[58].mxu1 %vm800_vm3, %v14929_v39  ;;  %v14974_v62 = vsel %vm875_vm0, %v2095_v32, %v2097_v58  ;;  %18268 = vst [vmem:[#allocation71_spill] sm:$0xff] %v14979_v25  ;;  %v467_v32 = vld [vmem:[%s14208_s12 + $0x5f0] sm:$0xff]  ;;  %v15000_v58 = vsel %vm687_vm2, %v1384_v22, %v1386_v19 }
  0x8d   : > { %12155 = vmatprep.mubr.msk.f32.mxu0 %vm800_vm3, %v14936_v46  ;;  %12217 = vmatprep.mubr.msk.f32.mxu1 %vm800_vm3, %v14939_v53  ;;  %v2104_v46 = vrot.slane %v460_v63, 4  ;;  %v14986_v53 = vld [vmem:[%s14208_s12 + $0x3a0] sm:$0xff]  ;;  %18271 = vst [vmem:[#allocation74_spill] sm:$0xff] %v15000_v58  ;;  %v15010_v29 = vsel %vm687_vm2, %v1388_v23, %v1389_v55  ;;  %v2107_v63 = vrot.slane %v14380_v40, 4  ;;  %v2109_v19 = vrot.slane %v467_v32, 4 }
  0x8e   : > { %18270 = vst [vmem:[#allocation73_spill] sm:$0xff] %v14986_v53  ;;  %18272 = vst [vmem:[#allocation75_spill] sm:$0xff] %v15010_v29  ;;  %v1391_v1 = vrot.slane %v14986_v53, 2  ;;  %v2122_v53 = vrot.slane %v14423_v14, 4  ;;  %v2124_v14 = vrot.slane %v14426_v21, 4 }
  0x8f   : > { %v15016_v22 = vsel %vm875_vm0, %v2104_v46, %v2105_v42  ;;  %v15036_v56 = vsel %vm875_vm0, %v2105_v42, %v2107_v63  ;;  %v2112_v46 = vrot.slane %v14403_v57, 4  ;;  %v2129_v63 = vrot.slane %v14451_v48, 4 }
  0x90   : > { %12156 = vmatmul.mubr.msk.f32.gmra.mrb[6].mxu0 %vm800_vm3, %v14971_v34  ;;  %12218 = vmatmul.mubr.msk.f32.gmra.mrb[60].mxu1 %vm800_vm3, %v14974_v62  ;;  %v1393_v34 = vrot.slane %v14989_v28, 2  ;;  %18273 = vst [vmem:[#allocation76_spill] sm:$0xff] %v15016_v22  ;;  %v15033_v40 = vsel %vm687_vm2, %v1389_v55, %v1391_v1  ;;  %v488_v1 = vld [vmem:[%s14208_s12 + $0x698] sm:$0xff] }
  0x91   : > { %12158 = vmatprep.mubr.msk.f32.mxu0 %vm800_vm3, %v14979_v25  ;;  %12220 = vmatprep.mubr.msk.f32.mxu1 %vm800_vm3, %v14982_v20  ;;  %v15021_v25 = vld [vmem:[%s14208_s12 + $0x3d8] sm:$0xff]  ;;  %v474_v20 = vld [vmem:[%s14208_s12 + $0x628] sm:$0xff]  ;;  %18275 = vst [vmem:[#allocation78_spill] sm:$0xff] %v15033_v40 }
  0x92   : > { %18274 = vst [vmem:[#allocation77_spill] sm:$0xff] %v15021_v25  ;;  %v1396_v23 = vrot.slane %v15021_v25, 2  ;;  %v15041_v32 = vsel %vm687_vm2, %v1393_v34, %v1394_v50  ;;  %v15060_v34 = vsel %vm875_vm0, %v2110_v52, %v2112_v46  ;;  %v364_v25 = vld [vmem:[%s14208_s12 + $0x2a8] sm:$0xff] }
  0x93   : > { %18276 = vst [vmem:[#allocation79_spill] sm:$0xff] %v15041_v32 }
  0x94   : > { %12159 = vmatmul.mubr.msk.f32.gmra.mrb[8].mxu0 %vm800_vm3, %v15000_v58  ;;  %12221 = vmatmul.mubr.msk.f32.gmra.mrb[62].mxu1 %vm800_vm3, %v15003_v37  ;;  %v15044_v58 = vsel %vm875_vm0, %v2109_v19, %v2110_v52  ;;  %v15057_v57 = vsel %vm687_vm2, %v1394_v50, %v1396_v23  ;;  %v2132_v50 = vrot.slane %v14474_v13, 4  ;;  %v495_v19 = vld [vmem:[%s14208_s12 + $0x6d0] sm:$0xff] }
  0x95   : > { %12161 = vmatprep.mubr.msk.f32.mxu0 %vm800_vm3, %v15010_v29  ;;  %12223 = vmatprep.mubr.msk.f32.mxu1 %vm800_vm3, %v15016_v22  ;;  %v2121_v29 = vrot.slane %v474_v20, 4  ;;  %v481_v22 = vld [vmem:[%s14208_s12 + $0x660] sm:$0xff]  ;;  %18277 = vst [vmem:[#allocation80_spill] sm:$0xff] %v15057_v57  ;;  %v2127_v20 = vrot.slane %v14448_v47, 4  ;;  %v18278_v52 = vld [vmem:[#allocation17_spill] sm:$0xff]  ;;  %v2136_v46 = vrot.slane %v495_v19, 4 }
  0x96   : > { %v2126_v55 = vrot.slane %v481_v22, 4  ;;  %v2131_v22 = vrot.slane %v488_v1, 4  ;;  %v2134_v23 = vrot.slane %v18278_v52, 4  ;;  %v502_v1 = vld [vmem:[%s14208_s12 + $0x708] sm:$0xff] }
  0x97   : > { %v15064_v42 = vsel %vm875_vm0, %v2121_v29, %v2122_v53  ;;  %v15077_v29 = vsel %vm875_vm0, %v2122_v53, %v2124_v14  ;;  %v15094_v53 = vsel %vm875_vm0, %v2127_v20, %v2129_v63  ;;  %v18279_v14 = vld [vmem:[#allocation19_spill] sm:$0xff]  ;;  %v18283_v63 = vld [vmem:[#allocation20_spill] sm:$0xff] }
  0x98   : > { %12162 = vmatmul.mubr.msk.f32.gmra.mrb[10].mxu0 %vm800_vm3, %v15033_v40  ;;  %12224 = vmatmul.mubr.msk.f32.gmra.mrb[64].mxu1 %vm800_vm3, %v15036_v56  ;;  %v15081_v47 = vsel %vm875_vm0, %v2126_v55, %v2127_v20  ;;  %v15098_v13 = vsel %vm875_vm0, %v2131_v22, %v2132_v50  ;;  %v2137_v55 = vrot.slane %v18279_v14, 4  ;;  %v15111_v20 = vsel %vm875_vm0, %v2132_v50, %v2134_v23  ;;  %v18289_v23 = vld [vmem:[#allocation24_spill] sm:$0xff] }
  0x99   : > { %12164 = vmatprep.mubr.msk.f32.mxu0 %vm800_vm3, %v15041_v32  ;;  %12226 = vmatprep.mubr.msk.f32.mxu1 %vm800_vm3, %v15044_v58  ;;  %18282 = vst [vmem:[#allocation17_spill] sm:$0xff] %v15111_v20  ;;  %v2139_v22 = vrot.slane %v18283_v63, 4  ;;  %v2141_v14 = vrot.slane %v502_v1, 4  ;;  %v18286_v32 = vld [vmem:[#allocation8_spill] sm:$0xff] }
  0x9a   : > { %v15115_v19 = vsel %vm875_vm0, %v2136_v46, %v2137_v55  ;;  %v2144_v46 = vrot.slane %v18289_v23, 4 }
  0x9b   : > { %18284 = vst [vmem:[#allocation19_spill] sm:$0xff] %v15115_v19  ;;  %v15128_v50 = vsel %vm875_vm0, %v2137_v55, %v2139_v22 }
  0x9c   : > { %12165 = vmatmul.mubr.msk.f32.gmra.mrb[12].mxu0 %vm800_vm3, %v15057_v57  ;;  %12227 = vmatmul.mubr.msk.f32.gmra.mrb[66].mxu1 %vm800_vm3, %v15060_v34  ;;  %v509_v57 = vld [vmem:[%s14208_s12 + $0x740] sm:$0xff]  ;;  %18288 = vst [vmem:[#allocation20_spill] sm:$0xff] %v15128_v50 }
  0x9d   : > { %12167 = vmatprep.mubr.msk.f32.mxu0 %vm800_vm3, %v14235_v17  ;;  %12229 = vmatprep.mubr.msk.f32.mxu1 %vm800_vm3, %v15064_v42  ;;  %v2146_v1 = vrot.slane %v509_v57, 4  ;;  %v18294_v57 = vld [vmem:[#allocation29_spill] sm:$0xff] }
  0x9e   : > { %v2149_v22 = vrot.slane %v18294_v57, 4 }
  0xa0   : > { %12168 = vmatmul.mubr.msk.f32.gmra.mrb[14].mxu0 %vm800_vm3, %v14238_v18  ;;  %12230 = vmatmul.mubr.msk.f32.gmra.mrb[68].mxu1 %vm800_vm3, %v15077_v29  ;;  %v18280_v18 = vld [vmem:[#allocation6_spill] sm:$0xff] }
  0xa1   : > { %12170 = vmatprep.mubr.msk.f32.mxu0 %vm800_vm3, %v14255_v26  ;;  %12232 = vmatprep.mubr.msk.f32.mxu1 %vm800_vm3, %v15081_v47  ;;  %v18281_v26 = vld [vmem:[#allocation7_spill] sm:$0xff] }
  0xa4   : > { %12171 = vmatmul.mubr.msk.f32.gmra.mrb[16].mxu0 %vm800_vm3, %v18280_v18  ;;  %12233 = vmatmul.mubr.msk.f32.gmra.mrb[70].mxu1 %vm800_vm3, %v15094_v53  ;;  %v18285_v18 = vld [vmem:[#allocation23_spill] sm:$0xff] }
  0xa5   : > { %12173 = vmatprep.mubr.msk.f32.mxu0 %vm800_vm3, %v18281_v26  ;;  %12235 = vmatprep.mubr.msk.f32.mxu1 %vm800_vm3, %v15098_v13  ;;  %v2142_v17 = vrot.slane %v18285_v18, 4  ;;  %v18287_v26 = vld [vmem:[#allocation9_spill] sm:$0xff] }
  0xa7   : > { %v15132_v18 = vsel %vm875_vm0, %v2141_v14, %v2142_v17  ;;  %v15145_v55 = vsel %vm875_vm0, %v2142_v17, %v2144_v46  ;;  %v2034_v14 = vrot.slane %v364_v25, 4  ;;  %v2037_v25 = vrot.slane %v14816_v33, 4 }
  0xa8   : > { %12174 = vmatmul.mubr.msk.f32.gmra.mrb[18].mxu0 %vm800_vm3, %v18286_v32  ;;  %12236 = vmatmul.mubr.msk.f32.gmra.mrb[72].mxu1 %vm800_vm3, %v15111_v20  ;;  %18290 = vst [vmem:[#allocation23_spill] sm:$0xff] %v15132_v18  ;;  %v18291_v32 = vld [vmem:[#allocation28_spill] sm:$0xff]  ;;  %v18292_v20 = vld [vmem:[#allocation10_spill] sm:$0xff] }
  0xa9   : > { %12176 = vmatprep.mubr.msk.f32.mxu0 %vm800_vm3, %v18287_v26  ;;  %12238 = vmatprep.mubr.msk.f32.mxu1 %vm800_vm3, %v15115_v19  ;;  %v2147_v40 = vrot.slane %v18291_v32, 4  ;;  %v18293_v26 = vld [vmem:[#allocation11_spill] sm:$0xff] }
  0xaa   : > { %v371_v19 = vld [vmem:[%s14208_s12 + $0x2e0] sm:$0xff] }
  0xab   : > { %v15149_v32 = vsel %vm875_vm0, %v2146_v1, %v2147_v40  ;;  %v15162_v17 = vsel %vm875_vm0, %v2147_v40, %v2149_v22  ;;  %v2039_v46 = vrot.slane %v371_v19, 4  ;;  %v378_v1 = vld [vmem:[%s14208_s12 + $0x318] sm:$0xff]  ;;  %v2042_v22 = vrot.slane %v14846_v9, 4 }
  0xac   : > { %12177 = vmatmul.mubr.msk.f32.gmra.mrb[20].mxu0 %vm800_vm3, %v18292_v20  ;;  %12239 = vmatmul.mubr.msk.f32.gmra.mrb[74].mxu1 %vm800_vm3, %v15128_v50  ;;  %v2035_v20 = vrot.slane %v14811_v44, 4  ;;  %v18295_v50 = vld [vmem:[#allocation12_spill] sm:$0xff] }
  0xad   : > { %12179 = vmatprep.mubr.msk.f32.mxu0 %vm800_vm3, %v18293_v26  ;;  %12241 = vmatprep.mubr.msk.f32.mxu1 %vm800_vm3, %v15132_v18  ;;  %v18296_v26 = vld [vmem:[#allocation13_spill] sm:$0xff]  ;;  %v18297_v18 = vld [vmem:[#allocation14_spill] sm:$0xff] }
  0xae   : > { %v2036_v44 = vsel %vm875_vm0, %v2034_v14, %v2035_v20  ;;  %v2038_v40 = vsel %vm875_vm0, %v2035_v20, %v2037_v25  ;;  %v2045_v14 = vrot.slane %v14874_v45, 4  ;;  %v2047_v45 = vrot.slane %v14877_v12, 4 }
  0xaf   : > { %v2050_v25 = vrot.slane %v14907_v51, 4  ;;  %v2052_v51 = vrot.slane %v14913_v2, 4 }
  0xb0   : > { %12180 = vmatmul.mubr.msk.f32.gmra.mrb[22].mxu0 %vm800_vm3, %v18295_v50  ;;  %12242 = vmatmul.mubr.msk.f32.gmra.mrb[76].mxu1 %vm800_vm3, %v15145_v55  ;;  %v2040_v50 = vrot.slane %v14843_v8, 4  ;;  %v2044_v8 = vrot.slane %v378_v1, 4  ;;  %v398_v1 = vld [vmem:[%s14208_s12 + $0x3c0] sm:$0xff] }
  0xb1   : > { %12182 = vmatprep.mubr.msk.f32.mxu0 %vm800_vm3, %v18296_v26  ;;  %12244 = vmatprep.mubr.msk.f32.mxu1 %vm800_vm3, %v15149_v32  ;;  %v385_v26 = vld [vmem:[%s14208_s12 + $0x350] sm:$0xff] }
  0xb2   : > { %v2041_v19 = vsel %vm875_vm0, %v2039_v46, %v2040_v50  ;;  %v2043_v20 = vsel %vm875_vm0, %v2040_v50, %v2042_v22  ;;  %v2055_v50 = vrot.slane %v14952_v61, 4  ;;  %v2059_v22 = vrot.slane %v398_v1, 4 }
  0xb3   : > { %v2060_v61 = vrot.slane %v14989_v28, 4 }
  0xb4   : > { %12183 = vmatmul.mubr.msk.f32.gmra.mrb[24].mxu0 %vm800_vm3, %v18297_v18  ;;  %12245 = vmatmul.mubr.msk.f32.gmra.mrb[78].mxu1 %vm800_vm3, %v15162_v17  ;;  %v2046_v18 = vsel %vm875_vm0, %v2044_v8, %v2045_v14  ;;  %v15240_v8 = vld [vmem:[%s14208_s12 + $0x410] sm:$0xff] }
  0xb5   : > { %12185 = vmatprep.mubr.msk.f32.mxu0 %vm800_vm3, %v14368_v31  ;;  %12249 = vmatprep.mubr.msk.f32.mxu1 %vm800_vm3, %v2036_v44  ;;  %v15186_v31 = vld [vmem:[%s18061_s3 + $0x1c] sm:$0xf]  ;;  %v392_v44 = vld [vmem:[%s14208_s12 + $0x388] sm:$0xff]  ;;  %v2061_v28 = vsel %vm875_vm0, %v2059_v22, %v2060_v61 }
  0xb6   : > { %v2054_v46 = vrot.slane %v392_v44, 4 }
  0xb8   : > { %12186 = vmatmul.mubr.msk.f32.gmra.mrb[26].mxu0 %vm800_vm3, %v14383_v43  ;;  %12250 = vmatmul.mubr.msk.f32.vlgmr.msra.gmra.mrb[48].mxu1 %vm800_vm3, %v2038_v40  ;;  %v2049_v43 = vrot.slane %v385_v26, 4  ;;  %v2056_v40 = vsel %vm875_vm0, %v2054_v46, %v2055_v50  ;;  %v15249_v26 = vld [vmem:[%s14208_s12 + $0x440] sm:$0xff] }
  0xb9   : > { %12188 = vmatprep.mubr.msk.f32.mxu0 %vm800_vm3, %v14391_v49  ;;  %12252 = vmatprep.mubr.msk.f32.mxu1 %vm800_vm3, %v2041_v19  ;;  %v2048_v49 = vsel %vm875_vm0, %v2045_v14, %v2047_v45  ;;  %v2062_v19 = vrot.slane %v14992_v24, 4  ;;  %v15271_v45 = vld [vmem:[%s14208_s12 + $0x480] sm:$0xff] }
  0xba   : > { %12298 = vmatpush3.msk.msra.mxu1 %vm875_vm0, %v14796_v3  ;;  %v2051_v3 = vsel %vm875_vm0, %v2049_v43, %v2050_v25  ;;  %v15348_v43 = vld [vmem:[%s14208_s12 + $0x5c8] sm:$0xff] }
  0xbb   : > { %12497 = vmatprep.subr.msk.mxu1 %vm875_vm0, %v15186_v31  ;;  %v2063_v14 = vsel %vm875_vm0, %v2060_v61, %v2062_v19  ;;  %v15416_v61 = vld [vmem:[%s18061_s3 + $0x4] sm:$0xf] }
  0xbc   : > { %12189 = vmatmul.mubr.msk.f32.gmra.mrb[28].mxu0 %vm800_vm3, %v14406_v60  ;;  %12253 = vmatmul.mubr.msk.f32.gmra.mrb[50].mxu1 %vm800_vm3, %v2043_v20  ;;  %v2053_v60 = vsel %vm875_vm0, %v2050_v25, %v2052_v51  ;;  %v15257_v20 = vld [vmem:[%s14208_s12 + $0x448] sm:$0xff]  ;;  %v15362_v25 = vld [vmem:[%s14208_s12 + $0x600] sm:$0xff] }
  0xbd   : > { %12191 = vmatprep.mubr.msk.f32.mxu0 %vm800_vm3, %v14414_v7  ;;  %12255 = vmatprep.mubr.msk.f32.mxu1 %vm800_vm3, %v2046_v18  ;;  %v2057_v7 = vrot.slane %v14955_v41, 4  ;;  %v15334_v18 = vld [vmem:[%s14208_s12 + $0x590] sm:$0xff] }
  0xc0   : > { %12192 = vmatmul.mubr.msk.f32.gmra.mrb[30].mxu0 %vm800_vm3, %v14429_v27  ;;  %12256 = vmatmul.mubr.msk.f32.gmra.mrb[52].mxu1 %vm800_vm3, %v2048_v49  ;;  %v15226_v27 = vld [vmem:[%s14208_s12 + $0x408] sm:$0xff] }
  0xc1   : > { %12194 = vmatprep.mubr.msk.f32.mxu0 %vm800_vm3, %v14439_v36  ;;  %12258 = vmatprep.mubr.msk.f32.mxu1 %vm800_vm3, %v2051_v3  ;;  %v2058_v36 = vsel %vm875_vm0, %v2055_v50, %v2057_v7  ;;  %v15371_v49 = vld [vmem:[%s14208_s12 + $0x608] sm:$0xff]  ;;  %v18301_v50 = vld [vmem:[#allocation15_spill] sm:$0xff] }
  0xc2   : > { %v18300_v3 = vld [vmem:[#allocation76_spill] sm:$0xff] }
  0xc4   : > { %12195 = vmatmul.mubr.msk.f32.gmra.mrb[32].mxu0 %vm800_vm3, %v14454_v54  ;;  %12259 = vmatmul.mubr.msk.f32.gmra.mrb[54].mxu1 %vm800_vm3, %v2053_v60  ;;  %v15236_v54 = vld [vmem:[%s18060_s2 + $0x20] sm:$0xf] }
  0xc5   : > { %12261 = vmatprep.mubr.msk.f32.mxu1 %vm800_vm3, %v2056_v40  ;;  %12349 = vmatprep.mubr.msk.f32.mxu0 %vm800_vm3, %v15226_v27 }
  0xc8   : > { %12262 = vmatmul.mubr.msk.f32.gmra.mrb[56].mxu1 %vm800_vm3, %v2058_v36  ;;  %12350 = vmatmul.mubr.msk.f32.vlgmr.msra.gmra.mrb[34].mxu0 %vm800_vm3, %v15240_v8 }
  0xc9   : > { %12398 = vmatpush3.msk.msra.mxu0 %vm875_vm0, %v14919_v59  ;;  %12264 = vmatprep.mubr.msk.f32.mxu1 %vm800_vm3, %v2061_v28  ;;  %v15264_v59 = vld [vmem:[%s14208_s12 + $0x478] sm:$0xff] }
  0xca   : > { %12352 = vmatprep.mubr.msk.f32.mxu0 %vm800_vm3, %v15249_v26  ;;  %12447 = vmatprep.subr.msk.mxu0 %vm875_vm0, %v15236_v54 }
  0xcc   : > { %12265 = vmatmul.mubr.msk.f32.gmra.mrb[58].mxu1 %vm800_vm3, %v2063_v14  ;;  %12353 = vmatmul.mubr.msk.f32.gmra.mrb[36].mxu0 %vm800_vm3, %v15257_v20  ;;  %v18311_v14 = vld [vmem:[#allocation19_spill] sm:$0xff] }
  0xcd   : > { %12267 = vmatprep.mubr.msk.f32.mxu1 %vm800_vm3, %v14768_v4  ;;  %12355 = vmatprep.mubr.msk.f32.mxu0 %vm800_vm3, %v15264_v59  ;;  %v15278_v4 = vld [vmem:[%s14208_s12 + $0x4b0] sm:$0xff] }
  0xd0   : > { %12268 = vmatmul.mubr.msk.f32.gmra.mrb[60].mxu1 %vm800_vm3, %v14781_v5  ;;  %12356 = vmatmul.mubr.msk.f32.gmra.mrb[38].mxu0 %vm800_vm3, %v15271_v45  ;;  %v15285_v5 = vld [vmem:[%s14208_s12 + $0x4b8] sm:$0xff] }
  0xd1   : > { %12270 = vmatprep.mubr.msk.f32.mxu1 %vm800_vm3, %v14785_v10  ;;  %12358 = vmatprep.mubr.msk.f32.mxu0 %vm800_vm3, %v15278_v4  ;;  %v15292_v10 = vld [vmem:[%s14208_s12 + $0x4e8] sm:$0xff] }
  0xd4   : > { %12271 = vmatmul.mubr.msk.f32.gmra.mrb[62].mxu1 %vm800_vm3, %v14803_v11  ;;  %12359 = vmatmul.mubr.msk.f32.gmra.mrb[40].mxu0 %vm800_vm3, %v15285_v5  ;;  %v15299_v11 = vld [vmem:[%s14208_s12 + $0x4f0] sm:$0xff] }
  0xd5   : > { %12273 = vmatprep.mubr.msk.f32.mxu1 %vm800_vm3, %v14807_v30  ;;  %12361 = vmatprep.mubr.msk.f32.mxu0 %vm800_vm3, %v15292_v10  ;;  %v15306_v30 = vld [vmem:[%s14208_s12 + $0x520] sm:$0xff] }
  0xd8   : > { %12274 = vmatmul.mubr.msk.f32.gmra.mrb[64].mxu1 %vm800_vm3, %v14830_v16  ;;  %12362 = vmatmul.mubr.msk.f32.gmra.mrb[42].mxu0 %vm800_vm3, %v15299_v11  ;;  %v15313_v16 = vld [vmem:[%s14208_s12 + $0x528] sm:$0xff] }
  0xd9   : > { %12276 = vmatprep.mubr.msk.f32.mxu1 %vm800_vm3, %v14838_v6  ;;  %12364 = vmatprep.mubr.msk.f32.mxu0 %vm800_vm3, %v15306_v30  ;;  %v15320_v6 = vld [vmem:[%s14208_s12 + $0x558] sm:$0xff] }
  0xdc   : > { %12277 = vmatmul.mubr.msk.f32.gmra.mrb[66].mxu1 %vm800_vm3, %v14860_v38  ;;  %12365 = vmatmul.mubr.msk.f32.gmra.mrb[44].mxu0 %vm800_vm3, %v15313_v16  ;;  %v15327_v38 = vld [vmem:[%s14208_s12 + $0x560] sm:$0xff] }
  0xdd   : > { %12279 = vmatprep.mubr.msk.f32.mxu1 %vm800_vm3, %v14869_v35  ;;  %12367 = vmatprep.mubr.msk.f32.mxu0 %vm800_vm3, %v15320_v6  ;;  %v15341_v35 = vld [vmem:[%s14208_s12 + $0x598] sm:$0xff] }
  0xe0   : > { %12280 = vmatmul.mubr.msk.f32.gmra.mrb[68].mxu1 %vm800_vm3, %v14889_v0  ;;  %12368 = vmatmul.mubr.msk.f32.gmra.mrb[46].mxu0 %vm800_vm3, %v15327_v38  ;;  %v18298_v0 = vld [vmem:[#allocation68_spill] sm:$0xff] }
  0xe1   : > { %12282 = vmatprep.mubr.msk.f32.mxu1 %vm800_vm3, %v14910_v15  ;;  %12370 = vmatprep.mubr.msk.f32.mxu0 %vm800_vm3, %v15334_v18  ;;  %v15355_v15 = vld [vmem:[%s14208_s12 + $0x5d0] sm:$0xff] }
  0xe4   : > { %12283 = vmatmul.mubr.msk.f32.gmra.mrb[70].mxu1 %vm800_vm3, %v14929_v39  ;;  %12371 = vmatmul.mubr.msk.f32.gmra.mrb[48].mxu0 %vm800_vm3, %v15341_v35  ;;  %v18299_v39 = vld [vmem:[#allocation72_spill] sm:$0xff] }
  0xe5   : > { %12285 = vmatprep.mubr.msk.f32.mxu1 %vm800_vm3, %v18298_v0  ;;  %12373 = vmatprep.mubr.msk.f32.mxu0 %vm800_vm3, %v15348_v43 }
  0xe8   : > { %12286 = vmatmul.mubr.msk.f32.gmra.mrb[72].mxu1 %vm800_vm3, %v14974_v62  ;;  %12374 = vmatmul.mubr.msk.f32.gmra.mrb[50].mxu0 %vm800_vm3, %v15355_v15 }
  0xe9   : > { %12288 = vmatprep.mubr.msk.f32.mxu1 %vm800_vm3, %v18299_v39  ;;  %12376 = vmatprep.mubr.msk.f32.mxu0 %vm800_vm3, %v15362_v25 }
  0xeb   : > { %v15366_v44 = vpop.f32.mrb[0].mxu1 }
  0xec   : > { %12289 = vmatmul.mubr.msk.f32.gmra.mrb[74].mxu1 %vm800_vm3, %v15003_v37  ;;  %12377 = vmatmul.mubr.msk.f32.gmra.mrb[52].mxu0 %vm800_vm3, %v15371_v49  ;;  %v15375_v51 = vpop.f32.mrb[1].mxu1 }
  0xed   : > { %12291 = vmatprep.mubr.msk.f32.mxu1 %vm800_vm3, %v18300_v3  ;;  %12379 = vmatprep.mubr.msk.f32.mxu0 %vm800_vm3, %v14426_v21  ;;  %v18302_v21 = vld [vmem:[#allocation16_spill] sm:$0xff] }
  0xef   : > { %v15381_v46 = vpop.f32.mrb[2].mxu1 }
  0xf0   : > { %12292 = vmatmul.mubr.msk.f32.gmra.mrb[76].mxu1 %vm800_vm3, %v15036_v56  ;;  %12380 = vmatmul.mubr.msk.f32.gmra.mrb[54].mxu0 %vm800_vm3, %v18301_v50  ;;  %v15387_v1 = vpop.f32.mrb[3].mxu1  ;;  %v18314_v50 = vld [vmem:[#allocation23_spill] sm:$0xff] }
  0xf1   : > { %12294 = vmatprep.mubr.msk.f32.mxu1 %vm800_vm3, %v15044_v58  ;;  %12382 = vmatprep.mubr.msk.f32.mxu0 %vm800_vm3, %v14451_v48  ;;  %v18303_v48 = vld [vmem:[#allocation18_spill] sm:$0xff] }
  0xf3   : > { %v15393_v60 = vpop.f32.mrb[4].mxu1 }
  0xf4   : > { %12295 = vmatmul.mubr.msk.f32.gmra.mrb[78].mxu1 %vm800_vm3, %v15060_v34  ;;  %12383 = vmatmul.mubr.msk.f32.gmra.mrb[56].mxu0 %vm800_vm3, %v18302_v21  ;;  %v15399_v7 = vpop.f32.mrb[5].mxu1 }
  0xf5   : > { %12299 = vmatprep.mubr.msk.f32.mxu1 %vm800_vm3, %v18298_v0  ;;  %12385 = vmatprep.mubr.msk.f32.mxu0 %vm800_vm3, %v18278_v52  ;;  %v18304_v52 = vld [vmem:[#allocation21_spill] sm:$0xff] }
  0xf7   : > { %v15405_v40 = vpop.f32.mrb[6].mxu1 }
  0xf8   : > { %12300 = vmatmul.mubr.msk.f32.vlgmr.msra.gmra.mrb[48].mxu1 %vm800_vm3, %v14974_v62  ;;  %12386 = vmatmul.mubr.msk.f32.gmra.mrb[58].mxu0 %vm800_vm3, %v18303_v48  ;;  %v15411_v22 = vpop.f32.mrb[7].mxu1 }
  0xf9   : > { %12302 = vmatprep.mubr.msk.f32.mxu1 %vm800_vm3, %v18299_v39  ;;  %12388 = vmatprep.mubr.msk.f32.mxu0 %vm800_vm3, %v18283_v63  ;;  %v18313_v39 = vld [vmem:[#allocation69_spill] sm:$0xff] }
  0xfa   : > { %12498 = vmatpush3.msk.msra.mxu1 %vm875_vm0, %v15186_v31  ;;  %v18305_v31 = vld [vmem:[#allocation26_spill] sm:$0xff] }
  0xfb   : > { %v15424_v62 = vpop.f32.mrb[8].mxu1  ;;  %12547 = vmatprep.subr.msk.mxu1 %vm875_vm0, %v15416_v61 }
  0xfc   : > { %12303 = vmatmul.mubr.msk.f32.gmra.mrb[50].mxu1 %vm800_vm3, %v15003_v37  ;;  %12389 = vmatmul.mubr.msk.f32.gmra.mrb[60].mxu0 %vm800_vm3, %v18304_v52  ;;  %v15432_v36 = vpop.f32.mrb[9].mxu1  ;;  %v522_v52 = vld [vmem:[%s14208_s12 + $0x7b0] sm:$0xff] }
  0xfd   : > { %12305 = vmatprep.mubr.msk.f32.mxu1 %vm800_vm3, %v18300_v3  ;;  %12391 = vmatprep.mubr.msk.f32.mxu0 %vm800_vm3, %v18289_v23  ;;  %v18306_v23 = vld [vmem:[#allocation31_spill] sm:$0xff] }
  0xff   : > { %v15438_v63 = vpop.f32.mrb[10].mxu1 }
 0x100   : > { %12306 = vmatmul.mubr.msk.f32.gmra.mrb[52].mxu1 %vm800_vm3, %v15036_v56  ;;  %12392 = vmatmul.mubr.msk.f32.gmra.mrb[62].mxu0 %vm800_vm3, %v18305_v31  ;;  %v15444_v37 = vpop.f32.mrb[11].mxu1 }
 0x101   : > { %12308 = vmatprep.mubr.msk.f32.mxu1 %vm800_vm3, %v15044_v58  ;;  %12394 = vmatprep.mubr.msk.f32.mxu0 %vm800_vm3, %v18294_v57  ;;  %v15467_v57 = vld [vmem:[%s18061_s3 + $0xc] sm:$0xf] }
 0x103   : > { %v15450_v19 = vpop.f32.mrb[12].mxu1 }
 0x104   : > { %12309 = vmatmul.mubr.msk.f32.gmra.mrb[54].mxu1 %vm800_vm3, %v15060_v34  ;;  %12395 = vmatmul.mubr.msk.f32.gmra.mrb[64].mxu0 %vm800_vm3, %v18306_v23  ;;  %v15456_v56 = vpop.f32.mrb[13].mxu1  ;;  %v18307_v34 = vld [vmem:[#allocation60_spill] sm:$0xff]  ;;  %v18316_v23 = vld [vmem:[#allocation73_spill] sm:$0xff] }
 0x105   : > { %12311 = vmatprep.mubr.msk.f32.mxu1 %vm800_vm3, %v15064_v42  ;;  %12399 = vmatprep.mubr.msk.f32.mxu0 %vm800_vm3, %v14816_v33  ;;  %v18308_v42 = vld [vmem:[#allocation61_spill] sm:$0xff] }
 0x107   : > { %v15462_v58 = vpop.f32.mrb[14].mxu1 }
 0x108   : > { %12312 = vmatmul.mubr.msk.f32.gmra.mrb[56].mxu1 %vm800_vm3, %v15077_v29  ;;  %12400 = vmatmul.mubr.msk.f32.vlgmr.msra.gmra.mrb[34].mxu0 %vm800_vm3, %v18307_v34  ;;  %v15473_v28 = vpop.f32.mrb[15].mxu1 }
 0x109   : > { %12448 = vmatpush3.msk.msra.mxu0 %vm875_vm0, %v15236_v54  ;;  %12314 = vmatprep.mubr.msk.f32.mxu1 %vm800_vm3, %v15081_v47  ;;  %v18309_v47 = vld [vmem:[#allocation17_spill] sm:$0xff] }
 0x10a   : > { %12402 = vmatprep.mubr.msk.f32.mxu0 %vm800_vm3, %v14846_v9  ;;  %12597 = vmatprep.subr.msk.mxu0 %vm875_vm0, %v15467_v57  ;;  %v18310_v54 = vld [vmem:[#allocation65_spill] sm:$0xff] }
 0x10b   : > { %v15483_v33 = vpop.f32.mrb[16].mxu1 }
 0x10c   : > { %12315 = vmatmul.mubr.msk.f32.gmra.mrb[58].mxu1 %vm800_vm3, %v15094_v53  ;;  %12403 = vmatmul.mubr.msk.f32.gmra.mrb[36].mxu0 %vm800_vm3, %v18308_v42  ;;  %v15489_v29 = vpop.f32.mrb[17].mxu1 }
 0x10d   : > { %12317 = vmatprep.mubr.msk.f32.mxu1 %vm800_vm3, %v15098_v13  ;;  %12405 = vmatprep.mubr.msk.f32.mxu0 %vm800_vm3, %v14877_v12  ;;  %v516_v13 = vld [vmem:[%s14208_s12 + $0x778] sm:$0xff]  ;;  %v18312_v12 = vld [vmem:[#allocation20_spill] sm:$0xff] }
 0x10e   : > { %v2703_v21 = vrot.slane %v516_v13, 4 }
 0x10f   : > { %v15495_v9 = vpop.f32.mrb[18].mxu1 }
 0x110   : > { %12318 = vmatmul.mubr.msk.f32.gmra.mrb[60].mxu1 %vm800_vm3, %v18309_v47  ;;  %12406 = vmatmul.mubr.msk.f32.gmra.mrb[38].mxu0 %vm800_vm3, %v18310_v54  ;;  %v15501_v53 = vpop.f32.mrb[19].mxu1  ;;  %v2708_v54 = vrot.slane %v522_v52, 4 }
 0x111   : > { %12320 = vmatprep.mubr.msk.f32.mxu1 %vm800_vm3, %v18311_v14  ;;  %12408 = vmatprep.mubr.msk.f32.mxu0 %vm800_vm3, %v14913_v2  ;;  %v18315_v2 = vld [vmem:[#allocation36_spill] sm:$0xff]  ;;  %v18318_v14 = vld [vmem:[#allocation38_spill] sm:$0xff] }
 0x112   : > { %v2704_v48 = vrot.slane %v18315_v2, 4  ;;  %v2709_v13 = vrot.slane %v18318_v14, 4 }
 0x113   : > { %v15508_v0 = vpop.f32.mrb[20].mxu1 }
 0x114   : > { %12321 = vmatmul.mubr.msk.f32.gmra.mrb[62].mxu1 %vm800_vm3, %v18312_v12  ;;  %12409 = vmatmul.mubr.msk.f32.gmra.mrb[40].mxu0 %vm800_vm3, %v18313_v39  ;;  %v15514_v3 = vpop.f32.mrb[21].mxu1  ;;  %v2705_v47 = vsel %vm875_vm0, %v2703_v21, %v2704_v48  ;;  %v18319_v39 = vld [vmem:[#allocation77_spill] sm:$0xff]  ;;  %v2710_v2 = vsel %vm875_vm0, %v2708_v54, %v2709_v13 }
 0x115   : > { %12323 = vmatprep.mubr.msk.f32.mxu1 %vm800_vm3, %v18314_v50  ;;  %12411 = vmatprep.mubr.msk.f32.mxu0 %vm800_vm3, %v14955_v41  ;;  %v18317_v41 = vld [vmem:[#allocation37_spill] sm:$0xff]  ;;  %v18320_v50 = vld [vmem:[#allocation39_spill] sm:$0xff] }
 0x116   : > { %v2706_v42 = vrot.slane %v18317_v41, 4  ;;  %v2711_v21 = vrot.slane %v18320_v50, 4  ;;  %v535_v41 = vld [vmem:[%s14208_s12 + $0x820] sm:$0xff]  ;;  %v542_v50 = vld [vmem:[%s14208_s12 + $0x858] sm:$0xff] }
 0x117   : > { %v15522_v31 = vpop.f32.mrb[22].mxu1 }
 0x118   : > { %12324 = vmatmul.mubr.msk.f32.gmra.mrb[64].mxu1 %vm800_vm3, %v15145_v55  ;;  %12412 = vmatmul.mubr.msk.f32.gmra.mrb[42].mxu0 %vm800_vm3, %v18316_v23  ;;  %v15528_v34 = vpop.f32.mrb[23].mxu1  ;;  %v528_v55 = vld [vmem:[%s14208_s12 + $0x7e8] sm:$0xff]  ;;  %v18321_v23 = vld [vmem:[#allocation41_spill] sm:$0xff] }
 0x119   : > { %12326 = vmatprep.mubr.msk.f32.mxu1 %vm800_vm3, %v15149_v32  ;;  %12414 = vmatprep.mubr.msk.f32.mxu0 %vm800_vm3, %v14992_v24  ;;  %v2707_v24 = vsel %vm875_vm0, %v2704_v48, %v2706_v42  ;;  %v2713_v52 = vrot.slane %v528_v55, 4  ;;  %v18322_v48 = vld [vmem:[#allocation42_spill] sm:$0xff]  ;;  %v2718_v55 = vrot.slane %v535_v41, 4  ;;  %v18325_v41 = vld [vmem:[#allocation49_spill] sm:$0xff] }
 0x11a   : > { %v2716_v42 = vrot.slane %v18322_v48, 4  ;;  %v2724_v48 = vrot.slane %v18325_v41, 4 }
 0x11b   : > { %v15538_v12 = vpop.f32.mrb[24].mxu1 }
 0x11c   : > { %12327 = vmatmul.mubr.msk.f32.gmra.mrb[66].mxu1 %vm800_vm3, %v15162_v17  ;;  %12415 = vmatmul.mubr.msk.f32.gmra.mrb[44].mxu0 %vm800_vm3, %v18319_v39  ;;  %v15544_v32 = vpop.f32.mrb[25].mxu1  ;;  %v2714_v17 = vrot.slane %v18321_v23, 4  ;;  %v18323_v39 = vld [vmem:[#allocation45_spill] sm:$0xff] }
 0x11d   : > { %12329 = vmatprep.mubr.msk.f32.mxu1 %vm800_vm3, %v2705_v47  ;;  %12417 = vmatprep.mubr.msk.f32.mxu0 %vm800_vm3, %v15226_v27  ;;  %v2712_v27 = vsel %vm875_vm0, %v2709_v13, %v2711_v21  ;;  %v18324_v13 = vld [vmem:[#allocation46_spill] sm:$0xff] }
 0x11e   : > { %v2715_v54 = vsel %vm875_vm0, %v2713_v52, %v2714_v17  ;;  %v2721_v21 = vrot.slane %v18324_v13, 4  ;;  %v2723_v52 = vrot.slane %v542_v50, 4  ;;  %v18327_v50 = vld [vmem:[#allocation53_spill] sm:$0xff] }
 0x11f   : > { %v15554_v14 = vpop.f32.mrb[26].mxu1  ;;  %v2729_v13 = vrot.slane %v18327_v50, 4  ;;  %v18330_v50 = vld [vmem:[#allocation25_spill] sm:$0xff] }
 0x120   : > { %12330 = vmatmul.mubr.msk.f32.gmra.mrb[68].mxu1 %vm800_vm3, %v2707_v24  ;;  %12418 = vmatmul.mubr.msk.f32.gmra.mrb[46].mxu0 %vm800_vm3, %v15240_v8  ;;  %v15559_v47 = vpop.f32.mrb[27].mxu1  ;;  %v2719_v24 = vrot.slane %v18323_v39, 4  ;;  %v549_v39 = vld [vmem:[%s14208_s12 + $0x890] sm:$0xff] }
 0x121   : > { %12332 = vmatprep.mubr.msk.f32.mxu1 %vm800_vm3, %v2710_v2  ;;  %12420 = vmatprep.mubr.msk.f32.mxu0 %vm800_vm3, %v15249_v26  ;;  %v2717_v26 = vsel %vm875_vm0, %v2714_v17, %v2716_v42  ;;  %v18326_v17 = vld [vmem:[#allocation50_spill] sm:$0xff] }
 0x122   : > { %v2720_v2 = vsel %vm875_vm0, %v2718_v55, %v2719_v24  ;;  %v2726_v42 = vrot.slane %v18326_v17, 4  ;;  %v2728_v55 = vrot.slane %v549_v39, 4 }
 0x123   : > { %v15569_v23 = vpop.f32.mrb[28].mxu1 }
 0x124   : > { %12333 = vmatmul.mubr.msk.f32.gmra.mrb[70].mxu1 %vm800_vm3, %v2712_v27  ;;  %12421 = vmatmul.mubr.msk.f32.gmra.mrb[48].mxu0 %vm800_vm3, %v15257_v20  ;;  %v1227_v8 = vpop.f32.mrb[29].mxu1 }
 0x125   : > { %12335 = vmatprep.mubr.msk.f32.mxu1 %vm800_vm3, %v2715_v54  ;;  %12423 = vmatprep.mubr.msk.f32.mxu0 %vm800_vm3, %v15264_v59  ;;  %v2722_v59 = vsel %vm875_vm0, %v2719_v24, %v2721_v21  ;;  %v2725_v54 = vsel %vm875_vm0, %v2723_v52, %v2724_v48  ;;  %v18328_v24 = vld [vmem:[#allocation54_spill] sm:$0xff] }
 0x126   : > { %v2731_v21 = vrot.slane %v18328_v24, 4 }
 0x127   : > { %v12096_v27 = vpop.f32.mrb[30].mxu1 }
 0x128   : > { %12336 = vmatmul.mubr.msk.f32.gmra.mrb[72].mxu1 %vm800_vm3, %v2717_v26  ;;  %12424 = vmatmul.mubr.msk.f32.gmra.mrb[50].mxu0 %vm800_vm3, %v15271_v45  ;;  %v1237_v20 = vpop.f32.mrb[31].mxu1  ;;  %v950_v45 = vlaneseq }
 0x129   : > { %12338 = vmatprep.mubr.msk.f32.mxu1 %vm800_vm3, %v2720_v2  ;;  %12426 = vmatprep.mubr.msk.f32.mxu0 %vm800_vm3, %v15278_v4  ;;  %v2727_v4 = vsel %vm875_vm0, %v2724_v48, %v2726_v42  ;;  %v2730_v2 = vsel %vm875_vm0, %v2728_v55, %v2729_v13 }
 0x12b   : > { %v15592_v41 = vpop.f32.mrb[32].mxu1 }
 0x12c   : > { %12339 = vmatmul.mubr.msk.f32.gmra.mrb[74].mxu1 %vm800_vm3, %v2722_v59  ;;  %12427 = vmatmul.mubr.msk.f32.gmra.mrb[52].mxu0 %vm800_vm3, %v15285_v5  ;;  %v15597_v26 = vpop.f32.mrb[33].mxu1  ;;  %v951_v5 = vshrl.u32 %v950_v45, 7  ;;  %v15645_v45 = vld [vmem:[%s18064_s6] ss:$0 sm:$0xff] }
 0x12d   : > { %12341 = vmatprep.mubr.msk.f32.mxu1 %vm800_vm3, %v2725_v54  ;;  %12429 = vmatprep.mubr.msk.f32.mxu0 %vm800_vm3, %v15292_v10  ;;  %v2732_v10 = vsel %vm875_vm0, %v2729_v13, %v2731_v21  ;;  %v15640_v13 = vld [vmem:[%s18061_s3 + $0x14] sm:$0xf] }
 0x12e   : > { %v952_v59 = vsub.s32 0, %v951_v5 }
 0x12f   : > { %v15605_v52 = vpop.f32.mrb[34].mxu1 }
 0x130   : > { %12342 = vmatmul.mubr.msk.f32.gmra.mrb[76].mxu1 %vm800_vm3, %v2727_v4  ;;  %12430 = vmatmul.mubr.msk.f32.gmra.mrb[54].mxu0 %vm800_vm3, %v15299_v11  ;;  %v15610_v39 = vpop.f32.mrb[35].mxu1  ;;  %v18329_v11 = vld [vmem:[#allocation22_spill] sm:$0xff]  ;;  %v18331_v4 = vld [vmem:[#allocation27_spill] sm:$0xff] }
 0x131   : > { %12344 = vmatprep.mubr.msk.f32.mxu1 %vm800_vm3, %v2730_v2  ;;  %12432 = vmatprep.mubr.msk.f32.mxu0 %vm800_vm3, %v15306_v30 }
 0x133   : > { %v15616_v48 = vpop.f32.mrb[36].mxu1 }
 0x134   : > { %12345 = vmatmul.mubr.msk.f32.gmra.mrb[78].mxu1 %vm800_vm3, %v2732_v10  ;;  %12433 = vmatmul.mubr.msk.f32.gmra.mrb[56].mxu0 %vm800_vm3, %v15313_v16  ;;  %v15621_v17 = vpop.f32.mrb[37].mxu1 }
 0x135   : > { %12435 = vmatprep.mubr.msk.f32.mxu0 %vm800_vm3, %v15320_v6  ;;  %12499 = vmatprep.mubr.msk.f32.mxu1 %vm800_vm3, %v18329_v11 }
 0x137   : > { %v945_v42 = vpop.f32.mrb[0].mxu0  ;;  %v15627_v30 = vpop.f32.mrb[38].mxu1 }
 0x138   : > { %v15629_v54 = vrot.slane %v945_v42, %v952_v59  ;;  %v12046_v55 = vpop.f32.mrb[1].mxu0  ;;  %12436 = vmatmul.mubr.msk.f32.gmra.mrb[58].mxu0 %vm800_vm3, %v15327_v38  ;;  %12500 = vmatmul.mubr.msk.f32.vlgmr.msra.gmra.mrb[80].mxu1 %vm800_vm3, %v18330_v50  ;;  %v15635_v16 = vpop.f32.mrb[39].mxu1 }
 0x139   : > { %12438 = vmatprep.mubr.msk.f32.mxu0 %vm800_vm3, %v15334_v18  ;;  %12502 = vmatprep.mubr.msk.f32.mxu1 %vm800_vm3, %v18331_v4 }
 0x13a   : > { %v1228_v24 = vadd.f32 %v1227_v8, %v15629_v54  ;;  %v1243_v21 = vadd.f32 %v12096_v27, %v15629_v54  ;;  %v1238_v2 = vadd.f32 %v1237_v20, %v15629_v54  ;;  %v1093_v5 = vadd.f32 %v15366_v44, %v15629_v54  ;;  %12548 = vmatpush3.msk.msra.mxu1 %vm875_vm0, %v15416_v61 }
 0x13b   : > { %v1088_v10 = vadd.f32 %v15375_v51, %v15629_v54  ;;  %v1103_v59 = vadd.f32 %v15381_v46, %v15629_v54  ;;  %v1098_v11 = vadd.f32 %v15387_v1, %v15629_v54  ;;  %v1113_v8 = vadd.f32 %v15393_v60, %v15629_v54  ;;  %v15666_v27 = vpop.f32.mrb[40].mxu1  ;;  %12747 = vmatprep.subr.msk.mxu1 %vm875_vm0, %v15640_v13  ;;  %v18332_v46 = vld [vmem:[#allocation30_spill] sm:$0xff]  ;;  %v18333_v60 = vld [vmem:[#allocation32_spill] sm:$0xff] }
 0x13c   : > { %v1281_v44 = vadd.f32 %v15645_v45, %v1228_v24  ;;  %v1284_v61 = vadd.f32 %v15645_v45, %v1243_v21  ;;  %v1283_v51 = vadd.f32 %v15645_v45, %v1238_v2  ;;  %12439 = vmatmul.mubr.msk.f32.gmra.mrb[60].mxu0 %vm800_vm3, %v15341_v35  ;;  %12503 = vmatmul.mubr.msk.f32.gmra.mrb[82].mxu1 %vm800_vm3, %v18332_v46  ;;  %v15677_v1 = vpop.f32.mrb[41].mxu1 }
 0x13d   : > { %12441 = vmatprep.mubr.msk.f32.mxu0 %vm800_vm3, %v15348_v43  ;;  %12505 = vmatprep.mubr.msk.f32.mxu1 %vm800_vm3, %v18333_v60  ;;  %v1254_v20 = vadd.f32 %v15645_v45, %v1093_v5  ;;  %v1253_v42 = vadd.f32 %v15645_v45, %v1088_v10  ;;  %v1256_v55 = vadd.f32 %v15645_v45, %v1103_v59 }
 0x13e   : > { %1314 = vst.msk [vmem:[#allocation2 + $0xe0] sm:$0xff] %vm1285_vm4, %v1281_v44  ;;  %1317 = vst.msk [vmem:[#allocation2 + $0xf8] sm:$0xff] %vm1285_vm4, %v1284_v61  ;;  %v1255_v50 = vadd.f32 %v15645_v45, %v1098_v11  ;;  %v1258_v4 = vadd.f32 %v15645_v45, %v1113_v8  ;;  %v1108_v24 = vadd.f32 %v15399_v7, %v15629_v54  ;;  %v18335_v11 = vld [vmem:[#allocation34_spill] sm:$0xff] }
 0x13f   : > { %1316 = vst.msk [vmem:[#allocation2 + $0xf0] sm:$0xff] %vm1285_vm4, %v1283_v51  ;;  %v1123_v21 = vadd.f32 %v15405_v40, %v15629_v54  ;;  %1287 = vst.msk [vmem:[#allocation2 + $0x8] sm:$0xff] %vm1285_vm4, %v1254_v20  ;;  %v1118_v2 = vadd.f32 %v15411_v22, %v15629_v54  ;;  %v1133_v5 = vadd.f32 %v15424_v62, %v15629_v54  ;;  %v15706_v59 = vpop.f32.mrb[42].mxu1  ;;  %v18334_v40 = vld [vmem:[#allocation33_spill] sm:$0xff] }
 0x140   : > { %1286 = vst.msk [vmem:[#allocation2] sm:$0xff] %vm1285_vm4, %v1253_v42  ;;  %1289 = vst.msk [vmem:[#allocation2 + $0x18] sm:$0xff] %vm1285_vm4, %v1256_v55  ;;  %v1128_v10 = vadd.f32 %v15432_v36, %v15629_v54  ;;  %v1143_v7 = vadd.f32 %v15438_v63, %v15629_v54  ;;  %12442 = vmatmul.mubr.msk.f32.gmra.mrb[62].mxu0 %vm800_vm3, %v15355_v15  ;;  %12506 = vmatmul.mubr.msk.f32.gmra.mrb[84].mxu1 %vm800_vm3, %v18334_v40  ;;  %v15718_v63 = vpop.f32.mrb[43].mxu1 }
 0x141   : > { %1288 = vst.msk [vmem:[#allocation2 + $0x10] sm:$0xff] %vm1285_vm4, %v1255_v50  ;;  %1291 = vst.msk [vmem:[#allocation2 + $0x28] sm:$0xff] %vm1285_vm4, %v1258_v4  ;;  %v1257_v22 = vadd.f32 %v15645_v45, %v1108_v24  ;;  %v1260_v62 = vadd.f32 %v15645_v45, %v1123_v21  ;;  %v1138_v36 = vadd.f32 %v15444_v37, %v15629_v54  ;;  %12444 = vmatprep.mubr.msk.f32.mxu0 %vm800_vm3, %v15362_v25  ;;  %v18337_v4 = vld [vmem:[#allocation40_spill] sm:$0xff] }
 0x142   : > { %12508 = vmatprep.mubr.msk.f32.mxu1 %vm800_vm3, %v18335_v11  ;;  %v1259_v8 = vadd.f32 %v15645_v45, %v1118_v2  ;;  %v1262_v44 = vadd.f32 %v15645_v45, %v1133_v5  ;;  %v1261_v61 = vadd.f32 %v15645_v45, %v1128_v10  ;;  %v1264_v37 = vadd.f32 %v15645_v45, %v1143_v7 }
 0x143   : > { %1290 = vst.msk [vmem:[#allocation2 + $0x20] sm:$0xff] %vm1285_vm4, %v1257_v22  ;;  %1293 = vst.msk [vmem:[#allocation2 + $0x38] sm:$0xff] %vm1285_vm4, %v1260_v62  ;;  %v1263_v51 = vadd.f32 %v15645_v45, %v1138_v36  ;;  %v1153_v46 = vadd.f32 %v15450_v19, %v15629_v54  ;;  %v1148_v60 = vadd.f32 %v15456_v56, %v15629_v54  ;;  %v15746_v50 = vpop.f32.mrb[44].mxu1  ;;  %v18336_v56 = vld [vmem:[#allocation35_spill] sm:$0xff] }
 0x144   : > { %1292 = vst.msk [vmem:[#allocation2 + $0x30] sm:$0xff] %vm1285_vm4, %v1259_v8  ;;  %1295 = vst.msk [vmem:[#allocation2 + $0x48] sm:$0xff] %vm1285_vm4, %v1262_v44  ;;  %v1163_v20 = vadd.f32 %v15462_v58, %v15629_v54  ;;  %v1158_v42 = vadd.f32 %v15473_v28, %v15629_v54  ;;  %v1173_v55 = vadd.f32 %v15483_v33, %v15629_v54  ;;  %12445 = vmatmul.mubr.msk.f32.gmra.mrb[64].mxu0 %vm800_vm3, %v15371_v49  ;;  %v15785_v22 = vld [vmem:[%s18061_s3] sm:$0xf]  ;;  %v18339_v44 = vld [vmem:[#allocation44_spill] sm:$0xff] }
 0x145   : > { %1294 = vst.msk [vmem:[#allocation2 + $0x40] sm:$0xff] %vm1285_vm4, %v1261_v61  ;;  %v1168_v19 = vadd.f32 %v15489_v29, %v15629_v54  ;;  %12509 = vmatmul.mubr.msk.f32.gmra.mrb[86].mxu1 %vm800_vm3, %v18336_v56  ;;  %1297 = vst.msk [vmem:[#allocation2 + $0x58] sm:$0xff] %vm1285_vm4, %v1264_v37  ;;  %v1266_v58 = vadd.f32 %v15645_v45, %v1153_v46  ;;  %v1265_v28 = vadd.f32 %v15645_v45, %v1148_v60  ;;  %v15758_v29 = vpop.f32.mrb[45].mxu1  ;;  %v558_v46 = vld [vmem:[%s14208_s12 + $0x8d8] sm:$0xff]  ;;  %v18344_v60 = vld [vmem:[#allocation55_spill] sm:$0xff] }
 0x146   : > { %1296 = vst.msk [vmem:[#allocation2 + $0x50] sm:$0xff] %vm1285_vm4, %v1263_v51  ;;  %v1183_v33 = vadd.f32 %v15495_v9, %v15629_v54  ;;  %12449 = vmatprep.mubr.msk.f32.mxu0 %vm800_vm3, %v15320_v6  ;;  %12511 = vmatprep.mubr.msk.f32.mxu1 %vm800_vm3, %v18337_v4  ;;  %v1268_v24 = vadd.f32 %v15645_v45, %v1163_v20  ;;  %v18340_v51 = vld [vmem:[#allocation47_spill] sm:$0xff]  ;;  %v18345_v20 = vld [vmem:[#allocation56_spill] sm:$0xff]  ;;  %v565_v56 = vld [vmem:[%s14208_s12 + $0x910] sm:$0xff] }
 0x147   : > { %v1267_v21 = vadd.f32 %v15645_v45, %v1158_v42  ;;  %v1270_v2 = vadd.f32 %v15645_v45, %v1173_v55  ;;  %1299 = vst.msk [vmem:[#allocation2 + $0x68] sm:$0xff] %vm1285_vm4, %v1266_v58  ;;  %1298 = vst.msk [vmem:[#allocation2 + $0x60] sm:$0xff] %vm1285_vm4, %v1265_v28  ;;  %v1269_v9 = vadd.f32 %v15645_v45, %v1168_v19  ;;  %v15791_v62 = vpop.f32.mrb[46].mxu1  ;;  %v4146_v42 = vrot.slane %v558_v46, 2  ;;  %v559_v55 = vld [vmem:[%s14208_s12 + $0x8e0] sm:$0xff]  ;;  %v564_v19 = vld [vmem:[%s14208_s12 + $0x908] sm:$0xff] }
 0x148   : > { %v1272_v5 = vadd.f32 %v15645_v45, %v1183_v33  ;;  %v1178_v6 = vadd.f32 %v15501_v53, %v15629_v54  ;;  %v1193_v10 = vadd.f32 %v15508_v0, %v15629_v54  ;;  %1301 = vst.msk [vmem:[#allocation2 + $0x78] sm:$0xff] %vm1285_vm4, %v1268_v24  ;;  %v1188_v7 = vadd.f32 %v15514_v3, %v15629_v54  ;;  %v18338_v3 = vld [vmem:[#allocation43_spill] sm:$0xff]  ;;  %v13812_v28 = vld [vmem:[%s14208_s12 + $0x670] sm:$0xff]  ;;  %v18347_v33 = vld [vmem:[#allocation58_spill] sm:$0xff] }
 0x149   : > { %1300 = vst.msk [vmem:[#allocation2 + $0x70] sm:$0xff] %vm1285_vm4, %v1267_v21  ;;  %1303 = vst.msk [vmem:[#allocation2 + $0x88] sm:$0xff] %vm1285_vm4, %v1270_v2  ;;  %v1203_v40 = vadd.f32 %v15522_v31, %v15629_v54  ;;  %v1198_v53 = vadd.f32 %v15528_v34, %v15629_v54  ;;  %v1213_v0 = vadd.f32 %v15538_v12, %v15629_v54  ;;  %12450 = vmatmul.mubr.msk.f32.vlgmr.msra.gmra.mrb[34].mxu0 %vm800_vm3, %v15327_v38  ;;  %v15803_v12 = vpop.f32.mrb[47].mxu1  ;;  %v13811_v58 = vld [vmem:[%s14208_s12 + $0x640] sm:$0xff] }
 0x14a   : > { %12512 = vmatmul.mubr.msk.f32.gmra.mrb[88].mxu1 %vm800_vm3, %v18338_v3  ;;  %1302 = vst.msk [vmem:[#allocation2 + $0x80] sm:$0xff] %vm1285_vm4, %v1269_v9  ;;  %1305 = vst.msk [vmem:[#allocation2 + $0x98] sm:$0xff] %vm1285_vm4, %v1272_v5  ;;  %v1271_v31 = vadd.f32 %v15645_v45, %v1178_v6  ;;  %v1274_v36 = vadd.f32 %v15645_v45, %v1193_v10  ;;  %v1208_v34 = vadd.f32 %v15544_v32, %v15629_v54  ;;  %v566_v9 = vld [vmem:[%s14208_s12 + $0x918] sm:$0xff]  ;;  %v1319_v5 = vld [vmem:[#allocation2 + $0x8] sm:$0xff] }
 0x14b   : > { %12598 = vmatpush3.msk.msra.mxu0 %vm875_vm0, %v15467_v57  ;;  %12452 = vmatprep.mubr.msk.f32.mxu0 %vm800_vm3, %v15334_v18  ;;  %v1273_v38 = vadd.f32 %v15645_v45, %v1188_v7  ;;  %v1276_v11 = vadd.f32 %v15645_v45, %v1203_v40  ;;  %v1275_v8 = vadd.f32 %v15645_v45, %v1198_v53  ;;  %v4148_v4 = vrot.slane %v559_v55, 2  ;;  %v571_v10 = vld [vmem:[%s14208_s12 + $0x940] sm:$0xff]  ;;  %v572_v7 = vld [vmem:[%s14208_s12 + $0x948] sm:$0xff]  ;;  %v13813_v3 = vld [vmem:[%s14208_s12 + $0x678] sm:$0xff] }
 0x14c   : > { %12514 = vmatprep.mubr.msk.f32.mxu1 %vm800_vm3, %v18339_v44  ;;  %1304 = vst.msk [vmem:[#allocation2 + $0x90] sm:$0xff] %vm1285_vm4, %v1271_v31  ;;  %1307 = vst.msk [vmem:[#allocation2 + $0xa8] sm:$0xff] %vm1285_vm4, %v1274_v36  ;;  %12647 = vmatprep.subr.msk.mxu0 %vm875_vm0, %v15785_v22  ;;  %v1278_v57 = vadd.f32 %v15645_v45, %v1213_v0  ;;  %v1277_v18 = vadd.f32 %v15645_v45, %v1208_v34  ;;  %v4150_v21 = vrot.slane %v564_v19, 2  ;;  %v1318_v53 = vld [vmem:[#allocation2] sm:$0xff]  ;;  %v13814_v34 = vld [vmem:[%s14208_s12 + $0x6a8] sm:$0xff] }
 0x14d   : > { %v1223_v32 = vadd.f32 %v15554_v14, %v15629_v54  ;;  %1306 = vst.msk [vmem:[#allocation2 + $0xa0] sm:$0xff] %vm1285_vm4, %v1273_v38  ;;  %1309 = vst.msk [vmem:[#allocation2 + $0xb8] sm:$0xff] %vm1285_vm4, %v1276_v11  ;;  %v1218_v61 = vadd.f32 %v15559_v47, %v15629_v54  ;;  %v1233_v37 = vadd.f32 %v15569_v23, %v15629_v54  ;;  %12453 = vmatmul.mubr.msk.f32.gmra.mrb[36].mxu0 %vm800_vm3, %v15341_v35  ;;  %v18341_v47 = vld [vmem:[#allocation48_spill] sm:$0xff]  ;;  %v18349_v31 = vld [vmem:[#allocation59_spill] sm:$0xff] }
 0x14e   : > { %1308 = vst.msk [vmem:[#allocation2 + $0xb0] sm:$0xff] %vm1285_vm4, %v1275_v8  ;;  %12515 = vmatmul.mubr.msk.f32.gmra.mrb[90].mxu1 %vm800_vm3, %v18340_v51  ;;  %1311 = vst.msk [vmem:[#allocation2 + $0xc8] sm:$0xff] %vm1285_vm4, %v1278_v57  ;;  %12455 = vmatprep.mubr.msk.f32.mxu0 %vm800_vm3, %v15348_v43  ;;  %v18342_v43 = vld [vmem:[#allocation51_spill] sm:$0xff]  ;;  %v18343_v54 = vld [vmem:[#allocation52_spill] sm:$0xff]  ;;  %v4151_v2 = vrot.slane %v565_v56, 2  ;;  %v15889_v38 = vsel %vm687_vm2, %v4146_v42, %v4148_v4  ;;  %v4153_v11 = vrot.slane %v566_v9, 2 }
 0x14f   : > { %1310 = vst.msk [vmem:[#allocation2 + $0xc0] sm:$0xff] %vm1285_vm4, %v1277_v18  ;;  %v1280_v14 = vadd.f32 %v15645_v45, %v1223_v32  ;;  %12517 = vmatprep.mubr.msk.f32.mxu1 %vm800_vm3, %v18341_v47  ;;  %v1279_v35 = vadd.f32 %v15645_v45, %v1218_v61  ;;  %v1282_v23 = vadd.f32 %v15645_v45, %v1233_v37  ;;  %v557_v45 = vld [vmem:[%s14208_s12 + $0x8d0] sm:$0xff]  ;;  %18350 = vst [vmem:[#allocation28_spill] sm:$0xff] %v15889_v38  ;;  %v1321_v32 = vld [vmem:[#allocation2 + $0x18] sm:$0xff] }
 0x150   : > { %v15893_v8 = vsel %vm687_vm2, %v4150_v21, %v4151_v2  ;;  %v4155_v44 = vrot.slane %v571_v10, 2  ;;  %v4156_v57 = vrot.slane %v572_v7, 2  ;;  %v573_v18 = vld [vmem:[%s14208_s12 + $0x950] sm:$0xff]  ;;  %v578_v37 = vld [vmem:[%s14208_s12 + $0x978] sm:$0xff]  ;;  %v579_v51 = vld [vmem:[%s14208_s12 + $0x980] sm:$0xff] }
 0x151   : > { %1313 = vst.msk [vmem:[#allocation2 + $0xd8] sm:$0xff] %vm1285_vm4, %v1280_v14  ;;  %1312 = vst.msk [vmem:[#allocation2 + $0xd0] sm:$0xff] %vm1285_vm4, %v1279_v35  ;;  %12456 = vmatmul.mubr.msk.f32.gmra.mrb[38].mxu0 %vm800_vm3, %v15355_v15  ;;  %v13810_v15 = vld [vmem:[%s14208_s12 + $0x638] sm:$0xff]  ;;  %v1320_v35 = vld [vmem:[#allocation2 + $0x10] sm:$0xff]  ;;  %v4160_v19 = vrot.slane %v578_v37, 2  ;;  %v4161_v56 = vrot.slane %v579_v51, 2 }
 0x152   : > { %1315 = vst.msk [vmem:[#allocation2 + $0xe8] sm:$0xff] %vm1285_vm4, %v1282_v23  ;;  %12518 = vmatmul.mubr.msk.f32.gmra.mrb[92].mxu1 %vm800_vm3, %v18342_v43  ;;  %12458 = vmatprep.mubr.msk.f32.mxu0 %vm800_vm3, %v15362_v25  ;;  %v4145_v25 = vrot.slane %v557_v45, 2  ;;  %18351 = vst [vmem:[#allocation11_spill] sm:$0xff] %v15893_v8  ;;  %v13815_v45 = vld [vmem:[%s14208_s12 + $0x6b0] sm:$0xff]  ;;  %v15912_v55 = vsel %vm687_vm2, %v4155_v44, %v4156_v57  ;;  %v586_v9 = vld [vmem:[%s14208_s12 + $0x9b8] sm:$0xff] }
 0x153   : > { %12520 = vmatprep.mubr.msk.f32.mxu1 %vm800_vm3, %v18343_v54  ;;  %18353 = vst [vmem:[#allocation12_spill] sm:$0xff] %v15912_v55  ;;  %v585_v21 = vld [vmem:[%s14208_s12 + $0x9b0] sm:$0xff]  ;;  %v13817_v10 = vld [vmem:[%s14208_s12 + $0x6e8] sm:$0xff]  ;;  %v1325_v44 = vld [vmem:[#allocation2 + $0x38] sm:$0xff] }
 0x154   : > { %v15875_v24 = vsel %vm687_vm2, %v4145_v25, %v4146_v42  ;;  %v15908_v25 = vsel %vm687_vm2, %v4151_v2, %v4153_v11  ;;  %v4158_v42 = vrot.slane %v573_v18, 2  ;;  %v1322_v2 = vld [vmem:[#allocation2 + $0x20] sm:$0xff] }
 0x155   : > { %12459 = vmatmul.mubr.msk.f32.gmra.mrb[40].mxu0 %vm800_vm3, %v15371_v49  ;;  %v18346_v49 = vld [vmem:[#allocation57_spill] sm:$0xff]  ;;  %18348 = vst [vmem:[#allocation24_spill] sm:$0xff] %v15875_v24  ;;  %18352 = vst [vmem:[#allocation29_spill] sm:$0xff] %v15908_v25  ;;  %v587_v11 = vld [vmem:[%s14208_s12 + $0x9c0] sm:$0xff] }
 0x156   : > { %12521 = vmatmul.mubr.msk.f32.gmra.mrb[94].mxu1 %vm800_vm3, %v18344_v60  ;;  %12461 = vmatprep.mubr.msk.f32.mxu0 %vm800_vm3, %v13810_v15  ;;  %v13816_v15 = vld [vmem:[%s14208_s12 + $0x6e0] sm:$0xff] }
 0x157   : > { %12523 = vmatprep.mubr.msk.f32.mxu1 %vm800_vm3, %v18345_v20 }
 0x159   : > { %12462 = vmatmul.mubr.msk.f32.gmra.mrb[42].mxu0 %vm800_vm3, %v13811_v58  ;;  %v580_v58 = vld [vmem:[%s14208_s12 + $0x988] sm:$0xff] }
 0x15a   : > { %12524 = vmatmul.mubr.msk.f32.gmra.mrb[96].mxu1 %vm800_vm3, %v18346_v49  ;;  %12464 = vmatprep.mubr.msk.f32.mxu0 %vm800_vm3, %v13812_v28  ;;  %v1323_v28 = vld [vmem:[#allocation2 + $0x28] sm:$0xff] }
 0x15b   : > { %12526 = vmatprep.mubr.msk.f32.mxu1 %vm800_vm3, %v18347_v33  ;;  %v12151_v6 = vpop.f32.mrb[2].mxu0 }
 0x15c   : > { %v1955_v40 = vadd.f32 %v12151_v6, %v1319_v5  ;;  %v1795_v0 = vpop.f32.mrb[3].mxu0 }
 0x15d   : > { %12465 = vmatmul.mubr.msk.f32.gmra.mrb[44].mxu0 %vm800_vm3, %v13813_v3  ;;  %v1954_v36 = vadd.f32 %v1795_v0, %v1318_v53  ;;  %v15927_v53 = vsel %vm687_vm2, %v4156_v57, %v4158_v42  ;;  %v4163_v0 = vrot.slane %v580_v58, 2  ;;  %v15931_v3 = vsel %vm687_vm2, %v4160_v19, %v4161_v56  ;;  %v1324_v57 = vld [vmem:[#allocation2 + $0x30] sm:$0xff]  ;;  %v594_v58 = vld [vmem:[%s14208_s12 + $0x9f8] sm:$0xff] }
 0x15e   : > { %12527 = vmatmul.mubr.msk.f32.gmra.mrb[98].mxu1 %vm800_vm3, %v18349_v31  ;;  %12467 = vmatprep.mubr.msk.f32.mxu0 %vm800_vm3, %v13814_v34  ;;  %1987 = vst.msk [vmem:[#allocation2 + $0x8] sm:$0xff] %vm1285_vm4, %v1955_v40  ;;  %v13818_v40 = vld [vmem:[%s14208_s12 + $0x718] sm:$0xff]  ;;  %18354 = vst [vmem:[#allocation13_spill] sm:$0xff] %v15927_v53  ;;  %v4166_v34 = vrot.slane %v586_v9, 2  ;;  %v324_v9 = vld [vmem:[%s14208_s12 + $0x168] sm:$0xff] }
 0x15f   : > { %12529 = vmatprep.mubr.msk.f32.mxu1 %vm800_vm3, %v15875_v24  ;;  %1986 = vst.msk [vmem:[#allocation2] sm:$0xff] %vm1285_vm4, %v1954_v36  ;;  %v12154_v61 = vpop.f32.mrb[4].mxu0  ;;  %18355 = vst [vmem:[#allocation14_spill] sm:$0xff] %v15931_v3  ;;  %v4165_v36 = vrot.slane %v585_v21, 2  ;;  %v15955_v21 = vld [vmem:[%s14208_s12 + $0x160] sm:$0xff]  ;;  %v464_v24 = vld [vmem:[%s14208_s12 + $0x5d8] sm:$0xff] }
 0x160   : > { %v1957_v14 = vadd.f32 %v12154_v61, %v1321_v32  ;;  %v1805_v23 = vpop.f32.mrb[5].mxu0  ;;  %v592_v32 = vld [vmem:[%s14208_s12 + $0x9e8] sm:$0xff]  ;;  %v593_v61 = vld [vmem:[%s14208_s12 + $0x9f0] sm:$0xff] }
 0x161   : > { %12468 = vmatmul.mubr.msk.f32.gmra.mrb[46].mxu0 %vm800_vm3, %v13815_v45  ;;  %v1956_v46 = vadd.f32 %v1805_v23, %v1320_v35  ;;  %v13820_v23 = vld [vmem:[%s14208_s12 + $0x750] sm:$0xff]  ;;  %v15946_v45 = vsel %vm687_vm2, %v4161_v56, %v4163_v0  ;;  %v4170_v42 = vrot.slane %v592_v32, 2  ;;  %v4171_v19 = vrot.slane %v593_v61, 2  ;;  %v1326_v56 = vld [vmem:[#allocation2 + $0x40] sm:$0xff]  ;;  %v1329_v32 = vld [vmem:[#allocation2 + $0x58] sm:$0xff] }
 0x162   : > { %12530 = vmatmul.mubr.msk.f32.gmra.mrb[100].mxu1 %vm800_vm3, %v15889_v38  ;;  %12470 = vmatprep.mubr.msk.f32.mxu0 %vm800_vm3, %v13816_v15  ;;  %1989 = vst.msk [vmem:[#allocation2 + $0x18] sm:$0xff] %vm1285_vm4, %v1957_v14  ;;  %v13819_v14 = vld [vmem:[%s14208_s12 + $0x720] sm:$0xff]  ;;  %18356 = vst [vmem:[#allocation68_spill] sm:$0xff] %v15946_v45  ;;  %v15950_v15 = vsel %vm687_vm2, %v4165_v36, %v4166_v34  ;;  %v4173_v0 = vrot.slane %v594_v58, 2 }
 0x163   : > { %12532 = vmatprep.mubr.msk.f32.mxu1 %vm800_vm3, %v15893_v8  ;;  %1988 = vst.msk [vmem:[#allocation2 + $0x10] sm:$0xff] %vm1285_vm4, %v1956_v46  ;;  %v12157_v4 = vpop.f32.mrb[6].mxu0  ;;  %v4168_v46 = vrot.slane %v587_v11, 2  ;;  %18357 = vst [vmem:[#allocation72_spill] sm:$0xff] %v15950_v15  ;;  %v15971_v36 = vsel %vm687_vm2, %v4170_v42, %v4171_v19  ;;  %v4095_v11 = vrot.slane %v15955_v21, 2  ;;  %v13879_v8 = vld [vmem:[%s14208_s12 + $0x560] sm:$0xff] }
 0x164   : > { %v1959_v5 = vadd.f32 %v12157_v4, %v1323_v28  ;;  %v1815_v6 = vpop.f32.mrb[7].mxu0  ;;  %v1327_v28 = vld [vmem:[#allocation2 + $0x48] sm:$0xff]  ;;  %18359 = vst [vmem:[#allocation15_spill] sm:$0xff] %v15971_v36  ;;  %v15989_v42 = vsel %vm687_vm2, %v4171_v19, %v4173_v0  ;;  %v338_v19 = vld [vmem:[%s14208_s12 + $0x1d8] sm:$0xff]  ;;  %v6096_v38 = vrot.slane %v13879_v8, 6 }
 0x165   : > { %12471 = vmatmul.mubr.msk.f32.gmra.mrb[48].mxu0 %vm800_vm3, %v13817_v10  ;;  %v1958_v7 = vadd.f32 %v1815_v6, %v1322_v2  ;;  %v13821_v6 = vld [vmem:[%s14208_s12 + $0x758] sm:$0xff]  ;;  %18360 = vst [vmem:[#allocation16_spill] sm:$0xff] %v15989_v42 }
 0x166   : > { %12533 = vmatmul.mubr.msk.f32.gmra.mrb[102].mxu1 %vm800_vm3, %v15908_v25  ;;  %12473 = vmatprep.mubr.msk.f32.mxu0 %vm800_vm3, %v13818_v40  ;;  %1991 = vst.msk [vmem:[#allocation2 + $0x28] sm:$0xff] %vm1285_vm4, %v1959_v5  ;;  %v15967_v40 = vsel %vm687_vm2, %v4166_v34, %v4168_v46  ;;  %v13824_v46 = vld [vmem:[%s14208_s12 + $0x7c0] sm:$0xff]  ;;  %v13877_v25 = vld [vmem:[%s14208_s12 + $0x528] sm:$0xff] }
 0x167   : > { %12535 = vmatprep.mubr.msk.f32.mxu1 %vm800_vm3, %v15912_v55  ;;  %1990 = vst.msk [vmem:[#allocation2 + $0x20] sm:$0xff] %vm1285_vm4, %v1958_v7  ;;  %v12160_v18 = vpop.f32.mrb[8].mxu0  ;;  %v13822_v7 = vld [vmem:[%s14208_s12 + $0x788] sm:$0xff]  ;;  %18358 = vst [vmem:[#allocation76_spill] sm:$0xff] %v15967_v40 }
 0x168   : > { %v1961_v37 = vadd.f32 %v12160_v18, %v1325_v44  ;;  %v1825_v51 = vpop.f32.mrb[9].mxu0  ;;  %v4096_v44 = vrot.slane %v324_v9, 2  ;;  %v325_v18 = vld [vmem:[%s14208_s12 + $0x170] sm:$0xff] }
 0x169   : > { %12474 = vmatmul.mubr.msk.f32.gmra.mrb[50].mxu0 %vm800_vm3, %v13819_v14  ;;  %v1960_v35 = vadd.f32 %v1825_v51, %v1324_v57  ;;  %v331_v57 = vld [vmem:[%s14208_s12 + $0x1a0] sm:$0xff]  ;;  %v1328_v51 = vld [vmem:[#allocation2 + $0x50] sm:$0xff]  ;;  %v4098_v58 = vrot.slane %v325_v18, 2  ;;  %v13825_v18 = vld [vmem:[%s14208_s12 + $0x7c8] sm:$0xff] }
 0x16a   : > { %12536 = vmatmul.mubr.msk.f32.gmra.mrb[104].mxu1 %vm800_vm3, %v15927_v53  ;;  %12476 = vmatprep.mubr.msk.f32.mxu0 %vm800_vm3, %v13820_v23  ;;  %1993 = vst.msk [vmem:[#allocation2 + $0x38] sm:$0xff] %vm1285_vm4, %v1961_v37  ;;  %v15977_v37 = vld [vmem:[%s14208_s12 + $0x198] sm:$0xff]  ;;  %v4101_v9 = vrot.slane %v331_v57, 2  ;;  %v13876_v53 = vld [vmem:[%s14208_s12 + $0x520] sm:$0xff] }
 0x16b   : > { %12538 = vmatprep.mubr.msk.f32.mxu1 %vm800_vm3, %v15931_v3  ;;  %1992 = vst.msk [vmem:[#allocation2 + $0x30] sm:$0xff] %vm1285_vm4, %v1960_v35  ;;  %v12163_v4 = vpop.f32.mrb[10].mxu0  ;;  %v13823_v35 = vld [vmem:[%s14208_s12 + $0x790] sm:$0xff]  ;;  %v336_v3 = vld [vmem:[%s14208_s12 + $0x1c8] sm:$0xff]  ;;  %v6090_v55 = vrot.slane %v13876_v53, 6 }
 0x16c   : > { %v1963_v5 = vadd.f32 %v12163_v4, %v1327_v28  ;;  %v1835_v2 = vpop.f32.mrb[11].mxu0  ;;  %v15993_v28 = vsel %vm687_vm2, %v4095_v11, %v4096_v44  ;;  %v4100_v4 = vrot.slane %v15977_v37, 2  ;;  %v4779_v53 = vrot.slane %v336_v3, 6  ;;  %v16454_v3 = vld [vmem:[%s18062_s4 + $0x1c] sm:$0xf] }
 0x16d   : > { %12477 = vmatmul.mubr.msk.f32.gmra.mrb[52].mxu0 %vm800_vm3, %v13821_v6  ;;  %v1962_v10 = vadd.f32 %v1835_v2, %v1326_v56  ;;  %18361 = vst [vmem:[#allocation18_spill] sm:$0xff] %v15993_v28  ;;  %v1331_v56 = vld [vmem:[#allocation2 + $0x68] sm:$0xff]  ;;  %v15999_v6 = vld [vmem:[%s14208_s12 + $0x1d0] sm:$0xff] }
 0x16e   : > { %12539 = vmatmul.mubr.msk.f32.gmra.mrb[106].mxu1 %vm800_vm3, %v15946_v45  ;;  %12479 = vmatprep.mubr.msk.f32.mxu0 %vm800_vm3, %v13822_v7  ;;  %1995 = vst.msk [vmem:[#allocation2 + $0x48] sm:$0xff] %vm1285_vm4, %v1963_v5  ;;  %v332_v5 = vld [vmem:[%s14208_s12 + $0x1a8] sm:$0xff]  ;;  %v1330_v7 = vld [vmem:[#allocation2 + $0x60] sm:$0xff]  ;;  %v329_v45 = vld [vmem:[%s14208_s12 + $0x190] sm:$0xff] }
 0x16f   : > { %12541 = vmatprep.mubr.msk.f32.mxu1 %vm800_vm3, %v15950_v15  ;;  %1994 = vst.msk [vmem:[#allocation2 + $0x40] sm:$0xff] %vm1285_vm4, %v1962_v10  ;;  %v12166_v61 = vpop.f32.mrb[12].mxu0  ;;  %v4103_v57 = vrot.slane %v332_v5, 2  ;;  %v328_v15 = vld [vmem:[%s14208_s12 + $0x188] sm:$0xff] }
 0x170   : > { %v1965_v34 = vadd.f32 %v12166_v61, %v1329_v32  ;;  %v1845_v14 = vpop.f32.mrb[13].mxu0  ;;  %v13826_v32 = vld [vmem:[%s14208_s12 + $0x7f8] sm:$0xff]  ;;  %v16011_v61 = vsel %vm687_vm2, %v4096_v44, %v4098_v58  ;;  %v1332_v58 = vld [vmem:[#allocation2 + $0x70] sm:$0xff] }
 0x171   : > { %12480 = vmatmul.mubr.msk.f32.gmra.mrb[54].mxu0 %vm800_vm3, %v13823_v35  ;;  %v1964_v23 = vadd.f32 %v1845_v14, %v1328_v51  ;;  %18362 = vst [vmem:[#allocation21_spill] sm:$0xff] %v16011_v61  ;;  %v16016_v51 = vsel %vm687_vm2, %v4100_v4, %v4101_v9  ;;  %v4105_v14 = vrot.slane %v15999_v6, 2  ;;  %v4106_v35 = vrot.slane %v338_v19, 2  ;;  %v16033_v19 = vld [vmem:[%s18061_s3 + $0x8] sm:$0xf] }
 0x172   : > { %12542 = vmatmul.mubr.msk.f32.gmra.mrb[108].mxu1 %vm800_vm3, %v15967_v40  ;;  %12482 = vmatprep.mubr.msk.f32.mxu0 %vm800_vm3, %v13824_v46  ;;  %1997 = vst.msk [vmem:[#allocation2 + $0x58] sm:$0xff] %vm1285_vm4, %v1965_v34  ;;  %v339_v34 = vld [vmem:[%s14208_s12 + $0x1e0] sm:$0xff]  ;;  %18363 = vst [vmem:[#allocation26_spill] sm:$0xff] %v16016_v51 }
 0x173   : > { %12544 = vmatprep.mubr.msk.f32.mxu1 %vm800_vm3, %v15971_v36  ;;  %1996 = vst.msk [vmem:[#allocation2 + $0x50] sm:$0xff] %vm1285_vm4, %v1964_v23  ;;  %v12169_v2 = vpop.f32.mrb[14].mxu0  ;;  %v1333_v23 = vld [vmem:[#allocation2 + $0x78] sm:$0xff]  ;;  %v4108_v4 = vrot.slane %v339_v34, 2  ;;  %v429_v36 = vld [vmem:[%s14208_s12 + $0x4c0] sm:$0xff] }
 0x174   : > { %v1967_v10 = vadd.f32 %v12169_v2, %v1331_v56  ;;  %v1855_v0 = vpop.f32.mrb[15].mxu0  ;;  %v16021_v56 = vld [vmem:[%s14208_s12 + $0x208] sm:$0xff]  ;;  %v16024_v2 = vld [vmem:[%s14208_s12 + $0x210] sm:$0xff] }
 0x175   : > { %12483 = vmatmul.mubr.msk.f32.gmra.mrb[56].mxu0 %vm800_vm3, %v13825_v18  ;;  %v1966_v11 = vadd.f32 %v1855_v0, %v1330_v7  ;;  %v13828_v0 = vld [vmem:[%s14208_s12 + $0x830] sm:$0xff]  ;;  %v16040_v18 = vsel %vm687_vm2, %v4101_v9, %v4103_v57  ;;  %v4111_v34 = vrot.slane %v16024_v2, 2  ;;  %v13829_v2 = vld [vmem:[%s14208_s12 + $0x838] sm:$0xff] }
 0x176   : > { %12545 = vmatmul.mubr.msk.f32.gmra.mrb[110].mxu1 %vm800_vm3, %v15989_v42  ;;  %12485 = vmatprep.mubr.msk.f32.mxu0 %vm800_vm3, %v13826_v32  ;;  %1999 = vst.msk [vmem:[#allocation2 + $0x68] sm:$0xff] %vm1285_vm4, %v1967_v10  ;;  %v13827_v10 = vld [vmem:[%s14208_s12 + $0x800] sm:$0xff]  ;;  %18364 = vst [vmem:[#allocation31_spill] sm:$0xff] %v16040_v18  ;;  %v4110_v32 = vrot.slane %v16021_v56, 2  ;;  %v403_v57 = vld [vmem:[%s14208_s12 + $0x3f0] sm:$0xff] }
 0x177   : > { %12549 = vmatprep.mubr.msk.f32.mxu1 %vm800_vm3, %v15993_v28  ;;  %1998 = vst.msk [vmem:[#allocation2 + $0x60] sm:$0xff] %vm1285_vm4, %v1966_v11  ;;  %v12172_v46 = vpop.f32.mrb[16].mxu0  ;;  %v16044_v11 = vsel %vm687_vm2, %v4105_v14, %v4106_v35 }
 0x178   : > { %v1969_v44 = vadd.f32 %v12172_v46, %v1333_v23  ;;  %v1865_v5 = vpop.f32.mrb[17].mxu0  ;;  %18365 = vst [vmem:[#allocation60_spill] sm:$0xff] %v16044_v11  ;;  %v346_v23 = vld [vmem:[%s14208_s12 + $0x218] sm:$0xff]  ;;  %v16050_v46 = vld [vmem:[%s14208_s12 + $0x240] sm:$0xff] }
 0x179   : > { %12486 = vmatmul.mubr.msk.f32.gmra.mrb[58].mxu0 %vm800_vm3, %v13827_v10  ;;  %v1968_v7 = vadd.f32 %v1865_v5, %v1332_v58  ;;  %v16053_v58 = vld [vmem:[%s14208_s12 + $0x248] sm:$0xff] }
 0x17a   : > { %12550 = vmatmul.mubr.msk.f32.vlgmr.msra.gmra.mrb[80].mxu1 %vm800_vm3, %v16011_v61  ;;  %12488 = vmatprep.mubr.msk.f32.mxu0 %vm800_vm3, %v13828_v0  ;;  %2001 = vst.msk [vmem:[#allocation2 + $0x78] sm:$0xff] %vm1285_vm4, %v1969_v44  ;;  %v1335_v5 = vld [vmem:[#allocation2 + $0x88] sm:$0xff]  ;;  %v4115_v0 = vrot.slane %v16050_v46, 2 }
 0x17b   : > { %12552 = vmatprep.mubr.msk.f32.mxu1 %vm800_vm3, %v16016_v51  ;;  %12748 = vmatpush3.msk.msra.mxu1 %vm875_vm0, %v15640_v13  ;;  %2000 = vst.msk [vmem:[#allocation2 + $0x70] sm:$0xff] %vm1285_vm4, %v1968_v7  ;;  %v12175_v9 = vpop.f32.mrb[18].mxu0  ;;  %v16067_v13 = vsel %vm687_vm2, %v4106_v35, %v4108_v4  ;;  %v13830_v7 = vld [vmem:[%s14208_s12 + $0x868] sm:$0xff]  ;;  %v1334_v35 = vld [vmem:[#allocation2 + $0x80] sm:$0xff]  ;;  %v16077_v4 = vsel %vm687_vm2, %v4110_v32, %v4111_v34 }
 0x17c   : > { %12797 = vmatprep.subr.msk.mxu1 %vm875_vm0, %v16033_v19  ;;  %v1881_v14 = vadd.f32 %v12175_v9, %v15592_v41  ;;  %v1875_v44 = vpop.f32.mrb[19].mxu0  ;;  %18366 = vst [vmem:[#allocation61_spill] sm:$0xff] %v16067_v13  ;;  %v4113_v41 = vrot.slane %v346_v23, 2  ;;  %v4116_v9 = vrot.slane %v16053_v58, 2  ;;  %18367 = vst [vmem:[#allocation17_spill] sm:$0xff] %v16077_v4  ;;  %v16082_v23 = vld [vmem:[%s14208_s12 + $0x278] sm:$0xff] }
 0x17d   : > { %12489 = vmatmul.mubr.msk.f32.gmra.mrb[60].mxu0 %vm800_vm3, %v13829_v2  ;;  %v1876_v10 = vadd.f32 %v1875_v44, %v15597_v26  ;;  %v4828_v26 = vrot.slane %v403_v57, 6  ;;  %v13831_v44 = vld [vmem:[%s14208_s12 + $0x3f8] sm:$0xff]  ;;  %v13832_v58 = vld [vmem:[%s14208_s12 + $0x400] sm:$0xff]  ;;  %v13833_v57 = vld [vmem:[%s14208_s12 + $0x870] sm:$0xff] }
 0x17e   : > { %12553 = vmatmul.mubr.msk.f32.gmra.mrb[82].mxu1 %vm800_vm3, %v16040_v18  ;;  %12491 = vmatprep.mubr.msk.f32.mxu0 %vm800_vm3, %v13830_v7  ;;  %v1971_v2 = vadd.f32 %v1881_v14, %v1335_v5  ;;  %v4829_v7 = vrot.slane %v13831_v44, 6  ;;  %v353_v18 = vld [vmem:[%s14208_s12 + $0x250] sm:$0xff]  ;;  %v4831_v14 = vrot.slane %v13832_v58, 6  ;;  %v13834_v58 = vld [vmem:[%s14208_s12 + $0x8a0] sm:$0xff] }
 0x17f   : > { %12555 = vmatprep.mubr.msk.f32.mxu1 %vm800_vm3, %v16044_v11  ;;  %v1970_v51 = vadd.f32 %v1876_v10, %v1334_v35  ;;  %v12178_v61 = vpop.f32.mrb[20].mxu0  ;;  %v16085_v11 = vld [vmem:[%s14208_s12 + $0x280] sm:$0xff]  ;;  %v410_v10 = vld [vmem:[%s14208_s12 + $0x428] sm:$0xff]  ;;  %v1337_v35 = vld [vmem:[#allocation2 + $0x98] sm:$0xff] }
 0x180   : > { %2003 = vst.msk [vmem:[#allocation2 + $0x88] sm:$0xff] %vm1285_vm4, %v1971_v2  ;;  %v1891_v32 = vadd.f32 %v12178_v61, %v15605_v52  ;;  %v1885_v5 = vpop.f32.mrb[21].mxu0  ;;  %v16102_v52 = vsel %vm687_vm2, %v4111_v34, %v4113_v41  ;;  %v16105_v61 = vsel %vm687_vm2, %v4115_v0, %v4116_v9  ;;  %v4118_v2 = vrot.slane %v353_v18, 2  ;;  %v13835_v34 = vld [vmem:[%s14208_s12 + $0x430] sm:$0xff]  ;;  %v417_v0 = vld [vmem:[%s14208_s12 + $0x460] sm:$0xff] }
 0x181   : > { %12492 = vmatmul.mubr.msk.f32.gmra.mrb[62].mxu0 %vm800_vm3, %v13833_v57  ;;  %2002 = vst.msk [vmem:[#allocation2 + $0x80] sm:$0xff] %vm1285_vm4, %v1970_v51  ;;  %v1886_v44 = vadd.f32 %v1885_v5, %v15610_v39  ;;  %18368 = vst [vmem:[#allocation65_spill] sm:$0xff] %v16102_v52  ;;  %v1336_v57 = vld [vmem:[#allocation2 + $0x90] sm:$0xff]  ;;  %v16108_v39 = vsel %vm4767_vm5, %v4828_v26, %v4829_v7  ;;  %v4120_v5 = vrot.slane %v16082_v23, 2  ;;  %v4833_v42 = vrot.slane %v410_v10, 6  ;;  %v1339_v26 = vld [vmem:[#allocation2 + $0xa8] sm:$0xff] }
 0x182   : > { %12556 = vmatmul.mubr.msk.f32.gmra.mrb[84].mxu1 %vm800_vm3, %v16067_v13  ;;  %12494 = vmatprep.mubr.msk.f32.mxu0 %vm800_vm3, %v13834_v58  ;;  %18369 = vst [vmem:[#allocation19_spill] sm:$0xff] %v16105_v61  ;;  %v1973_v51 = vadd.f32 %v1891_v32, %v1337_v35  ;;  %v4121_v58 = vrot.slane %v16085_v11, 2  ;;  %v360_v13 = vld [vmem:[%s14208_s12 + $0x288] sm:$0xff]  ;;  %v4834_v41 = vrot.slane %v13835_v34, 6  ;;  %v16122_v11 = vsel %vm4767_vm5, %v4829_v7, %v4831_v14  ;;  %v1338_v14 = vld [vmem:[#allocation2 + $0xa0] sm:$0xff] }
 0x183   : > { %12558 = vmatprep.mubr.msk.f32.mxu1 %vm800_vm3, %v16077_v4  ;;  %v1972_v28 = vadd.f32 %v1886_v44, %v1336_v57  ;;  %v12181_v4 = vpop.f32.mrb[22].mxu0  ;;  %v13836_v35 = vld [vmem:[%s14208_s12 + $0x8a8] sm:$0xff]  ;;  %v13837_v44 = vld [vmem:[%s14208_s12 + $0x438] sm:$0xff]  ;;  %v4838_v57 = vrot.slane %v417_v0, 6 }
 0x184   : > { %2005 = vst.msk [vmem:[#allocation2 + $0x98] sm:$0xff] %vm1285_vm4, %v1973_v51  ;;  %v1901_v18 = vadd.f32 %v12181_v4, %v15616_v48  ;;  %v1895_v32 = vpop.f32.mrb[23].mxu0  ;;  %v16131_v48 = vsel %vm687_vm2, %v4116_v9, %v4118_v2  ;;  %v4123_v4 = vrot.slane %v360_v13, 2  ;;  %v4836_v51 = vrot.slane %v13837_v44, 6  ;;  %v16145_v13 = vld [vmem:[%s18061_s3 + $0x18] sm:$0xf] }
 0x185   : > { %12495 = vmatmul.mubr.msk.f32.gmra.mrb[64].mxu0 %vm800_vm3, %v13836_v35  ;;  %2004 = vst.msk [vmem:[#allocation2 + $0x90] sm:$0xff] %vm1285_vm4, %v1972_v28  ;;  %v1896_v10 = vadd.f32 %v1895_v32, %v15621_v17  ;;  %18370 = vst [vmem:[#allocation20_spill] sm:$0xff] %v16131_v48  ;;  %v16135_v28 = vsel %vm687_vm2, %v4120_v5, %v4121_v58  ;;  %v13838_v17 = vld [vmem:[%s14208_s12 + $0x468] sm:$0xff]  ;;  %v1340_v44 = vld [vmem:[#allocation2 + $0xb0] sm:$0xff] }
 0x186   : > { %12559 = vmatmul.mubr.msk.f32.gmra.mrb[86].mxu1 %vm800_vm3, %v16102_v52  ;;  %12599 = vmatprep.mubr.msk.f32.mxu0 %vm800_vm3, %v16108_v39  ;;  %v1975_v7 = vadd.f32 %v1901_v18, %v1339_v26  ;;  %18371 = vst [vmem:[#allocation69_spill] sm:$0xff] %v16135_v28  ;;  %v4839_v34 = vrot.slane %v13838_v17, 6  ;;  %v424_v52 = vld [vmem:[%s14208_s12 + $0x498] sm:$0xff]  ;;  %v16163_v0 = vsel %vm4767_vm5, %v4834_v41, %v4836_v51  ;;  %v13839_v18 = vld [vmem:[%s14208_s12 + $0x470] sm:$0xff] }
 0x187   : > { %12561 = vmatprep.mubr.msk.f32.mxu1 %vm800_vm3, %v16105_v61  ;;  %v1974_v32 = vadd.f32 %v1896_v10, %v1338_v14  ;;  %v12184_v35 = vpop.f32.mrb[24].mxu0  ;;  %v16139_v61 = vsel %vm4767_vm5, %v4833_v42, %v4834_v41  ;;  %v1341_v42 = vld [vmem:[#allocation2 + $0xb8] sm:$0xff]  ;;  %v4841_v26 = vrot.slane %v13839_v18, 6 }
 0x188   : > { %2007 = vst.msk [vmem:[#allocation2 + $0xa8] sm:$0xff] %vm1285_vm4, %v1975_v7  ;;  %v1911_v9 = vadd.f32 %v12184_v35, %v15627_v30  ;;  %v1905_v2 = vpop.f32.mrb[25].mxu0  ;;  %v16160_v30 = vsel %vm687_vm2, %v4121_v58, %v4123_v4  ;;  %v13840_v7 = vld [vmem:[%s14208_s12 + $0x4a0] sm:$0xff]  ;;  %v431_v4 = vld [vmem:[%s14208_s12 + $0x4d0] sm:$0xff]  ;;  %v13841_v35 = vld [vmem:[%s14208_s12 + $0x4a8] sm:$0xff] }
 0x189   : > { %12600 = vmatmul.mubr.msk.f32.vlgmr.msra.gmra.mrb[66].mxu0 %vm800_vm3, %v16122_v11  ;;  %2006 = vst.msk [vmem:[#allocation2 + $0xa0] sm:$0xff] %vm1285_vm4, %v1974_v32  ;;  %v1906_v5 = vadd.f32 %v1905_v2, %v15635_v16  ;;  %18372 = vst [vmem:[#allocation23_spill] sm:$0xff] %v16160_v30  ;;  %v16169_v16 = vsel %vm4767_vm5, %v4838_v57, %v4839_v34  ;;  %v4844_v14 = vrot.slane %v13840_v7, 6  ;;  %v18373_v32 = vld [vmem:[#allocation62_spill] sm:$0xff]  ;;  %v4861_v18 = vrot.slane %v431_v4, 6 }
 0x18a   : > { %12562 = vmatmul.mubr.msk.f32.gmra.mrb[88].mxu1 %vm800_vm3, %v16131_v48  ;;  %12648 = vmatpush3.msk.msra.mxu0 %vm875_vm0, %v15785_v22  ;;  %v1977_v10 = vadd.f32 %v1911_v9, %v1341_v42  ;;  %v4843_v22 = vrot.slane %v424_v52, 6  ;;  %v1343_v52 = vld [vmem:[#allocation2 + $0xc8] sm:$0xff]  ;;  %v4846_v9 = vrot.slane %v13841_v35, 6  ;;  %v1342_v42 = vld [vmem:[#allocation2 + $0xc0] sm:$0xff]  ;;  %v1344_v35 = vld [vmem:[#allocation2 + $0xd0] sm:$0xff] }
 0x18b   : > { %12564 = vmatprep.mubr.msk.f32.mxu1 %vm800_vm3, %v16135_v28  ;;  %12602 = vmatprep.mubr.msk.f32.mxu0 %vm800_vm3, %v16139_v61  ;;  %v1976_v58 = vadd.f32 %v1906_v5, %v1340_v44  ;;  %v12187_v41 = vpop.f32.mrb[26].mxu0  ;;  %v13872_v28 = vld [vmem:[%s14208_s12 + $0x4b8] sm:$0xff] }
 0x18c   : > { %12697 = vmatprep.subr.msk.mxu0 %vm875_vm0, %v16145_v13  ;;  %2009 = vst.msk [vmem:[#allocation2 + $0xb8] sm:$0xff] %vm1285_vm4, %v1977_v10  ;;  %v1921_v51 = vadd.f32 %v12187_v41, %v15666_v27  ;;  %v1915_v17 = vpop.f32.mrb[27].mxu0  ;;  %v16188_v27 = vsel %vm4767_vm5, %v4839_v34, %v4841_v26  ;;  %v16192_v5 = vsel %vm4767_vm5, %v4843_v22, %v4844_v14  ;;  %v13842_v10 = vld [vmem:[%s14208_s12 + $0x4d8] sm:$0xff]  ;;  %v18374_v26 = vld [vmem:[#allocation63_spill] sm:$0xff]  ;;  %v6067_v48 = vrot.slane %v13872_v28, 6 }
 0x18d   : > { %12603 = vmatmul.mubr.msk.f32.gmra.mrb[68].mxu0 %vm800_vm3, %v16163_v0  ;;  %2008 = vst.msk [vmem:[#allocation2 + $0xb0] sm:$0xff] %vm1285_vm4, %v1976_v58  ;;  %v1916_v57 = vadd.f32 %v1915_v17, %v15677_v1  ;;  %v4862_v1 = vrot.slane %v13842_v10, 6  ;;  %v438_v58 = vld [vmem:[%s14208_s12 + $0x508] sm:$0xff]  ;;  %v1345_v22 = vld [vmem:[#allocation2 + $0xd8] sm:$0xff]  ;;  %v13843_v17 = vld [vmem:[%s14208_s12 + $0x4e0] sm:$0xff] }
 0x18e   : > { %12565 = vmatmul.mubr.msk.f32.gmra.mrb[90].mxu1 %vm800_vm3, %v16160_v30  ;;  %12605 = vmatprep.mubr.msk.f32.mxu0 %vm800_vm3, %v16169_v16  ;;  %v1979_v2 = vadd.f32 %v1921_v51, %v1343_v52  ;;  %v18375_v51 = vld [vmem:[#allocation64_spill] sm:$0xff]  ;;  %v4864_v52 = vrot.slane %v13843_v17, 6  ;;  %v13844_v10 = vld [vmem:[%s14208_s12 + $0x510] sm:$0xff] }
 0x18f   : > { %12567 = vmatprep.mubr.msk.f32.mxu1 %vm800_vm3, %v18373_v32  ;;  %v1978_v44 = vadd.f32 %v1916_v57, %v1342_v42  ;;  %v12190_v7 = vpop.f32.mrb[28].mxu0  ;;  %v4866_v42 = vrot.slane %v438_v58, 6  ;;  %v13871_v32 = vld [vmem:[%s14208_s12 + $0x4b0] sm:$0xff] }
 0x190   : > { %2011 = vst.msk [vmem:[#allocation2 + $0xc8] sm:$0xff] %vm1285_vm4, %v1979_v2  ;;  %v1931_v41 = vadd.f32 %v12190_v7, %v15706_v59  ;;  %v1925_v34 = vpop.f32.mrb[29].mxu0  ;;  %v16209_v59 = vsel %vm4767_vm5, %v4844_v14, %v4846_v9  ;;  %v4863_v2 = vsel %vm4767_vm5, %v4861_v18, %v4862_v1  ;;  %v18376_v9 = vld [vmem:[#allocation66_spill] sm:$0xff]  ;;  %v1347_v18 = vld [vmem:[#allocation2 + $0xe8] sm:$0xff]  ;;  %v6066_v30 = vrot.slane %v13871_v32, 6 }
 0x191   : > { %12606 = vmatmul.mubr.msk.f32.gmra.mrb[70].mxu0 %vm800_vm3, %v16188_v27  ;;  %2010 = vst.msk [vmem:[#allocation2 + $0xc0] sm:$0xff] %vm1285_vm4, %v1978_v44  ;;  %v1926_v4 = vadd.f32 %v1925_v34, %v15718_v63  ;;  %v4867_v44 = vrot.slane %v13844_v10, 6  ;;  %v445_v34 = vld [vmem:[%s14208_s12 + $0x540] sm:$0xff] }
 0x192   : > { %12568 = vmatmul.mubr.msk.f32.gmra.mrb[92].mxu1 %vm800_vm3, %v18374_v26  ;;  %12608 = vmatprep.mubr.msk.f32.mxu0 %vm800_vm3, %v16192_v5  ;;  %v1981_v57 = vadd.f32 %v1931_v41, %v1345_v22  ;;  %v18377_v41 = vld [vmem:[#allocation67_spill] sm:$0xff]  ;;  %v13845_v22 = vld [vmem:[%s14208_s12 + $0x518] sm:$0xff]  ;;  %v4871_v10 = vrot.slane %v445_v34, 6 }
 0x193   : > { %12570 = vmatprep.mubr.msk.f32.mxu1 %vm800_vm3, %v18375_v51  ;;  %v1980_v63 = vadd.f32 %v1926_v4, %v1344_v35  ;;  %v12193_v7 = vpop.f32.mrb[30].mxu0  ;;  %v4869_v4 = vrot.slane %v13845_v22, 6  ;;  %v4868_v35 = vsel %vm4767_vm5, %v4866_v42, %v4867_v44  ;;  %v18379_v42 = vld [vmem:[#allocation71_spill] sm:$0xff] }
 0x194   : > { %2013 = vst.msk [vmem:[#allocation2 + $0xd8] sm:$0xff] %vm1285_vm4, %v1981_v57  ;;  %v1941_v51 = vadd.f32 %v12193_v7, %v15746_v50  ;;  %v1935_v14 = vpop.f32.mrb[31].mxu0  ;;  %v4865_v50 = vsel %vm4767_vm5, %v4862_v1, %v4864_v52  ;;  %v1346_v57 = vld [vmem:[#allocation2 + $0xe0] sm:$0xff]  ;;  %v13846_v7 = vld [vmem:[%s14208_s12 + $0x548] sm:$0xff]  ;;  %v18378_v1 = vld [vmem:[#allocation70_spill] sm:$0xff] }
 0x195   : > { %12609 = vmatmul.mubr.msk.f32.gmra.mrb[72].mxu0 %vm800_vm3, %v16209_v59  ;;  %2012 = vst.msk [vmem:[#allocation2 + $0xd0] sm:$0xff] %vm1285_vm4, %v1980_v63  ;;  %v1936_v58 = vadd.f32 %v1935_v14, %v15758_v29  ;;  %v4872_v63 = vrot.slane %v13846_v7, 6  ;;  %v452_v29 = vld [vmem:[%s14208_s12 + $0x578] sm:$0xff] }
 0x196   : > { %12571 = vmatmul.mubr.msk.f32.gmra.mrb[94].mxu1 %vm800_vm3, %v18376_v9  ;;  %12611 = vmatprep.mubr.msk.f32.mxu0 %vm800_vm3, %v4863_v2  ;;  %v1983_v17 = vadd.f32 %v1941_v51, %v1347_v18  ;;  %v1349_v51 = vld [vmem:[#allocation2 + $0xf8] sm:$0xff]  ;;  %v4876_v22 = vrot.slane %v452_v29, 6 }
 0x197   : > { %12573 = vmatprep.mubr.msk.f32.mxu1 %vm800_vm3, %v18377_v41  ;;  %v1982_v9 = vadd.f32 %v1936_v58, %v1346_v57  ;;  %v12196_v26 = vpop.f32.mrb[32].mxu0  ;;  %v1348_v58 = vld [vmem:[#allocation2 + $0xf0] sm:$0xff]  ;;  %v18380_v7 = vld [vmem:[#allocation74_spill] sm:$0xff] }
 0x198   : > { %2015 = vst.msk [vmem:[#allocation2 + $0xe8] sm:$0xff] %vm1285_vm4, %v1983_v17  ;;  %v1951_v14 = vadd.f32 %v12196_v26, %v15791_v62  ;;  %v1945_v2 = vpop.f32.mrb[33].mxu0  ;;  %v4870_v62 = vsel %vm4767_vm5, %v4867_v44, %v4869_v4  ;;  %v13847_v26 = vld [vmem:[%s14208_s12 + $0x550] sm:$0xff]  ;;  %v18381_v44 = vld [vmem:[#allocation75_spill] sm:$0xff]  ;;  %v508_v41 = vld [vmem:[%s14208_s12 + $0x738] sm:$0xff] }
 0x199   : > { %12612 = vmatmul.mubr.msk.f32.gmra.mrb[74].mxu0 %vm800_vm3, %v4865_v50  ;;  %2014 = vst.msk [vmem:[#allocation2 + $0xe0] sm:$0xff] %vm1285_vm4, %v1982_v9  ;;  %v1946_v52 = vadd.f32 %v1945_v2, %v15803_v12  ;;  %v4874_v34 = vrot.slane %v13847_v26, 6  ;;  %v4873_v50 = vsel %vm4767_vm5, %v4871_v10, %v4872_v63  ;;  %v13848_v9 = vld [vmem:[%s14208_s12 + $0x580] sm:$0xff]  ;;  %v459_v57 = vld [vmem:[%s14208_s12 + $0x5b0] sm:$0xff]  ;;  %v13850_v2 = vld [vmem:[%s14208_s12 + $0x5b8] sm:$0xff] }
 0x19a   : > { %12574 = vmatmul.mubr.msk.f32.gmra.mrb[96].mxu1 %vm800_vm3, %v18378_v1  ;;  %12614 = vmatprep.mubr.msk.f32.mxu0 %vm800_vm3, %v4868_v35  ;;  %v1985_v18 = vadd.f32 %v1951_v14, %v1349_v51  ;;  %v4877_v17 = vrot.slane %v13848_v9, 6  ;;  %v13849_v35 = vld [vmem:[%s14208_s12 + $0x588] sm:$0xff]  ;;  %v4881_v14 = vrot.slane %v459_v57, 6  ;;  %v4882_v51 = vrot.slane %v13850_v2, 6  ;;  %v18383_v26 = vld [vmem:[#allocation79_spill] sm:$0xff] }
 0x19b   : > { %12576 = vmatprep.mubr.msk.f32.mxu1 %vm800_vm3, %v18379_v42  ;;  %v1984_v12 = vadd.f32 %v1946_v52, %v1348_v58  ;;  %v4875_v4 = vsel %vm4767_vm5, %v4872_v63, %v4874_v34  ;;  %v4879_v10 = vrot.slane %v13849_v35, 6  ;;  %v466_v52 = vld [vmem:[%s14208_s12 + $0x5e8] sm:$0xff]  ;;  %v13851_v34 = vld [vmem:[%s14208_s12 + $0x5c0] sm:$0xff] }
 0x19c   : > { %2017 = vst.msk [vmem:[#allocation2 + $0xf8] sm:$0xff] %vm1285_vm4, %v1985_v18  ;;  %v4878_v29 = vsel %vm4767_vm5, %v4876_v22, %v4877_v17  ;;  %v4884_v18 = vrot.slane %v13851_v34, 6  ;;  %v4883_v58 = vsel %vm4767_vm5, %v4881_v14, %v4882_v51  ;;  %v13852_v22 = vld [vmem:[%s14208_s12 + $0x5f0] sm:$0xff]  ;;  %v18384_v57 = vld [vmem:[#allocation80_spill] sm:$0xff]  ;;  %v13868_v42 = vld [vmem:[%s14208_s12 + $0x480] sm:$0xff] }
 0x19d   : > { %12615 = vmatmul.mubr.msk.f32.gmra.mrb[76].mxu0 %vm800_vm3, %v4870_v62  ;;  %2016 = vst.msk [vmem:[#allocation2 + $0xf0] sm:$0xff] %vm1285_vm4, %v1984_v12  ;;  %v18382_v62 = vld [vmem:[#allocation78_spill] sm:$0xff]  ;;  %v4880_v63 = vsel %vm4767_vm5, %v4877_v17, %v4879_v10  ;;  %v4887_v9 = vrot.slane %v13852_v22, 6  ;;  %v473_v12 = vld [vmem:[%s14208_s12 + $0x620] sm:$0xff]  ;;  %v13854_v14 = vld [vmem:[%s14208_s12 + $0x628] sm:$0xff]  ;;  %v6062_v1 = vrot.slane %v13868_v42, 6 }
 0x19e   : > { %12577 = vmatmul.mubr.msk.f32.gmra.mrb[98].mxu1 %vm800_vm3, %v18380_v7  ;;  %12617 = vmatprep.mubr.msk.f32.mxu0 %vm800_vm3, %v4873_v50  ;;  %v4886_v50 = vrot.slane %v466_v52, 6  ;;  %v4885_v17 = vsel %vm4767_vm5, %v4882_v51, %v4884_v18  ;;  %v4892_v2 = vrot.slane %v13854_v14, 6  ;;  %v480_v52 = vld [vmem:[%s14208_s12 + $0x658] sm:$0xff]  ;;  %v18387_v34 = vld [vmem:[#allocation5_spill] sm:$0xff]  ;;  %v13859_v14 = vld [vmem:[%s14208_s12 + $0x408] sm:$0xff] }
 0x19f   : > { %12579 = vmatprep.mubr.msk.f32.mxu1 %vm800_vm3, %v18381_v44  ;;  %v18385_v44 = vld [vmem:[#allocation3_spill] sm:$0xff] }
 0x1a0   : > { %v4888_v10 = vsel %vm4767_vm5, %v4886_v50, %v4887_v9  ;;  %v13856_v50 = vld [vmem:[%s14208_s12 + $0x660] sm:$0xff] }
 0x1a1   : > { %12618 = vmatmul.mubr.msk.f32.gmra.mrb[78].mxu0 %vm800_vm3, %v4875_v4  ;;  %v13853_v4 = vld [vmem:[%s14208_s12 + $0x5f8] sm:$0xff]  ;;  %v4897_v22 = vrot.slane %v13856_v50, 6  ;;  %v501_v7 = vld [vmem:[%s14208_s12 + $0x700] sm:$0xff] }
 0x1a2   : > { %12580 = vmatmul.mubr.msk.f32.gmra.mrb[100].mxu1 %vm800_vm3, %v18382_v62  ;;  %12620 = vmatprep.mubr.msk.f32.mxu0 %vm800_vm3, %v4878_v29  ;;  %v4889_v35 = vrot.slane %v13853_v4, 6  ;;  %v4891_v29 = vrot.slane %v473_v12, 6  ;;  %v18386_v62 = vld [vmem:[#allocation4_spill] sm:$0xff]  ;;  %v487_v12 = vld [vmem:[%s14208_s12 + $0x690] sm:$0xff]  ;;  %v18389_v4 = vld [vmem:[#allocation7_spill] sm:$0xff] }
 0x1a3   : > { %12582 = vmatprep.mubr.msk.f32.mxu1 %vm800_vm3, %v18383_v26  ;;  %v13855_v26 = vld [vmem:[%s14208_s12 + $0x630] sm:$0xff] }
 0x1a4   : > { %v4890_v51 = vsel %vm4767_vm5, %v4887_v9, %v4889_v35  ;;  %v4893_v18 = vsel %vm4767_vm5, %v4891_v29, %v4892_v2  ;;  %v4901_v35 = vrot.slane %v487_v12, 6  ;;  %v18391_v12 = vld [vmem:[#allocation9_spill] sm:$0xff] }
 0x1a5   : > { %12621 = vmatmul.mubr.msk.f32.gmra.mrb[80].mxu0 %vm800_vm3, %v4880_v63  ;;  %v4894_v63 = vrot.slane %v13855_v26, 6 }
 0x1a6   : > { %12583 = vmatmul.mubr.msk.f32.gmra.mrb[102].mxu1 %vm800_vm3, %v18384_v57  ;;  %12623 = vmatprep.mubr.msk.f32.mxu0 %vm800_vm3, %v4883_v58  ;;  %v4896_v58 = vrot.slane %v480_v52, 6  ;;  %v18388_v57 = vld [vmem:[#allocation6_spill] sm:$0xff]  ;;  %v6051_v52 = vrot.slane %v13859_v14, 6 }
 0x1a7   : > { %12585 = vmatprep.mubr.msk.f32.mxu1 %vm800_vm3, %v18385_v44  ;;  %v4895_v44 = vsel %vm4767_vm5, %v4892_v2, %v4894_v63  ;;  %v408_v2 = vld [vmem:[%s14208_s12 + $0x418] sm:$0xff]  ;;  %v494_v63 = vld [vmem:[%s14208_s12 + $0x6c8] sm:$0xff] }
 0x1a9   : > { %12624 = vmatmul.mubr.msk.f32.gmra.mrb[82].mxu0 %vm800_vm3, %v4885_v17  ;;  %v13857_v17 = vld [vmem:[%s14208_s12 + $0x668] sm:$0xff] }
 0x1aa   : > { %12586 = vmatmul.mubr.msk.f32.gmra.mrb[104].mxu1 %vm800_vm3, %v18386_v62  ;;  %12626 = vmatprep.mubr.msk.f32.mxu0 %vm800_vm3, %v4888_v10  ;;  %v4899_v9 = vrot.slane %v13857_v17, 6  ;;  %v13858_v10 = vld [vmem:[%s14208_s12 + $0x698] sm:$0xff]  ;;  %v13860_v62 = vld [vmem:[%s14208_s12 + $0x410] sm:$0xff] }
 0x1ab   : > { %12588 = vmatprep.mubr.msk.f32.mxu1 %vm800_vm3, %v18387_v34  ;;  %v4902_v29 = vrot.slane %v13858_v10, 6  ;;  %v6052_v26 = vrot.slane %v13860_v62, 6  ;;  %v4898_v34 = vsel %vm4767_vm5, %v4896_v58, %v4897_v22  ;;  %v13862_v10 = vld [vmem:[%s14208_s12 + $0x6d0] sm:$0xff]  ;;  %v13863_v62 = vld [vmem:[%s14208_s12 + $0x440] sm:$0xff] }
 0x1ac   : > { %v4900_v58 = vsel %vm4767_vm5, %v4897_v22, %v4899_v9  ;;  %v4907_v14 = vrot.slane %v13862_v10, 6  ;;  %v18392_v22 = vld [vmem:[#allocation10_spill] sm:$0xff]  ;;  %v4911_v10 = vrot.slane %v501_v7, 6  ;;  %v13869_v7 = vld [vmem:[%s14208_s12 + $0x710] sm:$0xff] }
 0x1ad   : > { %12627 = vmatmul.mubr.msk.f32.gmra.mrb[84].mxu0 %vm800_vm3, %v4890_v51  ;;  %v18390_v51 = vld [vmem:[#allocation8_spill] sm:$0xff]  ;;  %v16318_v17 = vsel %vm4767_vm5, %v6051_v52, %v6052_v26 }
 0x1ae   : > { %12589 = vmatmul.mubr.msk.f32.gmra.mrb[106].mxu1 %vm800_vm3, %v18388_v57  ;;  %12629 = vmatprep.mubr.msk.f32.mxu0 %vm800_vm3, %v4893_v18  ;;  %v13861_v18 = vld [vmem:[%s14208_s12 + $0x6a0] sm:$0xff]  ;;  %v16315_v57 = vsel %vm4767_vm5, %v4901_v35, %v4902_v29  ;;  %v13865_v35 = vld [vmem:[%s14208_s12 + $0x6d8] sm:$0xff] }
 0x1af   : > { %12591 = vmatprep.mubr.msk.f32.mxu1 %vm800_vm3, %v18389_v4  ;;  %v4904_v50 = vrot.slane %v13861_v18, 6  ;;  %v6054_v4 = vrot.slane %v408_v2, 6  ;;  %v13864_v18 = vld [vmem:[%s14208_s12 + $0x448] sm:$0xff]  ;;  %v4909_v52 = vrot.slane %v13865_v35, 6 }
 0x1b1   : > { %12630 = vmatmul.mubr.msk.f32.gmra.mrb[86].mxu0 %vm800_vm3, %v4895_v44  ;;  %v4906_v44 = vrot.slane %v494_v63, 6  ;;  %v16329_v9 = vsel %vm4767_vm5, %v4902_v29, %v4904_v50  ;;  %v16337_v2 = vsel %vm4767_vm5, %v6052_v26, %v6054_v4  ;;  %v4914_v26 = vrot.slane %v13869_v7, 6 }
 0x1b2   : > { %12592 = vmatmul.mubr.msk.f32.gmra.mrb[108].mxu1 %vm800_vm3, %v18390_v51  ;;  %12632 = vmatprep.mubr.msk.f32.mxu0 %vm800_vm3, %v4898_v34  ;;  %v6056_v51 = vrot.slane %v13863_v62, 6  ;;  %v415_v34 = vld [vmem:[%s14208_s12 + $0x450] sm:$0xff]  ;;  %v16365_v42 = vsel %vm4767_vm5, %v4907_v14, %v4909_v52 }
 0x1b3   : > { %12594 = vmatprep.mubr.msk.f32.mxu1 %vm800_vm3, %v18391_v12  ;;  %v6057_v12 = vrot.slane %v13864_v18, 6  ;;  %v6059_v63 = vrot.slane %v415_v34, 6  ;;  %v422_v18 = vld [vmem:[%s14208_s12 + $0x488] sm:$0xff]  ;;  %v16342_v29 = vsel %vm4767_vm5, %v4906_v44, %v4907_v14  ;;  %v16358_v44 = vld [vmem:[%s18061_s3 + $0x20] sm:$0xf]  ;;  %v4916_v34 = vrot.slane %v508_v41, 6 }
 0x1b4   : > { %v6064_v4 = vrot.slane %v422_v18, 6  ;;  %v321_v14 = vld [vmem:[%s14208_s12 + $0x150] sm:$0xff]  ;;  %v322_v41 = vld [vmem:[%s14208_s12 + $0x158] sm:$0xff] }
 0x1b5   : > { %12633 = vmatmul.mubr.msk.f32.gmra.mrb[88].mxu0 %vm800_vm3, %v4900_v58  ;;  %v13866_v58 = vld [vmem:[%s14208_s12 + $0x708] sm:$0xff]  ;;  %v16345_v50 = vsel %vm4767_vm5, %v6056_v51, %v6057_v12  ;;  %v16368_v51 = vsel %vm4767_vm5, %v6057_v12, %v6059_v63  ;;  %v6069_v63 = vrot.slane %v429_v36, 6 }
 0x1b6   : > { %12595 = vmatmul.mubr.msk.f32.gmra.mrb[110].mxu1 %vm800_vm3, %v18392_v22  ;;  %12635 = vmatprep.mubr.msk.f32.mxu0 %vm800_vm3, %v16315_v57  ;;  %v4912_v62 = vrot.slane %v13866_v58, 6  ;;  %v13867_v22 = vld [vmem:[%s14208_s12 + $0x478] sm:$0xff]  ;;  %v13870_v58 = vld [vmem:[%s14208_s12 + $0x740] sm:$0xff]  ;;  %v16394_v32 = vsel %vm4767_vm5, %v6062_v1, %v6064_v4  ;;  %v13873_v12 = vld [vmem:[%s14208_s12 + $0x748] sm:$0xff] }
 0x1b7   : > { %12749 = vmatprep.mubr.msk.f32.mxu1 %vm800_vm3, %v16318_v17  ;;  %v6061_v35 = vrot.slane %v13867_v22, 6  ;;  %v4917_v18 = vrot.slane %v13870_v58, 6  ;;  %v4919_v52 = vrot.slane %v13873_v12, 6  ;;  %v13875_v58 = vld [vmem:[%s14208_s12 + $0x4f0] sm:$0xff] }
 0x1b8   : > { %v16372_v22 = vsel %vm4767_vm5, %v4911_v10, %v4912_v62  ;;  %v16391_v28 = vsel %vm4767_vm5, %v4912_v62, %v4914_v26  ;;  %v4768_v10 = vrot.slane %v321_v14, 6  ;;  %v436_v62 = vld [vmem:[%s14208_s12 + $0x4f8] sm:$0xff]  ;;  %v13874_v26 = vld [vmem:[%s14208_s12 + $0x4e8] sm:$0xff]  ;;  %v6086_v40 = vrot.slane %v13875_v58, 6  ;;  %v335_v58 = vld [vmem:[%s14208_s12 + $0x1c0] sm:$0xff] }
 0x1b9   : > { %12636 = vmatmul.mubr.msk.f32.gmra.mrb[90].mxu0 %vm800_vm3, %v16329_v9  ;;  %v16375_v7 = vsel %vm4767_vm5, %v6061_v35, %v6062_v1  ;;  %v16406_v35 = vsel %vm4767_vm5, %v6066_v30, %v6067_v48  ;;  %v4769_v1 = vrot.slane %v322_v41, 6  ;;  %v6085_v4 = vrot.slane %v13874_v26, 6 }
 0x1ba   : > { %12750 = vmatmul.mubr.msk.f32.vlgmr.msra.gmra.mrb[112].mxu1 %vm800_vm3, %v16337_v2  ;;  %12638 = vmatprep.mubr.msk.f32.mxu0 %vm800_vm3, %v16342_v29  ;;  %v6088_v36 = vrot.slane %v436_v62, 6  ;;  %v16422_v30 = vsel %vm4767_vm5, %v4917_v18, %v4919_v52  ;;  %v16425_v14 = vsel %vm4767_vm5, %v6067_v48, %v6069_v63  ;;  %v4773_v26 = vrot.slane %v328_v15, 6  ;;  %v450_v63 = vld [vmem:[%s14208_s12 + $0x568] sm:$0xff] }
 0x1bb   : > { %12752 = vmatprep.mubr.msk.f32.mxu1 %vm800_vm3, %v16345_v50  ;;  %12798 = vmatpush3.msk.msra.mxu1 %vm875_vm0, %v16033_v19  ;;  %v16401_v19 = vsel %vm4767_vm5, %v4916_v34, %v4917_v18  ;;  %v4771_v34 = vrot.slane %v15955_v21, 6  ;;  %v443_v21 = vld [vmem:[%s14208_s12 + $0x530] sm:$0xff]  ;;  %v4770_v41 = vsel %vm4767_vm5, %v4768_v10, %v4769_v1  ;;  %v6087_v12 = vsel %vm4767_vm5, %v6085_v4, %v6086_v40  ;;  %v13878_v10 = vld [vmem:[%s14208_s12 + $0x558] sm:$0xff] }
 0x1bc   : > { %12847 = vmatprep.subr.msk.mxu1 %vm875_vm0, %v16358_v44  ;;  %v4774_v62 = vrot.slane %v329_v45, 6  ;;  %v6091_v18 = vrot.slane %v13877_v25, 6  ;;  %v6089_v52 = vsel %vm4767_vm5, %v6086_v40, %v6088_v36  ;;  %v4776_v45 = vrot.slane %v15977_v37, 6  ;;  %v342_v36 = vld [vmem:[%s14208_s12 + $0x1f8] sm:$0xff] }
 0x1bd   : > { %12639 = vmatmul.mubr.msk.f32.gmra.mrb[92].mxu0 %vm800_vm3, %v16365_v42  ;;  %v4772_v48 = vsel %vm4767_vm5, %v4769_v1, %v4771_v34  ;;  %v6093_v15 = vrot.slane %v443_v21, 6  ;;  %v4778_v25 = vrot.slane %v335_v58, 6  ;;  %v6095_v4 = vrot.slane %v13878_v10, 6  ;;  %v343_v21 = vld [vmem:[%s14208_s12 + $0x200] sm:$0xff] }
 0x1be   : > { %12753 = vmatmul.mubr.msk.f32.gmra.mrb[114].mxu1 %vm800_vm3, %v16368_v51  ;;  %12641 = vmatprep.mubr.msk.f32.mxu0 %vm800_vm3, %v16372_v22  ;;  %v4775_v1 = vsel %vm4767_vm5, %v4773_v26, %v4774_v62  ;;  %v6092_v40 = vsel %vm4767_vm5, %v6090_v55, %v6091_v18  ;;  %v4781_v37 = vrot.slane %v15999_v6, 6  ;;  %v6098_v34 = vrot.slane %v450_v63, 6  ;;  %v13881_v63 = vld [vmem:[%s14208_s12 + $0x598] sm:$0xff] }
 0x1bf   : > { %12755 = vmatprep.mubr.msk.f32.mxu1 %vm800_vm3, %v16375_v7  ;;  %v4777_v8 = vsel %vm4767_vm5, %v4774_v62, %v4776_v45  ;;  %v6094_v55 = vsel %vm4767_vm5, %v6091_v18, %v6093_v15  ;;  %v4780_v6 = vsel %vm4767_vm5, %v4778_v25, %v4779_v53  ;;  %v4783_v26 = vrot.slane %v342_v36, 6  ;;  %v349_v45 = vld [vmem:[%s14208_s12 + $0x230] sm:$0xff]  ;;  %v3020_v15 = vld [vmem:[#allocation2 + $0x8] sm:$0xff] }
 0x1c0   : > { %v4784_v58 = vrot.slane %v343_v21, 6  ;;  %v6101_v62 = vrot.slane %v13881_v63, 6  ;;  %v4782_v25 = vsel %vm4767_vm5, %v4779_v53, %v4781_v37  ;;  %v6099_v10 = vsel %vm4767_vm5, %v6096_v38, %v6098_v34  ;;  %v13883_v37 = vld [vmem:[%s14208_s12 + $0x5d0] sm:$0xff] }
 0x1c1   : > { %12642 = vmatmul.mubr.msk.f32.gmra.mrb[94].mxu0 %vm800_vm3, %v16391_v28  ;;  %v4786_v36 = vrot.slane %v16021_v56, 6  ;;  %v6106_v34 = vrot.slane %v13883_v37, 6  ;;  %v3024_v37 = vld [vmem:[#allocation2 + $0x28] sm:$0xff] }
 0x1c2   : > { %12756 = vmatmul.mubr.msk.f32.gmra.mrb[116].mxu1 %vm800_vm3, %v16394_v32  ;;  %12644 = vmatprep.mubr.msk.f32.mxu0 %vm800_vm3, %v16401_v19 }
 0x1c3   : > { %12758 = vmatprep.mubr.msk.f32.mxu1 %vm800_vm3, %v16406_v35 }
 0x1c5   : > { %12645 = vmatmul.mubr.msk.f32.gmra.mrb[96].mxu0 %vm800_vm3, %v16422_v30 }
 0x1c6   : > { %12759 = vmatmul.mubr.msk.f32.gmra.mrb[118].mxu1 %vm800_vm3, %v16425_v14  ;;  %12649 = vmatprep.mubr.msk.f32.mxu0 %vm800_vm3, %v4770_v41  ;;  %v6097_v41 = vsel %vm4767_vm5, %v6095_v4, %v6096_v38  ;;  %v4788_v38 = vrot.slane %v349_v45, 6 }
 0x1c7   : > { %12761 = vmatprep.mubr.msk.f32.mxu1 %vm800_vm3, %v6087_v12  ;;  %v457_v12 = vld [vmem:[%s14208_s12 + $0x5a0] sm:$0xff] }
 0x1c8   : > { %v6103_v21 = vrot.slane %v457_v12, 6  ;;  %v3022_v12 = vld [vmem:[#allocation2 + $0x18] sm:$0xff] }
 0x1c9   : > { %12650 = vmatmul.mubr.msk.f32.vlgmr.msra.gmra.mrb[66].mxu0 %vm800_vm3, %v4772_v48  ;;  %v13880_v48 = vld [vmem:[%s14208_s12 + $0x590] sm:$0xff] }
 0x1ca   : > { %12762 = vmatmul.mubr.msk.f32.gmra.mrb[120].mxu1 %vm800_vm3, %v6089_v52  ;;  %12698 = vmatpush3.msk.msra.mxu0 %vm875_vm0, %v16145_v13  ;;  %v6100_v52 = vrot.slane %v13880_v48, 6  ;;  %v350_v13 = vld [vmem:[%s14208_s12 + $0x238] sm:$0xff]  ;;  %v13882_v48 = vld [vmem:[%s14208_s12 + $0x5c8] sm:$0xff] }
 0x1cb   : > { %12652 = vmatprep.mubr.msk.f32.mxu0 %vm800_vm3, %v4775_v1  ;;  %12764 = vmatprep.mubr.msk.f32.mxu1 %vm800_vm3, %v6092_v40  ;;  %v12301_v18 = vpop.f32.mrb[48].mxu1  ;;  %v3019_v40 = vld [vmem:[#allocation2] sm:$0xff]  ;;  %v6105_v63 = vrot.slane %v13882_v48, 6  ;;  %v4789_v53 = vrot.slane %v350_v13, 6 }
 0x1cc   : > { %12897 = vmatprep.subr.msk.mxu0 %vm875_vm0, %v16454_v3  ;;  %v3052_v4 = vadd.f32 %v12301_v18, %v3020_v15  ;;  %v2828_v1 = vpop.f32.mrb[49].mxu1  ;;  %v6102_v56 = vsel %vm4767_vm5, %v6100_v52, %v6101_v62  ;;  %v4791_v18 = vrot.slane %v16050_v46, 6  ;;  %v356_v15 = vld [vmem:[%s14208_s12 + $0x268] sm:$0xff] }
 0x1cd   : > { %12653 = vmatmul.mubr.msk.f32.gmra.mrb[68].mxu0 %vm800_vm3, %v4777_v8  ;;  %v3051_v31 = vadd.f32 %v3019_v40, %v2828_v1  ;;  %v4785_v8 = vsel %vm4767_vm5, %v4783_v26, %v4784_v58  ;;  %v3021_v1 = vld [vmem:[#allocation2 + $0x10] sm:$0xff]  ;;  %v6104_v26 = vsel %vm4767_vm5, %v6101_v62, %v6103_v21  ;;  %v6107_v46 = vsel %vm4767_vm5, %v6105_v63, %v6106_v34  ;;  %v363_v62 = vld [vmem:[%s14208_s12 + $0x2a0] sm:$0xff] }
 0x1ce   : > { %12765 = vmatmul.mubr.msk.f32.gmra.mrb[122].mxu1 %vm800_vm3, %v6094_v55  ;;  %12655 = vmatprep.mubr.msk.f32.mxu0 %vm800_vm3, %v4780_v6  ;;  %3084 = vst.msk [vmem:[#allocation2 + $0x8] sm:$0xff] %vm1285_vm4, %v3052_v4  ;;  %v6108_v6 = vrot.slane %v464_v24, 6  ;;  %v4790_v24 = vsel %vm4767_vm5, %v4788_v38, %v4789_v53  ;;  %v471_v4 = vld [vmem:[%s14208_s12 + $0x610] sm:$0xff]  ;;  %v4792_v38 = vsel %vm4767_vm5, %v4789_v53, %v4791_v18  ;;  %v4798_v53 = vrot.slane %v363_v62, 6 }
 0x1cf   : > { %12767 = vmatprep.mubr.msk.f32.mxu1 %vm800_vm3, %v6097_v41  ;;  %3083 = vst.msk [vmem:[#allocation2] sm:$0xff] %vm1285_vm4, %v3051_v31  ;;  %v12304_v55 = vpop.f32.mrb[50].mxu1  ;;  %v357_v41 = vld [vmem:[%s14208_s12 + $0x270] sm:$0xff]  ;;  %v4787_v31 = vsel %vm4767_vm5, %v4784_v58, %v4786_v36  ;;  %v13885_v58 = vld [vmem:[%s14208_s12 + $0x608] sm:$0xff] }
 0x1d0   : > { %v3054_v45 = vadd.f32 %v12304_v55, %v3022_v12  ;;  %v2838_v13 = vpop.f32.mrb[51].mxu1  ;;  %v4794_v40 = vrot.slane %v357_v41, 6  ;;  %v6111_v36 = vrot.slane %v13885_v58, 6  ;;  %v6109_v63 = vsel %vm4767_vm5, %v6106_v34, %v6108_v6  ;;  %v3023_v55 = vld [vmem:[#allocation2 + $0x20] sm:$0xff]  ;;  %v13886_v41 = vld [vmem:[%s14208_s12 + $0x2a8] sm:$0xff]  ;;  %v13887_v34 = vld [vmem:[%s14208_s12 + $0x638] sm:$0xff] }
 0x1d1   : > { %12656 = vmatmul.mubr.msk.f32.gmra.mrb[70].mxu0 %vm800_vm3, %v4782_v25  ;;  %v3053_v52 = vadd.f32 %v3021_v1, %v2838_v13  ;;  %v4793_v25 = vrot.slane %v356_v15, 6  ;;  %v4796_v12 = vrot.slane %v16082_v23, 6  ;;  %v6113_v15 = vrot.slane %v471_v4, 6  ;;  %v478_v13 = vld [vmem:[%s14208_s12 + $0x648] sm:$0xff]  ;;  %v13888_v6 = vld [vmem:[%s14208_s12 + $0x640] sm:$0xff]  ;;  %v3026_v4 = vld [vmem:[#allocation2 + $0x38] sm:$0xff] }
 0x1d2   : > { %12768 = vmatmul.mubr.msk.f32.gmra.mrb[124].mxu1 %vm800_vm3, %v6099_v10  ;;  %12658 = vmatprep.mubr.msk.f32.mxu0 %vm800_vm3, %v4785_v8  ;;  %3086 = vst.msk [vmem:[#allocation2 + $0x18] sm:$0xff] %vm1285_vm4, %v3054_v45  ;;  %v13884_v10 = vld [vmem:[%s14208_s12 + $0x600] sm:$0xff]  ;;  %v4799_v45 = vrot.slane %v13886_v41, 6  ;;  %v6115_v18 = vrot.slane %v13887_v34, 6  ;;  %v6118_v58 = vrot.slane %v478_v13, 6 }
 0x1d3   : > { %12770 = vmatprep.mubr.msk.f32.mxu1 %vm800_vm3, %v6102_v56  ;;  %v6110_v48 = vrot.slane %v13884_v10, 6  ;;  %3085 = vst.msk [vmem:[#allocation2 + $0x10] sm:$0xff] %vm1285_vm4, %v3053_v52  ;;  %v12307_v21 = vpop.f32.mrb[52].mxu1  ;;  %v4795_v23 = vsel %vm4767_vm5, %v4793_v25, %v4794_v40  ;;  %v13889_v10 = vld [vmem:[%s14208_s12 + $0x2b0] sm:$0xff]  ;;  %v4797_v25 = vsel %vm4767_vm5, %v4794_v40, %v4796_v12  ;;  %v485_v41 = vld [vmem:[%s14208_s12 + $0x680] sm:$0xff] }
 0x1d4   : > { %v3056_v8 = vadd.f32 %v12307_v21, %v3024_v37  ;;  %v2848_v56 = vpop.f32.mrb[53].mxu1  ;;  %v3025_v37 = vld [vmem:[#allocation2 + $0x30] sm:$0xff]  ;;  %v13890_v13 = vld [vmem:[%s14208_s12 + $0x2e0] sm:$0xff] }
 0x1d5   : > { %12659 = vmatmul.mubr.msk.f32.gmra.mrb[72].mxu0 %vm800_vm3, %v4787_v31  ;;  %v3055_v1 = vadd.f32 %v3023_v55, %v2848_v56  ;;  %v6116_v31 = vrot.slane %v13888_v6, 6  ;;  %v4800_v56 = vsel %vm4767_vm5, %v4798_v53, %v4799_v45  ;;  %v13891_v40 = vld [vmem:[%s14208_s12 + $0x670] sm:$0xff]  ;;  %v3028_v53 = vld [vmem:[#allocation2 + $0x48] sm:$0xff] }
 0x1d6   : > { %12771 = vmatmul.mubr.msk.f32.gmra.mrb[126].mxu1 %vm800_vm3, %v6104_v26  ;;  %12661 = vmatprep.mubr.msk.f32.mxu0 %vm800_vm3, %v4790_v24  ;;  %3088 = vst.msk [vmem:[#allocation2 + $0x28] sm:$0xff] %vm1285_vm4, %v3056_v8  ;;  %v6112_v26 = vsel %vm4767_vm5, %v6110_v48, %v6111_v36  ;;  %v4801_v24 = vrot.slane %v13889_v10, 6  ;;  %v6114_v48 = vsel %vm4767_vm5, %v6111_v36, %v6113_v15  ;;  %v6120_v12 = vrot.slane %v13891_v40, 6  ;;  %v377_v15 = vld [vmem:[%s14208_s12 + $0x310] sm:$0xff]  ;;  %v3030_v40 = vld [vmem:[#allocation2 + $0x58] sm:$0xff] }
 0x1d7   : > { %12773 = vmatprep.mubr.msk.f32.mxu1 %vm800_vm3, %v6107_v46  ;;  %3087 = vst.msk [vmem:[#allocation2 + $0x20] sm:$0xff] %vm1285_vm4, %v3055_v1  ;;  %v12310_v52 = vpop.f32.mrb[54].mxu1  ;;  %v370_v46 = vld [vmem:[%s14208_s12 + $0x2d8] sm:$0xff]  ;;  %v6117_v55 = vsel %vm4767_vm5, %v6115_v18, %v6116_v31  ;;  %v6119_v6 = vsel %vm4767_vm5, %v6116_v31, %v6118_v58  ;;  %v13895_v31 = vld [vmem:[%s14208_s12 + $0x6a8] sm:$0xff]  ;;  %v13896_v58 = vld [vmem:[%s14208_s12 + $0x6b0] sm:$0xff] }
 0x1d8   : > { %v3058_v62 = vadd.f32 %v12310_v52, %v3026_v4  ;;  %v2858_v21 = vpop.f32.mrb[55].mxu1  ;;  %v13892_v1 = vld [vmem:[%s14208_s12 + $0x678] sm:$0xff]  ;;  %v4802_v18 = vsel %vm4767_vm5, %v4799_v45, %v4801_v24  ;;  %v3027_v52 = vld [vmem:[#allocation2 + $0x40] sm:$0xff]  ;;  %v13893_v4 = vld [vmem:[%s14208_s12 + $0x2e8] sm:$0xff]  ;;  %v4808_v45 = vrot.slane %v377_v15, 6  ;;  %v6125_v24 = vrot.slane %v13895_v31, 6 }
 0x1d9   : > { %12662 = vmatmul.mubr.msk.f32.gmra.mrb[74].mxu0 %vm800_vm3, %v4792_v38  ;;  %v3057_v8 = vadd.f32 %v3025_v37, %v2858_v21  ;;  %v4803_v38 = vrot.slane %v370_v46, 6  ;;  %v6121_v36 = vrot.slane %v13892_v1, 6  ;;  %v4806_v10 = vrot.slane %v13893_v4, 6  ;;  %v492_v37 = vld [vmem:[%s14208_s12 + $0x6b8] sm:$0xff]  ;;  %v13897_v1 = vld [vmem:[%s14208_s12 + $0x320] sm:$0xff] }
 0x1da   : > { %12774 = vmatmul.mubr.msk.f32.gmra.mrb[128].mxu1 %vm800_vm3, %v6109_v63  ;;  %12664 = vmatprep.mubr.msk.f32.mxu0 %vm800_vm3, %v4795_v23  ;;  %3090 = vst.msk [vmem:[#allocation2 + $0x38] sm:$0xff] %vm1285_vm4, %v3058_v62  ;;  %v4804_v63 = vrot.slane %v13890_v13, 6  ;;  %v6123_v46 = vrot.slane %v485_v41, 6  ;;  %v13894_v62 = vld [vmem:[%s14208_s12 + $0x318] sm:$0xff] }
 0x1db   : > { %12776 = vmatprep.mubr.msk.f32.mxu1 %vm800_vm3, %v6112_v26  ;;  %3089 = vst.msk [vmem:[#allocation2 + $0x30] sm:$0xff] %vm1285_vm4, %v3057_v8  ;;  %v12313_v34 = vpop.f32.mrb[56].mxu1  ;;  %v4809_v21 = vrot.slane %v13894_v62, 6  ;;  %v6122_v41 = vsel %vm4767_vm5, %v6120_v12, %v6121_v36  ;;  %v499_v62 = vld [vmem:[%s14208_s12 + $0x6f0] sm:$0xff] }
 0x1dc   : > { %v3060_v23 = vadd.f32 %v12313_v34, %v3028_v53  ;;  %v2868_v26 = vpop.f32.mrb[57].mxu1  ;;  %v6128_v34 = vrot.slane %v492_v37, 6  ;;  %v6124_v12 = vsel %vm4767_vm5, %v6121_v36, %v6123_v46  ;;  %v13900_v36 = vld [vmem:[%s14208_s12 + $0x6e8] sm:$0xff] }
 0x1dd   : > { %12665 = vmatmul.mubr.msk.f32.gmra.mrb[76].mxu0 %vm800_vm3, %v4797_v25  ;;  %v3059_v8 = vadd.f32 %v3027_v52, %v2868_v26  ;;  %v6126_v25 = vrot.slane %v13896_v58, 6  ;;  %v3029_v26 = vld [vmem:[#allocation2 + $0x50] sm:$0xff]  ;;  %v4810_v52 = vsel %vm4767_vm5, %v4808_v45, %v4809_v21  ;;  %v6131_v46 = vrot.slane %v13900_v36, 6  ;;  %v3032_v45 = vld [vmem:[#allocation2 + $0x68] sm:$0xff] }
 0x1de   : > { %12777 = vmatmul.mubr.msk.f32.gmra.mrb[130].mxu1 %vm800_vm3, %v6114_v48  ;;  %12667 = vmatprep.mubr.msk.f32.mxu0 %vm800_vm3, %v4800_v56  ;;  %3092 = vst.msk [vmem:[#allocation2 + $0x48] sm:$0xff] %vm1285_vm4, %v3060_v23  ;;  %v4805_v48 = vsel %vm4767_vm5, %v4803_v38, %v4804_v63  ;;  %v4811_v56 = vrot.slane %v13897_v1, 6  ;;  %v4807_v38 = vsel %vm4767_vm5, %v4804_v63, %v4806_v10  ;;  %v13899_v63 = vld [vmem:[%s14208_s12 + $0x6e0] sm:$0xff] }
 0x1df   : > { %12779 = vmatprep.mubr.msk.f32.mxu1 %vm800_vm3, %v6117_v55  ;;  %3091 = vst.msk [vmem:[#allocation2 + $0x40] sm:$0xff] %vm1285_vm4, %v3059_v8  ;;  %v12316_v13 = vpop.f32.mrb[58].mxu1  ;;  %v384_v55 = vld [vmem:[%s14208_s12 + $0x348] sm:$0xff]  ;;  %v16561_v4 = vsel %vm4767_vm5, %v6125_v24, %v6126_v25  ;;  %v6130_v10 = vrot.slane %v13899_v63, 6  ;;  %v391_v8 = vld [vmem:[%s14208_s12 + $0x380] sm:$0xff]  ;;  %v16572_v58 = vsel %vm4767_vm5, %v6126_v25, %v6128_v34  ;;  %v397_v63 = vld [vmem:[%s14208_s12 + $0x3b8] sm:$0xff] }
 0x1e0   : > { %v3062_v15 = vadd.f32 %v12316_v13, %v3030_v40  ;;  %v2878_v53 = vpop.f32.mrb[59].mxu1  ;;  %v4812_v24 = vsel %vm4767_vm5, %v4809_v21, %v4811_v56  ;;  %v3031_v13 = vld [vmem:[#allocation2 + $0x60] sm:$0xff]  ;;  %v13901_v40 = vld [vmem:[%s14208_s12 + $0x358] sm:$0xff]  ;;  %v4818_v25 = vrot.slane %v391_v8, 6 }
 0x1e1   : > { %12668 = vmatmul.mubr.msk.f32.gmra.mrb[78].mxu0 %vm800_vm3, %v4802_v18  ;;  %v3061_v23 = vadd.f32 %v3029_v26, %v2878_v53  ;;  %v4813_v18 = vrot.slane %v384_v55, 6  ;;  %v4816_v1 = vrot.slane %v13901_v40, 6  ;;  %v6133_v55 = vrot.slane %v499_v62, 6  ;;  %v13903_v56 = vld [vmem:[%s14208_s12 + $0x718] sm:$0xff]  ;;  %v13904_v26 = vld [vmem:[%s14208_s12 + $0x720] sm:$0xff]  ;;  %v506_v62 = vld [vmem:[%s14208_s12 + $0x728] sm:$0xff] }
 0x1e2   : > { %12780 = vmatmul.mubr.msk.f32.gmra.mrb[132].mxu1 %vm800_vm3, %v6119_v6  ;;  %12670 = vmatprep.mubr.msk.f32.mxu0 %vm800_vm3, %v4805_v48  ;;  %3094 = vst.msk [vmem:[#allocation2 + $0x58] sm:$0xff] %vm1285_vm4, %v3062_v15  ;;  %v13898_v6 = vld [vmem:[%s14208_s12 + $0x350] sm:$0xff]  ;;  %v13902_v15 = vld [vmem:[%s14208_s12 + $0x388] sm:$0xff]  ;;  %v6135_v34 = vrot.slane %v13903_v56, 6  ;;  %v6138_v40 = vrot.slane %v506_v62, 6 }
 0x1e3   : > { %12782 = vmatprep.mubr.msk.f32.mxu1 %vm800_vm3, %v6122_v41  ;;  %v4814_v37 = vrot.slane %v13898_v6, 6  ;;  %3093 = vst.msk [vmem:[#allocation2 + $0x50] sm:$0xff] %vm1285_vm4, %v3061_v23  ;;  %v12319_v31 = vpop.f32.mrb[60].mxu1  ;;  %v4819_v53 = vrot.slane %v13902_v15, 6  ;;  %v16586_v23 = vsel %vm4767_vm5, %v6130_v10, %v6131_v46  ;;  %v3034_v6 = vld [vmem:[#allocation2 + $0x78] sm:$0xff]  ;;  %v16596_v10 = vsel %vm4767_vm5, %v6131_v46, %v6133_v55  ;;  %v13906_v46 = vld [vmem:[%s14208_s12 + $0x3c0] sm:$0xff] }
 0x1e4   : > { %v3064_v48 = vadd.f32 %v12319_v31, %v3032_v45  ;;  %v2888_v41 = vpop.f32.mrb[61].mxu1  ;;  %v3033_v31 = vld [vmem:[#allocation2 + $0x70] sm:$0xff] }
 0x1e5   : > { %12671 = vmatmul.mubr.msk.f32.gmra.mrb[80].mxu0 %vm800_vm3, %v4807_v38  ;;  %v3063_v21 = vadd.f32 %v3031_v13, %v2888_v41  ;;  %v6136_v38 = vrot.slane %v13904_v26, 6  ;;  %v13905_v45 = vld [vmem:[%s14208_s12 + $0x390] sm:$0xff]  ;;  %v513_v26 = vld [vmem:[%s14208_s12 + $0x760] sm:$0xff] }
 0x1e6   : > { %12783 = vmatmul.mubr.msk.f32.gmra.mrb[134].mxu1 %vm800_vm3, %v6124_v12  ;;  %12673 = vmatprep.mubr.msk.f32.mxu0 %vm800_vm3, %v4810_v52  ;;  %3096 = vst.msk [vmem:[#allocation2 + $0x68] sm:$0xff] %vm1285_vm4, %v3064_v48  ;;  %v4815_v12 = vsel %vm4767_vm5, %v4813_v18, %v4814_v37  ;;  %v4817_v18 = vsel %vm4767_vm5, %v4814_v37, %v4816_v1  ;;  %v4821_v48 = vrot.slane %v13905_v45, 6  ;;  %v4823_v37 = vrot.slane %v397_v63, 6  ;;  %v13907_v55 = vld [vmem:[%s14208_s12 + $0x750] sm:$0xff] }
 0x1e7   : > { %12785 = vmatprep.mubr.msk.f32.mxu1 %vm800_vm3, %v16561_v4  ;;  %3095 = vst.msk [vmem:[#allocation2 + $0x60] sm:$0xff] %vm1285_vm4, %v3063_v21  ;;  %v12322_v52 = vpop.f32.mrb[62].mxu1  ;;  %v16604_v13 = vsel %vm4767_vm5, %v6135_v34, %v6136_v38  ;;  %v4824_v1 = vrot.slane %v13906_v46, 6  ;;  %v6140_v15 = vrot.slane %v13907_v55, 6  ;;  %v13908_v21 = vld [vmem:[%s14208_s12 + $0x758] sm:$0xff]  ;;  %v6143_v45 = vrot.slane %v513_v26, 6 }
 0x1e8   : > { %v3066_v36 = vadd.f32 %v12322_v52, %v3034_v6  ;;  %v2898_v8 = vpop.f32.mrb[63].mxu1  ;;  %v6141_v56 = vrot.slane %v13908_v21, 6  ;;  %v3036_v52 = vld [vmem:[#allocation2 + $0x88] sm:$0xff]  ;;  %v3035_v6 = vld [vmem:[#allocation2 + $0x80] sm:$0xff]  ;;  %v4822_v62 = vsel %vm4767_vm5, %v4819_v53, %v4821_v48  ;;  %v13911_v46 = vld [vmem:[%s14208_s12 + $0x170] sm:$0xff] }
 0x1e9   : > { %12674 = vmatmul.mubr.msk.f32.gmra.mrb[82].mxu0 %vm800_vm3, %v4812_v24  ;;  %v3065_v41 = vadd.f32 %v3033_v31, %v2898_v8  ;;  %v4820_v24 = vsel %vm4767_vm5, %v4818_v25, %v4819_v53  ;;  %v13909_v8 = vld [vmem:[%s14208_s12 + $0x3c8] sm:$0xff]  ;;  %v326_v55 = vld [vmem:[%s14208_s12 + $0x178] sm:$0xff] }
 0x1ea   : > { %12786 = vmatmul.mubr.msk.f32.gmra.mrb[136].mxu1 %vm800_vm3, %v16572_v58  ;;  %12676 = vmatprep.mubr.msk.f32.mxu0 %vm800_vm3, %v4815_v12  ;;  %3098 = vst.msk [vmem:[#allocation2 + $0x78] sm:$0xff] %vm1285_vm4, %v3066_v36  ;;  %v16620_v36 = vsel %vm4767_vm5, %v6136_v38, %v6138_v40  ;;  %v4826_v31 = vrot.slane %v13909_v8, 6  ;;  %v13910_v53 = vld [vmem:[%s14208_s12 + $0x168] sm:$0xff]  ;;  %v3038_v40 = vld [vmem:[#allocation2 + $0x98] sm:$0xff] }
 0x1eb   : > { %12788 = vmatprep.mubr.msk.f32.mxu1 %vm800_vm3, %v16586_v23  ;;  %3097 = vst.msk [vmem:[#allocation2 + $0x70] sm:$0xff] %vm1285_vm4, %v3065_v41  ;;  %v12325_v12 = vpop.f32.mrb[64].mxu1  ;;  %v16626_v41 = vsel %vm4767_vm5, %v6140_v15, %v6141_v56  ;;  %v5991_v48 = vrot.slane %v13910_v53, 6  ;;  %v333_v53 = vld [vmem:[%s14208_s12 + $0x1b0] sm:$0xff] }
 0x1ec   : > { %v3068_v25 = vadd.f32 %v12325_v12, %v3036_v52  ;;  %v2908_v34 = vpop.f32.mrb[65].mxu1  ;;  %v3037_v12 = vld [vmem:[#allocation2 + $0x90] sm:$0xff]  ;;  %v4827_v15 = vsel %vm4767_vm5, %v4824_v1, %v4826_v31  ;;  %v16640_v52 = vsel %vm4767_vm5, %v6141_v56, %v6143_v45  ;;  %v3039_v31 = vld [vmem:[#allocation2 + $0xa0] sm:$0xff] }
 0x1ed   : > { %12677 = vmatmul.mubr.msk.f32.gmra.mrb[84].mxu0 %vm800_vm3, %v4817_v18  ;;  %v3067_v63 = vadd.f32 %v3035_v6, %v2908_v34  ;;  %v4825_v18 = vsel %vm4767_vm5, %v4823_v37, %v4824_v1  ;;  %v13912_v6 = vld [vmem:[%s14208_s12 + $0x1a0] sm:$0xff] }
 0x1ee   : > { %12789 = vmatmul.mubr.msk.f32.gmra.mrb[138].mxu1 %vm800_vm3, %v16596_v10  ;;  %12679 = vmatprep.mubr.msk.f32.mxu0 %vm800_vm3, %v4820_v24  ;;  %3100 = vst.msk [vmem:[#allocation2 + $0x88] sm:$0xff] %vm1285_vm4, %v3068_v25  ;;  %v5992_v24 = vrot.slane %v13911_v46, 6  ;;  %v5994_v25 = vrot.slane %v326_v55, 6  ;;  %v3040_v46 = vld [vmem:[#allocation2 + $0xa8] sm:$0xff]  ;;  %v5999_v55 = vrot.slane %v333_v53, 6 }
 0x1ef   : > { %12791 = vmatprep.mubr.msk.f32.mxu1 %vm800_vm3, %v16604_v13  ;;  %3099 = vst.msk [vmem:[#allocation2 + $0x80] sm:$0xff] %vm1285_vm4, %v3067_v63  ;;  %v12328_v38 = vpop.f32.mrb[66].mxu1  ;;  %v13913_v63 = vld [vmem:[%s14208_s12 + $0x1a8] sm:$0xff] }
 0x1f0   : > { %v3070_v21 = vadd.f32 %v12328_v38, %v3038_v40  ;;  %v2918_v26 = vpop.f32.mrb[67].mxu1  ;;  %v5993_v34 = vsel %vm4767_vm5, %v5991_v48, %v5992_v24  ;;  %v5997_v8 = vrot.slane %v13913_v63, 6  ;;  %v5995_v48 = vsel %vm4767_vm5, %v5992_v24, %v5994_v25  ;;  %v13914_v40 = vld [vmem:[%s14208_s12 + $0x1d8] sm:$0xff]  ;;  %v3041_v24 = vld [vmem:[#allocation2 + $0xb0] sm:$0xff]  ;;  %v16667_v25 = vld [vmem:[%s18062_s4 + $0xc] sm:$0xf] }
 0x1f1   : > { %12680 = vmatmul.mubr.msk.f32.gmra.mrb[86].mxu0 %vm800_vm3, %v4822_v62  ;;  %v3069_v37 = vadd.f32 %v3037_v12, %v2918_v26  ;;  %v5996_v62 = vrot.slane %v13912_v6, 6  ;;  %v13915_v26 = vld [vmem:[%s14208_s12 + $0x1e0] sm:$0xff]  ;;  %v3042_v6 = vld [vmem:[#allocation2 + $0xb8] sm:$0xff] }
 0x1f2   : > { %12792 = vmatmul.mubr.msk.f32.gmra.mrb[140].mxu1 %vm800_vm3, %v16620_v36  ;;  %12682 = vmatprep.mubr.msk.f32.mxu0 %vm800_vm3, %v4825_v18  ;;  %3102 = vst.msk [vmem:[#allocation2 + $0x98] sm:$0xff] %vm1285_vm4, %v3070_v21  ;;  %v6001_v21 = vrot.slane %v13914_v40, 6  ;;  %v6002_v12 = vrot.slane %v13915_v26, 6  ;;  %v6000_v63 = vsel %vm4767_vm5, %v5997_v8, %v5999_v55  ;;  %v3043_v55 = vld [vmem:[#allocation2 + $0xc0] sm:$0xff]  ;;  %v13918_v26 = vld [vmem:[%s14208_s12 + $0x248] sm:$0xff] }
 0x1f3   : > { %12794 = vmatprep.mubr.msk.f32.mxu1 %vm800_vm3, %v16626_v41  ;;  %3101 = vst.msk [vmem:[#allocation2 + $0x90] sm:$0xff] %vm1285_vm4, %v3069_v37  ;;  %v12331_v18 = vpop.f32.mrb[68].mxu1  ;;  %v5998_v38 = vsel %vm4767_vm5, %v5996_v62, %v5997_v8  ;;  %v340_v37 = vld [vmem:[%s14208_s12 + $0x1e8] sm:$0xff] }
 0x1f4   : > { %v3072_v1 = vadd.f32 %v12331_v18, %v3040_v46  ;;  %v2928_v56 = vpop.f32.mrb[69].mxu1  ;;  %v6004_v53 = vrot.slane %v340_v37, 6  ;;  %v13916_v18 = vld [vmem:[%s14208_s12 + $0x210] sm:$0xff]  ;;  %v6011_v37 = vrot.slane %v13918_v26, 6  ;;  %v13923_v26 = vld [vmem:[%s14208_s12 + $0x2c0] sm:$0xff] }
 0x1f5   : > { %12683 = vmatmul.mubr.msk.f32.gmra.mrb[88].mxu0 %vm800_vm3, %v4827_v15  ;;  %v3071_v45 = vadd.f32 %v3039_v31, %v2928_v56  ;;  %v6006_v46 = vrot.slane %v13916_v18, 6  ;;  %v347_v31 = vld [vmem:[%s14208_s12 + $0x220] sm:$0xff]  ;;  %v361_v18 = vld [vmem:[%s14208_s12 + $0x290] sm:$0xff] }
 0x1f6   : > { %12795 = vmatmul.mubr.msk.f32.gmra.mrb[142].mxu1 %vm800_vm3, %v16640_v52  ;;  %12685 = vmatprep.mubr.msk.f32.mxu0 %vm800_vm3, %v16108_v39  ;;  %3104 = vst.msk [vmem:[#allocation2 + $0xa8] sm:$0xff] %vm1285_vm4, %v3072_v1  ;;  %v13917_v1 = vld [vmem:[%s14208_s12 + $0x218] sm:$0xff]  ;;  %v6009_v40 = vrot.slane %v347_v31, 6 }
 0x1f7   : > { %12799 = vmatprep.mubr.msk.f32.mxu1 %vm800_vm3, %v5993_v34  ;;  %3103 = vst.msk [vmem:[#allocation2 + $0xa0] sm:$0xff] %vm1285_vm4, %v3071_v45  ;;  %v12334_v15 = vpop.f32.mrb[70].mxu1  ;;  %v6007_v56 = vrot.slane %v13917_v1, 6  ;;  %v3044_v45 = vld [vmem:[#allocation2 + $0xc8] sm:$0xff]  ;;  %v13920_v1 = vld [vmem:[%s14208_s12 + $0x280] sm:$0xff] }
 0x1f8   : > { %v3074_v39 = vadd.f32 %v12334_v15, %v3042_v6  ;;  %v2938_v34 = vpop.f32.mrb[71].mxu1  ;;  %v13919_v15 = vld [vmem:[%s14208_s12 + $0x250] sm:$0xff]  ;;  %v6016_v31 = vrot.slane %v13920_v1, 6 }
 0x1f9   : > { %12686 = vmatmul.mubr.msk.f32.gmra.mrb[90].mxu0 %vm800_vm3, %v16122_v11  ;;  %v3073_v62 = vadd.f32 %v3041_v24, %v2938_v34  ;;  %v6003_v11 = vsel %vm4767_vm5, %v6001_v21, %v6002_v12  ;;  %v6008_v21 = vsel %vm4767_vm5, %v6006_v46, %v6007_v56  ;;  %v6012_v6 = vrot.slane %v13919_v15, 6  ;;  %v3046_v34 = vld [vmem:[#allocation2 + $0xd8] sm:$0xff] }
 0x1fa   : > { %12800 = vmatmul.mubr.msk.f32.vlgmr.msra.gmra.mrb[112].mxu1 %vm800_vm3, %v5995_v48  ;;  %12688 = vmatprep.mubr.msk.f32.mxu0 %vm800_vm3, %v16139_v61  ;;  %3106 = vst.msk [vmem:[#allocation2 + $0xb8] sm:$0xff] %vm1285_vm4, %v3074_v39  ;;  %v3050_v15 = vld [vmem:[#allocation2 + $0xf8] sm:$0xff] }
 0x1fb   : > { %12802 = vmatprep.mubr.msk.f32.mxu1 %vm800_vm3, %v5998_v38  ;;  %12848 = vmatpush3.msk.msra.mxu1 %vm875_vm0, %v16358_v44  ;;  %3105 = vst.msk [vmem:[#allocation2 + $0xb0] sm:$0xff] %vm1285_vm4, %v3073_v62  ;;  %v12337_v61 = vpop.f32.mrb[72].mxu1  ;;  %v6005_v44 = vsel %vm4767_vm5, %v6002_v12, %v6004_v53  ;;  %v3045_v62 = vld [vmem:[#allocation2 + $0xd0] sm:$0xff] }
 0x1fc   : > { %12997 = vmatprep.subr.msk.mxu1 %vm875_vm0, %v16667_v25  ;;  %v3076_v8 = vadd.f32 %v12337_v61, %v3044_v45  ;;  %v2948_v48 = vpop.f32.mrb[73].mxu1  ;;  %v13921_v61 = vld [vmem:[%s14208_s12 + $0x288] sm:$0xff] }
 0x1fd   : > { %12689 = vmatmul.mubr.msk.f32.gmra.mrb[92].mxu0 %vm800_vm3, %v16163_v0  ;;  %v3075_v38 = vadd.f32 %v3043_v55, %v2948_v48  ;;  %v354_v0 = vld [vmem:[%s14208_s12 + $0x258] sm:$0xff] }
 0x1fe   : > { %12803 = vmatmul.mubr.msk.f32.gmra.mrb[114].mxu1 %vm800_vm3, %v6000_v63  ;;  %12691 = vmatprep.mubr.msk.f32.mxu0 %vm800_vm3, %v16169_v16  ;;  %3108 = vst.msk [vmem:[#allocation2 + $0xc8] sm:$0xff] %vm1285_vm4, %v3076_v8  ;;  %v6010_v63 = vsel %vm4767_vm5, %v6007_v56, %v6009_v40  ;;  %v6014_v53 = vrot.slane %v354_v0, 6  ;;  %v3047_v56 = vld [vmem:[#allocation2 + $0xe0] sm:$0xff]  ;;  %v13922_v40 = vld [vmem:[%s14208_s12 + $0x2b8] sm:$0xff] }
 0x1ff   : > { %12805 = vmatprep.mubr.msk.f32.mxu1 %vm800_vm3, %v6003_v11  ;;  %3107 = vst.msk [vmem:[#allocation2 + $0xc0] sm:$0xff] %vm1285_vm4, %v3075_v38  ;;  %v12340_v39 = vpop.f32.mrb[74].mxu1  ;;  %v6013_v11 = vsel %vm4767_vm5, %v6011_v37, %v6012_v6  ;;  %v6019_v38 = vrot.slane %v361_v18, 6  ;;  %v6022_v37 = vrot.slane %v13923_v26, 6  ;;  %v375_v18 = vld [vmem:[%s14208_s12 + $0x300] sm:$0xff] }
 0x200   : > { %v3078_v16 = vadd.f32 %v12340_v39, %v3046_v34  ;;  %v2958_v24 = vpop.f32.mrb[75].mxu1  ;;  %v6015_v55 = vsel %vm4767_vm5, %v6012_v6, %v6014_v53  ;;  %v3049_v34 = vld [vmem:[#allocation2 + $0xf0] sm:$0xff]  ;;  %v13925_v53 = vld [vmem:[%s14208_s12 + $0x2f8] sm:$0xff]  ;;  %v6029_v1 = vrot.slane %v375_v18, 6  ;;  %v13936_v18 = vld [vmem:[%s14208_s12 + $0x3a0] sm:$0xff] }
 0x201   : > { %12692 = vmatmul.mubr.msk.f32.gmra.mrb[94].mxu0 %vm800_vm3, %v16188_v27  ;;  %v3077_v12 = vadd.f32 %v3045_v62, %v2958_v24  ;;  %v3048_v27 = vld [vmem:[#allocation2 + $0xe8] sm:$0xff] }
 0x202   : > { %12806 = vmatmul.mubr.msk.f32.gmra.mrb[116].mxu1 %vm800_vm3, %v6005_v44  ;;  %12694 = vmatprep.mubr.msk.f32.mxu0 %vm800_vm3, %v16192_v5  ;;  %3110 = vst.msk [vmem:[#allocation2 + $0xd8] sm:$0xff] %vm1285_vm4, %v3078_v16  ;;  %v6017_v5 = vrot.slane %v13921_v61, 6  ;;  %v368_v44 = vld [vmem:[%s14208_s12 + $0x2c8] sm:$0xff] }
 0x203   : > { %12808 = vmatprep.mubr.msk.f32.mxu1 %vm800_vm3, %v6008_v21  ;;  %3109 = vst.msk [vmem:[#allocation2 + $0xd0] sm:$0xff] %vm1285_vm4, %v3077_v12  ;;  %v12343_v46 = vpop.f32.mrb[76].mxu1  ;;  %v6021_v21 = vrot.slane %v13922_v40, 6  ;;  %v6024_v16 = vrot.slane %v368_v44, 6  ;;  %v13927_v61 = vld [vmem:[%s14208_s12 + $0x328] sm:$0xff] }
 0x204   : > { %v3080_v45 = vadd.f32 %v12343_v46, %v3048_v27  ;;  %v2968_v8 = vpop.f32.mrb[77].mxu1  ;;  %v6018_v0 = vsel %vm4767_vm5, %v6016_v31, %v6017_v5  ;;  %v6020_v62 = vsel %vm4767_vm5, %v6017_v5, %v6019_v38  ;;  %v13926_v46 = vld [vmem:[%s14208_s12 + $0x778] sm:$0xff]  ;;  %v6031_v5 = vrot.slane %v13927_v61, 6  ;;  %v13937_v61 = vld [vmem:[%s14208_s12 + $0x7f0] sm:$0xff] }
 0x205   : > { %12695 = vmatmul.mubr.msk.f32.gmra.mrb[96].mxu0 %vm800_vm3, %v16209_v59  ;;  %v3079_v48 = vadd.f32 %v3047_v56, %v2968_v8  ;;  %v6023_v12 = vsel %vm4767_vm5, %v6021_v21, %v6022_v37  ;;  %v5510_v27 = vrot.slane %v13926_v46, 6 }
 0x206   : > { %12809 = vmatmul.mubr.msk.f32.gmra.mrb[118].mxu1 %vm800_vm3, %v6010_v63  ;;  %12699 = vmatprep.mubr.msk.f32.mxu0 %vm800_vm3, %v16315_v57  ;;  %3112 = vst.msk [vmem:[#allocation2 + $0xe8] sm:$0xff] %vm1285_vm4, %v3080_v45  ;;  %v16725_v57 = vld [vmem:[%s18062_s4 + $0x4] sm:$0xf]  ;;  %v13928_v45 = vld [vmem:[%s14208_s12 + $0x330] sm:$0xff] }
 0x207   : > { %12811 = vmatprep.mubr.msk.f32.mxu1 %vm800_vm3, %v6013_v11  ;;  %3111 = vst.msk [vmem:[#allocation2 + $0xe0] sm:$0xff] %vm1285_vm4, %v3079_v48  ;;  %v12346_v59 = vpop.f32.mrb[78].mxu1  ;;  %v6027_v11 = vrot.slane %v13925_v53, 6  ;;  %v6032_v8 = vrot.slane %v13928_v45, 6  ;;  %v521_v48 = vld [vmem:[%s14208_s12 + $0x7a8] sm:$0xff] }
 0x208   : > { %v3082_v6 = vadd.f32 %v12346_v59, %v3050_v15  ;;  %v2978_v39 = vpop.f32.mrb[79].mxu1  ;;  %v5514_v26 = vrot.slane %v521_v48, 6  ;;  %v13931_v15 = vld [vmem:[%s14208_s12 + $0x360] sm:$0xff] }
 0x209   : > { %12700 = vmatmul.mubr.msk.f32.vlgmr.msra.gmra.mrb[66].mxu0 %vm800_vm3, %v16329_v9  ;;  %v3081_v24 = vadd.f32 %v3049_v34, %v2978_v39  ;;  %v13924_v9 = vld [vmem:[%s14208_s12 + $0x2f0] sm:$0xff]  ;;  %v6030_v44 = vsel %vm4767_vm5, %v6027_v11, %v6029_v1  ;;  %v6033_v21 = vsel %vm4767_vm5, %v6031_v5, %v6032_v8  ;;  %v534_v1 = vld [vmem:[%s14208_s12 + $0x818] sm:$0xff]  ;;  %v5522_v5 = vrot.slane %v13937_v61, 6 }
 0x20a   : > { %12812 = vmatmul.mubr.msk.f32.gmra.mrb[120].mxu1 %vm800_vm3, %v6015_v55  ;;  %12898 = vmatpush3.msk.msra.mxu0 %vm875_vm0, %v16454_v3  ;;  %3114 = vst.msk [vmem:[#allocation2 + $0xf8] sm:$0xff] %vm1285_vm4, %v3082_v6  ;;  %v6026_v63 = vrot.slane %v13924_v9, 6  ;;  %v515_v3 = vld [vmem:[%s14208_s12 + $0x770] sm:$0xff]  ;;  %v13932_v6 = vld [vmem:[%s14208_s12 + $0x368] sm:$0xff]  ;;  %v5524_v48 = vrot.slane %v534_v1, 6 }
 0x20b   : > { %12702 = vmatprep.mubr.msk.f32.mxu0 %vm800_vm3, %v16342_v29  ;;  %12814 = vmatprep.mubr.msk.f32.mxu1 %vm800_vm3, %v6018_v0  ;;  %3113 = vst.msk [vmem:[#allocation2 + $0xf0] sm:$0xff] %vm1285_vm4, %v3081_v24  ;;  %v6025_v29 = vsel %vm4767_vm5, %v6022_v37, %v6024_v16  ;;  %v5509_v31 = vrot.slane %v515_v3, 6  ;;  %v13930_v37 = vld [vmem:[%s14208_s12 + $0x7b0] sm:$0xff]  ;;  %v6036_v0 = vrot.slane %v13931_v15, 6  ;;  %v6037_v39 = vrot.slane %v13932_v6, 6  ;;  %v13933_v24 = vld [vmem:[%s14208_s12 + $0x7b8] sm:$0xff] }
 0x20c   : > { %12947 = vmatprep.subr.msk.mxu0 %vm875_vm0, %v16725_v57  ;;  %v6028_v56 = vsel %vm4767_vm5, %v6026_v63, %v6027_v11  ;;  %v5515_v59 = vrot.slane %v13930_v37, 6  ;;  %v13934_v63 = vld [vmem:[%s14208_s12 + $0x7e8] sm:$0xff]  ;;  %v6042_v3 = vrot.slane %v13936_v18, 6  ;;  %v3949_v6 = vld [vmem:[#allocation2] sm:$0xff]  ;;  %v3952_v18 = vld [vmem:[#allocation2 + $0x18] sm:$0xff] }
 0x20d   : > { %12703 = vmatmul.mubr.msk.f32.gmra.mrb[68].mxu0 %vm800_vm3, %v16365_v42  ;;  %v382_v42 = vld [vmem:[%s14208_s12 + $0x338] sm:$0xff]  ;;  %v5511_v40 = vsel %vm4767_vm5, %v5509_v31, %v5510_v27  ;;  %v5520_v53 = vrot.slane %v13934_v63, 6  ;;  %v6038_v46 = vsel %vm4767_vm5, %v6036_v0, %v6037_v39  ;;  %v3950_v37 = vld [vmem:[#allocation2 + $0x8] sm:$0xff] }
 0x20e   : > { %12815 = vmatmul.mubr.msk.f32.gmra.mrb[122].mxu1 %vm800_vm3, %v6020_v62  ;;  %12705 = vmatprep.mubr.msk.f32.mxu0 %vm800_vm3, %v16372_v22  ;;  %v13929_v22 = vld [vmem:[%s14208_s12 + $0x780] sm:$0xff]  ;;  %v6034_v38 = vrot.slane %v382_v42, 6  ;;  %v5517_v62 = vrot.slane %v13933_v24, 6 }
 0x20f   : > { %12817 = vmatprep.mubr.msk.f32.mxu1 %vm800_vm3, %v6023_v12  ;;  %v5512_v55 = vrot.slane %v13929_v22, 6  ;;  %v13938_v22 = vld [vmem:[%s14208_s12 + $0x820] sm:$0xff] }
 0x210   : > { %v6035_v16 = vsel %vm4767_vm5, %v6032_v8, %v6034_v38  ;;  %v5518_v31 = vsel %vm4767_vm5, %v5515_v59, %v5517_v62  ;;  %v13939_v38 = vld [vmem:[%s14208_s12 + $0x3d0] sm:$0xff] }
 0x211   : > { %12706 = vmatmul.mubr.msk.f32.gmra.mrb[70].mxu0 %vm800_vm3, %v16391_v28  ;;  %v389_v28 = vld [vmem:[%s14208_s12 + $0x370] sm:$0xff]  ;;  %v5513_v34 = vsel %vm4767_vm5, %v5510_v27, %v5512_v55  ;;  %v396_v27 = vld [vmem:[%s14208_s12 + $0x3a8] sm:$0xff]  ;;  %v5525_v55 = vrot.slane %v13938_v22, 6 }
 0x212   : > { %12818 = vmatmul.mubr.msk.f32.gmra.mrb[124].mxu1 %vm800_vm3, %v6025_v29  ;;  %12708 = vmatprep.mubr.msk.f32.mxu0 %vm800_vm3, %v16401_v19  ;;  %v527_v19 = vld [vmem:[%s14208_s12 + $0x7e0] sm:$0xff]  ;;  %v6039_v12 = vrot.slane %v389_v28, 6  ;;  %v5516_v29 = vsel %vm4767_vm5, %v5514_v26, %v5515_v59  ;;  %v541_v59 = vld [vmem:[%s14208_s12 + $0x850] sm:$0xff] }
 0x213   : > { %12820 = vmatprep.mubr.msk.f32.mxu1 %vm800_vm3, %v6028_v56  ;;  %v5519_v9 = vrot.slane %v527_v19, 6  ;;  %v6044_v56 = vrot.slane %v396_v27, 6  ;;  %v402_v28 = vld [vmem:[%s14208_s12 + $0x3e0] sm:$0xff]  ;;  %v5529_v63 = vrot.slane %v541_v59, 6  ;;  %v3951_v27 = vld [vmem:[#allocation2 + $0x10] sm:$0xff]  ;;  %v13945_v59 = vld [vmem:[%s14208_s12 + $0x898] sm:$0xff] }
 0x214   : > { %v6040_v45 = vsel %vm4767_vm5, %v6037_v39, %v6039_v12  ;;  %v5523_v39 = vsel %vm4767_vm5, %v5520_v53, %v5522_v5  ;;  %v6049_v62 = vrot.slane %v402_v28, 6  ;;  %v5526_v12 = vsel %vm4767_vm5, %v5524_v48, %v5525_v55  ;;  %v13943_v5 = vld [vmem:[%s14208_s12 + $0x860] sm:$0xff] }
 0x215   : > { %12709 = vmatmul.mubr.msk.f32.gmra.mrb[72].mxu0 %vm800_vm3, %v16422_v30  ;;  %v13935_v30 = vld [vmem:[%s14208_s12 + $0x398] sm:$0xff]  ;;  %v5521_v8 = vsel %vm4767_vm5, %v5519_v9, %v5520_v53 }
 0x216   : > { %12821 = vmatmul.mubr.msk.f32.gmra.mrb[126].mxu1 %vm800_vm3, %v6030_v44  ;;  %12711 = vmatprep.mubr.msk.f32.mxu0 %vm800_vm3, %v5511_v40  ;;  %v6041_v11 = vrot.slane %v13935_v30, 6  ;;  %v6046_v44 = vrot.slane %v13939_v38, 6  ;;  %v13940_v40 = vld [vmem:[%s14208_s12 + $0x3d8] sm:$0xff]  ;;  %v3954_v38 = vld [vmem:[#allocation2 + $0x28] sm:$0xff] }
 0x217   : > { %12823 = vmatprep.mubr.msk.f32.mxu1 %vm800_vm3, %v6033_v21  ;;  %v6047_v21 = vrot.slane %v13940_v40, 6  ;;  %v13942_v30 = vld [vmem:[%s14208_s12 + $0x858] sm:$0xff]  ;;  %v556_v40 = vld [vmem:[%s14208_s12 + $0x8c8] sm:$0xff] }
 0x218   : > { %v6043_v42 = vsel %vm4767_vm5, %v6041_v11, %v6042_v3  ;;  %v5530_v53 = vrot.slane %v13942_v30, 6  ;;  %v13946_v30 = vld [vmem:[%s14208_s12 + $0x8d0] sm:$0xff] }
 0x219   : > { %12712 = vmatmul.mubr.msk.f32.gmra.mrb[74].mxu0 %vm800_vm3, %v5513_v34  ;;  %v6045_v34 = vsel %vm4767_vm5, %v6042_v3, %v6044_v56  ;;  %v6048_v9 = vsel %vm4767_vm5, %v6046_v44, %v6047_v21  ;;  %v6050_v61 = vsel %vm4767_vm5, %v6047_v21, %v6049_v62  ;;  %v13944_v56 = vld [vmem:[%s14208_s12 + $0x890] sm:$0xff]  ;;  %v555_v44 = vld [vmem:[%s14208_s12 + $0x8c0] sm:$0xff] }
 0x21a   : > { %12824 = vmatmul.mubr.msk.f32.gmra.mrb[128].mxu1 %vm800_vm3, %v6035_v16  ;;  %12714 = vmatprep.mubr.msk.f32.mxu0 %vm800_vm3, %v5516_v29  ;;  %v13941_v16 = vld [vmem:[%s14208_s12 + $0x828] sm:$0xff]  ;;  %v5535_v48 = vrot.slane %v13944_v56, 6 }
 0x21b   : > { %12826 = vmatprep.mubr.msk.f32.mxu1 %vm800_vm3, %v6038_v46  ;;  %v5527_v24 = vrot.slane %v13941_v16, 6  ;;  %v548_v29 = vld [vmem:[%s14208_s12 + $0x888] sm:$0xff]  ;;  %v562_v16 = vld [vmem:[%s14208_s12 + $0x8f8] sm:$0xff] }
 0x21c   : > { %v12451_v26 = vpop.f32.mrb[34].mxu0 }
 0x21d   : > { %v3982_v15 = vadd.f32 %v12451_v26, %v3950_v37  ;;  %v3758_v0 = vpop.f32.mrb[35].mxu0  ;;  %12715 = vmatmul.mubr.msk.f32.gmra.mrb[76].mxu0 %vm800_vm3, %v5518_v31  ;;  %v5528_v31 = vsel %vm4767_vm5, %v5525_v55, %v5527_v24  ;;  %v3953_v26 = vld [vmem:[#allocation2 + $0x20] sm:$0xff] }
 0x21e   : > { %12827 = vmatmul.mubr.msk.f32.gmra.mrb[130].mxu1 %vm800_vm3, %v6040_v45  ;;  %v3981_v19 = vadd.f32 %v3949_v6, %v3758_v0  ;;  %12717 = vmatprep.mubr.msk.f32.mxu0 %vm800_vm3, %v5521_v8  ;;  %v5532_v45 = vrot.slane %v13943_v5, 6  ;;  %v5531_v8 = vsel %vm4767_vm5, %v5529_v63, %v5530_v53  ;;  %v5539_v6 = vrot.slane %v555_v44, 6  ;;  %v563_v24 = vld [vmem:[%s14208_s12 + $0x900] sm:$0xff]  ;;  %v577_v44 = vld [vmem:[%s14208_s12 + $0x970] sm:$0xff] }
 0x21f   : > { %12829 = vmatprep.mubr.msk.f32.mxu1 %vm800_vm3, %v6043_v42  ;;  %4014 = vst.msk [vmem:[#allocation2 + $0x8] sm:$0xff] %vm1285_vm4, %v3982_v15  ;;  %v5534_v42 = vrot.slane %v548_v29, 6  ;;  %v5537_v15 = vrot.slane %v13945_v59, 6  ;;  %v5545_v29 = vrot.slane %v563_v24, 6 }
 0x220   : > { %4013 = vst.msk [vmem:[#allocation2] sm:$0xff] %vm1285_vm4, %v3981_v19  ;;  %v12454_v11 = vpop.f32.mrb[36].mxu0  ;;  %v5533_v37 = vsel %vm4767_vm5, %v5530_v53, %v5532_v45  ;;  %v5542_v53 = vrot.slane %v13946_v30, 6  ;;  %v13947_v45 = vld [vmem:[%s14208_s12 + $0x908] sm:$0xff] }
 0x221   : > { %v3984_v3 = vadd.f32 %v12454_v11, %v3952_v18  ;;  %v3768_v46 = vpop.f32.mrb[37].mxu0  ;;  %12718 = vmatmul.mubr.msk.f32.gmra.mrb[78].mxu0 %vm800_vm3, %v5523_v39  ;;  %v5536_v0 = vsel %vm4767_vm5, %v5534_v42, %v5535_v48  ;;  %v5540_v39 = vrot.slane %v556_v40, 6  ;;  %v5538_v63 = vsel %vm4767_vm5, %v5535_v48, %v5537_v15 }
 0x222   : > { %12830 = vmatmul.mubr.msk.f32.gmra.mrb[132].mxu1 %vm800_vm3, %v6045_v34  ;;  %v3983_v1 = vadd.f32 %v3951_v27, %v3768_v46  ;;  %12720 = vmatprep.mubr.msk.f32.mxu0 %vm800_vm3, %v5526_v12  ;;  %v3956_v34 = vld [vmem:[#allocation2 + $0x38] sm:$0xff]  ;;  %v5544_v18 = vrot.slane %v562_v16, 6  ;;  %v569_v46 = vld [vmem:[%s14208_s12 + $0x930] sm:$0xff] }
 0x223   : > { %12832 = vmatprep.mubr.msk.f32.mxu1 %vm800_vm3, %v6048_v9  ;;  %4016 = vst.msk [vmem:[#allocation2 + $0x18] sm:$0xff] %vm1285_vm4, %v3984_v3  ;;  %v5541_v11 = vsel %vm4767_vm5, %v5539_v6, %v5540_v39  ;;  %v3958_v3 = vld [vmem:[#allocation2 + $0x48] sm:$0xff]  ;;  %v570_v27 = vld [vmem:[%s14208_s12 + $0x938] sm:$0xff]  ;;  %v5543_v5 = vsel %vm4767_vm5, %v5540_v39, %v5542_v53  ;;  %v5549_v56 = vrot.slane %v569_v46, 6  ;;  %v583_v39 = vld [vmem:[%s14208_s12 + $0x9a0] sm:$0xff] }
 0x224   : > { %4015 = vst.msk [vmem:[#allocation2 + $0x10] sm:$0xff] %vm1285_vm4, %v3983_v1  ;;  %v12457_v22 = vpop.f32.mrb[38].mxu0  ;;  %v5546_v42 = vsel %vm4767_vm5, %v5544_v18, %v5545_v29  ;;  %v5550_v48 = vrot.slane %v570_v27, 6  ;;  %v3962_v6 = vld [vmem:[#allocation2 + $0x68] sm:$0xff]  ;;  %v3964_v53 = vld [vmem:[#allocation2 + $0x78] sm:$0xff]  ;;  %v591_v18 = vld [vmem:[%s14208_s12 + $0x9e0] sm:$0xff] }
 0x225   : > { %v3986_v28 = vadd.f32 %v12457_v22, %v3954_v38  ;;  %v3778_v55 = vpop.f32.mrb[39].mxu0  ;;  %12721 = vmatmul.mubr.msk.f32.gmra.mrb[80].mxu0 %vm800_vm3, %v5528_v31  ;;  %v3960_v22 = vld [vmem:[#allocation2 + $0x58] sm:$0xff]  ;;  %v576_v38 = vld [vmem:[%s14208_s12 + $0x968] sm:$0xff] }
 0x226   : > { %12833 = vmatmul.mubr.msk.f32.gmra.mrb[134].mxu1 %vm800_vm3, %v6050_v61  ;;  %v3985_v21 = vadd.f32 %v3953_v26, %v3778_v55  ;;  %12723 = vmatprep.mubr.msk.f32.mxu0 %vm800_vm3, %v5531_v8  ;;  %v5547_v8 = vrot.slane %v13947_v45, 6  ;;  %v5551_v59 = vsel %vm4767_vm5, %v5549_v56, %v5550_v48  ;;  %v5554_v15 = vrot.slane %v576_v38, 6  ;;  %v3966_v45 = vld [vmem:[#allocation2 + $0x88] sm:$0xff] }
 0x227   : > { %12835 = vmatprep.mubr.msk.f32.mxu1 %vm800_vm3, %v16318_v17  ;;  %4018 = vst.msk [vmem:[#allocation2 + $0x28] sm:$0xff] %vm1285_vm4, %v3986_v28  ;;  %v3955_v17 = vld [vmem:[#allocation2 + $0x30] sm:$0xff]  ;;  %v13952_v38 = vld [vmem:[%s14208_s12 + $0x788] sm:$0xff] }
 0x228   : > { %4017 = vst.msk [vmem:[#allocation2 + $0x20] sm:$0xff] %vm1285_vm4, %v3985_v21  ;;  %v12460_v19 = vpop.f32.mrb[40].mxu0  ;;  %v5548_v26 = vsel %vm4767_vm5, %v5545_v29, %v5547_v8  ;;  %v13948_v21 = vld [vmem:[%s14208_s12 + $0x940] sm:$0xff] }
 0x229   : > { %v3988_v62 = vadd.f32 %v12460_v19, %v3956_v34  ;;  %v3788_v12 = vpop.f32.mrb[41].mxu0  ;;  %12724 = vmatmul.mubr.msk.f32.gmra.mrb[82].mxu0 %vm800_vm3, %v5533_v37  ;;  %v5552_v37 = vrot.slane %v13948_v21, 6  ;;  %v584_v19 = vld [vmem:[%s14208_s12 + $0x9a8] sm:$0xff]  ;;  %v3967_v21 = vld [vmem:[#allocation2 + $0x90] sm:$0xff] }
 0x22a   : > { %12836 = vmatmul.mubr.msk.f32.gmra.mrb[136].mxu1 %vm800_vm3, %v16337_v2  ;;  %v3987_v9 = vadd.f32 %v3955_v17, %v3788_v12  ;;  %12726 = vmatprep.mubr.msk.f32.mxu0 %vm800_vm3, %v5536_v0  ;;  %v5555_v0 = vrot.slane %v577_v44, 6  ;;  %v13949_v12 = vld [vmem:[%s14208_s12 + $0x978] sm:$0xff]  ;;  %v5560_v30 = vrot.slane %v584_v19, 6  ;;  %v6727_v44 = vrot.slane %v13952_v38, 6 }
 0x22b   : > { %12838 = vmatprep.mubr.msk.f32.mxu1 %vm800_vm3, %v16345_v50  ;;  %4020 = vst.msk [vmem:[#allocation2 + $0x38] sm:$0xff] %vm1285_vm4, %v3988_v62  ;;  %v3957_v50 = vld [vmem:[#allocation2 + $0x40] sm:$0xff]  ;;  %v5553_v62 = vsel %vm4767_vm5, %v5550_v48, %v5552_v37  ;;  %v5557_v17 = vrot.slane %v13949_v12, 6  ;;  %v13951_v48 = vld [vmem:[%s14208_s12 + $0x9e8] sm:$0xff] }
 0x22c   : > { %4019 = vst.msk [vmem:[#allocation2 + $0x30] sm:$0xff] %vm1285_vm4, %v3987_v9  ;;  %v12463_v2 = vpop.f32.mrb[42].mxu0  ;;  %v5556_v9 = vsel %vm4767_vm5, %v5554_v15, %v5555_v0 }
 0x22d   : > { %v3990_v1 = vadd.f32 %v12463_v2, %v3958_v3  ;;  %v3798_v31 = vpop.f32.mrb[43].mxu0  ;;  %12727 = vmatmul.mubr.msk.f32.gmra.mrb[84].mxu0 %vm800_vm3, %v5538_v63  ;;  %v5559_v63 = vrot.slane %v583_v39, 6  ;;  %v16898_v3 = vld [vmem:[%s18062_s4] sm:$0xf]  ;;  %v5558_v27 = vsel %vm4767_vm5, %v5555_v0, %v5557_v17  ;;  %v13955_v39 = vld [vmem:[%s14208_s12 + $0x7c8] sm:$0xff] }
 0x22e   : > { %12839 = vmatmul.mubr.msk.f32.gmra.mrb[138].mxu1 %vm800_vm3, %v16368_v51  ;;  %v3989_v61 = vadd.f32 %v3957_v50, %v3798_v31  ;;  %12729 = vmatprep.mubr.msk.f32.mxu0 %vm800_vm3, %v5541_v11  ;;  %v590_v11 = vld [vmem:[%s14208_s12 + $0x9d8] sm:$0xff]  ;;  %v6733_v19 = vrot.slane %v13955_v39, 6 }
 0x22f   : > { %12841 = vmatprep.mubr.msk.f32.mxu1 %vm800_vm3, %v16375_v7  ;;  %4022 = vst.msk [vmem:[#allocation2 + $0x48] sm:$0xff] %vm1285_vm4, %v3990_v1  ;;  %v3959_v7 = vld [vmem:[#allocation2 + $0x50] sm:$0xff]  ;;  %v5561_v50 = vsel %vm4767_vm5, %v5559_v63, %v5560_v30  ;;  %v13956_v63 = vld [vmem:[%s14208_s12 + $0x7f8] sm:$0xff] }
 0x230   : > { %4021 = vst.msk [vmem:[#allocation2 + $0x40] sm:$0xff] %vm1285_vm4, %v3989_v61  ;;  %v12466_v51 = vpop.f32.mrb[44].mxu0  ;;  %v13950_v1 = vld [vmem:[%s14208_s12 + $0x9b0] sm:$0xff]  ;;  %v5565_v61 = vrot.slane %v591_v18, 6  ;;  %v3972_v18 = vld [vmem:[#allocation2 + $0xb8] sm:$0xff] }
 0x231   : > { %v3992_v40 = vadd.f32 %v12466_v51, %v3960_v22  ;;  %v3808_v28 = vpop.f32.mrb[45].mxu0  ;;  %12730 = vmatmul.mubr.msk.f32.gmra.mrb[86].mxu0 %vm800_vm3, %v5543_v5  ;;  %v5562_v31 = vrot.slane %v13950_v1, 6  ;;  %v5567_v51 = vrot.slane %v13951_v48, 6  ;;  %v4045_v48 = vld [vmem:[#allocation2] sm:$0xff] }
 0x232   : > { %12842 = vmatmul.mubr.msk.f32.gmra.mrb[140].mxu1 %vm800_vm3, %v16394_v32  ;;  %v3991_v55 = vadd.f32 %v3959_v7, %v3808_v28  ;;  %12732 = vmatprep.mubr.msk.f32.mxu0 %vm800_vm3, %v5546_v42  ;;  %v3965_v42 = vld [vmem:[#allocation2 + $0x80] sm:$0xff]  ;;  %v520_v7 = vld [vmem:[%s14208_s12 + $0x798] sm:$0xff] }
 0x233   : > { %12844 = vmatprep.mubr.msk.f32.mxu1 %vm800_vm3, %v16406_v35  ;;  %4024 = vst.msk [vmem:[#allocation2 + $0x58] sm:$0xff] %vm1285_vm4, %v3992_v40  ;;  %v3961_v35 = vld [vmem:[#allocation2 + $0x60] sm:$0xff]  ;;  %v13953_v40 = vld [vmem:[%s14208_s12 + $0x790] sm:$0xff]  ;;  %v6730_v15 = vrot.slane %v520_v7, 6  ;;  %v13960_v7 = vld [vmem:[%s14208_s12 + $0x868] sm:$0xff] }
 0x234   : > { %4023 = vst.msk [vmem:[#allocation2 + $0x50] sm:$0xff] %vm1285_vm4, %v3991_v55  ;;  %v12469_v32 = vpop.f32.mrb[46].mxu0  ;;  %v6728_v28 = vrot.slane %v13953_v40, 6  ;;  %v3968_v55 = vld [vmem:[#allocation2 + $0x98] sm:$0xff] }
 0x235   : > { %v3994_v34 = vadd.f32 %v12469_v32, %v3962_v6  ;;  %v3818_v16 = vpop.f32.mrb[47].mxu0  ;;  %12733 = vmatmul.mubr.msk.f32.gmra.mrb[88].mxu0 %vm800_vm3, %v5548_v26  ;;  %v13954_v32 = vld [vmem:[%s14208_s12 + $0x7c0] sm:$0xff] }
 0x236   : > { %12845 = vmatmul.mubr.msk.f32.gmra.mrb[142].mxu1 %vm800_vm3, %v16425_v14  ;;  %v3993_v24 = vadd.f32 %v3961_v35, %v3818_v16  ;;  %12735 = vmatprep.mubr.msk.f32.mxu0 %vm800_vm3, %v5551_v59  ;;  %v5568_v59 = vsel %vm4767_vm5, %v5565_v61, %v5567_v51  ;;  %v6729_v0 = vsel %vm4767_vm5, %v6727_v44, %v6728_v28  ;;  %v6732_v6 = vrot.slane %v13954_v32, 6  ;;  %v3970_v16 = vld [vmem:[#allocation2 + $0xa8] sm:$0xff]  ;;  %v3975_v32 = vld [vmem:[#allocation2 + $0xd0] sm:$0xff] }
 0x237   : > { %12849 = vmatprep.mubr.msk.f32.mxu1 %vm800_vm3, %v16561_v4  ;;  %4026 = vst.msk [vmem:[#allocation2 + $0x68] sm:$0xff] %vm1285_vm4, %v3994_v34  ;;  %v3963_v4 = vld [vmem:[#allocation2 + $0x70] sm:$0xff]  ;;  %v6731_v12 = vsel %vm4767_vm5, %v6728_v28, %v6730_v15 }
 0x238   : > { %4025 = vst.msk [vmem:[#allocation2 + $0x60] sm:$0xff] %vm1285_vm4, %v3993_v24  ;;  %v12472_v14 = vpop.f32.mrb[48].mxu0  ;;  %v526_v34 = vld [vmem:[%s14208_s12 + $0x7d0] sm:$0xff]  ;;  %v3969_v24 = vld [vmem:[#allocation2 + $0xa0] sm:$0xff] }
 0x239   : > { %v3996_v29 = vadd.f32 %v12472_v14, %v3964_v53  ;;  %v3828_v2 = vpop.f32.mrb[49].mxu0  ;;  %12736 = vmatmul.mubr.msk.f32.gmra.mrb[90].mxu0 %vm800_vm3, %v5553_v62  ;;  %v6735_v17 = vrot.slane %v526_v34, 6  ;;  %v13957_v14 = vld [vmem:[%s14208_s12 + $0x800] sm:$0xff] }
 0x23a   : > { %12850 = vmatmul.mubr.msk.f32.vlgmr.msra.gmra.mrb[112].mxu1 %vm800_vm3, %v16572_v58  ;;  %v3995_v46 = vadd.f32 %v3963_v4, %v3828_v2  ;;  %12738 = vmatprep.mubr.msk.f32.mxu0 %vm800_vm3, %v5556_v9  ;;  %v5564_v58 = vrot.slane %v590_v11, 6  ;;  %v6734_v9 = vsel %vm4767_vm5, %v6732_v6, %v6733_v19  ;;  %v6738_v53 = vrot.slane %v13957_v14, 6  ;;  %v532_v11 = vld [vmem:[%s14208_s12 + $0x808] sm:$0xff]  ;;  %v3971_v4 = vld [vmem:[#allocation2 + $0xb0] sm:$0xff] }
 0x23b   : > { %12852 = vmatprep.mubr.msk.f32.mxu1 %vm800_vm3, %v16586_v23  ;;  %4028 = vst.msk [vmem:[#allocation2 + $0x78] sm:$0xff] %vm1285_vm4, %v3996_v29  ;;  %12998 = vmatpush3.msk.msra.mxu1 %vm875_vm0, %v16667_v25  ;;  %v5563_v25 = vsel %vm4767_vm5, %v5560_v30, %v5562_v31  ;;  %v6737_v30 = vrot.slane %v13956_v63, 6  ;;  %v6740_v1 = vrot.slane %v532_v11, 6  ;;  %v4047_v6 = vld [vmem:[#allocation2 + $0x10] sm:$0xff]  ;;  %v3977_v11 = vld [vmem:[#allocation2 + $0xe0] sm:$0xff] }
 0x23c   : > { %4027 = vst.msk [vmem:[#allocation2 + $0x70] sm:$0xff] %vm1285_vm4, %v3995_v46  ;;  %v12475_v5 = vpop.f32.mrb[50].mxu0  ;;  %13047 = vmatprep.subr.msk.mxu1 %vm875_vm0, %v16898_v3  ;;  %v5566_v22 = vsel %vm4767_vm5, %v5564_v58, %v5565_v61  ;;  %v13959_v61 = vld [vmem:[%s14208_s12 + $0x838] sm:$0xff] }
 0x23d   : > { %v3998_v23 = vadd.f32 %v12475_v5, %v3966_v45  ;;  %v3838_v8 = vpop.f32.mrb[51].mxu0  ;;  %12739 = vmatmul.mubr.msk.f32.gmra.mrb[92].mxu0 %vm800_vm3, %v5558_v27  ;;  %v6736_v27 = vsel %vm4767_vm5, %v6733_v19, %v6735_v17  ;;  %v6739_v31 = vsel %vm4767_vm5, %v6737_v30, %v6738_v53  ;;  %v539_v5 = vld [vmem:[%s14208_s12 + $0x840] sm:$0xff]  ;;  %v3974_v45 = vld [vmem:[#allocation2 + $0xc8] sm:$0xff]  ;;  %v6741_v44 = vsel %vm4767_vm5, %v6738_v53, %v6740_v1 }
 0x23e   : > { %12853 = vmatmul.mubr.msk.f32.gmra.mrb[114].mxu1 %vm800_vm3, %v16596_v10  ;;  %v3997_v56 = vadd.f32 %v3965_v42, %v3838_v8  ;;  %12741 = vmatprep.mubr.msk.f32.mxu0 %vm800_vm3, %v5561_v50  ;;  %v13958_v50 = vld [vmem:[%s14208_s12 + $0x830] sm:$0xff]  ;;  %v6745_v40 = vrot.slane %v539_v5, 6  ;;  %v560_v5 = vld [vmem:[%s14208_s12 + $0x8e8] sm:$0xff] }
 0x23f   : > { %12855 = vmatprep.mubr.msk.f32.mxu1 %vm800_vm3, %v16604_v13  ;;  %4030 = vst.msk [vmem:[#allocation2 + $0x88] sm:$0xff] %vm1285_vm4, %v3998_v23  ;;  %v6742_v58 = vrot.slane %v13958_v50, 6  ;;  %v4046_v23 = vld [vmem:[#allocation2 + $0x8] sm:$0xff]  ;;  %v13964_v50 = vld [vmem:[%s14208_s12 + $0x8d8] sm:$0xff] }
 0x240   : > { %4029 = vst.msk [vmem:[#allocation2 + $0x80] sm:$0xff] %vm1285_vm4, %v3997_v56  ;;  %v12478_v10 = vpop.f32.mrb[52].mxu0 }
 0x241   : > { %v4000_v13 = vadd.f32 %v12478_v10, %v3968_v55  ;;  %v3848_v26 = vpop.f32.mrb[53].mxu0  ;;  %12742 = vmatmul.mubr.msk.f32.gmra.mrb[94].mxu0 %vm800_vm3, %v5563_v25  ;;  %v3973_v25 = vld [vmem:[#allocation2 + $0xc0] sm:$0xff]  ;;  %v6747_v10 = vrot.slane %v13960_v7, 6  ;;  %v13961_v55 = vld [vmem:[%s14208_s12 + $0x870] sm:$0xff]  ;;  %v6760_v7 = vrot.slane %v560_v5, 6  ;;  %v18401_v5 = vld [vmem:[#allocation68_spill] sm:$0xff] }
 0x242   : > { %12856 = vmatmul.mubr.msk.f32.gmra.mrb[116].mxu1 %vm800_vm3, %v16620_v36  ;;  %v3999_v37 = vadd.f32 %v3967_v21, %v3848_v26  ;;  %12744 = vmatprep.mubr.msk.f32.mxu0 %vm800_vm3, %v5566_v22  ;;  %v4048_v21 = vld [vmem:[#allocation2 + $0x18] sm:$0xff] }
 0x243   : > { %12858 = vmatprep.mubr.msk.f32.mxu1 %vm800_vm3, %v16626_v41  ;;  %4032 = vst.msk [vmem:[#allocation2 + $0x98] sm:$0xff] %vm1285_vm4, %v4000_v13  ;;  %v546_v13 = vld [vmem:[%s14208_s12 + $0x878] sm:$0xff] }
 0x244   : > { %4031 = vst.msk [vmem:[#allocation2 + $0x90] sm:$0xff] %vm1285_vm4, %v3999_v37  ;;  %v12481_v36 = vpop.f32.mrb[54].mxu0 }
 0x245   : > { %v4002_v35 = vadd.f32 %v12481_v36, %v3970_v16  ;;  %v3858_v41 = vpop.f32.mrb[55].mxu0  ;;  %12745 = vmatmul.mubr.msk.f32.gmra.mrb[96].mxu0 %vm800_vm3, %v5568_v59  ;;  %v6750_v16 = vrot.slane %v546_v13, 6  ;;  %v13967_v13 = vld [vmem:[%s14208_s12 + $0x918] sm:$0xff] }
 0x246   : > { %12859 = vmatmul.mubr.msk.f32.gmra.mrb[118].mxu1 %vm800_vm3, %v16640_v52  ;;  %v4001_v62 = vadd.f32 %v3969_v24, %v3858_v41  ;;  %12899 = vmatprep.mubr.msk.f32.mxu0 %vm800_vm3, %v18341_v47  ;;  %v16955_v47 = vld [vmem:[%s18062_s4 + $0x14] sm:$0xf]  ;;  %v13962_v41 = vld [vmem:[%s14208_s12 + $0x8a0] sm:$0xff] }
 0x247   : > { %12861 = vmatprep.mubr.msk.f32.mxu1 %vm800_vm3, %v6729_v0  ;;  %4034 = vst.msk [vmem:[#allocation2 + $0xa8] sm:$0xff] %vm1285_vm4, %v4002_v35  ;;  %v6752_v24 = vrot.slane %v13962_v41, 6 }
 0x248   : > { %4033 = vst.msk [vmem:[#allocation2 + $0xa0] sm:$0xff] %vm1285_vm4, %v4001_v62  ;;  %v12484_v52 = vpop.f32.mrb[56].mxu0  ;;  %v13963_v62 = vld [vmem:[%s14208_s12 + $0x8a8] sm:$0xff] }
 0x249   : > { %v4004_v29 = vadd.f32 %v12484_v52, %v3972_v18  ;;  %v3868_v2 = vpop.f32.mrb[57].mxu0  ;;  %12900 = vmatmul.mubr.msk.f32.vlgmr.msra.gmra.mrb[98].mxu0 %vm800_vm3, %v18342_v43  ;;  %v6743_v43 = vrot.slane %v13959_v61, 6  ;;  %v4049_v52 = vld [vmem:[#allocation2 + $0x20] sm:$0xff] }
 0x24a   : > { %12862 = vmatmul.mubr.msk.f32.gmra.mrb[120].mxu1 %vm800_vm3, %v6731_v12  ;;  %v4003_v46 = vadd.f32 %v3971_v4, %v3868_v2  ;;  %12948 = vmatpush3.msk.msra.mxu0 %vm875_vm0, %v16725_v57  ;;  %v553_v12 = vld [vmem:[%s14208_s12 + $0x8b0] sm:$0xff]  ;;  %v13965_v61 = vld [vmem:[%s14208_s12 + $0x8e0] sm:$0xff] }
 0x24b   : > { %12864 = vmatprep.mubr.msk.f32.mxu1 %vm800_vm3, %v6734_v9  ;;  %4036 = vst.msk [vmem:[#allocation2 + $0xb8] sm:$0xff] %vm1285_vm4, %v4004_v29  ;;  %12902 = vmatprep.mubr.msk.f32.mxu0 %vm800_vm3, %v18343_v54  ;;  %v6744_v28 = vsel %vm4767_vm5, %v6742_v58, %v6743_v43  ;;  %v6746_v36 = vsel %vm4767_vm5, %v6743_v43, %v6745_v40  ;;  %v4050_v9 = vld [vmem:[#allocation2 + $0x28] sm:$0xff]  ;;  %v18393_v29 = vld [vmem:[#allocation59_spill] sm:$0xff]  ;;  %v6755_v1 = vrot.slane %v553_v12, 6  ;;  %v6757_v58 = vrot.slane %v13964_v50, 6 }
 0x24c   : > { %13147 = vmatprep.subr.msk.mxu0 %vm875_vm0, %v16955_v47  ;;  %4035 = vst.msk [vmem:[#allocation2 + $0xb0] sm:$0xff] %vm1285_vm4, %v4003_v46  ;;  %v12487_v57 = vpop.f32.mrb[58].mxu0  ;;  %v18394_v46 = vld [vmem:[#allocation24_spill] sm:$0xff]  ;;  %v6758_v43 = vrot.slane %v13965_v61, 6  ;;  %v18396_v40 = vld [vmem:[#allocation11_spill] sm:$0xff] }
 0x24d   : > { %v12551_v8 = vpop.f32.mrb[80].mxu1  ;;  %v4006_v42 = vadd.f32 %v12487_v57, %v3974_v45  ;;  %v3878_v54 = vpop.f32.mrb[59].mxu0  ;;  %12903 = vmatmul.mubr.msk.f32.gmra.mrb[100].mxu0 %vm800_vm3, %v18344_v60  ;;  %v6748_v60 = vrot.slane %v13961_v55, 6  ;;  %v3980_v45 = vld [vmem:[#allocation2 + $0xf8] sm:$0xff]  ;;  %v13966_v55 = vld [vmem:[%s14208_s12 + $0x910] sm:$0xff]  ;;  %v4057_v61 = vld [vmem:[#allocation2 + $0x60] sm:$0xff] }
 0x24e   : > { %v4682_v56 = vadd.f32 %v12551_v8, %v4046_v23  ;;  %v4522_v51 = vpop.f32.mrb[81].mxu1  ;;  %12865 = vmatmul.mubr.msk.f32.gmra.mrb[122].mxu1 %vm800_vm3, %v6736_v27  ;;  %v4005_v22 = vadd.f32 %v3973_v25, %v3878_v54  ;;  %12905 = vmatprep.mubr.msk.f32.mxu0 %vm800_vm3, %v18345_v20  ;;  %v3976_v20 = vld [vmem:[#allocation2 + $0xd8] sm:$0xff]  ;;  %v3979_v25 = vld [vmem:[#allocation2 + $0xf0] sm:$0xff] }
 0x24f   : > { %v4681_v38 = vadd.f32 %v4522_v51, %v4045_v48  ;;  %12867 = vmatprep.mubr.msk.f32.mxu1 %vm800_vm3, %v6739_v31  ;;  %4038 = vst.msk [vmem:[#allocation2 + $0xc8] sm:$0xff] %vm1285_vm4, %v4006_v42  ;;  %v6749_v35 = vsel %vm4767_vm5, %v6747_v10, %v6748_v60  ;;  %v6751_v27 = vsel %vm4767_vm5, %v6748_v60, %v6750_v16  ;;  %v4052_v23 = vld [vmem:[#allocation2 + $0x38] sm:$0xff]  ;;  %v4051_v48 = vld [vmem:[#allocation2 + $0x30] sm:$0xff]  ;;  %v6762_v60 = vrot.slane %v13966_v55, 6 }
 0x250   : > { %4714 = vst.msk [vmem:[#allocation2 + $0x8] sm:$0xff] %vm1285_vm4, %v4682_v56  ;;  %4037 = vst.msk [vmem:[#allocation2 + $0xc0] sm:$0xff] %vm1285_vm4, %v4005_v22  ;;  %v12490_v26 = vpop.f32.mrb[60].mxu0  ;;  %v18395_v22 = vld [vmem:[#allocation28_spill] sm:$0xff]  ;;  %v6759_v10 = vsel %vm4767_vm5, %v6757_v58, %v6758_v43 }
 0x251   : > { %4713 = vst.msk [vmem:[#allocation2] sm:$0xff] %vm1285_vm4, %v4681_v38  ;;  %v12554_v37 = vpop.f32.mrb[82].mxu1  ;;  %v4008_v59 = vadd.f32 %v12490_v26, %v3976_v20  ;;  %v3888_v0 = vpop.f32.mrb[61].mxu0  ;;  %12906 = vmatmul.mubr.msk.f32.gmra.mrb[102].mxu0 %vm800_vm3, %v18346_v49  ;;  %v6753_v49 = vrot.slane %v13963_v62, 6  ;;  %v6763_v26 = vrot.slane %v13967_v13, 6  ;;  %v567_v20 = vld [vmem:[%s14208_s12 + $0x920] sm:$0xff] }
 0x252   : > { %v4684_v15 = vadd.f32 %v12554_v37, %v4048_v21  ;;  %v4532_v39 = vpop.f32.mrb[83].mxu1  ;;  %12868 = vmatmul.mubr.msk.f32.gmra.mrb[124].mxu1 %vm800_vm3, %v6741_v44  ;;  %v4007_v19 = vadd.f32 %v3975_v32, %v3888_v0  ;;  %12908 = vmatprep.mubr.msk.f32.mxu0 %vm800_vm3, %v18347_v33  ;;  %v3978_v33 = vld [vmem:[#allocation2 + $0xe8] sm:$0xff]  ;;  %v18397_v32 = vld [vmem:[#allocation29_spill] sm:$0xff] }
 0x253   : > { %v4683_v34 = vadd.f32 %v4532_v39, %v4047_v6  ;;  %12870 = vmatprep.mubr.msk.f32.mxu1 %vm800_vm3, %v6744_v28  ;;  %4040 = vst.msk [vmem:[#allocation2 + $0xd8] sm:$0xff] %vm1285_vm4, %v4008_v59  ;;  %v6754_v31 = vsel %vm4767_vm5, %v6752_v24, %v6753_v49  ;;  %v6756_v28 = vsel %vm4767_vm5, %v6753_v49, %v6755_v1  ;;  %v4054_v21 = vld [vmem:[#allocation2 + $0x48] sm:$0xff]  ;;  %v13969_v24 = vld [vmem:[%s14208_s12 + $0x950] sm:$0xff]  ;;  %v4056_v49 = vld [vmem:[#allocation2 + $0x58] sm:$0xff] }
 0x254   : > { %4716 = vst.msk [vmem:[#allocation2 + $0x18] sm:$0xff] %vm1285_vm4, %v4684_v15  ;;  %4039 = vst.msk [vmem:[#allocation2 + $0xd0] sm:$0xff] %vm1285_vm4, %v4007_v19  ;;  %v12493_v17 = vpop.f32.mrb[62].mxu0  ;;  %v4053_v15 = vld [vmem:[#allocation2 + $0x40] sm:$0xff]  ;;  %v18398_v39 = vld [vmem:[#allocation12_spill] sm:$0xff]  ;;  %v6761_v19 = vsel %vm4767_vm5, %v6758_v43, %v6760_v7  ;;  %v6764_v16 = vsel %vm4767_vm5, %v6762_v60, %v6763_v26  ;;  %v6768_v62 = vrot.slane %v13969_v24, 6 }
 0x255   : > { %4715 = vst.msk [vmem:[#allocation2 + $0x10] sm:$0xff] %vm1285_vm4, %v4683_v34  ;;  %v12557_v63 = vpop.f32.mrb[84].mxu1  ;;  %v4010_v30 = vadd.f32 %v12493_v17, %v3978_v33  ;;  %v3898_v53 = vpop.f32.mrb[63].mxu0  ;;  %12909 = vmatmul.mubr.msk.f32.gmra.mrb[104].mxu0 %vm800_vm3, %v18393_v29  ;;  %v6765_v34 = vrot.slane %v567_v20, 6  ;;  %v4055_v33 = vld [vmem:[#allocation2 + $0x50] sm:$0xff]  ;;  %v13970_v29 = vld [vmem:[%s14208_s12 + $0x980] sm:$0xff] }
 0x256   : > { %v4686_v14 = vadd.f32 %v12557_v63, %v4050_v9  ;;  %v4542_v18 = vpop.f32.mrb[85].mxu1  ;;  %12871 = vmatmul.mubr.msk.f32.gmra.mrb[126].mxu1 %vm800_vm3, %v6746_v36  ;;  %v4009_v2 = vadd.f32 %v3977_v11, %v3898_v53  ;;  %12911 = vmatprep.mubr.msk.f32.mxu0 %vm800_vm3, %v18394_v46  ;;  %v574_v36 = vld [vmem:[%s14208_s12 + $0x958] sm:$0xff]  ;;  %v18399_v63 = vld [vmem:[#allocation13_spill] sm:$0xff]  ;;  %v17061_v1 = vld [vmem:[%s14208_s12 + $0xa28] sm:$0xff] }
 0x257   : > { %v4685_v4 = vadd.f32 %v4542_v18, %v4049_v52  ;;  %12873 = vmatprep.mubr.msk.f32.mxu1 %vm800_vm3, %v6749_v35  ;;  %4042 = vst.msk [vmem:[#allocation2 + $0xe8] sm:$0xff] %vm1285_vm4, %v4010_v30  ;;  %v13968_v35 = vld [vmem:[%s14208_s12 + $0x948] sm:$0xff]  ;;  %v6770_v30 = vrot.slane %v574_v36, 6  ;;  %v18400_v53 = vld [vmem:[#allocation14_spill] sm:$0xff]  ;;  %v6766_v11 = vsel %vm4767_vm5, %v6763_v26, %v6765_v34  ;;  %v581_v52 = vld [vmem:[%s14208_s12 + $0x990] sm:$0xff] }
 0x258   : > { %4718 = vst.msk [vmem:[#allocation2 + $0x28] sm:$0xff] %vm1285_vm4, %v4686_v14  ;;  %4041 = vst.msk [vmem:[#allocation2 + $0xe0] sm:$0xff] %vm1285_vm4, %v4009_v2  ;;  %v12496_v57 = vpop.f32.mrb[64].mxu0  ;;  %v6767_v41 = vrot.slane %v13968_v35, 6  ;;  %v6772_v2 = vrot.slane %v13970_v29, 6  ;;  %v606_v7 = vld [vmem:[%s14208_s12 + $0xa58] sm:$0xff] }
 0x259   : > { %4717 = vst.msk [vmem:[#allocation2 + $0x20] sm:$0xff] %vm1285_vm4, %v4685_v4  ;;  %v12560_v8 = vpop.f32.mrb[86].mxu1  ;;  %v4012_v42 = vadd.f32 %v12496_v57, %v3980_v45  ;;  %v3908_v54 = vpop.f32.mrb[65].mxu0  ;;  %12912 = vmatmul.mubr.msk.f32.gmra.mrb[106].mxu0 %vm800_vm3, %v18395_v22  ;;  %v13971_v4 = vld [vmem:[%s14208_s12 + $0x988] sm:$0xff]  ;;  %v6771_v57 = vsel %vm4767_vm5, %v6768_v62, %v6770_v30  ;;  %v6775_v45 = vrot.slane %v581_v52, 6  ;;  %v4059_v60 = vld [vmem:[#allocation2 + $0x70] sm:$0xff] }
 0x25a   : > { %v4688_v56 = vadd.f32 %v12560_v8, %v4052_v23  ;;  %v4552_v51 = vpop.f32.mrb[87].mxu1  ;;  %12874 = vmatmul.mubr.msk.f32.gmra.mrb[128].mxu1 %vm800_vm3, %v6751_v27  ;;  %v4011_v38 = vadd.f32 %v3979_v25, %v3908_v54  ;;  %12914 = vmatprep.mubr.msk.f32.mxu0 %vm800_vm3, %v18396_v40  ;;  %v6769_v18 = vsel %vm4767_vm5, %v6767_v41, %v6768_v62  ;;  %v6773_v46 = vrot.slane %v13971_v4, 6  ;;  %v599_v27 = vld [vmem:[%s14208_s12 + $0xa20] sm:$0xff]  ;;  %v13972_v23 = vld [vmem:[%s14208_s12 + $0x9b8] sm:$0xff]  ;;  %v588_v22 = vld [vmem:[%s14208_s12 + $0x9c8] sm:$0xff] }
 0x25b   : > { %v4687_v44 = vadd.f32 %v4552_v51, %v4051_v48  ;;  %12876 = vmatprep.mubr.msk.f32.mxu1 %vm800_vm3, %v6754_v31  ;;  %4044 = vst.msk [vmem:[#allocation2 + $0xf8] sm:$0xff] %vm1285_vm4, %v4012_v42  ;;  %v4058_v31 = vld [vmem:[#allocation2 + $0x68] sm:$0xff]  ;;  %v6777_v8 = vrot.slane %v13972_v23, 6  ;;  %v13973_v54 = vld [vmem:[%s14208_s12 + $0x9c0] sm:$0xff]  ;;  %v7293_v48 = vrot.slane %v599_v27, 2  ;;  %v7294_v51 = vrot.slane %v17061_v1, 2 }
 0x25c   : > { %4720 = vst.msk [vmem:[#allocation2 + $0x38] sm:$0xff] %vm1285_vm4, %v4688_v56  ;;  %4043 = vst.msk [vmem:[#allocation2 + $0xf0] sm:$0xff] %vm1285_vm4, %v4011_v38  ;;  %v18402_v56 = vld [vmem:[#allocation72_spill] sm:$0xff]  ;;  %v6778_v25 = vrot.slane %v13973_v54, 6  ;;  %v6774_v38 = vsel %vm4767_vm5, %v6772_v2, %v6773_v46  ;;  %v4060_v40 = vld [vmem:[#allocation2 + $0x78] sm:$0xff]  ;;  %v6776_v20 = vsel %vm4767_vm5, %v6773_v46, %v6775_v45  ;;  %v7298_v36 = vrot.slane %v606_v7, 2 }
 0x25d   : > { %4719 = vst.msk [vmem:[#allocation2 + $0x30] sm:$0xff] %vm1285_vm4, %v4687_v44  ;;  %v12563_v37 = vpop.f32.mrb[88].mxu1  ;;  %12915 = vmatmul.mubr.msk.f32.gmra.mrb[108].mxu0 %vm800_vm3, %v18397_v32  ;;  %v601_v44 = vld [vmem:[%s14208_s12 + $0xa30] sm:$0xff]  ;;  %v18403_v26 = vld [vmem:[#allocation76_spill] sm:$0xff]  ;;  %v595_v35 = vld [vmem:[%s14208_s12 + $0xa00] sm:$0xff] }
 0x25e   : > { %v4690_v59 = vadd.f32 %v12563_v37, %v4054_v21  ;;  %v4562_v0 = vpop.f32.mrb[89].mxu1  ;;  %12877 = vmatmul.mubr.msk.f32.gmra.mrb[130].mxu1 %vm800_vm3, %v6756_v28  ;;  %12917 = vmatprep.mubr.msk.f32.mxu0 %vm800_vm3, %v18398_v39  ;;  %v6780_v21 = vrot.slane %v588_v22, 6  ;;  %v7296_v32 = vrot.slane %v601_v44, 2  ;;  %v608_v41 = vld [vmem:[%s14208_s12 + $0xa68] sm:$0xff]  ;;  %v615_v46 = vld [vmem:[%s14208_s12 + $0xaa0] sm:$0xff]  ;;  %v4064_v27 = vld [vmem:[#allocation2 + $0x98] sm:$0xff] }
 0x25f   : > { %v4689_v6 = vadd.f32 %v4562_v0, %v4053_v15  ;;  %12879 = vmatprep.mubr.msk.f32.mxu1 %vm800_vm3, %v6759_v10  ;;  %v607_v10 = vld [vmem:[%s14208_s12 + $0xa60] sm:$0xff]  ;;  %v6779_v15 = vsel %vm4767_vm5, %v6777_v8, %v6778_v25  ;;  %v7295_v0 = vsel %vm687_vm2, %v7293_v48, %v7294_v51  ;;  %v4062_v24 = vld [vmem:[#allocation2 + $0x88] sm:$0xff]  ;;  %v7301_v52 = vrot.slane %v608_v41, 2  ;;  %v622_v54 = vld [vmem:[%s14208_s12 + $0xad8] sm:$0xff] }
 0x260   : > { %4722 = vst.msk [vmem:[#allocation2 + $0x48] sm:$0xff] %vm1285_vm4, %v4690_v59  ;;  %v18404_v59 = vld [vmem:[#allocation15_spill] sm:$0xff]  ;;  %v6781_v30 = vsel %vm4767_vm5, %v6778_v25, %v6780_v21  ;;  %v7306_v23 = vrot.slane %v615_v46, 2  ;;  %v4066_v25 = vld [vmem:[#allocation2 + $0xa8] sm:$0xff]  ;;  %v13976_v7 = vld [vmem:[%s14208_s12 + $0x3f0] sm:$0xff] }
 0x261   : > { %4721 = vst.msk [vmem:[#allocation2 + $0x40] sm:$0xff] %vm1285_vm4, %v4689_v6  ;;  %v12566_v12 = vpop.f32.mrb[90].mxu1  ;;  %12918 = vmatmul.mubr.msk.f32.gmra.mrb[110].mxu0 %vm800_vm3, %v18399_v63  ;;  %v13974_v6 = vld [vmem:[%s14208_s12 + $0x9f0] sm:$0xff]  ;;  %v18405_v63 = vld [vmem:[#allocation16_spill] sm:$0xff]  ;;  %v4065_v44 = vld [vmem:[#allocation2 + $0xa0] sm:$0xff] }
 0x262   : > { %v4692_v17 = vadd.f32 %v12566_v12, %v4056_v49  ;;  %v4572_v9 = vpop.f32.mrb[91].mxu1  ;;  %12880 = vmatmul.mubr.msk.f32.gmra.mrb[132].mxu1 %vm800_vm3, %v6761_v19  ;;  %12920 = vmatprep.mubr.msk.f32.mxu0 %vm800_vm3, %v18400_v53  ;;  %v6782_v39 = vrot.slane %v13974_v6, 6  ;;  %v13975_v19 = vld [vmem:[%s14208_s12 + $0x9f8] sm:$0xff]  ;;  %v613_v49 = vld [vmem:[%s14208_s12 + $0xa90] sm:$0xff]  ;;  %v7297_v53 = vsel %vm687_vm2, %v7294_v51, %v7296_v32  ;;  %v627_v51 = vld [vmem:[%s14208_s12 + $0xb00] sm:$0xff] }
 0x263   : > { %v4691_v14 = vadd.f32 %v4572_v9, %v4055_v33  ;;  %12882 = vmatprep.mubr.msk.f32.mxu1 %vm800_vm3, %v6764_v16  ;;  %v6783_v34 = vrot.slane %v13975_v19, 6  ;;  %v7299_v16 = vrot.slane %v607_v10, 2  ;;  %v614_v12 = vld [vmem:[%s14208_s12 + $0xa98] sm:$0xff]  ;;  %v4061_v33 = vld [vmem:[#allocation2 + $0x80] sm:$0xff]  ;;  %v7303_v2 = vrot.slane %v613_v49, 2  ;;  %v628_v22 = vld [vmem:[%s14208_s12 + $0xb08] sm:$0xff] }
 0x264   : > { %4724 = vst.msk [vmem:[#allocation2 + $0x58] sm:$0xff] %vm1285_vm4, %v4692_v17  ;;  %v7304_v4 = vrot.slane %v614_v12, 2  ;;  %v4068_v21 = vld [vmem:[#allocation2 + $0xb8] sm:$0xff]  ;;  %v4067_v32 = vld [vmem:[#allocation2 + $0xb0] sm:$0xff]  ;;  %v636_v49 = vld [vmem:[%s14208_s12 + $0xb48] sm:$0xff] }
 0x265   : > { %4723 = vst.msk [vmem:[#allocation2 + $0x50] sm:$0xff] %vm1285_vm4, %v4691_v14  ;;  %v12569_v50 = vpop.f32.mrb[92].mxu1  ;;  %12921 = vmatmul.mubr.msk.f32.gmra.mrb[112].mxu0 %vm800_vm3, %v18401_v5  ;;  %v7300_v29 = vsel %vm687_vm2, %v7298_v36, %v7299_v16  ;;  %v7302_v45 = vsel %vm687_vm2, %v7299_v16, %v7301_v52  ;;  %v17142_v19 = vld [vmem:[%s18062_s4 + $0x18] sm:$0xf]  ;;  %v13978_v36 = vld [vmem:[%s14208_s12 + $0x428] sm:$0xff]  ;;  %v17168_v46 = vld [vmem:[%s14208_s12 + $0x20] sm:$0xff] }
 0x266   : > { %v4694_v58 = vadd.f32 %v12569_v50, %v4058_v31  ;;  %v4582_v43 = vpop.f32.mrb[93].mxu1  ;;  %12883 = vmatmul.mubr.msk.f32.gmra.mrb[134].mxu1 %vm800_vm3, %v6766_v11  ;;  %12923 = vmatprep.mubr.msk.f32.mxu0 %vm800_vm3, %v18402_v56  ;;  %v6785_v11 = vrot.slane %v595_v35, 6  ;;  %v620_v31 = vld [vmem:[%s14208_s12 + $0xac8] sm:$0xff]  ;;  %v621_v50 = vld [vmem:[%s14208_s12 + $0xad0] sm:$0xff]  ;;  %v7305_v8 = vsel %vm687_vm2, %v7303_v2, %v7304_v4  ;;  %v7307_v10 = vsel %vm687_vm2, %v7304_v4, %v7306_v23 }
 0x267   : > { %v4693_v42 = vadd.f32 %v4582_v43, %v4057_v61  ;;  %12885 = vmatprep.mubr.msk.f32.mxu1 %vm800_vm3, %v6769_v18  ;;  %v6784_v18 = vsel %vm4767_vm5, %v6782_v39, %v6783_v34  ;;  %v4063_v61 = vld [vmem:[#allocation2 + $0x90] sm:$0xff]  ;;  %v7309_v56 = vrot.slane %v621_v50, 2  ;;  %v13977_v39 = vld [vmem:[%s14208_s12 + $0x3f8] sm:$0xff]  ;;  %v4070_v12 = vld [vmem:[#allocation2 + $0xc8] sm:$0xff] }
 0x268   : > { %4726 = vst.msk [vmem:[#allocation2 + $0x68] sm:$0xff] %vm1285_vm4, %v4694_v58  ;;  %v289_v50 = vld [vmem:[%s14208_s12 + $0x50] sm:$0xff] }
 0x269   : > { %4725 = vst.msk [vmem:[#allocation2 + $0x60] sm:$0xff] %vm1285_vm4, %v4693_v42  ;;  %v12572_v28 = vpop.f32.mrb[94].mxu1  ;;  %12924 = vmatmul.mubr.msk.f32.gmra.mrb[114].mxu0 %vm800_vm3, %v18403_v26  ;;  %v7308_v42 = vrot.slane %v620_v31, 2  ;;  %v7314_v26 = vrot.slane %v628_v22, 2  ;;  %v288_v31 = vld [vmem:[%s14208_s12 + $0x48] sm:$0xff]  ;;  %v295_v22 = vld [vmem:[%s14208_s12 + $0x80] sm:$0xff] }
 0x26a   : > { %v4696_v55 = vadd.f32 %v12572_v28, %v4060_v40  ;;  %v4592_v13 = vpop.f32.mrb[95].mxu1  ;;  %12886 = vmatmul.mubr.msk.f32.gmra.mrb[136].mxu1 %vm800_vm3, %v6771_v57  ;;  %12926 = vmatprep.mubr.msk.f32.mxu0 %vm800_vm3, %v18404_v59  ;;  %v6786_v57 = vsel %vm4767_vm5, %v6783_v34, %v6785_v11  ;;  %v634_v59 = vld [vmem:[%s14208_s12 + $0xb38] sm:$0xff]  ;;  %v13980_v11 = vld [vmem:[%s14208_s12 + $0x460] sm:$0xff] }
 0x26b   : > { %v4695_v37 = vadd.f32 %v4592_v13, %v4059_v60  ;;  %12888 = vmatprep.mubr.msk.f32.mxu1 %vm800_vm3, %v6774_v38  ;;  %v7310_v60 = vsel %vm687_vm2, %v7308_v42, %v7309_v56  ;;  %v7313_v13 = vrot.slane %v627_v51, 2 }
 0x26c   : > { %4728 = vst.msk [vmem:[#allocation2 + $0x78] sm:$0xff] %vm1285_vm4, %v4696_v55  ;;  %v7311_v55 = vrot.slane %v622_v54, 2  ;;  %v7249_v54 = vrot.slane %v289_v50, 2 }
 0x26d   : > { %4727 = vst.msk [vmem:[#allocation2 + $0x70] sm:$0xff] %vm1285_vm4, %v4695_v37  ;;  %v12575_v62 = vpop.f32.mrb[96].mxu1  ;;  %12927 = vmatmul.mubr.msk.f32.gmra.mrb[116].mxu0 %vm800_vm3, %v18405_v63  ;;  %v7315_v41 = vsel %vm687_vm2, %v7313_v13, %v7314_v26 }
 0x26e   : > { %v4698_v17 = vadd.f32 %v12575_v62, %v4062_v24  ;;  %v4602_v9 = vpop.f32.mrb[97].mxu1  ;;  %12889 = vmatmul.mubr.msk.f32.gmra.mrb[138].mxu1 %vm800_vm3, %v6776_v20  ;;  %12929 = vmatprep.mubr.msk.f32.mxu0 %vm800_vm3, %v7295_v0  ;;  %v629_v20 = vld [vmem:[%s14208_s12 + $0xb10] sm:$0xff]  ;;  %v7312_v16 = vsel %vm687_vm2, %v7309_v56, %v7311_v55  ;;  %v7318_v24 = vrot.slane %v634_v59, 2  ;;  %v7248_v56 = vrot.slane %v288_v31, 2  ;;  %v302_v59 = vld [vmem:[%s14208_s12 + $0xb8] sm:$0xff] }
 0x26f   : > { %v4697_v14 = vadd.f32 %v4602_v9, %v4061_v33  ;;  %12891 = vmatprep.mubr.msk.f32.mxu1 %vm800_vm3, %v6779_v15  ;;  %v635_v15 = vld [vmem:[%s14208_s12 + $0xb40] sm:$0xff]  ;;  %v7316_v35 = vrot.slane %v629_v20, 2  ;;  %v281_v33 = vld [vmem:[%s14208_s12 + $0x10] sm:$0xff]  ;;  %v282_v9 = vld [vmem:[%s14208_s12 + $0x18] sm:$0xff]  ;;  %v7253_v20 = vrot.slane %v295_v22, 2 }
 0x270   : > { %4730 = vst.msk [vmem:[#allocation2 + $0x88] sm:$0xff] %vm1285_vm4, %v4698_v17  ;;  %v7319_v62 = vrot.slane %v635_v15, 2  ;;  %v7243_v2 = vrot.slane %v281_v33, 2  ;;  %v7244_v4 = vrot.slane %v282_v9, 2  ;;  %v13984_v55 = vld [vmem:[%s14208_s12 + $0x4d0] sm:$0xff]  ;;  %v4076_v15 = vld [vmem:[#allocation2 + $0xf8] sm:$0xff] }
 0x271   : > { %4729 = vst.msk [vmem:[#allocation2 + $0x80] sm:$0xff] %vm1285_vm4, %v4697_v14  ;;  %v12578_v1 = vpop.f32.mrb[98].mxu1  ;;  %12930 = vmatmul.mubr.msk.f32.gmra.mrb[118].mxu0 %vm800_vm3, %v7297_v53  ;;  %v13979_v53 = vld [vmem:[%s14208_s12 + $0x430] sm:$0xff]  ;;  %v7317_v52 = vsel %vm687_vm2, %v7314_v26, %v7316_v35  ;;  %v7250_v26 = vsel %vm687_vm2, %v7248_v56, %v7249_v54  ;;  %v17223_v33 = vld [vmem:[%s14208_s12 + $0xc8] sm:$0xff]  ;;  %v310_v9 = vld [vmem:[%s14208_s12 + $0xf8] sm:$0xff] }
 0x272   : > { %v4700_v58 = vadd.f32 %v12578_v1, %v4064_v27  ;;  %v4612_v43 = vpop.f32.mrb[99].mxu1  ;;  %12892 = vmatmul.mubr.msk.f32.gmra.mrb[140].mxu1 %vm800_vm3, %v6781_v30  ;;  %12932 = vmatprep.mubr.msk.f32.mxu0 %vm800_vm3, %v7300_v29  ;;  %v4069_v30 = vld [vmem:[#allocation2 + $0xc0] sm:$0xff]  ;;  %v7320_v29 = vsel %vm687_vm2, %v7318_v24, %v7319_v62  ;;  %v4072_v27 = vld [vmem:[#allocation2 + $0xd8] sm:$0xff]  ;;  %v7245_v42 = vsel %vm687_vm2, %v7243_v2, %v7244_v4  ;;  %v317_v2 = vld [vmem:[%s14208_s12 + $0x130] sm:$0xff] }
 0x273   : > { %v4699_v5 = vadd.f32 %v4612_v43, %v4063_v61  ;;  %12894 = vmatprep.mubr.msk.f32.mxu1 %vm800_vm3, %v6784_v18  ;;  %v7321_v18 = vrot.slane %v636_v49, 2  ;;  %v4071_v61 = vld [vmem:[#allocation2 + $0xd0] sm:$0xff]  ;;  %v13994_v56 = vld [vmem:[%s14208_s12 + $0x5e8] sm:$0xff]  ;;  %v13996_v22 = vld [vmem:[%s14208_s12 + $0x620] sm:$0xff] }
 0x274   : > { %4732 = vst.msk [vmem:[#allocation2 + $0x98] sm:$0xff] %vm1285_vm4, %v4700_v58 }
 0x275   : > { %4731 = vst.msk [vmem:[#allocation2 + $0x90] sm:$0xff] %vm1285_vm4, %v4699_v5  ;;  %v12581_v48 = vpop.f32.mrb[100].mxu1  ;;  %12933 = vmatmul.mubr.msk.f32.gmra.mrb[120].mxu0 %vm800_vm3, %v7302_v45  ;;  %v13981_v5 = vld [vmem:[%s14208_s12 + $0x468] sm:$0xff]  ;;  %v13982_v45 = vld [vmem:[%s14208_s12 + $0x498] sm:$0xff]  ;;  %v7322_v23 = vsel %vm687_vm2, %v7319_v62, %v7321_v18  ;;  %v17240_v18 = vld [vmem:[%s14208_s12 + $0x100] sm:$0xff] }
 0x276   : > { %v4702_v38 = vadd.f32 %v12581_v48, %v4066_v25  ;;  %v4622_v40 = vpop.f32.mrb[101].mxu1  ;;  %12895 = vmatmul.mubr.msk.f32.gmra.mrb[142].mxu1 %vm800_vm3, %v6786_v57  ;;  %12935 = vmatprep.mubr.msk.f32.mxu0 %vm800_vm3, %v7305_v8  ;;  %v7246_v8 = vrot.slane %v17168_v46, 2  ;;  %v17184_v25 = vld [vmem:[%s14208_s12 + $0x58] sm:$0xff]  ;;  %v4074_v48 = vld [vmem:[#allocation2 + $0xe8] sm:$0xff]  ;;  %v7266_v31 = vrot.slane %v17240_v18, 2 }
 0x277   : > { %v4701_v28 = vadd.f32 %v4622_v40, %v4065_v44  ;;  %12999 = vmatprep.mubr.msk.f32.mxu1 %vm800_vm3, %v13976_v7  ;;  %v4073_v40 = vld [vmem:[#allocation2 + $0xe0] sm:$0xff]  ;;  %v7251_v13 = vrot.slane %v17184_v25, 2  ;;  %v13986_v62 = vld [vmem:[%s14208_s12 + $0x508] sm:$0xff] }
 0x278   : > { %4734 = vst.msk [vmem:[#allocation2 + $0xa8] sm:$0xff] %vm1285_vm4, %v4702_v38  ;;  %v296_v38 = vld [vmem:[%s14208_s12 + $0x88] sm:$0xff]  ;;  %v13983_v7 = vld [vmem:[%s14208_s12 + $0x4a0] sm:$0xff] }
 0x279   : > { %4733 = vst.msk [vmem:[#allocation2 + $0xa0] sm:$0xff] %vm1285_vm4, %v4701_v28  ;;  %v12584_v37 = vpop.f32.mrb[102].mxu1  ;;  %12936 = vmatmul.mubr.msk.f32.gmra.mrb[122].mxu0 %vm800_vm3, %v7307_v10 }
 0x27a   : > { %v4704_v0 = vadd.f32 %v12584_v37, %v4068_v21  ;;  %v4632_v6 = vpop.f32.mrb[103].mxu1  ;;  %13000 = vmatmul.mubr.msk.f32.vlgmr.msra.gmra.mrb[144].mxu1 %vm800_vm3, %v13977_v39  ;;  %12938 = vmatprep.mubr.msk.f32.mxu0 %vm800_vm3, %v7310_v60  ;;  %v7247_v60 = vsel %vm687_vm2, %v7244_v4, %v7246_v8  ;;  %v7254_v21 = vrot.slane %v296_v38, 2  ;;  %v17200_v37 = vld [vmem:[%s14208_s12 + $0x90] sm:$0xff]  ;;  %v13989_v4 = vld [vmem:[%s14208_s12 + $0x548] sm:$0xff] }
 0x27b   : > { %v4703_v34 = vadd.f32 %v4632_v6, %v4067_v32  ;;  %13002 = vmatprep.mubr.msk.f32.mxu1 %vm800_vm3, %v13978_v36  ;;  %13048 = vmatpush3.msk.msra.mxu1 %vm875_vm0, %v16898_v3  ;;  %v303_v32 = vld [vmem:[%s14208_s12 + $0xc0] sm:$0xff]  ;;  %v17208_v6 = vld [vmem:[%s18062_s4 + $0x8] sm:$0xf]  ;;  %v7256_v24 = vrot.slane %v17200_v37, 2  ;;  %v18407_v38 = vld [vmem:[#allocation21_spill] sm:$0xff] }
 0x27c   : > { %4736 = vst.msk [vmem:[#allocation2 + $0xb8] sm:$0xff] %vm1285_vm4, %v4704_v0  ;;  %13097 = vmatprep.subr.msk.mxu1 %vm875_vm0, %v17142_v19  ;;  %v7255_v49 = vsel %vm687_vm2, %v7253_v20, %v7254_v21  ;;  %v18412_v20 = vld [vmem:[#allocation17_spill] sm:$0xff] }
 0x27d   : > { %4735 = vst.msk [vmem:[#allocation2 + $0xb0] sm:$0xff] %vm1285_vm4, %v4703_v34  ;;  %v12587_v17 = vpop.f32.mrb[104].mxu1  ;;  %12939 = vmatmul.mubr.msk.f32.gmra.mrb[124].mxu0 %vm800_vm3, %v7312_v16  ;;  %v4075_v34 = vld [vmem:[#allocation2 + $0xf0] sm:$0xff]  ;;  %v13985_v16 = vld [vmem:[%s14208_s12 + $0x4d8] sm:$0xff] }
 0x27e   : > { %v4706_v63 = vadd.f32 %v12587_v17, %v4070_v12  ;;  %v4642_v14 = vpop.f32.mrb[105].mxu1  ;;  %13003 = vmatmul.mubr.msk.f32.gmra.mrb[146].mxu1 %vm800_vm3, %v13979_v53  ;;  %12941 = vmatprep.mubr.msk.f32.mxu0 %vm800_vm3, %v7315_v41  ;;  %v7252_v41 = vsel %vm687_vm2, %v7249_v54, %v7251_v13  ;;  %v7258_v12 = vrot.slane %v302_v59, 2  ;;  %v7259_v17 = vrot.slane %v303_v32, 2  ;;  %v18411_v13 = vld [vmem:[#allocation61_spill] sm:$0xff]  ;;  %v14004_v32 = vld [vmem:[%s14208_s12 + $0x700] sm:$0xff] }
 0x27f   : > { %v4705_v3 = vadd.f32 %v4642_v14, %v4069_v30  ;;  %13005 = vmatprep.mubr.msk.f32.mxu1 %vm800_vm3, %v13980_v11  ;;  %v13988_v30 = vld [vmem:[%s14208_s12 + $0x540] sm:$0xff]  ;;  %v7257_v14 = vsel %vm687_vm2, %v7254_v21, %v7256_v24  ;;  %v7261_v53 = vrot.slane %v17223_v33, 2  ;;  %v14002_v21 = vld [vmem:[%s14208_s12 + $0x6c8] sm:$0xff]  ;;  %v18413_v59 = vld [vmem:[#allocation65_spill] sm:$0xff] }
 0x280   : > { %4738 = vst.msk [vmem:[#allocation2 + $0xc8] sm:$0xff] %vm1285_vm4, %v4706_v63  ;;  %v13987_v63 = vld [vmem:[%s14208_s12 + $0x510] sm:$0xff]  ;;  %v14007_v24 = vld [vmem:[%s14208_s12 + $0x740] sm:$0xff] }
 0x281   : > { %4737 = vst.msk [vmem:[#allocation2 + $0xc0] sm:$0xff] %vm1285_vm4, %v4705_v3  ;;  %v12590_v1 = vpop.f32.mrb[106].mxu1  ;;  %12942 = vmatmul.mubr.msk.f32.gmra.mrb[126].mxu0 %vm800_vm3, %v7317_v52  ;;  %v7260_v3 = vsel %vm687_vm2, %v7258_v12, %v7259_v17  ;;  %v7264_v52 = vrot.slane %v310_v9, 2  ;;  %v286_v12 = vld [vmem:[%s14208_s12 + $0x38] sm:$0xff]  ;;  %v287_v9 = vld [vmem:[%s14208_s12 + $0x40] sm:$0xff] }
 0x282   : > { %v4708_v58 = vadd.f32 %v12590_v1, %v4072_v27  ;;  %v4652_v43 = vpop.f32.mrb[107].mxu1  ;;  %13006 = vmatmul.mubr.msk.f32.gmra.mrb[148].mxu1 %vm800_vm3, %v13981_v5  ;;  %12944 = vmatprep.mubr.msk.f32.mxu0 %vm800_vm3, %v7320_v29  ;;  %v316_v29 = vld [vmem:[%s14208_s12 + $0x128] sm:$0xff]  ;;  %v13990_v27 = vld [vmem:[%s14208_s12 + $0x578] sm:$0xff]  ;;  %v7262_v1 = vsel %vm687_vm2, %v7259_v17, %v7261_v53  ;;  %v13991_v5 = vld [vmem:[%s14208_s12 + $0x580] sm:$0xff] }
 0x283   : > { %v4707_v57 = vadd.f32 %v4652_v43, %v4071_v61  ;;  %13008 = vmatprep.mubr.msk.f32.mxu1 %vm800_vm3, %v13982_v45  ;;  %v7269_v61 = vrot.slane %v317_v2, 2  ;;  %v17254_v43 = vld [vmem:[%s14208_s12 + $0x138] sm:$0xff]  ;;  %v7267_v45 = vsel %vm687_vm2, %v7264_v52, %v7266_v31  ;;  %v18419_v17 = vld [vmem:[#allocation63_spill] sm:$0xff] }
 0x284   : > { %4740 = vst.msk [vmem:[#allocation2 + $0xd8] sm:$0xff] %vm1285_vm4, %v4708_v58  ;;  %v7268_v58 = vrot.slane %v316_v29, 2  ;;  %v294_v53 = vld [vmem:[%s14208_s12 + $0x78] sm:$0xff]  ;;  %v409_v2 = vld [vmem:[%s14208_s12 + $0x420] sm:$0xf] }
 0x285   : > { %4739 = vst.msk [vmem:[#allocation2 + $0xd0] sm:$0xff] %vm1285_vm4, %v4707_v57  ;;  %v12593_v51 = vpop.f32.mrb[108].mxu1  ;;  %12945 = vmatmul.mubr.msk.f32.gmra.mrb[128].mxu0 %vm800_vm3, %v7322_v23  ;;  %v13992_v57 = vld [vmem:[%s14208_s12 + $0x5b0] sm:$0xff]  ;;  %v7271_v23 = vrot.slane %v17254_v43, 2  ;;  %v9049_v31 = vrot.slane %v409_v2, 4 }
 0x286   : > { %v4710_v44 = vadd.f32 %v12593_v51, %v4074_v48  ;;  %v4662_v28 = vpop.f32.mrb[109].mxu1  ;;  %13009 = vmatmul.mubr.msk.f32.gmra.mrb[150].mxu1 %vm800_vm3, %v13983_v7  ;;  %12949 = vmatprep.mubr.msk.f32.mxu0 %vm800_vm3, %v7245_v42  ;;  %v7270_v8 = vsel %vm687_vm2, %v7268_v58, %v7269_v61  ;;  %v13993_v42 = vld [vmem:[%s14208_s12 + $0x5b8] sm:$0xff]  ;;  %v13995_v48 = vld [vmem:[%s14208_s12 + $0x5f0] sm:$0xff]  ;;  %v18409_v7 = vld [vmem:[#allocation31_spill] sm:$0xff] }
 0x287   : > { %v4709_v10 = vadd.f32 %v4662_v28, %v4073_v40  ;;  %13011 = vmatprep.mubr.msk.f32.mxu1 %vm800_vm3, %v13984_v55  ;;  %v7272_v54 = vsel %vm687_vm2, %v7269_v61, %v7271_v23  ;;  %v18406_v51 = vld [vmem:[#allocation18_spill] sm:$0xff]  ;;  %v18410_v55 = vld [vmem:[#allocation60_spill] sm:$0xff] }
 0x288   : > { %4742 = vst.msk [vmem:[#allocation2 + $0xe8] sm:$0xff] %vm1285_vm4, %v4710_v44  ;;  %v13997_v44 = vld [vmem:[%s14208_s12 + $0x628] sm:$0xff]  ;;  %v18408_v40 = vld [vmem:[#allocation26_spill] sm:$0xff] }
 0x289   : > { %4741 = vst.msk [vmem:[#allocation2 + $0xe0] sm:$0xff] %vm1285_vm4, %v4709_v10  ;;  %v12596_v0 = vpop.f32.mrb[110].mxu1  ;;  %12950 = vmatmul.mubr.msk.f32.vlgmr.msra.gmra.mrb[98].mxu0 %vm800_vm3, %v7247_v60  ;;  %v13998_v28 = vld [vmem:[%s14208_s12 + $0x658] sm:$0xff]  ;;  %v13999_v10 = vld [vmem:[%s14208_s12 + $0x660] sm:$0xff]  ;;  %v14000_v60 = vld [vmem:[%s14208_s12 + $0x690] sm:$0xff] }
 0x28a   : > { %v4712_v39 = vadd.f32 %v12596_v0, %v4076_v15  ;;  %v4672_v36 = vpop.f32.mrb[111].mxu1  ;;  %13012 = vmatmul.mubr.msk.f32.gmra.mrb[152].mxu1 %vm800_vm3, %v13985_v16  ;;  %13148 = vmatpush3.msk.msra.mxu0 %vm875_vm0, %v16955_v47  ;;  %v309_v47 = vld [vmem:[%s14208_s12 + $0xf0] sm:$0xff]  ;;  %v18414_v0 = vld [vmem:[#allocation19_spill] sm:$0xff]  ;;  %v14006_v16 = vld [vmem:[%s14208_s12 + $0x738] sm:$0xff] }
 0x28b   : > { %v4711_v35 = vadd.f32 %v4672_v36, %v4075_v34  ;;  %12952 = vmatprep.mubr.msk.f32.mxu0 %vm800_vm3, %v7250_v26  ;;  %13014 = vmatprep.mubr.msk.f32.mxu1 %vm800_vm3, %v13986_v62  ;;  %v7263_v11 = vrot.slane %v309_v47, 2  ;;  %v14001_v26 = vld [vmem:[%s14208_s12 + $0x698] sm:$0xff]  ;;  %v14003_v15 = vld [vmem:[%s14208_s12 + $0x6d0] sm:$0xff]  ;;  %v14005_v34 = vld [vmem:[%s14208_s12 + $0x708] sm:$0xff] }
 0x28c   : > { %4744 = vst.msk [vmem:[#allocation2 + $0xf8] sm:$0xff] %vm1285_vm4, %v4712_v39  ;;  %13197 = vmatprep.subr.msk.mxu0 %vm875_vm0, %v17208_v6  ;;  %v18415_v39 = vld [vmem:[#allocation20_spill] sm:$0xff]  ;;  %v18416_v36 = vld [vmem:[#allocation69_spill] sm:$0xff]  ;;  %v18418_v62 = vld [vmem:[#allocation62_spill] sm:$0xff] }
 0x28d   : > { %4743 = vst.msk [vmem:[#allocation2 + $0xf0] sm:$0xff] %vm1285_vm4, %v4711_v35  ;;  %12953 = vmatmul.mubr.msk.f32.gmra.mrb[100].mxu0 %vm800_vm3, %v7252_v41  ;;  %v7265_v50 = vsel %vm687_vm2, %v7263_v11, %v7264_v52  ;;  %v279_v35 = vld [vmem:[%s14208_s12] sm:$0xff]  ;;  %v18420_v47 = vld [vmem:[#allocation64_spill] sm:$0xff]  ;;  %v14008_v11 = vld [vmem:[%s14208_s12 + $0x410] sm:$0xff] }
 0x28e   : > { %13015 = vmatmul.mubr.msk.f32.gmra.mrb[154].mxu1 %vm800_vm3, %v13987_v63  ;;  %12955 = vmatprep.mubr.msk.f32.mxu0 %vm800_vm3, %v7255_v49  ;;  %v18417_v41 = vld [vmem:[#allocation23_spill] sm:$0xff]  ;;  %v280_v49 = vld [vmem:[%s14208_s12 + $0x8] sm:$0xff]  ;;  %v293_v63 = vld [vmem:[%s14208_s12 + $0x70] sm:$0xff]  ;;  %v9046_v52 = vrot.slane %v14008_v11, 4 }
 0x28f   : > { %13017 = vmatprep.mubr.msk.f32.mxu1 %vm800_vm3, %v13988_v30  ;;  %v18421_v30 = vld [vmem:[#allocation66_spill] sm:$0xff] }
 0x290   : > { %v416_v61 = vld [vmem:[%s14208_s12 + $0x458] sm:$0xf] }
 0x291   : > { %12956 = vmatmul.mubr.msk.f32.gmra.mrb[102].mxu0 %vm800_vm3, %v7257_v14  ;;  %v18422_v14 = vld [vmem:[#allocation67_spill] sm:$0xff] }
 0x292   : > { %13018 = vmatmul.mubr.msk.f32.gmra.mrb[156].mxu1 %vm800_vm3, %v13989_v4  ;;  %12958 = vmatprep.mubr.msk.f32.mxu0 %vm800_vm3, %v7260_v3  ;;  %v300_v3 = vld [vmem:[%s14208_s12 + $0xa8] sm:$0xff]  ;;  %v18423_v4 = vld [vmem:[#allocation70_spill] sm:$0xff] }
 0x293   : > { %13020 = vmatprep.mubr.msk.f32.mxu1 %vm800_vm3, %v13990_v27  ;;  %v18424_v27 = vld [vmem:[#allocation71_spill] sm:$0xff] }
 0x295   : > { %12959 = vmatmul.mubr.msk.f32.gmra.mrb[104].mxu0 %vm800_vm3, %v7262_v1  ;;  %v301_v1 = vld [vmem:[%s14208_s12 + $0xb0] sm:$0xff] }
 0x296   : > { %13021 = vmatmul.mubr.msk.f32.gmra.mrb[158].mxu1 %vm800_vm3, %v13991_v5  ;;  %12961 = vmatprep.mubr.msk.f32.mxu0 %vm800_vm3, %v7265_v50  ;;  %v307_v50 = vld [vmem:[%s14208_s12 + $0xe0] sm:$0xff]  ;;  %v14010_v5 = vld [vmem:[%s14208_s12 + $0x448] sm:$0xff] }
 0x297   : > { %13023 = vmatprep.mubr.msk.f32.mxu1 %vm800_vm3, %v13992_v57  ;;  %v9051_v57 = vrot.slane %v14010_v5, 4 }
 0x299   : > { %12962 = vmatmul.mubr.msk.f32.gmra.mrb[106].mxu0 %vm800_vm3, %v7267_v45  ;;  %v14011_v45 = vld [vmem:[%s14208_s12 + $0x450] sm:$0xff] }
 0x29a   : > { %13024 = vmatmul.mubr.msk.f32.gmra.mrb[160].mxu1 %vm800_vm3, %v13993_v42  ;;  %12964 = vmatprep.mubr.msk.f32.mxu0 %vm800_vm3, %v7270_v8  ;;  %v9052_v23 = vrot.slane %v14011_v45, 4  ;;  %v18425_v8 = vld [vmem:[#allocation74_spill] sm:$0xff]  ;;  %v308_v42 = vld [vmem:[%s14208_s12 + $0xe8] sm:$0xff] }
 0x29b   : > { %13026 = vmatprep.mubr.msk.f32.mxu1 %vm800_vm3, %v13994_v56 }
 0x29d   : > { %12965 = vmatmul.mubr.msk.f32.gmra.mrb[108].mxu0 %vm800_vm3, %v7272_v54  ;;  %v9054_v54 = vrot.slane %v416_v61, 4 }
 0x29e   : > { %13027 = vmatmul.mubr.msk.f32.gmra.mrb[162].mxu1 %vm800_vm3, %v13995_v48  ;;  %12967 = vmatprep.mubr.msk.f32.mxu0 %vm800_vm3, %v18406_v51  ;;  %v314_v48 = vld [vmem:[%s14208_s12 + $0x118] sm:$0xff]  ;;  %v14012_v51 = vld [vmem:[%s14208_s12 + $0x480] sm:$0xff] }
 0x29f   : > { %13029 = vmatprep.mubr.msk.f32.mxu1 %vm800_vm3, %v13996_v22  ;;  %v9056_v22 = vrot.slane %v14012_v51, 4 }
 0x2a1   : > { %12968 = vmatmul.mubr.msk.f32.gmra.mrb[110].mxu0 %vm800_vm3, %v18407_v38  ;;  %v14013_v38 = vld [vmem:[%s14208_s12 + $0x488] sm:$0xff] }
 0x2a2   : > { %13030 = vmatmul.mubr.msk.f32.gmra.mrb[164].mxu1 %vm800_vm3, %v13997_v44  ;;  %12970 = vmatprep.mubr.msk.f32.mxu0 %vm800_vm3, %v18408_v40  ;;  %v9057_v44 = vrot.slane %v14013_v38, 4  ;;  %v423_v40 = vld [vmem:[%s14208_s12 + $0x490] sm:$0xf]  ;;  %v14031_v38 = vld [vmem:[%s14208_s12 + $0x200] sm:$0xff] }
 0x2a3   : > { %13032 = vmatprep.mubr.msk.f32.mxu1 %vm800_vm3, %v13998_v28  ;;  %v9053_v28 = vsel %vm875_vm0, %v9051_v57, %v9052_v23  ;;  %v14029_v57 = vld [vmem:[%s14208_s12 + $0x598] sm:$0xff] }
 0x2a4   : > { %v9081_v45 = vrot.slane %v14029_v57, 4  ;;  %v5885_v57 = vld [vmem:[#allocation2 + $0x30] sm:$0xff] }
 0x2a5   : > { %12971 = vmatmul.mubr.msk.f32.gmra.mrb[112].mxu0 %vm800_vm3, %v18409_v7  ;;  %v17377_v7 = vld [vmem:[%s18062_s4 + $0x20] sm:$0xf] }
 0x2a6   : > { %13033 = vmatmul.mubr.msk.f32.gmra.mrb[166].mxu1 %vm800_vm3, %v13999_v10  ;;  %12973 = vmatprep.mubr.msk.f32.mxu0 %vm800_vm3, %v18410_v55  ;;  %v315_v10 = vld [vmem:[%s14208_s12 + $0x120] sm:$0xff]  ;;  %v9055_v55 = vsel %vm875_vm0, %v9052_v23, %v9054_v54  ;;  %v5880_v54 = vld [vmem:[#allocation2 + $0x8] sm:$0xff] }
 0x2a7   : > { %13035 = vmatprep.mubr.msk.f32.mxu1 %vm800_vm3, %v14000_v60  ;;  %v9059_v60 = vrot.slane %v423_v40, 4  ;;  %v14030_v23 = vld [vmem:[%s14208_s12 + $0x5a0] sm:$0xff]  ;;  %v14032_v40 = vld [vmem:[%s14208_s12 + $0x230] sm:$0xff] }
 0x2a9   : > { %12974 = vmatmul.mubr.msk.f32.gmra.mrb[114].mxu0 %vm800_vm3, %v18411_v13  ;;  %v9058_v13 = vsel %vm875_vm0, %v9056_v22, %v9057_v44  ;;  %v5879_v22 = vld [vmem:[#allocation2] sm:$0xff] }
 0x2aa   : > { %13036 = vmatmul.mubr.msk.f32.gmra.mrb[168].mxu1 %vm800_vm3, %v14001_v26  ;;  %12976 = vmatprep.mubr.msk.f32.mxu0 %vm800_vm3, %v18412_v20  ;;  %v14014_v26 = vld [vmem:[%s14208_s12 + $0x4b8] sm:$0xff] }
 0x2ab   : > { %13038 = vmatprep.mubr.msk.f32.mxu1 %vm800_vm3, %v14002_v21  ;;  %v9061_v20 = vrot.slane %v14014_v26, 4  ;;  %v14015_v21 = vld [vmem:[%s14208_s12 + $0x4c0] sm:$0xff]  ;;  %v14034_v26 = vld [vmem:[%s14208_s12 + $0x5d8] sm:$0xff] }
 0x2ad   : > { %12977 = vmatmul.mubr.msk.f32.gmra.mrb[116].mxu0 %vm800_vm3, %v18413_v59  ;;  %v9062_v59 = vrot.slane %v14015_v21, 4  ;;  %v465_v21 = vld [vmem:[%s14208_s12 + $0x5e0] sm:$0xf] }
 0x2ae   : > { %13039 = vmatmul.mubr.msk.f32.gmra.mrb[170].mxu1 %vm800_vm3, %v14003_v15  ;;  %12979 = vmatprep.mubr.msk.f32.mxu0 %vm800_vm3, %v18414_v0  ;;  %v430_v15 = vld [vmem:[%s14208_s12 + $0x4c8] sm:$0xf]  ;;  %v9060_v0 = vsel %vm875_vm0, %v9057_v44, %v9059_v60  ;;  %v14033_v60 = vld [vmem:[%s14208_s12 + $0x5d0] sm:$0xff] }
 0x2af   : > { %13041 = vmatprep.mubr.msk.f32.mxu1 %vm800_vm3, %v14004_v32  ;;  %v9064_v32 = vrot.slane %v430_v15, 4  ;;  %v5882_v15 = vld [vmem:[#allocation2 + $0x18] sm:$0xff] }
 0x2b1   : > { %12980 = vmatmul.mubr.msk.f32.gmra.mrb[118].mxu0 %vm800_vm3, %v18415_v39  ;;  %v9063_v39 = vsel %vm875_vm0, %v9061_v20, %v9062_v59  ;;  %v9087_v20 = vrot.slane %v14034_v26, 4 }
 0x2b2   : > { %13042 = vmatmul.mubr.msk.f32.gmra.mrb[172].mxu1 %vm800_vm3, %v14005_v34  ;;  %12982 = vmatprep.mubr.msk.f32.mxu0 %vm800_vm3, %v18416_v36  ;;  %v14017_v34 = vld [vmem:[%s14208_s12 + $0x4f0] sm:$0xff] }
 0x2b3   : > { %13044 = vmatprep.mubr.msk.f32.mxu1 %vm800_vm3, %v14006_v16  ;;  %v9066_v36 = vrot.slane %v14017_v34, 4  ;;  %v14018_v16 = vld [vmem:[%s14208_s12 + $0x4f8] sm:$0xff] }
 0x2b5   : > { %12983 = vmatmul.mubr.msk.f32.gmra.mrb[120].mxu0 %vm800_vm3, %v18417_v41  ;;  %v437_v41 = vld [vmem:[%s14208_s12 + $0x500] sm:$0xf] }
 0x2b6   : > { %13045 = vmatmul.mubr.msk.f32.gmra.mrb[174].mxu1 %vm800_vm3, %v14007_v24  ;;  %12985 = vmatprep.mubr.msk.f32.mxu0 %vm800_vm3, %v18418_v62  ;;  %v14019_v24 = vld [vmem:[%s14208_s12 + $0x158] sm:$0xff]  ;;  %v14020_v62 = vld [vmem:[%s14208_s12 + $0x188] sm:$0xff] }
 0x2b7   : > { %13049 = vmatprep.mubr.msk.f32.mxu1 %vm800_vm3, %v279_v35  ;;  %v9067_v35 = vrot.slane %v14018_v16, 4 }
 0x2b9   : > { %12986 = vmatmul.mubr.msk.f32.gmra.mrb[122].mxu0 %vm800_vm3, %v18419_v17  ;;  %v9068_v17 = vsel %vm875_vm0, %v9066_v36, %v9067_v35  ;;  %v14036_v36 = vld [vmem:[%s14208_s12 + $0x268] sm:$0xff] }
 0x2ba   : > { %13050 = vmatmul.mubr.msk.f32.vlgmr.msra.gmra.mrb[144].mxu1 %vm800_vm3, %v280_v49  ;;  %12988 = vmatprep.mubr.msk.f32.mxu0 %vm800_vm3, %v18420_v47  ;;  %v9065_v49 = vsel %vm875_vm0, %v9062_v59, %v9064_v32  ;;  %v14021_v47 = vld [vmem:[%s14208_s12 + $0x528] sm:$0xff]  ;;  %v5881_v32 = vld [vmem:[#allocation2 + $0x10] sm:$0xff] }
 0x2bb   : > { %13052 = vmatprep.mubr.msk.f32.mxu1 %vm800_vm3, %v286_v12  ;;  %13098 = vmatpush3.msk.msra.mxu1 %vm875_vm0, %v17142_v19  ;;  %v14009_v19 = vld [vmem:[%s14208_s12 + $0x418] sm:$0xff]  ;;  %v9069_v12 = vrot.slane %v437_v41, 4 }
 0x2bc   : > { %v9047_v29 = vrot.slane %v14009_v19, 4 }
 0x2bd   : > { %12989 = vmatmul.mubr.msk.f32.gmra.mrb[124].mxu0 %vm800_vm3, %v18421_v30  ;;  %v9070_v11 = vsel %vm875_vm0, %v9067_v35, %v9069_v12  ;;  %v9089_v35 = vrot.slane %v465_v21, 4 }
 0x2be   : > { %13053 = vmatmul.mubr.msk.f32.gmra.mrb[146].mxu1 %vm800_vm3, %v287_v9  ;;  %12991 = vmatprep.mubr.msk.f32.mxu0 %vm800_vm3, %v18422_v14  ;;  %v9048_v58 = vsel %vm875_vm0, %v9046_v52, %v9047_v29  ;;  %v9050_v56 = vsel %vm875_vm0, %v9047_v29, %v9049_v31  ;;  %v9071_v9 = vrot.slane %v14021_v47, 4  ;;  %v444_v14 = vld [vmem:[%s14208_s12 + $0x538] sm:$0xf]  ;;  %v14025_v29 = vld [vmem:[%s14208_s12 + $0x560] sm:$0xff]  ;;  %v14027_v31 = vld [vmem:[%s14208_s12 + $0x1c8] sm:$0xff] }
 0x2bf   : > { %13055 = vmatprep.mubr.msk.f32.mxu1 %vm800_vm3, %v293_v63  ;;  %v14022_v63 = vld [vmem:[%s14208_s12 + $0x530] sm:$0xff]  ;;  %v9074_v52 = vrot.slane %v444_v14, 4  ;;  %v9076_v2 = vrot.slane %v14025_v29, 4  ;;  %v5883_v14 = vld [vmem:[#allocation2 + $0x20] sm:$0xff] }
 0x2c0   : > { %v9072_v30 = vrot.slane %v14022_v63, 4 }
 0x2c1   : > { %12992 = vmatmul.mubr.msk.f32.gmra.mrb[126].mxu0 %vm800_vm3, %v18423_v4  ;;  %v14026_v4 = vld [vmem:[%s14208_s12 + $0x568] sm:$0xff] }
 0x2c2   : > { %13056 = vmatmul.mubr.msk.f32.gmra.mrb[148].mxu1 %vm800_vm3, %v294_v53  ;;  %12994 = vmatprep.mubr.msk.f32.mxu0 %vm800_vm3, %v18424_v27  ;;  %v14023_v53 = vld [vmem:[%s14208_s12 + $0x190] sm:$0xff]  ;;  %v9073_v19 = vsel %vm875_vm0, %v9071_v9, %v9072_v30  ;;  %v9077_v27 = vrot.slane %v14026_v4, 4  ;;  %v5884_v9 = vld [vmem:[#allocation2 + $0x28] sm:$0xff] }
 0x2c3   : > { %13058 = vmatprep.mubr.msk.f32.mxu1 %vm800_vm3, %v300_v3  ;;  %v14024_v3 = vld [vmem:[%s14208_s12 + $0x1c0] sm:$0xff] }
 0x2c4   : > { %v9078_v5 = vsel %vm875_vm0, %v9076_v2, %v9077_v27  ;;  %v14041_v2 = vld [vmem:[%s14208_s12 + $0x640] sm:$0xff] }
 0x2c5   : > { %12995 = vmatmul.mubr.msk.f32.gmra.mrb[128].mxu0 %vm800_vm3, %v18425_v8  ;;  %v9082_v8 = vrot.slane %v14030_v23, 4  ;;  %v9096_v4 = vrot.slane %v14041_v2, 4  ;;  %v5891_v2 = vld [vmem:[#allocation2 + $0x60] sm:$0xff] }
 0x2c6   : > { %13059 = vmatmul.mubr.msk.f32.gmra.mrb[150].mxu1 %vm800_vm3, %v301_v1  ;;  %13149 = vmatprep.mubr.msk.f32.mxu0 %vm800_vm3, %v9048_v58  ;;  %v451_v1 = vld [vmem:[%s14208_s12 + $0x570] sm:$0xf]  ;;  %v9075_v58 = vsel %vm875_vm0, %v9072_v30, %v9074_v52  ;;  %v9090_v52 = vsel %vm875_vm0, %v9087_v20, %v9089_v35 }
 0x2c7   : > { %13061 = vmatprep.mubr.msk.f32.mxu1 %vm800_vm3, %v307_v50  ;;  %v14028_v50 = vld [vmem:[%s14208_s12 + $0x1f8] sm:$0xff]  ;;  %v9079_v61 = vrot.slane %v451_v1, 4 }
 0x2c9   : > { %13150 = vmatmul.mubr.msk.f32.vlgmr.msra.gmra.mrb[130].mxu0 %vm800_vm3, %v9050_v56 }
 0x2ca   : > { %13062 = vmatmul.mubr.msk.f32.gmra.mrb[152].mxu1 %vm800_vm3, %v308_v42  ;;  %13198 = vmatpush3.msk.msra.mxu0 %vm875_vm0, %v17208_v6  ;;  %v14016_v6 = vld [vmem:[%s14208_s12 + $0x150] sm:$0xff]  ;;  %v458_v42 = vld [vmem:[%s14208_s12 + $0x5a8] sm:$0xf] }
 0x2cb   : > { %13064 = vmatprep.mubr.msk.f32.mxu1 %vm800_vm3, %v314_v48  ;;  %13152 = vmatprep.mubr.msk.f32.mxu0 %vm800_vm3, %v9053_v28  ;;  %v9080_v28 = vsel %vm875_vm0, %v9077_v27, %v9079_v61  ;;  %v14042_v27 = vld [vmem:[%s14208_s12 + $0x648] sm:$0xff] }
 0x2cc   : > { %13247 = vmatprep.subr.msk.mxu0 %vm875_vm0, %v17377_v7  ;;  %v9097_v1 = vrot.slane %v14042_v27, 4 }
 0x2cd   : > { %13153 = vmatmul.mubr.msk.f32.gmra.mrb[132].mxu0 %vm800_vm3, %v9055_v55  ;;  %v9083_v55 = vsel %vm875_vm0, %v9081_v45, %v9082_v8  ;;  %v14043_v45 = vld [vmem:[%s14208_s12 + $0x2a8] sm:$0xff] }
 0x2ce   : > { %13065 = vmatmul.mubr.msk.f32.gmra.mrb[154].mxu1 %vm800_vm3, %v315_v10  ;;  %13155 = vmatprep.mubr.msk.f32.mxu0 %vm800_vm3, %v9058_v13  ;;  %v9084_v10 = vrot.slane %v458_v42, 4  ;;  %v9086_v13 = vrot.slane %v14033_v60, 4  ;;  %v5887_v60 = vld [vmem:[#allocation2 + $0x40] sm:$0xff] }
 0x2cf   : > { %13067 = vmatprep.mubr.msk.f32.mxu1 %vm800_vm3, %v14016_v6 }
 0x2d0   : > { %v9085_v16 = vsel %vm875_vm0, %v9082_v8, %v9084_v10  ;;  %v9088_v41 = vsel %vm875_vm0, %v9086_v13, %v9087_v20  ;;  %v14044_v8 = vld [vmem:[%s14208_s12 + $0x2d8] sm:$0xff]  ;;  %v14047_v13 = vld [vmem:[%s14208_s12 + $0x2e0] sm:$0xff]  ;;  %v14048_v20 = vld [vmem:[%s14208_s12 + $0x310] sm:$0xff] }
 0x2d1   : > { %13156 = vmatmul.mubr.msk.f32.gmra.mrb[134].mxu0 %vm800_vm3, %v9060_v0 }
 0x2d2   : > { %13068 = vmatmul.mubr.msk.f32.gmra.mrb[156].mxu1 %vm800_vm3, %v14019_v24  ;;  %13158 = vmatprep.mubr.msk.f32.mxu0 %vm800_vm3, %v9063_v39  ;;  %v14035_v39 = vld [vmem:[%s14208_s12 + $0x238] sm:$0xff]  ;;  %v14037_v24 = vld [vmem:[%s14208_s12 + $0x608] sm:$0xff] }
 0x2d3   : > { %13070 = vmatprep.mubr.msk.f32.mxu1 %vm800_vm3, %v14020_v62  ;;  %v9091_v62 = vrot.slane %v14037_v24, 4  ;;  %v5889_v24 = vld [vmem:[#allocation2 + $0x50] sm:$0xff] }
 0x2d5   : > { %13159 = vmatmul.mubr.msk.f32.gmra.mrb[136].mxu0 %vm800_vm3, %v9065_v49  ;;  %v14038_v49 = vld [vmem:[%s14208_s12 + $0x610] sm:$0xff] }
 0x2d6   : > { %13071 = vmatmul.mubr.msk.f32.gmra.mrb[158].mxu1 %vm800_vm3, %v14023_v53  ;;  %13161 = vmatprep.mubr.msk.f32.mxu0 %vm800_vm3, %v9068_v17  ;;  %v9092_v12 = vrot.slane %v14038_v49, 4  ;;  %v472_v17 = vld [vmem:[%s14208_s12 + $0x618] sm:$0xf]  ;;  %v14039_v53 = vld [vmem:[%s14208_s12 + $0x270] sm:$0xff] }
 0x2d7   : > { %13073 = vmatprep.mubr.msk.f32.mxu1 %vm800_vm3, %v14024_v3 }
 0x2d8   : > { %v9093_v29 = vsel %vm875_vm0, %v9091_v62, %v9092_v12  ;;  %v14051_v62 = vld [vmem:[%s14208_s12 + $0x318] sm:$0xff] }
 0x2d9   : > { %13162 = vmatmul.mubr.msk.f32.gmra.mrb[138].mxu0 %vm800_vm3, %v9070_v11  ;;  %v14040_v11 = vld [vmem:[%s14208_s12 + $0x2a0] sm:$0xff] }
 0x2da   : > { %13074 = vmatmul.mubr.msk.f32.gmra.mrb[160].mxu1 %vm800_vm3, %v14027_v31  ;;  %13164 = vmatprep.mubr.msk.f32.mxu0 %vm800_vm3, %v9073_v19  ;;  %v9094_v19 = vrot.slane %v472_v17, 4  ;;  %v479_v31 = vld [vmem:[%s14208_s12 + $0x650] sm:$0xf] }
 0x2db   : > { %13076 = vmatprep.mubr.msk.f32.mxu1 %vm800_vm3, %v14028_v50 }
 0x2dc   : > { %v12701_v56 = vpop.f32.mrb[66].mxu0  ;;  %v9095_v42 = vsel %vm875_vm0, %v9092_v12, %v9094_v19  ;;  %v14052_v12 = vld [vmem:[%s14208_s12 + $0x348] sm:$0xff] }
 0x2dd   : > { %v5912_v48 = vadd.f32 %v12701_v56, %v5880_v54  ;;  %v5688_v51 = vpop.f32.mrb[67].mxu0  ;;  %13165 = vmatmul.mubr.msk.f32.gmra.mrb[140].mxu0 %vm800_vm3, %v9075_v58  ;;  %v5886_v58 = vld [vmem:[#allocation2 + $0x38] sm:$0xff]  ;;  %v9099_v56 = vrot.slane %v479_v31, 4  ;;  %v9098_v54 = vsel %vm875_vm0, %v9096_v4, %v9097_v1  ;;  %v14055_v4 = vld [vmem:[%s14208_s12 + $0x350] sm:$0xff] }
 0x2de   : > { %13077 = vmatmul.mubr.msk.f32.gmra.mrb[162].mxu1 %vm800_vm3, %v14031_v38  ;;  %v5911_v44 = vadd.f32 %v5879_v22, %v5688_v51  ;;  %13167 = vmatprep.mubr.msk.f32.mxu0 %vm800_vm3, %v9078_v5  ;;  %v14046_v22 = vld [vmem:[%s14208_s12 + $0x680] sm:$0xff] }
 0x2df   : > { %13079 = vmatprep.mubr.msk.f32.mxu1 %vm800_vm3, %v14032_v40  ;;  %5944 = vst.msk [vmem:[#allocation2 + $0x8] sm:$0xff] %vm1285_vm4, %v5912_v48  ;;  %v14045_v48 = vld [vmem:[%s14208_s12 + $0x678] sm:$0xff]  ;;  %v9102_v38 = vrot.slane %v14046_v22, 4  ;;  %v9100_v21 = vsel %vm875_vm0, %v9097_v1, %v9099_v56  ;;  %v14056_v1 = vld [vmem:[%s14208_s12 + $0x7e0] sm:$0xff] }
 0x2e0   : > { %5943 = vst.msk [vmem:[#allocation2] sm:$0xff] %vm1285_vm4, %v5911_v44  ;;  %v12704_v59 = vpop.f32.mrb[68].mxu0  ;;  %v9101_v51 = vrot.slane %v14045_v48, 4  ;;  %v486_v44 = vld [vmem:[%s14208_s12 + $0x688] sm:$0xf]  ;;  %v5893_v48 = vld [vmem:[#allocation2 + $0x70] sm:$0xff] }
 0x2e1   : > { %v5914_v6 = vadd.f32 %v12704_v59, %v5882_v15  ;;  %v5698_v0 = vpop.f32.mrb[69].mxu0  ;;  %13168 = vmatmul.mubr.msk.f32.gmra.mrb[142].mxu0 %vm800_vm3, %v9080_v28  ;;  %v5888_v28 = vld [vmem:[#allocation2 + $0x48] sm:$0xff]  ;;  %v9104_v59 = vrot.slane %v486_v44, 4 }
 0x2e2   : > { %13080 = vmatmul.mubr.msk.f32.gmra.mrb[164].mxu1 %vm800_vm3, %v14035_v39  ;;  %v5913_v34 = vadd.f32 %v5881_v32, %v5698_v0  ;;  %13170 = vmatprep.mubr.msk.f32.mxu0 %vm800_vm3, %v9083_v55  ;;  %v9103_v15 = vsel %vm875_vm0, %v9101_v51, %v9102_v38  ;;  %v14050_v32 = vld [vmem:[%s14208_s12 + $0x6b8] sm:$0xff]  ;;  %v14059_v51 = vld [vmem:[%s14208_s12 + $0x7e8] sm:$0xff] }
 0x2e3   : > { %13082 = vmatprep.mubr.msk.f32.mxu1 %vm800_vm3, %v14036_v36  ;;  %5946 = vst.msk [vmem:[#allocation2 + $0x18] sm:$0xff] %vm1285_vm4, %v5914_v6  ;;  %v14049_v6 = vld [vmem:[%s14208_s12 + $0x6b0] sm:$0xff]  ;;  %v9107_v39 = vrot.slane %v14050_v32, 4  ;;  %v9105_v17 = vsel %vm875_vm0, %v9102_v38, %v9104_v59  ;;  %v14060_v38 = vld [vmem:[%s14208_s12 + $0x818] sm:$0xff]  ;;  %v284_v59 = vld [vmem:[%s14208_s12 + $0x28] sm:$0xff] }
 0x2e4   : > { %5945 = vst.msk [vmem:[#allocation2 + $0x10] sm:$0xff] %vm1285_vm4, %v5913_v34  ;;  %v12707_v47 = vpop.f32.mrb[70].mxu0  ;;  %v9106_v0 = vrot.slane %v14049_v6, 4  ;;  %v493_v34 = vld [vmem:[%s14208_s12 + $0x6c0] sm:$0xf] }
 0x2e5   : > { %v5916_v63 = vadd.f32 %v12707_v47, %v5884_v9  ;;  %v5708_v30 = vpop.f32.mrb[71].mxu0  ;;  %13171 = vmatmul.mubr.msk.f32.gmra.mrb[144].mxu0 %vm800_vm3, %v9085_v16  ;;  %v5890_v16 = vld [vmem:[#allocation2 + $0x58] sm:$0xff]  ;;  %v9109_v47 = vrot.slane %v493_v34, 4  ;;  %v14063_v32 = vld [vmem:[%s14208_s12 + $0x820] sm:$0xff]  ;;  %v14064_v34 = vld [vmem:[%s14208_s12 + $0x850] sm:$0xff] }
 0x2e6   : > { %13083 = vmatmul.mubr.msk.f32.gmra.mrb[166].mxu1 %vm800_vm3, %v14039_v53  ;;  %v5915_v3 = vadd.f32 %v5883_v14, %v5708_v30  ;;  %13173 = vmatprep.mubr.msk.f32.mxu0 %vm800_vm3, %v9088_v41  ;;  %v9108_v9 = vsel %vm875_vm0, %v9106_v0, %v9107_v39  ;;  %v14054_v14 = vld [vmem:[%s14208_s12 + $0x6f0] sm:$0xff]  ;;  %v5895_v0 = vld [vmem:[#allocation2 + $0x80] sm:$0xff] }
 0x2e7   : > { %13085 = vmatprep.mubr.msk.f32.mxu1 %vm800_vm3, %v14040_v11  ;;  %5948 = vst.msk [vmem:[#allocation2 + $0x28] sm:$0xff] %vm1285_vm4, %v5916_v63  ;;  %v14053_v63 = vld [vmem:[%s14208_s12 + $0x6e8] sm:$0xff]  ;;  %v9112_v53 = vrot.slane %v14054_v14, 4  ;;  %v9110_v31 = vsel %vm875_vm0, %v9107_v39, %v9109_v47 }
 0x2e8   : > { %5947 = vst.msk [vmem:[#allocation2 + $0x20] sm:$0xff] %vm1285_vm4, %v5915_v3  ;;  %v12710_v50 = vpop.f32.mrb[72].mxu0  ;;  %v9111_v30 = vrot.slane %v14053_v63, 4  ;;  %v500_v3 = vld [vmem:[%s14208_s12 + $0x6f8] sm:$0xf] }
 0x2e9   : > { %v5918_v61 = vadd.f32 %v12710_v50, %v5886_v58  ;;  %v5718_v5 = vpop.f32.mrb[73].mxu0  ;;  %13174 = vmatmul.mubr.msk.f32.gmra.mrb[146].mxu0 %vm800_vm3, %v9090_v52  ;;  %v5892_v52 = vld [vmem:[#allocation2 + $0x68] sm:$0xff]  ;;  %v9114_v50 = vrot.slane %v500_v3, 4  ;;  %v14065_v63 = vld [vmem:[%s14208_s12 + $0x858] sm:$0xff] }
 0x2ea   : > { %13086 = vmatmul.mubr.msk.f32.gmra.mrb[168].mxu1 %vm800_vm3, %v14043_v45  ;;  %v5917_v23 = vadd.f32 %v5885_v57, %v5718_v5  ;;  %13176 = vmatprep.mubr.msk.f32.mxu0 %vm800_vm3, %v9093_v29  ;;  %v9113_v58 = vsel %vm875_vm0, %v9111_v30, %v9112_v53  ;;  %v14058_v57 = vld [vmem:[%s14208_s12 + $0x728] sm:$0xff]  ;;  %v291_v30 = vld [vmem:[%s14208_s12 + $0x60] sm:$0xff] }
 0x2eb   : > { %13088 = vmatprep.mubr.msk.f32.mxu1 %vm800_vm3, %v14044_v8  ;;  %5950 = vst.msk [vmem:[#allocation2 + $0x38] sm:$0xff] %vm1285_vm4, %v5918_v61  ;;  %v14057_v61 = vld [vmem:[%s14208_s12 + $0x720] sm:$0xff]  ;;  %v9117_v45 = vrot.slane %v14058_v57, 4  ;;  %v9115_v44 = vsel %vm875_vm0, %v9112_v53, %v9114_v50  ;;  %v14066_v53 = vld [vmem:[%s14208_s12 + $0x888] sm:$0xff] }
 0x2ec   : > { %5949 = vst.msk [vmem:[#allocation2 + $0x30] sm:$0xff] %vm1285_vm4, %v5917_v23  ;;  %v12713_v40 = vpop.f32.mrb[74].mxu0  ;;  %v9116_v5 = vrot.slane %v14057_v61, 4  ;;  %v507_v23 = vld [vmem:[%s14208_s12 + $0x730] sm:$0xf]  ;;  %v5899_v50 = vld [vmem:[#allocation2 + $0xa0] sm:$0xff] }
 0x2ed   : > { %v5920_v10 = vadd.f32 %v12713_v40, %v5888_v28  ;;  %v5728_v55 = vpop.f32.mrb[75].mxu0  ;;  %13177 = vmatmul.mubr.msk.f32.gmra.mrb[148].mxu0 %vm800_vm3, %v9095_v42  ;;  %v5894_v42 = vld [vmem:[#allocation2 + $0x78] sm:$0xff]  ;;  %v9119_v40 = vrot.slane %v507_v23, 4 }
 0x2ee   : > { %13089 = vmatmul.mubr.msk.f32.gmra.mrb[170].mxu1 %vm800_vm3, %v14047_v13  ;;  %v5919_v26 = vadd.f32 %v5887_v60, %v5728_v55  ;;  %13179 = vmatprep.mubr.msk.f32.mxu0 %vm800_vm3, %v9098_v54  ;;  %v9118_v28 = vsel %vm875_vm0, %v9116_v5, %v9117_v45  ;;  %v14062_v60 = vld [vmem:[%s14208_s12 + $0x760] sm:$0xff] }
 0x2ef   : > { %13091 = vmatprep.mubr.msk.f32.mxu1 %vm800_vm3, %v14048_v20  ;;  %5952 = vst.msk [vmem:[#allocation2 + $0x48] sm:$0xff] %vm1285_vm4, %v5920_v10  ;;  %v14061_v10 = vld [vmem:[%s14208_s12 + $0x758] sm:$0xff]  ;;  %v9122_v13 = vrot.slane %v14062_v60, 4  ;;  %v14068_v5 = vld [vmem:[%s14208_s12 + $0x8c0] sm:$0xff]  ;;  %v8963_v60 = vrot.slane %v17223_v33, 4 }
 0x2f0   : > { %5951 = vst.msk [vmem:[#allocation2 + $0x40] sm:$0xff] %vm1285_vm4, %v5919_v26  ;;  %v12716_v36 = vpop.f32.mrb[76].mxu0  ;;  %v9121_v55 = vrot.slane %v14061_v10, 4  ;;  %v514_v26 = vld [vmem:[%s14208_s12 + $0x768] sm:$0xf]  ;;  %v14071_v33 = vld [vmem:[%s14208_s12 + $0x900] sm:$0xff] }
 0x2f1   : > { %v5922_v35 = vadd.f32 %v12716_v36, %v5890_v16  ;;  %v5738_v41 = vpop.f32.mrb[77].mxu0  ;;  %13180 = vmatmul.mubr.msk.f32.gmra.mrb[150].mxu0 %vm800_vm3, %v9100_v21  ;;  %v5896_v21 = vld [vmem:[#allocation2 + $0x88] sm:$0xff]  ;;  %v9120_v36 = vsel %vm875_vm0, %v9117_v45, %v9119_v40  ;;  %v9124_v16 = vrot.slane %v514_v26, 4  ;;  %v8958_v45 = vrot.slane %v17200_v37, 4  ;;  %v14070_v40 = vld [vmem:[%s14208_s12 + $0x8f8] sm:$0xff] }
 0x2f2   : > { %13092 = vmatmul.mubr.msk.f32.gmra.mrb[172].mxu1 %vm800_vm3, %v14051_v62  ;;  %v5921_v49 = vadd.f32 %v5889_v24, %v5738_v41  ;;  %13182 = vmatprep.mubr.msk.f32.mxu0 %vm800_vm3, %v9103_v15  ;;  %v8948_v41 = vrot.slane %v17168_v46, 4  ;;  %v8949_v24 = vrot.slane %v284_v59, 4  ;;  %v285_v62 = vld [vmem:[%s14208_s12 + $0x30] sm:$0xf]  ;;  %v306_v26 = vld [vmem:[%s14208_s12 + $0xd8] sm:$0xf] }
 0x2f3   : > { %13094 = vmatprep.mubr.msk.f32.mxu1 %vm800_vm3, %v14052_v12  ;;  %5954 = vst.msk [vmem:[#allocation2 + $0x58] sm:$0xff] %vm1285_vm4, %v5922_v35  ;;  %v9123_v35 = vsel %vm875_vm0, %v9121_v55, %v9122_v13  ;;  %v5898_v12 = vld [vmem:[#allocation2 + $0x98] sm:$0xff]  ;;  %v9125_v46 = vsel %vm875_vm0, %v9122_v13, %v9124_v16  ;;  %v8951_v3 = vrot.slane %v285_v62, 4  ;;  %v7098_v59 = vld [vmem:[#allocation2 + $0x8] sm:$0xff]  ;;  %v8966_v62 = vrot.slane %v306_v26, 4 }
 0x2f4   : > { %5953 = vst.msk [vmem:[#allocation2 + $0x50] sm:$0xff] %vm1285_vm4, %v5921_v49  ;;  %v12719_v11 = vpop.f32.mrb[78].mxu0  ;;  %v327_v26 = vld [vmem:[%s14208_s12 + $0x180] sm:$0xf] }
 0x2f5   : > { %v5924_v19 = vadd.f32 %v12719_v11, %v5892_v52  ;;  %v5748_v29 = vpop.f32.mrb[79].mxu0  ;;  %13183 = vmatmul.mubr.msk.f32.gmra.mrb[152].mxu0 %vm800_vm3, %v9105_v17  ;;  %v8950_v11 = vsel %vm875_vm0, %v8948_v41, %v8949_v24  ;;  %v292_v52 = vld [vmem:[%s14208_s12 + $0x68] sm:$0xf]  ;;  %v14072_v41 = vld [vmem:[%s14208_s12 + $0x930] sm:$0xff] }
 0x2f6   : > { %13095 = vmatmul.mubr.msk.f32.gmra.mrb[174].mxu1 %vm800_vm3, %v14055_v4  ;;  %v5923_v27 = vadd.f32 %v5891_v2, %v5748_v29  ;;  %13185 = vmatprep.mubr.msk.f32.mxu0 %vm800_vm3, %v9108_v9  ;;  %v5897_v9 = vld [vmem:[#allocation2 + $0x90] sm:$0xff]  ;;  %v5900_v29 = vld [vmem:[#allocation2 + $0xa8] sm:$0xff]  ;;  %v8953_v2 = vrot.slane %v17184_v25, 4  ;;  %v8954_v4 = vrot.slane %v291_v30, 4  ;;  %v8952_v25 = vsel %vm875_vm0, %v8949_v24, %v8951_v3 }
 0x2f7   : > { %13099 = vmatprep.mubr.msk.f32.mxu1 %vm800_vm3, %v14056_v1  ;;  %5956 = vst.msk [vmem:[#allocation2 + $0x68] sm:$0xff] %vm1285_vm4, %v5924_v19  ;;  %v8956_v57 = vrot.slane %v292_v52, 4  ;;  %v5905_v52 = vld [vmem:[#allocation2 + $0xd0] sm:$0xff] }
 0x2f8   : > { %5955 = vst.msk [vmem:[#allocation2 + $0x60] sm:$0xff] %vm1285_vm4, %v5923_v27  ;;  %v12722_v8 = vpop.f32.mrb[80].mxu0  ;;  %v298_v27 = vld [vmem:[%s14208_s12 + $0x98] sm:$0xff] }
 0x2f9   : > { %v5926_v56 = vadd.f32 %v12722_v8, %v5894_v42  ;;  %v5758_v54 = vpop.f32.mrb[81].mxu0  ;;  %13186 = vmatmul.mubr.msk.f32.gmra.mrb[154].mxu0 %vm800_vm3, %v9110_v31  ;;  %v8959_v23 = vrot.slane %v298_v27, 4  ;;  %v299_v8 = vld [vmem:[%s14208_s12 + $0xa0] sm:$0xf]  ;;  %v14074_v27 = vld [vmem:[%s14208_s12 + $0x968] sm:$0xff] }
 0x2fa   : > { %13100 = vmatmul.mubr.msk.f32.vlgmr.msra.gmra.mrb[144].mxu1 %vm800_vm3, %v14059_v51  ;;  %v5925_v22 = vadd.f32 %v5893_v48, %v5758_v54  ;;  %13188 = vmatprep.mubr.msk.f32.mxu0 %vm800_vm3, %v9113_v58  ;;  %v14067_v58 = vld [vmem:[%s14208_s12 + $0x890] sm:$0xff]  ;;  %v8955_v54 = vsel %vm875_vm0, %v8953_v2, %v8954_v4  ;;  %v8961_v10 = vrot.slane %v299_v8, 4 }
 0x2fb   : > { %13102 = vmatprep.mubr.msk.f32.mxu1 %vm800_vm3, %v14060_v38  ;;  %5958 = vst.msk [vmem:[#allocation2 + $0x78] sm:$0xff] %vm1285_vm4, %v5926_v56  ;;  %v5902_v56 = vld [vmem:[#allocation2 + $0xb8] sm:$0xff]  ;;  %v17580_v48 = vld [vmem:[%s14208_s12 + $0xd0] sm:$0xff]  ;;  %v8960_v55 = vsel %vm875_vm0, %v8958_v45, %v8959_v23 }
 0x2fc   : > { %5957 = vst.msk [vmem:[#allocation2 + $0x70] sm:$0xff] %vm1285_vm4, %v5925_v22  ;;  %v12725_v20 = vpop.f32.mrb[82].mxu0  ;;  %v5901_v38 = vld [vmem:[#allocation2 + $0xb0] sm:$0xff]  ;;  %v8964_v13 = vrot.slane %v17580_v48, 4  ;;  %v8962_v24 = vsel %vm875_vm0, %v8959_v23, %v8961_v10  ;;  %v7102_v23 = vld [vmem:[#allocation2 + $0x28] sm:$0xff] }
 0x2fd   : > { %v5928_v15 = vadd.f32 %v12725_v20, %v5896_v21  ;;  %v5768_v6 = vpop.f32.mrb[83].mxu0  ;;  %13189 = vmatmul.mubr.msk.f32.gmra.mrb[156].mxu0 %vm800_vm3, %v9115_v44  ;;  %v14069_v44 = vld [vmem:[%s14208_s12 + $0x8c8] sm:$0xff]  ;;  %v14077_v10 = vld [vmem:[%s14208_s12 + $0x170] sm:$0xff] }
 0x2fe   : > { %13103 = vmatmul.mubr.msk.f32.gmra.mrb[146].mxu1 %vm800_vm3, %v14063_v32  ;;  %v5927_v39 = vadd.f32 %v5895_v0, %v5768_v6  ;;  %13191 = vmatprep.mubr.msk.f32.mxu0 %vm800_vm3, %v9118_v28  ;;  %v8957_v28 = vsel %vm875_vm0, %v8954_v4, %v8956_v57  ;;  %v5904_v20 = vld [vmem:[#allocation2 + $0xc8] sm:$0xff] }
 0x2ff   : > { %13105 = vmatprep.mubr.msk.f32.mxu1 %vm800_vm3, %v14064_v34  ;;  %5960 = vst.msk [vmem:[#allocation2 + $0x88] sm:$0xff] %vm1285_vm4, %v5928_v15  ;;  %v17598_v15 = vld [vmem:[%s14208_s12 + $0x108] sm:$0xff] }
 0x300   : > { %5959 = vst.msk [vmem:[#allocation2 + $0x80] sm:$0xff] %vm1285_vm4, %v5927_v39  ;;  %v12728_v49 = vpop.f32.mrb[84].mxu0  ;;  %v5903_v39 = vld [vmem:[#allocation2 + $0xc0] sm:$0xff]  ;;  %v5908_v57 = vld [vmem:[#allocation2 + $0xe8] sm:$0xff] }
 0x301   : > { %v5930_v17 = vadd.f32 %v12728_v49, %v5898_v12  ;;  %v5778_v47 = vpop.f32.mrb[85].mxu0  ;;  %13192 = vmatmul.mubr.msk.f32.gmra.mrb[158].mxu0 %vm800_vm3, %v9120_v36  ;;  %v7097_v36 = vld [vmem:[#allocation2] sm:$0xff]  ;;  %v8965_v49 = vsel %vm875_vm0, %v8963_v60, %v8964_v13  ;;  %v8968_v12 = vrot.slane %v17240_v18, 4  ;;  %v14078_v60 = vld [vmem:[%s14208_s12 + $0x178] sm:$0xff] }
 0x302   : > { %13106 = vmatmul.mubr.msk.f32.gmra.mrb[148].mxu1 %vm800_vm3, %v14065_v63  ;;  %v5929_v14 = vadd.f32 %v5897_v9, %v5778_v47  ;;  %13194 = vmatprep.mubr.msk.f32.mxu0 %vm800_vm3, %v9123_v35  ;;  %v313_v47 = vld [vmem:[%s14208_s12 + $0x110] sm:$0xf]  ;;  %v5906_v63 = vld [vmem:[#allocation2 + $0xd8] sm:$0xff] }
 0x303   : > { %13108 = vmatprep.mubr.msk.f32.mxu1 %vm800_vm3, %v14066_v53  ;;  %5962 = vst.msk [vmem:[#allocation2 + $0x98] sm:$0xff] %vm1285_vm4, %v5930_v17  ;;  %v8969_v17 = vrot.slane %v17598_v15, 4  ;;  %v17616_v53 = vld [vmem:[%s14208_s12 + $0x140] sm:$0xff] }
 0x304   : > { %5961 = vst.msk [vmem:[#allocation2 + $0x90] sm:$0xff] %vm1285_vm4, %v5929_v14  ;;  %v12731_v19 = vpop.f32.mrb[86].mxu0  ;;  %v7100_v14 = vld [vmem:[#allocation2 + $0x18] sm:$0xff] }
 0x305   : > { %v5932_v1 = vadd.f32 %v12731_v19, %v5900_v29  ;;  %v5788_v31 = vpop.f32.mrb[87].mxu0  ;;  %13195 = vmatmul.mubr.msk.f32.gmra.mrb[160].mxu0 %vm800_vm3, %v9125_v46  ;;  %v7099_v19 = vld [vmem:[#allocation2 + $0x10] sm:$0xff]  ;;  %v14073_v29 = vld [vmem:[%s14208_s12 + $0x938] sm:$0xff] }
 0x306   : > { %13109 = vmatmul.mubr.msk.f32.gmra.mrb[150].mxu1 %vm800_vm3, %v14067_v58  ;;  %v5931_v61 = vadd.f32 %v5899_v50, %v5788_v31  ;;  %13199 = vmatprep.mubr.msk.f32.mxu0 %vm800_vm3, %v8950_v11  ;;  %v8971_v31 = vrot.slane %v313_v47, 4  ;;  %v8970_v50 = vsel %vm875_vm0, %v8968_v12, %v8969_v17  ;;  %v8973_v58 = vrot.slane %v17254_v43, 4  ;;  %v14075_v43 = vld [vmem:[%s14208_s12 + $0x970] sm:$0xff]  ;;  %v14081_v12 = vld [vmem:[%s14208_s12 + $0x1a8] sm:$0xff] }
 0x307   : > { %13111 = vmatprep.mubr.msk.f32.mxu1 %vm800_vm3, %v14068_v5  ;;  %5964 = vst.msk [vmem:[#allocation2 + $0xa8] sm:$0xff] %vm1285_vm4, %v5932_v1  ;;  %v8967_v1 = vsel %vm875_vm0, %v8964_v13, %v8966_v62  ;;  %v320_v5 = vld [vmem:[%s14208_s12 + $0x148] sm:$0xf]  ;;  %v8979_v13 = vrot.slane %v14078_v60, 4  ;;  %v597_v62 = vld [vmem:[%s14208_s12 + $0xa10] sm:$0xff] }
 0x308   : > { %5963 = vst.msk [vmem:[#allocation2 + $0xa0] sm:$0xff] %vm1285_vm4, %v5931_v61  ;;  %v12734_v42 = vpop.f32.mrb[88].mxu0  ;;  %v8974_v61 = vrot.slane %v17616_v53, 4  ;;  %v14082_v47 = vld [vmem:[%s14208_s12 + $0x1b0] sm:$0xff] }
 0x309   : > { %v5934_v51 = vadd.f32 %v12734_v42, %v5902_v56  ;;  %v5798_v22 = vpop.f32.mrb[89].mxu0  ;;  %13200 = vmatmul.mubr.msk.f32.vlgmr.msra.gmra.mrb[130].mxu0 %vm800_vm3, %v8952_v25 }
 0x30a   : > { %13112 = vmatmul.mubr.msk.f32.gmra.mrb[152].mxu1 %vm800_vm3, %v14069_v44  ;;  %v5933_v37 = vadd.f32 %v5901_v38, %v5798_v22  ;;  %13248 = vmatpush3.msk.msra.mxu0 %vm875_vm0, %v17377_v7  ;;  %v14076_v44 = vld [vmem:[%s14208_s12 + $0x9a0] sm:$0xff] }
 0x30b   : > { %13114 = vmatprep.mubr.msk.f32.mxu1 %vm800_vm3, %v14070_v40  ;;  %5966 = vst.msk [vmem:[#allocation2 + $0xb8] sm:$0xff] %vm1285_vm4, %v5934_v51  ;;  %13202 = vmatprep.mubr.msk.f32.mxu0 %vm800_vm3, %v8955_v54  ;;  %v5907_v54 = vld [vmem:[#allocation2 + $0xe0] sm:$0xff]  ;;  %v8976_v40 = vrot.slane %v320_v5, 4  ;;  %v7108_v5 = vld [vmem:[#allocation2 + $0x58] sm:$0xff] }
 0x30c   : > { %5965 = vst.msk [vmem:[#allocation2 + $0xb0] sm:$0xff] %vm1285_vm4, %v5933_v37  ;;  %v12737_v7 = vpop.f32.mrb[90].mxu0  ;;  %v7101_v51 = vld [vmem:[#allocation2 + $0x20] sm:$0xff]  ;;  %v8972_v37 = vsel %vm875_vm0, %v8969_v17, %v8971_v31  ;;  %v8983_v17 = vrot.slane %v14081_v12, 4  ;;  %v14085_v31 = vld [vmem:[%s14208_s12 + $0x1e8] sm:$0xff] }
 0x30d   : > { %v12851_v21 = vpop.f32.mrb[112].mxu1  ;;  %v5936_v6 = vadd.f32 %v12737_v7, %v5904_v20  ;;  %v5808_v32 = vpop.f32.mrb[91].mxu0  ;;  %13203 = vmatmul.mubr.msk.f32.gmra.mrb[132].mxu0 %vm800_vm3, %v8957_v28  ;;  %v8975_v28 = vsel %vm875_vm0, %v8973_v58, %v8974_v61  ;;  %v5910_v20 = vld [vmem:[#allocation2 + $0xf8] sm:$0xff]  ;;  %v341_v58 = vld [vmem:[%s14208_s12 + $0x1f0] sm:$0xf] }
 0x30e   : > { %v7130_v0 = vadd.f32 %v12851_v21, %v7098_v59  ;;  %v6906_v34 = vpop.f32.mrb[113].mxu1  ;;  %13115 = vmatmul.mubr.msk.f32.gmra.mrb[154].mxu1 %vm800_vm3, %v14071_v33  ;;  %v5935_v16 = vadd.f32 %v5903_v39, %v5808_v32  ;;  %13205 = vmatprep.mubr.msk.f32.mxu0 %vm800_vm3, %v8960_v55  ;;  %v8978_v55 = vrot.slane %v14077_v10, 4  ;;  %v7104_v59 = vld [vmem:[#allocation2 + $0x38] sm:$0xff]  ;;  %v5909_v32 = vld [vmem:[#allocation2 + $0xf0] sm:$0xff] }
 0x30f   : > { %v7129_v35 = vadd.f32 %v7097_v36, %v6906_v34  ;;  %13117 = vmatprep.mubr.msk.f32.mxu1 %vm800_vm3, %v14072_v41  ;;  %5968 = vst.msk [vmem:[#allocation2 + $0xc8] sm:$0xff] %vm1285_vm4, %v5936_v6  ;;  %v7103_v34 = vld [vmem:[#allocation2 + $0x30] sm:$0xff]  ;;  %v14079_v36 = vld [vmem:[%s14208_s12 + $0x9a8] sm:$0xff]  ;;  %v8977_v41 = vsel %vm875_vm0, %v8974_v61, %v8976_v40 }
 0x310   : > { %7162 = vst.msk [vmem:[#allocation2 + $0x8] sm:$0xff] %vm1285_vm4, %v7130_v0  ;;  %5967 = vst.msk [vmem:[#allocation2 + $0xc0] sm:$0xff] %vm1285_vm4, %v5935_v16  ;;  %v12740_v9 = vpop.f32.mrb[92].mxu0  ;;  %v7110_v40 = vld [vmem:[#allocation2 + $0x68] sm:$0xff] }
 0x311   : > { %7161 = vst.msk [vmem:[#allocation2] sm:$0xff] %vm1285_vm4, %v7129_v35  ;;  %v12854_v30 = vpop.f32.mrb[114].mxu1  ;;  %v5938_v46 = vadd.f32 %v12740_v9, %v5906_v63  ;;  %v5818_v11 = vpop.f32.mrb[93].mxu0  ;;  %13206 = vmatmul.mubr.msk.f32.gmra.mrb[134].mxu0 %vm800_vm3, %v8962_v24  ;;  %v14080_v35 = vld [vmem:[%s14208_s12 + $0x9d8] sm:$0xff]  ;;  %v8981_v24 = vrot.slane %v327_v26, 4  ;;  %v8984_v9 = vrot.slane %v14082_v47, 4 }
 0x312   : > { %v7132_v3 = vadd.f32 %v12854_v30, %v7100_v14  ;;  %v6916_v18 = vpop.f32.mrb[115].mxu1  ;;  %13118 = vmatmul.mubr.msk.f32.gmra.mrb[156].mxu1 %vm800_vm3, %v14073_v29  ;;  %v5937_v2 = vadd.f32 %v5905_v52, %v5818_v11  ;;  %13208 = vmatprep.mubr.msk.f32.mxu0 %vm800_vm3, %v8965_v49  ;;  %v8980_v49 = vsel %vm875_vm0, %v8978_v55, %v8979_v13  ;;  %v334_v63 = vld [vmem:[%s14208_s12 + $0x1b8] sm:$0xf]  ;;  %v7106_v14 = vld [vmem:[#allocation2 + $0x48] sm:$0xff]  ;;  %v14083_v11 = vld [vmem:[%s14208_s12 + $0x9e0] sm:$0xff] }
 0x313   : > { %v7131_v4 = vadd.f32 %v7099_v19, %v6916_v18  ;;  %13120 = vmatprep.mubr.msk.f32.mxu1 %vm800_vm3, %v14074_v27  ;;  %5970 = vst.msk [vmem:[#allocation2 + $0xd8] sm:$0xff] %vm1285_vm4, %v5938_v46  ;;  %v598_v18 = vld [vmem:[%s14208_s12 + $0xa18] sm:$0xff]  ;;  %v8982_v19 = vsel %vm875_vm0, %v8979_v13, %v8981_v24  ;;  %v8986_v29 = vrot.slane %v334_v63, 4  ;;  %v14084_v27 = vld [vmem:[%s14208_s12 + $0x1e0] sm:$0xff]  ;;  %v612_v13 = vld [vmem:[%s14208_s12 + $0xa88] sm:$0xff] }
 0x314   : > { %7164 = vst.msk [vmem:[#allocation2 + $0x18] sm:$0xff] %vm1285_vm4, %v7132_v3  ;;  %5969 = vst.msk [vmem:[#allocation2 + $0xd0] sm:$0xff] %vm1285_vm4, %v5937_v2  ;;  %v12743_v25 = vpop.f32.mrb[94].mxu0  ;;  %v7105_v3 = vld [vmem:[#allocation2 + $0x40] sm:$0xff]  ;;  %v604_v2 = vld [vmem:[%s14208_s12 + $0xa48] sm:$0xff] }
 0x315   : > { %7163 = vst.msk [vmem:[#allocation2 + $0x10] sm:$0xff] %vm1285_vm4, %v7131_v4  ;;  %v12857_v45 = vpop.f32.mrb[116].mxu1  ;;  %v5940_v8 = vadd.f32 %v12743_v25, %v5908_v57  ;;  %v5828_v56 = vpop.f32.mrb[95].mxu0  ;;  %13209 = vmatmul.mubr.msk.f32.gmra.mrb[136].mxu0 %vm800_vm3, %v8967_v1  ;;  %v8985_v4 = vsel %vm875_vm0, %v8983_v17, %v8984_v9  ;;  %v8988_v1 = vrot.slane %v14084_v27, 4  ;;  %v7109_v55 = vld [vmem:[#allocation2 + $0x60] sm:$0xff]  ;;  %v14090_v17 = vld [vmem:[%s14208_s12 + $0x288] sm:$0xff] }
 0x316   : > { %v7134_v42 = vadd.f32 %v12857_v45, %v7102_v23  ;;  %v6926_v48 = vpop.f32.mrb[117].mxu1  ;;  %13121 = vmatmul.mubr.msk.f32.gmra.mrb[158].mxu1 %vm800_vm3, %v14075_v43  ;;  %v5939_v22 = vadd.f32 %v5907_v54, %v5828_v56  ;;  %13211 = vmatprep.mubr.msk.f32.mxu0 %vm800_vm3, %v8970_v50  ;;  %v8989_v50 = vrot.slane %v14085_v31, 4  ;;  %v7107_v45 = vld [vmem:[#allocation2 + $0x50] sm:$0xff]  ;;  %v8991_v56 = vrot.slane %v341_v58, 4  ;;  %v611_v54 = vld [vmem:[%s14208_s12 + $0xa80] sm:$0xff]  ;;  %v14093_v31 = vld [vmem:[%s14208_s12 + $0x2c8] sm:$0xff] }
 0x317   : > { %v7133_v38 = vadd.f32 %v7101_v51, %v6926_v48  ;;  %13123 = vmatprep.mubr.msk.f32.mxu1 %vm800_vm3, %v14076_v44  ;;  %5972 = vst.msk [vmem:[#allocation2 + $0xe8] sm:$0xff] %vm1285_vm4, %v5940_v8  ;;  %v605_v8 = vld [vmem:[%s14208_s12 + $0xa50] sm:$0xff]  ;;  %v14086_v51 = vld [vmem:[%s14208_s12 + $0x218] sm:$0xff]  ;;  %v348_v44 = vld [vmem:[%s14208_s12 + $0x228] sm:$0xf]  ;;  %v9003_v47 = vrot.slane %v14090_v17, 4 }
 0x318   : > { %7166 = vst.msk [vmem:[#allocation2 + $0x28] sm:$0xff] %vm1285_vm4, %v7134_v42  ;;  %5971 = vst.msk [vmem:[#allocation2 + $0xe0] sm:$0xff] %vm1285_vm4, %v5939_v22  ;;  %v12746_v7 = vpop.f32.mrb[96].mxu0  ;;  %v8987_v42 = vsel %vm875_vm0, %v8984_v9, %v8986_v29  ;;  %v8990_v48 = vsel %vm875_vm0, %v8988_v1, %v8989_v50  ;;  %v8993_v43 = vrot.slane %v14086_v51, 4  ;;  %v14087_v22 = vld [vmem:[%s14208_s12 + $0x220] sm:$0xff]  ;;  %v8992_v26 = vsel %vm875_vm0, %v8989_v50, %v8991_v56  ;;  %v14091_v9 = vld [vmem:[%s14208_s12 + $0x290] sm:$0xff] }
 0x319   : > { %7165 = vst.msk [vmem:[#allocation2 + $0x20] sm:$0xff] %vm1285_vm4, %v7133_v38  ;;  %v12860_v21 = vpop.f32.mrb[118].mxu1  ;;  %v5942_v15 = vadd.f32 %v12746_v7, %v5910_v20  ;;  %v5838_v0 = vpop.f32.mrb[97].mxu0  ;;  %13212 = vmatmul.mubr.msk.f32.gmra.mrb[138].mxu0 %vm800_vm3, %v8972_v37  ;;  %v8994_v38 = vrot.slane %v14087_v22, 4  ;;  %v8996_v7 = vrot.slane %v348_v44, 4  ;;  %v618_v20 = vld [vmem:[%s14208_s12 + $0xab8] sm:$0xff] }
 0x31a   : > { %v7136_v6 = vadd.f32 %v12860_v21, %v7104_v59  ;;  %v6936_v39 = vpop.f32.mrb[119].mxu1  ;;  %13124 = vmatmul.mubr.msk.f32.gmra.mrb[160].mxu1 %vm800_vm3, %v14079_v36  ;;  %v5941_v33 = vadd.f32 %v5909_v32, %v5838_v0  ;;  %13214 = vmatprep.mubr.msk.f32.mxu0 %vm800_vm3, %v8975_v28  ;;  %v14088_v59 = vld [vmem:[%s14208_s12 + $0x250] sm:$0xff]  ;;  %v355_v32 = vld [vmem:[%s14208_s12 + $0x260] sm:$0xf]  ;;  %v9004_v63 = vrot.slane %v14091_v9, 4  ;;  %v9009_v50 = vrot.slane %v14093_v31, 4 }
 0x31b   : > { %v7135_v16 = vadd.f32 %v7103_v34, %v6936_v39  ;;  %13126 = vmatprep.mubr.msk.f32.mxu1 %vm800_vm3, %v14080_v35  ;;  %5974 = vst.msk [vmem:[#allocation2 + $0xf8] sm:$0xff] %vm1285_vm4, %v5942_v15  ;;  %v8995_v21 = vsel %vm875_vm0, %v8993_v43, %v8994_v38  ;;  %v8998_v15 = vrot.slane %v14088_v59, 4  ;;  %v7112_v34 = vld [vmem:[#allocation2 + $0x78] sm:$0xff]  ;;  %v8997_v24 = vsel %vm875_vm0, %v8994_v38, %v8996_v7  ;;  %v14092_v27 = vld [vmem:[%s14208_s12 + $0x2c0] sm:$0xff]  ;;  %v369_v58 = vld [vmem:[%s14208_s12 + $0x2d0] sm:$0xf] }
 0x31c   : > { %7168 = vst.msk [vmem:[#allocation2 + $0x38] sm:$0xff] %vm1285_vm4, %v7136_v6  ;;  %5973 = vst.msk [vmem:[#allocation2 + $0xf0] sm:$0xff] %vm1285_vm4, %v5941_v33  ;;  %v14089_v6 = vld [vmem:[%s14208_s12 + $0x258] sm:$0xff]  ;;  %v9008_v1 = vrot.slane %v14092_v27, 4  ;;  %v9011_v56 = vrot.slane %v369_v58, 4  ;;  %v14095_v43 = vld [vmem:[%s14208_s12 + $0x300] sm:$0xff] }
 0x31d   : > { %7167 = vst.msk [vmem:[#allocation2 + $0x30] sm:$0xff] %vm1285_vm4, %v7135_v16  ;;  %v12863_v30 = vpop.f32.mrb[120].mxu1  ;;  %13215 = vmatmul.mubr.msk.f32.gmra.mrb[140].mxu0 %vm800_vm3, %v8977_v41  ;;  %v8999_v0 = vrot.slane %v14089_v6, 4  ;;  %v7111_v16 = vld [vmem:[#allocation2 + $0x70] sm:$0xff]  ;;  %v619_v41 = vld [vmem:[%s14208_s12 + $0xac0] sm:$0xff]  ;;  %v9014_v22 = vrot.slane %v14095_v43, 4 }
 0x31e   : > { %v7138_v53 = vadd.f32 %v12863_v30, %v7106_v14  ;;  %v6946_v46 = vpop.f32.mrb[121].mxu1  ;;  %13127 = vmatmul.mubr.msk.f32.gmra.mrb[162].mxu1 %vm800_vm3, %v14083_v11  ;;  %13217 = vmatprep.mubr.msk.f32.mxu0 %vm800_vm3, %v8980_v49  ;;  %v625_v49 = vld [vmem:[%s14208_s12 + $0xaf0] sm:$0xff]  ;;  %v362_v30 = vld [vmem:[%s14208_s12 + $0x298] sm:$0xf]  ;;  %v7113_v11 = vld [vmem:[#allocation2 + $0x80] sm:$0xff] }
 0x31f   : > { %v7137_v52 = vadd.f32 %v7105_v3, %v6946_v46  ;;  %13129 = vmatprep.mubr.msk.f32.mxu1 %vm800_vm3, %v597_v62  ;;  %v9001_v62 = vrot.slane %v355_v32, 4  ;;  %v9000_v12 = vsel %vm875_vm0, %v8998_v15, %v8999_v0  ;;  %v9006_v29 = vrot.slane %v362_v30, 4  ;;  %v376_v38 = vld [vmem:[%s14208_s12 + $0x308] sm:$0xf]  ;;  %v14096_v7 = vld [vmem:[%s14208_s12 + $0x330] sm:$0xff]  ;;  %v7121_v30 = vld [vmem:[#allocation2 + $0xc0] sm:$0xff] }
 0x320   : > { %7170 = vst.msk [vmem:[#allocation2 + $0x48] sm:$0xff] %vm1285_vm4, %v7138_v53  ;;  %v7114_v53 = vld [vmem:[#allocation2 + $0x88] sm:$0xff]  ;;  %v383_v15 = vld [vmem:[%s14208_s12 + $0x340] sm:$0xf]  ;;  %v7123_v31 = vld [vmem:[#allocation2 + $0xd0] sm:$0xff] }
 0x321   : > { %7169 = vst.msk [vmem:[#allocation2 + $0x40] sm:$0xff] %vm1285_vm4, %v7137_v52  ;;  %v12866_v61 = vpop.f32.mrb[122].mxu1  ;;  %13218 = vmatmul.mubr.msk.f32.gmra.mrb[142].mxu0 %vm800_vm3, %v8982_v19  ;;  %v9002_v19 = vsel %vm875_vm0, %v8999_v0, %v9001_v62  ;;  %v7120_v0 = vld [vmem:[#allocation2 + $0xb8] sm:$0xff]  ;;  %v14099_v62 = vld [vmem:[%s14208_s12 + $0x370] sm:$0xff] }
 0x322   : > { %v7140_v25 = vadd.f32 %v12866_v61, %v7108_v5  ;;  %v6956_v57 = vpop.f32.mrb[123].mxu1  ;;  %13130 = vmatmul.mubr.msk.f32.gmra.mrb[164].mxu1 %vm800_vm3, %v598_v18  ;;  %13220 = vmatprep.mubr.msk.f32.mxu0 %vm800_vm3, %v8985_v4  ;;  %v626_v18 = vld [vmem:[%s14208_s12 + $0xaf8] sm:$0xff]  ;;  %v9005_v4 = vsel %vm875_vm0, %v9003_v47, %v9004_v63  ;;  %v7122_v47 = vld [vmem:[#allocation2 + $0xc8] sm:$0xff] }
 0x323   : > { %v7139_v23 = vadd.f32 %v7107_v45, %v6956_v57  ;;  %13132 = vmatprep.mubr.msk.f32.mxu1 %vm800_vm3, %v604_v2  ;;  %v632_v2 = vld [vmem:[%s14208_s12 + $0xb28] sm:$0xff]  ;;  %v7116_v5 = vld [vmem:[#allocation2 + $0x98] sm:$0xff]  ;;  %v7115_v45 = vld [vmem:[#allocation2 + $0x90] sm:$0xff] }
 0x324   : > { %7172 = vst.msk [vmem:[#allocation2 + $0x58] sm:$0xff] %vm1285_vm4, %v7140_v25 }
 0x325   : > { %7171 = vst.msk [vmem:[#allocation2 + $0x50] sm:$0xff] %vm1285_vm4, %v7139_v23  ;;  %v12869_v37 = vpop.f32.mrb[124].mxu1  ;;  %13221 = vmatmul.mubr.msk.f32.gmra.mrb[144].mxu0 %vm800_vm3, %v8987_v42  ;;  %v9007_v42 = vsel %vm875_vm0, %v9004_v63, %v9006_v29  ;;  %v533_v29 = vld [vmem:[%s14208_s12 + $0x810] sm:$0xf] }
 0x326   : > { %v7142_v28 = vadd.f32 %v12869_v37, %v7110_v40  ;;  %v6966_v10 = vpop.f32.mrb[125].mxu1  ;;  %13133 = vmatmul.mubr.msk.f32.gmra.mrb[166].mxu1 %vm800_vm3, %v605_v8  ;;  %13223 = vmatprep.mubr.msk.f32.mxu0 %vm800_vm3, %v8990_v48  ;;  %v633_v8 = vld [vmem:[%s14208_s12 + $0xb30] sm:$0xff]  ;;  %v14094_v48 = vld [vmem:[%s14208_s12 + $0x2f8] sm:$0xff]  ;;  %v7118_v37 = vld [vmem:[#allocation2 + $0xa8] sm:$0xff] }
 0x327   : > { %v7141_v60 = vadd.f32 %v7109_v55, %v6966_v10  ;;  %13135 = vmatprep.mubr.msk.f32.mxu1 %vm800_vm3, %v611_v54  ;;  %v9010_v54 = vsel %vm875_vm0, %v9008_v1, %v9009_v50  ;;  %v9013_v51 = vrot.slane %v14094_v48, 4  ;;  %v7117_v10 = vld [vmem:[#allocation2 + $0xa0] sm:$0xff] }
 0x328   : > { %7174 = vst.msk [vmem:[#allocation2 + $0x68] sm:$0xff] %vm1285_vm4, %v7142_v28 }
 0x329   : > { %7173 = vst.msk [vmem:[#allocation2 + $0x60] sm:$0xff] %vm1285_vm4, %v7141_v60  ;;  %v12872_v39 = vpop.f32.mrb[126].mxu1  ;;  %13224 = vmatmul.mubr.msk.f32.gmra.mrb[146].mxu0 %vm800_vm3, %v8992_v26  ;;  %v9012_v60 = vsel %vm875_vm0, %v9009_v50, %v9011_v56  ;;  %v9015_v26 = vsel %vm875_vm0, %v9013_v51, %v9014_v22  ;;  %v7126_v56 = vld [vmem:[#allocation2 + $0xe8] sm:$0xff]  ;;  %v7125_v51 = vld [vmem:[#allocation2 + $0xe0] sm:$0xff] }
 0x32a   : > { %v7144_v36 = vadd.f32 %v12872_v39, %v7112_v34  ;;  %v6976_v33 = vpop.f32.mrb[127].mxu1  ;;  %13136 = vmatmul.mubr.msk.f32.gmra.mrb[168].mxu1 %vm800_vm3, %v612_v13  ;;  %13226 = vmatprep.mubr.msk.f32.mxu0 %vm800_vm3, %v8995_v21  ;;  %v9016_v13 = vrot.slane %v376_v38, 4  ;;  %v14097_v21 = vld [vmem:[%s14208_s12 + $0x338] sm:$0xff]  ;;  %v7119_v34 = vld [vmem:[#allocation2 + $0xb0] sm:$0xff] }
 0x32b   : > { %v7143_v35 = vadd.f32 %v7111_v16, %v6976_v33  ;;  %13138 = vmatprep.mubr.msk.f32.mxu1 %vm800_vm3, %v618_v20  ;;  %v9018_v20 = vrot.slane %v14096_v7, 4  ;;  %v9019_v59 = vrot.slane %v14097_v21, 4  ;;  %v9021_v16 = vrot.slane %v383_v15, 4 }
 0x32c   : > { %7176 = vst.msk [vmem:[#allocation2 + $0x78] sm:$0xff] %vm1285_vm4, %v7144_v36  ;;  %v9017_v33 = vsel %vm875_vm0, %v9014_v22, %v9016_v13  ;;  %v7128_v13 = vld [vmem:[#allocation2 + $0xf8] sm:$0xff] }
 0x32d   : > { %7175 = vst.msk [vmem:[#allocation2 + $0x70] sm:$0xff] %vm1285_vm4, %v7143_v35  ;;  %v12875_v14 = vpop.f32.mrb[128].mxu1  ;;  %13227 = vmatmul.mubr.msk.f32.gmra.mrb[148].mxu0 %vm800_vm3, %v8997_v24  ;;  %v9020_v35 = vsel %vm875_vm0, %v9018_v20, %v9019_v59  ;;  %v7127_v20 = vld [vmem:[#allocation2 + $0xf0] sm:$0xff] }
 0x32e   : > { %v7146_v46 = vadd.f32 %v12875_v14, %v7114_v53  ;;  %v6986_v3 = vpop.f32.mrb[129].mxu1  ;;  %13139 = vmatmul.mubr.msk.f32.gmra.mrb[170].mxu1 %vm800_vm3, %v619_v41  ;;  %13229 = vmatprep.mubr.msk.f32.mxu0 %vm800_vm3, %v9000_v12  ;;  %v14098_v41 = vld [vmem:[%s14208_s12 + $0x368] sm:$0xff]  ;;  %v390_v12 = vld [vmem:[%s14208_s12 + $0x378] sm:$0xf]  ;;  %v9022_v53 = vsel %vm875_vm0, %v9019_v59, %v9021_v16 }
 0x32f   : > { %v7145_v52 = vadd.f32 %v7113_v11, %v6986_v3  ;;  %13141 = vmatprep.mubr.msk.f32.mxu1 %vm800_vm3, %v625_v49  ;;  %v9023_v24 = vrot.slane %v14098_v41, 4  ;;  %v9024_v49 = vrot.slane %v14099_v62, 4  ;;  %v14100_v11 = vld [vmem:[%s14208_s12 + $0x800] sm:$0xff]  ;;  %v14109_v62 = vld [vmem:[%s14208_s12 + $0x8e8] sm:$0xff] }
 0x330   : > { %7178 = vst.msk [vmem:[#allocation2 + $0x88] sm:$0xff] %vm1285_vm4, %v7146_v46  ;;  %v9026_v46 = vrot.slane %v390_v12, 4  ;;  %v14108_v41 = vld [vmem:[%s14208_s12 + $0x8e0] sm:$0xff]  ;;  %v561_v12 = vld [vmem:[%s14208_s12 + $0x8f0] sm:$0xf] }
 0x331   : > { %7177 = vst.msk [vmem:[#allocation2 + $0x80] sm:$0xff] %vm1285_vm4, %v7145_v52  ;;  %v12878_v61 = vpop.f32.mrb[130].mxu1  ;;  %13230 = vmatmul.mubr.msk.f32.gmra.mrb[150].mxu0 %vm800_vm3, %v9002_v19  ;;  %v9025_v3 = vsel %vm875_vm0, %v9023_v24, %v9024_v49  ;;  %v9734_v52 = vrot.slane %v14100_v11, 4  ;;  %v9754_v24 = vrot.slane %v14108_v41, 4 }
 0x332   : > { %v7148_v25 = vadd.f32 %v12878_v61, %v7116_v5  ;;  %v6996_v57 = vpop.f32.mrb[131].mxu1  ;;  %13142 = vmatmul.mubr.msk.f32.gmra.mrb[172].mxu1 %vm800_vm3, %v626_v18  ;;  %13232 = vmatprep.mubr.msk.f32.mxu0 %vm800_vm3, %v9005_v4  ;;  %v14101_v18 = vld [vmem:[%s14208_s12 + $0x808] sm:$0xff]  ;;  %v7124_v4 = vld [vmem:[#allocation2 + $0xd8] sm:$0xff]  ;;  %v9027_v58 = vsel %vm875_vm0, %v9024_v49, %v9026_v46  ;;  %v9737_v61 = vrot.slane %v533_v29, 4  ;;  %v9755_v49 = vrot.slane %v14109_v62, 4 }
 0x333   : > { %v7147_v23 = vadd.f32 %v7115_v45, %v6996_v57  ;;  %13144 = vmatprep.mubr.msk.f32.mxu1 %vm800_vm3, %v632_v2  ;;  %v9735_v19 = vrot.slane %v14101_v18, 4  ;;  %v14103_v45 = vld [vmem:[%s14208_s12 + $0x840] sm:$0xff]  ;;  %v568_v46 = vld [vmem:[%s14208_s12 + $0x928] sm:$0xf]  ;;  %v14112_v18 = vld [vmem:[%s14208_s12 + $0x950] sm:$0xff] }
 0x334   : > { %7180 = vst.msk [vmem:[#allocation2 + $0x98] sm:$0xff] %vm1285_vm4, %v7148_v25  ;;  %v14102_v25 = vld [vmem:[%s14208_s12 + $0x838] sm:$0xff]  ;;  %v9762_v11 = vrot.slane %v568_v46, 4 }
 0x335   : > { %7179 = vst.msk [vmem:[#allocation2 + $0x90] sm:$0xff] %vm1285_vm4, %v7147_v23  ;;  %v12881_v44 = vpop.f32.mrb[132].mxu1  ;;  %13233 = vmatmul.mubr.msk.f32.gmra.mrb[152].mxu0 %vm800_vm3, %v9007_v42  ;;  %v9736_v5 = vsel %vm875_vm0, %v9734_v52, %v9735_v19  ;;  %v9739_v57 = vrot.slane %v14102_v25, 4  ;;  %v9740_v23 = vrot.slane %v14103_v45, 4  ;;  %v9738_v22 = vsel %vm875_vm0, %v9735_v19, %v9737_v61  ;;  %v14113_v29 = vld [vmem:[%s14208_s12 + $0x958] sm:$0xff]  ;;  %v14115_v61 = vld [vmem:[%s14208_s12 + $0x990] sm:$0xff] }
 0x336   : > { %v7150_v40 = vadd.f32 %v12881_v44, %v7118_v37  ;;  %v7006_v28 = vpop.f32.mrb[133].mxu1  ;;  %13145 = vmatmul.mubr.msk.f32.gmra.mrb[174].mxu1 %vm800_vm3, %v633_v8  ;;  %13235 = vmatprep.mubr.msk.f32.mxu0 %vm800_vm3, %v9010_v54  ;;  %v540_v8 = vld [vmem:[%s14208_s12 + $0x848] sm:$0xf]  ;;  %v14104_v37 = vld [vmem:[%s14208_s12 + $0x870] sm:$0xff]  ;;  %v9764_v19 = vrot.slane %v14112_v18, 4 }
 0x337   : > { %v7149_v55 = vadd.f32 %v7117_v10, %v7006_v28  ;;  %v9742_v38 = vrot.slane %v540_v8, 4  ;;  %v9741_v44 = vsel %vm875_vm0, %v9739_v57, %v9740_v23  ;;  %v14105_v28 = vld [vmem:[%s14208_s12 + $0x878] sm:$0xff]  ;;  %v7194_v57 = vld [vmem:[#allocation2 + $0x8] sm:$0xff]  ;;  %v7193_v8 = vld [vmem:[#allocation2] sm:$0xff] }
 0x338   : > { %7182 = vst.msk [vmem:[#allocation2 + $0xa8] sm:$0xff] %vm1285_vm4, %v7150_v40  ;;  %v9744_v40 = vrot.slane %v14104_v37, 4  ;;  %v9745_v10 = vrot.slane %v14105_v28, 4  ;;  %v582_v25 = vld [vmem:[%s14208_s12 + $0x998] sm:$0xf] }
 0x339   : > { %7181 = vst.msk [vmem:[#allocation2 + $0xa0] sm:$0xff] %vm1285_vm4, %v7149_v55  ;;  %v12884_v6 = vpop.f32.mrb[134].mxu1  ;;  %13236 = vmatmul.mubr.msk.f32.gmra.mrb[154].mxu0 %vm800_vm3, %v9012_v60  ;;  %v547_v55 = vld [vmem:[%s14208_s12 + $0x880] sm:$0xf]  ;;  %v9743_v59 = vsel %vm875_vm0, %v9740_v23, %v9742_v38  ;;  %v14117_v38 = vld [vmem:[%s14208_s12 + $0x9c8] sm:$0xff] }
 0x33a   : > { %v7152_v32 = vadd.f32 %v12884_v6, %v7120_v0  ;;  %v7016_v39 = vpop.f32.mrb[135].mxu1  ;;  %13238 = vmatprep.mubr.msk.f32.mxu0 %vm800_vm3, %v9015_v26  ;;  %v9747_v15 = vrot.slane %v547_v55, 4  ;;  %v9746_v6 = vsel %vm875_vm0, %v9744_v40, %v9745_v10  ;;  %v14106_v0 = vld [vmem:[%s14208_s12 + $0x8a8] sm:$0xff]  ;;  %v589_v37 = vld [vmem:[%s14208_s12 + $0x9d0] sm:$0xf]  ;;  %v7196_v40 = vld [vmem:[#allocation2 + $0x18] sm:$0xff] }
 0x33b   : > { %v7151_v36 = vadd.f32 %v7119_v34, %v7016_v39  ;;  %v14107_v39 = vld [vmem:[%s14208_s12 + $0x8b0] sm:$0xff] }
 0x33c   : > { %7184 = vst.msk [vmem:[#allocation2 + $0xb8] sm:$0xff] %vm1285_vm4, %v7152_v32  ;;  %v9749_v32 = vrot.slane %v14106_v0, 4  ;;  %v9750_v34 = vrot.slane %v14107_v39, 4  ;;  %v7195_v55 = vld [vmem:[#allocation2 + $0x10] sm:$0xff]  ;;  %v596_v0 = vld [vmem:[%s14208_s12 + $0xa08] sm:$0xf] }
 0x33d   : > { %7183 = vst.msk [vmem:[#allocation2 + $0xb0] sm:$0xff] %vm1285_vm4, %v7151_v36  ;;  %v12887_v17 = vpop.f32.mrb[136].mxu1  ;;  %13239 = vmatmul.mubr.msk.f32.gmra.mrb[156].mxu0 %vm800_vm3, %v9017_v33  ;;  %v554_v36 = vld [vmem:[%s14208_s12 + $0x8b8] sm:$0xf]  ;;  %v9748_v33 = vsel %vm875_vm0, %v9745_v10, %v9747_v15  ;;  %v14119_v15 = vld [vmem:[%s14208_s12 + $0xa00] sm:$0xff] }
 0x33e   : > { %v7154_v9 = vadd.f32 %v12887_v17, %v7122_v47  ;;  %v7026_v63 = vpop.f32.mrb[137].mxu1  ;;  %13241 = vmatprep.mubr.msk.f32.mxu0 %vm800_vm3, %v9020_v35  ;;  %v9752_v16 = vrot.slane %v554_v36, 4  ;;  %v9751_v35 = vsel %vm875_vm0, %v9749_v32, %v9750_v34  ;;  %v9757_v47 = vrot.slane %v561_v12, 4  ;;  %v7198_v32 = vld [vmem:[#allocation2 + $0x28] sm:$0xff] }
 0x33f   : > { %v7153_v14 = vadd.f32 %v7121_v30, %v7026_v63  ;;  %v14110_v63 = vld [vmem:[%s14208_s12 + $0x918] sm:$0xff] }
 0x340   : > { %7186 = vst.msk [vmem:[#allocation2 + $0xc8] sm:$0xff] %vm1285_vm4, %v7154_v9  ;;  %v9753_v17 = vsel %vm875_vm0, %v9750_v34, %v9752_v16  ;;  %v9756_v9 = vsel %vm875_vm0, %v9754_v24, %v9755_v49  ;;  %v9759_v30 = vrot.slane %v14110_v63, 4  ;;  %v602_v34 = vld [vmem:[%s14208_s12 + $0xa38] sm:$0xff]  ;;  %v9782_v24 = vrot.slane %v596_v0, 4 }
 0x341   : > { %7185 = vst.msk [vmem:[#allocation2 + $0xc0] sm:$0xff] %vm1285_vm4, %v7153_v14  ;;  %v12890_v2 = vpop.f32.mrb[138].mxu1  ;;  %13242 = vmatmul.mubr.msk.f32.gmra.mrb[158].mxu0 %vm800_vm3, %v9022_v53  ;;  %v14111_v14 = vld [vmem:[%s14208_s12 + $0x920] sm:$0xff] }
 0x342   : > { %v7156_v27 = vadd.f32 %v12890_v2, %v7124_v4  ;;  %v7036_v1 = vpop.f32.mrb[139].mxu1  ;;  %13244 = vmatprep.mubr.msk.f32.mxu0 %vm800_vm3, %v9025_v3  ;;  %v9760_v53 = vrot.slane %v14111_v14, 4  ;;  %v9758_v3 = vsel %vm875_vm0, %v9755_v49, %v9757_v47  ;;  %v9765_v2 = vrot.slane %v14113_v29, 4  ;;  %v575_v4 = vld [vmem:[%s14208_s12 + $0x960] sm:$0xf]  ;;  %v14120_v49 = vld [vmem:[%s14208_s12 + $0xa30] sm:$0xff] }
 0x343   : > { %v7155_v50 = vadd.f32 %v7123_v31, %v7036_v1  ;;  %v9767_v1 = vrot.slane %v575_v4, 4  ;;  %v9784_v12 = vrot.slane %v14120_v49, 4  ;;  %v603_v47 = vld [vmem:[%s14208_s12 + $0xa40] sm:$0xf]  ;;  %v610_v4 = vld [vmem:[%s14208_s12 + $0xa78] sm:$0xf] }
 0x344   : > { %7188 = vst.msk [vmem:[#allocation2 + $0xd8] sm:$0xff] %vm1285_vm4, %v7156_v27  ;;  %v9761_v52 = vsel %vm875_vm0, %v9759_v30, %v9760_v53  ;;  %v9763_v27 = vsel %vm875_vm0, %v9760_v53, %v9762_v11  ;;  %v9766_v31 = vsel %vm875_vm0, %v9764_v19, %v9765_v2  ;;  %v609_v30 = vld [vmem:[%s14208_s12 + $0xa70] sm:$0xff]  ;;  %v14121_v19 = vld [vmem:[%s14208_s12 + $0xa68] sm:$0xff] }
 0x345   : > { %7187 = vst.msk [vmem:[#allocation2 + $0xd0] sm:$0xff] %vm1285_vm4, %v7155_v50  ;;  %v12893_v42 = vpop.f32.mrb[140].mxu1  ;;  %13245 = vmatmul.mubr.msk.f32.gmra.mrb[160].mxu0 %vm800_vm3, %v9027_v58  ;;  %v14114_v50 = vld [vmem:[%s14208_s12 + $0x988] sm:$0xff]  ;;  %v7199_v53 = vld [vmem:[#allocation2 + $0x30] sm:$0xff]  ;;  %v9789_v29 = vrot.slane %v14121_v19, 4 }
 0x346   : > { %v7158_v54 = vadd.f32 %v12893_v42, %v7126_v56  ;;  %v7046_v48 = vpop.f32.mrb[141].mxu1  ;;  %13249 = vmatprep.mubr.msk.f32.mxu0 %vm800_vm3, %v9736_v5  ;;  %v9769_v58 = vrot.slane %v14114_v50, 4  ;;  %v9770_v5 = vrot.slane %v14115_v61, 4  ;;  %v7207_v49 = vld [vmem:[#allocation2 + $0x70] sm:$0xff] }
 0x347   : > { %v7157_v43 = vadd.f32 %v7125_v51, %v7046_v48  ;;  %v9772_v48 = vrot.slane %v582_v25, 4 }
 0x348   : > { %7190 = vst.msk [vmem:[#allocation2 + $0xe8] sm:$0xff] %vm1285_vm4, %v7158_v54  ;;  %v9768_v54 = vsel %vm875_vm0, %v9765_v2, %v9767_v1  ;;  %v9771_v51 = vsel %vm875_vm0, %v9769_v58, %v9770_v5  ;;  %v9790_v2 = vrot.slane %v609_v30, 4  ;;  %v7201_v58 = vld [vmem:[#allocation2 + $0x40] sm:$0xff]  ;;  %v14125_v30 = vld [vmem:[%s14208_s12 + $0xb48] sm:$0xff] }
 0x349   : > { %7189 = vst.msk [vmem:[#allocation2 + $0xe0] sm:$0xff] %vm1285_vm4, %v7157_v43  ;;  %v12896_v60 = vpop.f32.mrb[142].mxu1  ;;  %13250 = vmatmul.mubr.msk.f32.vlgmr.msra.gmra.mrb[130].mxu0 %vm800_vm3, %v9738_v22  ;;  %v14116_v43 = vld [vmem:[%s14208_s12 + $0x9c0] sm:$0xff] }
 0x34a   : > { %v7160_v26 = vadd.f32 %v12896_v60, %v7128_v13  ;;  %v7056_v7 = vpop.f32.mrb[143].mxu1  ;;  %13252 = vmatprep.mubr.msk.f32.mxu0 %vm800_vm3, %v9741_v44  ;;  %v9774_v22 = vrot.slane %v14116_v43, 4  ;;  %v9775_v44 = vrot.slane %v14117_v38, 4 }
 0x34b   : > { %v7159_v21 = vadd.f32 %v7127_v20, %v7056_v7  ;;  %v9777_v7 = vrot.slane %v589_v37, 4 }
 0x34c   : > { %7192 = vst.msk [vmem:[#allocation2 + $0xf8] sm:$0xff] %vm1285_vm4, %v7160_v26  ;;  %v9773_v26 = vsel %vm875_vm0, %v9770_v5, %v9772_v48  ;;  %v9776_v20 = vsel %vm875_vm0, %v9774_v22, %v9775_v44  ;;  %v7203_v22 = vld [vmem:[#allocation2 + $0x50] sm:$0xff] }
 0x34d   : > { %7191 = vst.msk [vmem:[#allocation2 + $0xf0] sm:$0xff] %vm1285_vm4, %v7159_v21  ;;  %13253 = vmatmul.mubr.msk.f32.gmra.mrb[132].mxu0 %vm800_vm3, %v9743_v59  ;;  %v14118_v21 = vld [vmem:[%s14208_s12 + $0x9f8] sm:$0xff]  ;;  %v9778_v41 = vsel %vm875_vm0, %v9775_v44, %v9777_v7 }
 0x34e   : > { %13255 = vmatprep.mubr.msk.f32.mxu0 %vm800_vm3, %v9746_v6  ;;  %v9779_v59 = vrot.slane %v14118_v21, 4  ;;  %v9780_v6 = vrot.slane %v14119_v15, 4 }
 0x350   : > { %v9781_v62 = vsel %vm875_vm0, %v9779_v59, %v9780_v6  ;;  %v9783_v11 = vsel %vm875_vm0, %v9780_v6, %v9782_v24  ;;  %v7205_v59 = vld [vmem:[#allocation2 + $0x60] sm:$0xff]  ;;  %v637_v24 = vld [vmem:[%s14208_s12 + $0xb50] sm:$0xff] }
 0x351   : > { %13256 = vmatmul.mubr.msk.f32.gmra.mrb[134].mxu0 %vm800_vm3, %v9748_v33  ;;  %v7197_v33 = vld [vmem:[#allocation2 + $0x20] sm:$0xff] }
 0x352   : > { %13258 = vmatprep.mubr.msk.f32.mxu0 %vm800_vm3, %v9751_v35 }
 0x355   : > { %13259 = vmatmul.mubr.msk.f32.gmra.mrb[136].mxu0 %vm800_vm3, %v9753_v17  ;;  %v9785_v17 = vrot.slane %v602_v34, 4  ;;  %v14124_v34 = vld [vmem:[%s14208_s12 + $0xb10] sm:$0xff] }
 0x356   : > { %13261 = vmatprep.mubr.msk.f32.mxu0 %vm800_vm3, %v9756_v9  ;;  %v7200_v9 = vld [vmem:[#allocation2 + $0x38] sm:$0xff] }
 0x357   : > { %v9786_v18 = vsel %vm875_vm0, %v9784_v12, %v9785_v17 }
 0x359   : > { %13262 = vmatmul.mubr.msk.f32.gmra.mrb[138].mxu0 %vm800_vm3, %v9758_v3 }
 0x35a   : > { %13264 = vmatprep.mubr.msk.f32.mxu0 %vm800_vm3, %v9761_v52  ;;  %v9787_v52 = vrot.slane %v603_v47, 4 }
 0x35c   : > { %v12951_v45 = vpop.f32.mrb[98].mxu0  ;;  %v9788_v25 = vsel %vm875_vm0, %v9785_v17, %v9787_v52 }
 0x35d   : > { %v7830_v23 = vadd.f32 %v12951_v45, %v7194_v57  ;;  %v7670_v42 = vpop.f32.mrb[99].mxu0  ;;  %13265 = vmatmul.mubr.msk.f32.gmra.mrb[140].mxu0 %vm800_vm3, %v9763_v27  ;;  %v7202_v27 = vld [vmem:[#allocation2 + $0x48] sm:$0xff]  ;;  %v9792_v57 = vrot.slane %v610_v4, 4  ;;  %v9791_v45 = vsel %vm875_vm0, %v9789_v29, %v9790_v2 }
 0x35e   : > { %v7829_v56 = vadd.f32 %v7670_v42, %v7193_v8  ;;  %13267 = vmatprep.mubr.msk.f32.mxu0 %vm800_vm3, %v9766_v31  ;;  %v616_v31 = vld [vmem:[%s14208_s12 + $0xaa8] sm:$0xff] }
 0x35f   : > { %7862 = vst.msk [vmem:[#allocation2 + $0x8] sm:$0xff] %vm1285_vm4, %v7830_v23  ;;  %v14122_v23 = vld [vmem:[%s14208_s12 + $0xaa0] sm:$0xff]  ;;  %v9795_v42 = vrot.slane %v616_v31, 4  ;;  %v9793_v37 = vsel %vm875_vm0, %v9790_v2, %v9792_v57  ;;  %v7214_v57 = vld [vmem:[#allocation2 + $0xa8] sm:$0xff] }
 0x360   : > { %7861 = vst.msk [vmem:[#allocation2] sm:$0xff] %vm1285_vm4, %v7829_v56  ;;  %v12954_v28 = vpop.f32.mrb[100].mxu0  ;;  %v9794_v8 = vrot.slane %v14122_v23, 4  ;;  %v617_v56 = vld [vmem:[%s14208_s12 + $0xab0] sm:$0xf] }
 0x361   : > { %v7832_v10 = vadd.f32 %v12954_v28, %v7196_v40  ;;  %v7680_v60 = vpop.f32.mrb[101].mxu0  ;;  %13268 = vmatmul.mubr.msk.f32.gmra.mrb[142].mxu0 %vm800_vm3, %v9768_v54  ;;  %v7204_v54 = vld [vmem:[#allocation2 + $0x58] sm:$0xff]  ;;  %v9797_v40 = vrot.slane %v617_v56, 4 }
 0x362   : > { %v7831_v13 = vadd.f32 %v7680_v60, %v7195_v55  ;;  %13270 = vmatprep.mubr.msk.f32.mxu0 %vm800_vm3, %v9771_v51  ;;  %v623_v51 = vld [vmem:[%s14208_s12 + $0xae0] sm:$0xff]  ;;  %v9796_v28 = vsel %vm875_vm0, %v9794_v8, %v9795_v42 }
 0x363   : > { %7864 = vst.msk [vmem:[#allocation2 + $0x18] sm:$0xff] %vm1285_vm4, %v7832_v10  ;;  %v14123_v10 = vld [vmem:[%s14208_s12 + $0xad8] sm:$0xff]  ;;  %v9800_v60 = vrot.slane %v623_v51, 4  ;;  %v9798_v0 = vsel %vm875_vm0, %v9795_v42, %v9797_v40  ;;  %v7213_v8 = vld [vmem:[#allocation2 + $0xa0] sm:$0xff] }
 0x364   : > { %7863 = vst.msk [vmem:[#allocation2 + $0x10] sm:$0xff] %vm1285_vm4, %v7831_v13  ;;  %v12957_v39 = vpop.f32.mrb[102].mxu0  ;;  %v9799_v55 = vrot.slane %v14123_v10, 4  ;;  %v624_v13 = vld [vmem:[%s14208_s12 + $0xae8] sm:$0xf] }
 0x365   : > { %v7834_v36 = vadd.f32 %v12957_v39, %v7198_v32  ;;  %v7690_v16 = vpop.f32.mrb[103].mxu0  ;;  %13271 = vmatmul.mubr.msk.f32.gmra.mrb[144].mxu0 %vm800_vm3, %v9773_v26  ;;  %v7206_v26 = vld [vmem:[#allocation2 + $0x68] sm:$0xff]  ;;  %v9802_v32 = vrot.slane %v624_v13, 4 }
 0x366   : > { %v7833_v35 = vadd.f32 %v7690_v16, %v7197_v33  ;;  %13273 = vmatprep.mubr.msk.f32.mxu0 %vm800_vm3, %v9776_v20  ;;  %v630_v20 = vld [vmem:[%s14208_s12 + $0xb18] sm:$0xff]  ;;  %v9801_v39 = vsel %vm875_vm0, %v9799_v55, %v9800_v60  ;;  %v631_v16 = vld [vmem:[%s14208_s12 + $0xb20] sm:$0xf] }
 0x367   : > { %7866 = vst.msk [vmem:[#allocation2 + $0x28] sm:$0xff] %vm1285_vm4, %v7834_v36  ;;  %v9804_v36 = vrot.slane %v14124_v34, 4  ;;  %v9805_v33 = vrot.slane %v630_v20, 4  ;;  %v9803_v47 = vsel %vm875_vm0, %v9800_v60, %v9802_v32  ;;  %v7220_v60 = vld [vmem:[#allocation2 + $0xd8] sm:$0xff] }
 0x368   : > { %7865 = vst.msk [vmem:[#allocation2 + $0x20] sm:$0xff] %vm1285_vm4, %v7833_v35  ;;  %v12960_v63 = vpop.f32.mrb[104].mxu0  ;;  %v7208_v35 = vld [vmem:[#allocation2 + $0x78] sm:$0xff] }
 0x369   : > { %v7836_v14 = vadd.f32 %v12960_v63, %v7200_v9  ;;  %v7700_v46 = vpop.f32.mrb[105].mxu0  ;;  %13274 = vmatmul.mubr.msk.f32.gmra.mrb[146].mxu0 %vm800_vm3, %v9778_v41  ;;  %v9807_v9 = vrot.slane %v631_v16, 4  ;;  %v9806_v63 = vsel %vm875_vm0, %v9804_v36, %v9805_v33  ;;  %v7224_v34 = vld [vmem:[#allocation2 + $0xf8] sm:$0xff]  ;;  %v7223_v16 = vld [vmem:[#allocation2 + $0xf0] sm:$0xff] }
 0x36a   : > { %v7835_v3 = vadd.f32 %v7700_v46, %v7199_v53  ;;  %13276 = vmatprep.mubr.msk.f32.mxu0 %vm800_vm3, %v9781_v62  ;;  %v9810_v53 = vrot.slane %v637_v24, 4  ;;  %v638_v46 = vld [vmem:[%s14208_s12 + $0xb58] sm:$0xf]  ;;  %s11214_s12 = sshll.u32 %s18427_s25, 8 }
 0x36b   : > { %7868 = vst.msk [vmem:[#allocation2 + $0x38] sm:$0xff] %vm1285_vm4, %v7836_v14  ;;  %v9809_v14 = vrot.slane %v14125_v30, 4  ;;  %v9808_v2 = vsel %vm875_vm0, %v9805_v33, %v9807_v9  ;;  %v9812_v4 = vrot.slane %v638_v46, 4  ;;  %s17960_s23 = scalar_lea.vmem %s18065_s7, %s11214_s12 }
 0x36c   : > { %7867 = vst.msk [vmem:[#allocation2 + $0x30] sm:$0xff] %vm1285_vm4, %v7835_v3  ;;  %v12963_v1 = vpop.f32.mrb[106].mxu0  ;;  %v7210_v3 = vld [vmem:[#allocation2 + $0x88] sm:$0xff] }
 0x36d   : > { %v7838_v50 = vadd.f32 %v12963_v1, %v7202_v27  ;;  %v7710_v61 = vpop.f32.mrb[107].mxu0  ;;  %13277 = vmatmul.mubr.msk.f32.gmra.mrb[148].mxu0 %vm800_vm3, %v9783_v11  ;;  %v9811_v27 = vsel %vm875_vm0, %v9809_v14, %v9810_v53  ;;  %v7212_v1 = vld [vmem:[#allocation2 + $0x98] sm:$0xff] }
 0x36e   : > { %v7837_v5 = vadd.f32 %v7710_v61, %v7201_v58  ;;  %13279 = vmatprep.mubr.msk.f32.mxu0 %vm800_vm3, %v9786_v18  ;;  %v7209_v18 = vld [vmem:[#allocation2 + $0x80] sm:$0xff]  ;;  %v7211_v58 = vld [vmem:[#allocation2 + $0x90] sm:$0xff] }
 0x36f   : > { %7870 = vst.msk [vmem:[#allocation2 + $0x48] sm:$0xff] %vm1285_vm4, %v7838_v50 }
 0x370   : > { %7869 = vst.msk [vmem:[#allocation2 + $0x40] sm:$0xff] %vm1285_vm4, %v7837_v5  ;;  %v12966_v48 = vpop.f32.mrb[108].mxu0 }
 0x371   : > { %v7840_v43 = vadd.f32 %v12966_v48, %v7204_v54  ;;  %v7720_v38 = vpop.f32.mrb[109].mxu0  ;;  %13280 = vmatmul.mubr.msk.f32.gmra.mrb[150].mxu0 %vm800_vm3, %v9788_v25  ;;  %v9813_v25 = vsel %vm875_vm0, %v9810_v53, %v9812_v4  ;;  %v7216_v54 = vld [vmem:[#allocation2 + $0xb8] sm:$0xff]  ;;  %v8832_v53 = vld [vmem:[#allocation2 + $0x10] sm:$0xff] }
 0x372   : > { %v7839_v44 = vadd.f32 %v7720_v38, %v7203_v22  ;;  %13282 = vmatprep.mubr.msk.f32.mxu0 %vm800_vm3, %v9791_v45  ;;  %v8837_v4 = vld [vmem:[#allocation2 + $0x38] sm:$0xff] }
 0x373   : > { %7872 = vst.msk [vmem:[#allocation2 + $0x58] sm:$0xff] %vm1285_vm4, %v7840_v43  ;;  %v7215_v43 = vld [vmem:[#allocation2 + $0xb0] sm:$0xff] }
 0x374   : > { %7871 = vst.msk [vmem:[#allocation2 + $0x50] sm:$0xff] %vm1285_vm4, %v7839_v44  ;;  %v12969_v7 = vpop.f32.mrb[110].mxu0  ;;  %v7218_v44 = vld [vmem:[#allocation2 + $0xc8] sm:$0xff] }
 0x375   : > { %v7842_v21 = vadd.f32 %v12969_v7, %v7206_v26  ;;  %v7730_v15 = vpop.f32.mrb[111].mxu0  ;;  %13283 = vmatmul.mubr.msk.f32.gmra.mrb[152].mxu0 %vm800_vm3, %v9793_v37  ;;  %v7219_v7 = vld [vmem:[#allocation2 + $0xd0] sm:$0xff] }
 0x376   : > { %v7841_v6 = vadd.f32 %v7730_v15, %v7205_v59  ;;  %13285 = vmatprep.mubr.msk.f32.mxu0 %vm800_vm3, %v9796_v28  ;;  %v7217_v28 = vld [vmem:[#allocation2 + $0xc0] sm:$0xff]  ;;  %v7222_v59 = vld [vmem:[#allocation2 + $0xe8] sm:$0xff] }
 0x377   : > { %7874 = vst.msk [vmem:[#allocation2 + $0x68] sm:$0xff] %vm1285_vm4, %v7842_v21 }
 0x378   : > { %7873 = vst.msk [vmem:[#allocation2 + $0x60] sm:$0xff] %vm1285_vm4, %v7841_v6  ;;  %v12972_v41 = vpop.f32.mrb[112].mxu0 }
 0x379   : > { %v7844_v62 = vadd.f32 %v12972_v41, %v7208_v35  ;;  %v7740_v12 = vpop.f32.mrb[113].mxu0  ;;  %13286 = vmatmul.mubr.msk.f32.gmra.mrb[154].mxu0 %vm800_vm3, %v9798_v0  ;;  %v7221_v0 = vld [vmem:[#allocation2 + $0xe0] sm:$0xff] }
 0x37a   : > { %v7843_v17 = vadd.f32 %v7740_v12, %v7207_v49  ;;  %13288 = vmatprep.mubr.msk.f32.mxu0 %vm800_vm3, %v9801_v39 }
 0x37b   : > { %7876 = vst.msk [vmem:[#allocation2 + $0x78] sm:$0xff] %vm1285_vm4, %v7844_v62  ;;  %v8831_v62 = vld [vmem:[#allocation2 + $0x8] sm:$0xff] }
 0x37c   : > { %7875 = vst.msk [vmem:[#allocation2 + $0x70] sm:$0xff] %vm1285_vm4, %v7843_v17  ;;  %v12975_v11 = vpop.f32.mrb[114].mxu0  ;;  %v8830_v17 = vld [vmem:[#allocation2] sm:$0xff] }
 0x37d   : > { %v7846_v52 = vadd.f32 %v12975_v11, %v7210_v3  ;;  %v7750_v19 = vpop.f32.mrb[115].mxu0  ;;  %13289 = vmatmul.mubr.msk.f32.gmra.mrb[156].mxu0 %vm800_vm3, %v9803_v47  ;;  %v8835_v11 = vld [vmem:[#allocation2 + $0x28] sm:$0xff] }
 0x37e   : > { %v7845_v29 = vadd.f32 %v7750_v19, %v7209_v18  ;;  %13291 = vmatprep.mubr.msk.f32.mxu0 %vm800_vm3, %v9806_v63  ;;  %v8833_v63 = vld [vmem:[#allocation2 + $0x18] sm:$0xff]  ;;  %v8834_v19 = vld [vmem:[#allocation2 + $0x20] sm:$0xff] }
 0x37f   : > { %7878 = vst.msk [vmem:[#allocation2 + $0x88] sm:$0xff] %vm1285_vm4, %v7846_v52 }
 0x380   : > { %7877 = vst.msk [vmem:[#allocation2 + $0x80] sm:$0xff] %vm1285_vm4, %v7845_v29  ;;  %v12978_v31 = vpop.f32.mrb[116].mxu0 }
 0x381   : > { %v7848_v50 = vadd.f32 %v12978_v31, %v7212_v1  ;;  %v7760_v61 = vpop.f32.mrb[117].mxu0  ;;  %13292 = vmatmul.mubr.msk.f32.gmra.mrb[158].mxu0 %vm800_vm3, %v9808_v2  ;;  %v8836_v31 = vld [vmem:[#allocation2 + $0x30] sm:$0xff] }
 0x382   : > { %v7847_v5 = vadd.f32 %v7760_v61, %v7211_v58  ;;  %13294 = vmatprep.mubr.msk.f32.mxu0 %vm800_vm3, %v9811_v27  ;;  %v8839_v61 = vld [vmem:[#allocation2 + $0x48] sm:$0xff] }
 0x383   : > { %7880 = vst.msk [vmem:[#allocation2 + $0x98] sm:$0xff] %vm1285_vm4, %v7848_v50 }
 0x384   : > { %7879 = vst.msk [vmem:[#allocation2 + $0x90] sm:$0xff] %vm1285_vm4, %v7847_v5  ;;  %v12981_v45 = vpop.f32.mrb[118].mxu0 }
 0x385   : > { %v7850_v23 = vadd.f32 %v12981_v45, %v7214_v57  ;;  %v7770_v42 = vpop.f32.mrb[119].mxu0  ;;  %13295 = vmatmul.mubr.msk.f32.gmra.mrb[160].mxu0 %vm800_vm3, %v9813_v25  ;;  %v8838_v57 = vld [vmem:[#allocation2 + $0x40] sm:$0xff] }
 0x386   : > { %v7849_v56 = vadd.f32 %v7770_v42, %v7213_v8  ;;  %v8841_v8 = vld [vmem:[#allocation2 + $0x58] sm:$0xff] }
 0x387   : > { %7882 = vst.msk [vmem:[#allocation2 + $0xa8] sm:$0xff] %vm1285_vm4, %v7850_v23 }
 0x388   : > { %7881 = vst.msk [vmem:[#allocation2 + $0xa0] sm:$0xff] %vm1285_vm4, %v7849_v56  ;;  %v12984_v48 = vpop.f32.mrb[120].mxu0 }
 0x389   : > { %v7852_v51 = vadd.f32 %v12984_v48, %v7216_v54  ;;  %v7780_v22 = vpop.f32.mrb[121].mxu0  ;;  %v8840_v54 = vld [vmem:[#allocation2 + $0x50] sm:$0xff] }
 0x38a   : > { %v7851_v38 = vadd.f32 %v7780_v22, %v7215_v43  ;;  %v8843_v43 = vld [vmem:[#allocation2 + $0x68] sm:$0xff] }
 0x38b   : > { %7884 = vst.msk [vmem:[#allocation2 + $0xb8] sm:$0xff] %vm1285_vm4, %v7852_v51 }
 0x38c   : > { %7883 = vst.msk [vmem:[#allocation2 + $0xb0] sm:$0xff] %vm1285_vm4, %v7851_v38  ;;  %v12987_v37 = vpop.f32.mrb[122].mxu0 }
 0x38d   : > { %v7854_v40 = vadd.f32 %v12987_v37, %v7218_v44  ;;  %v7790_v10 = vpop.f32.mrb[123].mxu0  ;;  %v8842_v44 = vld [vmem:[#allocation2 + $0x60] sm:$0xff] }
 0x38e   : > { %v7853_v55 = vadd.f32 %v7790_v10, %v7217_v28  ;;  %v8845_v28 = vld [vmem:[#allocation2 + $0x78] sm:$0xff] }
 0x38f   : > { %7886 = vst.msk [vmem:[#allocation2 + $0xc8] sm:$0xff] %vm1285_vm4, %v7854_v40 }
 0x390   : > { %7885 = vst.msk [vmem:[#allocation2 + $0xc0] sm:$0xff] %vm1285_vm4, %v7853_v55  ;;  %v12990_v13 = vpop.f32.mrb[124].mxu0 }
 0x391   : > { %v7856_v26 = vadd.f32 %v12990_v13, %v7220_v60  ;;  %v7800_v20 = vpop.f32.mrb[125].mxu0  ;;  %v8844_v60 = vld [vmem:[#allocation2 + $0x70] sm:$0xff] }
 0x392   : > { %v7855_v21 = vadd.f32 %v7800_v20, %v7219_v7  ;;  %v8847_v7 = vld [vmem:[#allocation2 + $0x88] sm:$0xff] }
 0x393   : > { %7888 = vst.msk [vmem:[#allocation2 + $0xd8] sm:$0xff] %vm1285_vm4, %v7856_v26 }
 0x394   : > { %7887 = vst.msk [vmem:[#allocation2 + $0xd0] sm:$0xff] %vm1285_vm4, %v7855_v21  ;;  %v12993_v15 = vpop.f32.mrb[126].mxu0 }
 0x395   : > { %v7858_v6 = vadd.f32 %v12993_v15, %v7222_v59  ;;  %v7810_v32 = vpop.f32.mrb[127].mxu0  ;;  %v8846_v59 = vld [vmem:[#allocation2 + $0x80] sm:$0xff] }
 0x396   : > { %v7857_v39 = vadd.f32 %v7810_v32, %v7221_v0  ;;  %v8849_v0 = vld [vmem:[#allocation2 + $0x98] sm:$0xff] }
 0x397   : > { %7890 = vst.msk [vmem:[#allocation2 + $0xe8] sm:$0xff] %vm1285_vm4, %v7858_v6 }
 0x398   : > { %7889 = vst.msk [vmem:[#allocation2 + $0xe0] sm:$0xff] %vm1285_vm4, %v7857_v39  ;;  %v12996_v36 = vpop.f32.mrb[128].mxu0 }
 0x399   : > { %v7860_v33 = vadd.f32 %v12996_v36, %v7224_v34  ;;  %v7820_v35 = vpop.f32.mrb[129].mxu0  ;;  %v8848_v34 = vld [vmem:[#allocation2 + $0x90] sm:$0xff] }
 0x39a   : > { %v7859_v41 = vadd.f32 %v7820_v35, %v7223_v16  ;;  %v8851_v16 = vld [vmem:[#allocation2 + $0xa8] sm:$0xff] }
 0x39b   : > { %7892 = vst.msk [vmem:[#allocation2 + $0xf8] sm:$0xff] %vm1285_vm4, %v7860_v33 }
 0x39c   : > { %7891 = vst.msk [vmem:[#allocation2 + $0xf0] sm:$0xff] %vm1285_vm4, %v7859_v41 }
 0x3cd   : > { %v13101_v24 = vpop.f32.mrb[144].mxu1 }
 0x3ce   : > { %v8863_v49 = vadd.f32 %v13101_v24, %v8831_v62  ;;  %v8639_v12 = vpop.f32.mrb[145].mxu1  ;;  %v8850_v24 = vld [vmem:[#allocation2 + $0xa0] sm:$0xff] }
 0x3cf   : > { %v8862_v47 = vadd.f32 %v8830_v17, %v8639_v12  ;;  %v8853_v12 = vld [vmem:[#allocation2 + $0xb8] sm:$0xff] }
 0x3d0   : > { %8895 = vst.msk [vmem:[#allocation2 + $0x8] sm:$0xff] %vm1285_vm4, %v8863_v49 }
 0x3d1   : > { %8894 = vst.msk [vmem:[#allocation2] sm:$0xff] %vm1285_vm4, %v8862_v47  ;;  %v13104_v9 = vpop.f32.mrb[146].mxu1 }
 0x3d2   : > { %v8865_v30 = vadd.f32 %v13104_v9, %v8833_v63  ;;  %v8649_v14 = vpop.f32.mrb[147].mxu1  ;;  %v8852_v9 = vld [vmem:[#allocation2 + $0xb0] sm:$0xff] }
 0x3d3   : > { %v8864_v46 = vadd.f32 %v8832_v53, %v8649_v14  ;;  %v8855_v14 = vld [vmem:[#allocation2 + $0xc8] sm:$0xff] }
 0x3d4   : > { %8897 = vst.msk [vmem:[#allocation2 + $0x18] sm:$0xff] %vm1285_vm4, %v8865_v30 }
 0x3d5   : > { %8896 = vst.msk [vmem:[#allocation2 + $0x10] sm:$0xff] %vm1285_vm4, %v8864_v46  ;;  %v13107_v3 = vpop.f32.mrb[148].mxu1 }
 0x3d6   : > { %v8867_v52 = vadd.f32 %v13107_v3, %v8835_v11  ;;  %v8659_v18 = vpop.f32.mrb[149].mxu1  ;;  %v8854_v3 = vld [vmem:[#allocation2 + $0xc0] sm:$0xff] }
 0x3d7   : > { %v8866_v29 = vadd.f32 %v8834_v19, %v8659_v18  ;;  %v8857_v18 = vld [vmem:[#allocation2 + $0xd8] sm:$0xff] }
 0x3d8   : > { %8899 = vst.msk [vmem:[#allocation2 + $0x28] sm:$0xff] %vm1285_vm4, %v8867_v52 }
 0x3d9   : > { %8898 = vst.msk [vmem:[#allocation2 + $0x20] sm:$0xff] %vm1285_vm4, %v8866_v29  ;;  %v13110_v2 = vpop.f32.mrb[150].mxu1 }
 0x3da   : > { %v8869_v27 = vadd.f32 %v13110_v2, %v8837_v4  ;;  %v8669_v1 = vpop.f32.mrb[151].mxu1  ;;  %v8856_v2 = vld [vmem:[#allocation2 + $0xd0] sm:$0xff] }
 0x3db   : > { %v8868_v50 = vadd.f32 %v8836_v31, %v8669_v1  ;;  %v8859_v1 = vld [vmem:[#allocation2 + $0xe8] sm:$0xff] }
 0x3dc   : > { %8901 = vst.msk [vmem:[#allocation2 + $0x38] sm:$0xff] %vm1285_vm4, %v8869_v27 }
 0x3dd   : > { %8900 = vst.msk [vmem:[#allocation2 + $0x30] sm:$0xff] %vm1285_vm4, %v8868_v50  ;;  %v13113_v58 = vpop.f32.mrb[152].mxu1 }
 0x3de   : > { %v8871_v5 = vadd.f32 %v13113_v58, %v8839_v61  ;;  %v8679_v25 = vpop.f32.mrb[153].mxu1  ;;  %v8858_v58 = vld [vmem:[#allocation2 + $0xe0] sm:$0xff] }
 0x3df   : > { %v8870_v45 = vadd.f32 %v8838_v57, %v8679_v25  ;;  %v8861_v25 = vld [vmem:[#allocation2 + $0xf8] sm:$0xff] }
 0x3e0   : > { %8903 = vst.msk [vmem:[#allocation2 + $0x48] sm:$0xff] %vm1285_vm4, %v8871_v5 }
 0x3e1   : > { %8902 = vst.msk [vmem:[#allocation2 + $0x40] sm:$0xff] %vm1285_vm4, %v8870_v45  ;;  %v13116_v23 = vpop.f32.mrb[154].mxu1 }
 0x3e2   : > { %v8873_v42 = vadd.f32 %v13116_v23, %v8841_v8  ;;  %v8689_v56 = vpop.f32.mrb[155].mxu1  ;;  %v8860_v23 = vld [vmem:[#allocation2 + $0xf0] sm:$0xff] }
 0x3e3   : > { %v8872_v48 = vadd.f32 %v8840_v54, %v8689_v56  ;;  %v10141_v56 = vld [vmem:[#allocation2 + $0x8] sm:$0xff] }
 0x3e4   : > { %8905 = vst.msk [vmem:[#allocation2 + $0x58] sm:$0xff] %vm1285_vm4, %v8873_v42 }
 0x3e5   : > { %8904 = vst.msk [vmem:[#allocation2 + $0x50] sm:$0xff] %vm1285_vm4, %v8872_v48  ;;  %v13119_v51 = vpop.f32.mrb[156].mxu1 }
 0x3e6   : > { %v8875_v22 = vadd.f32 %v13119_v51, %v8843_v43  ;;  %v8699_v38 = vpop.f32.mrb[157].mxu1  ;;  %v10140_v51 = vld [vmem:[#allocation2] sm:$0xff] }
 0x3e7   : > { %v8874_v37 = vadd.f32 %v8842_v44, %v8699_v38  ;;  %v10143_v38 = vld [vmem:[#allocation2 + $0x18] sm:$0xff] }
 0x3e8   : > { %8907 = vst.msk [vmem:[#allocation2 + $0x68] sm:$0xff] %vm1285_vm4, %v8875_v22 }
 0x3e9   : > { %8906 = vst.msk [vmem:[#allocation2 + $0x60] sm:$0xff] %vm1285_vm4, %v8874_v37  ;;  %v13122_v40 = vpop.f32.mrb[158].mxu1 }
 0x3ea   : > { %v8877_v10 = vadd.f32 %v13122_v40, %v8845_v28  ;;  %v8709_v55 = vpop.f32.mrb[159].mxu1  ;;  %v10142_v40 = vld [vmem:[#allocation2 + $0x10] sm:$0xff] }
 0x3eb   : > { %v8876_v13 = vadd.f32 %v8844_v60, %v8709_v55  ;;  %v10145_v55 = vld [vmem:[#allocation2 + $0x28] sm:$0xff] }
 0x3ec   : > { %8909 = vst.msk [vmem:[#allocation2 + $0x78] sm:$0xff] %vm1285_vm4, %v8877_v10 }
 0x3ed   : > { %8908 = vst.msk [vmem:[#allocation2 + $0x70] sm:$0xff] %vm1285_vm4, %v8876_v13  ;;  %v13125_v26 = vpop.f32.mrb[160].mxu1 }
 0x3ee   : > { %v8879_v20 = vadd.f32 %v13125_v26, %v8847_v7  ;;  %v8719_v21 = vpop.f32.mrb[161].mxu1  ;;  %v10144_v26 = vld [vmem:[#allocation2 + $0x20] sm:$0xff] }
 0x3ef   : > { %v8878_v15 = vadd.f32 %v8846_v59, %v8719_v21 }
 0x3f0   : > { %8911 = vst.msk [vmem:[#allocation2 + $0x88] sm:$0xff] %vm1285_vm4, %v8879_v20 }
 0x3f1   : > { %8910 = vst.msk [vmem:[#allocation2 + $0x80] sm:$0xff] %vm1285_vm4, %v8878_v15  ;;  %v13128_v6 = vpop.f32.mrb[162].mxu1  ;;  %v10147_v15 = vld [vmem:[#allocation2 + $0x38] sm:$0xff] }
 0x3f2   : > { %v8881_v32 = vadd.f32 %v13128_v6, %v8849_v0  ;;  %v8729_v39 = vpop.f32.mrb[163].mxu1 }
 0x3f3   : > { %v8880_v36 = vadd.f32 %v8848_v34, %v8729_v39 }
 0x3f4   : > { %8913 = vst.msk [vmem:[#allocation2 + $0x98] sm:$0xff] %vm1285_vm4, %v8881_v32  ;;  %v10146_v32 = vld [vmem:[#allocation2 + $0x30] sm:$0xff] }
 0x3f5   : > { %8912 = vst.msk [vmem:[#allocation2 + $0x90] sm:$0xff] %vm1285_vm4, %v8880_v36  ;;  %v13131_v33 = vpop.f32.mrb[164].mxu1 }
 0x3f6   : > { %v8883_v35 = vadd.f32 %v13131_v33, %v8851_v16  ;;  %v8739_v41 = vpop.f32.mrb[165].mxu1  ;;  %v10149_v16 = vld [vmem:[#allocation2 + $0x48] sm:$0xff] }
 0x3f7   : > { %v8882_v62 = vadd.f32 %v8850_v24, %v8739_v41  ;;  %v10148_v24 = vld [vmem:[#allocation2 + $0x40] sm:$0xff] }
 0x3f8   : > { %8915 = vst.msk [vmem:[#allocation2 + $0xa8] sm:$0xff] %vm1285_vm4, %v8883_v35 }
 0x3f9   : > { %8914 = vst.msk [vmem:[#allocation2 + $0xa0] sm:$0xff] %vm1285_vm4, %v8882_v62  ;;  %v13134_v49 = vpop.f32.mrb[166].mxu1 }
 0x3fa   : > { %v8885_v17 = vadd.f32 %v13134_v49, %v8853_v12  ;;  %v8749_v47 = vpop.f32.mrb[167].mxu1 }
 0x3fb   : > { %v8884_v63 = vadd.f32 %v8852_v9, %v8749_v47  ;;  %v10151_v47 = vld [vmem:[#allocation2 + $0x58] sm:$0xff] }
 0x3fc   : > { %8917 = vst.msk [vmem:[#allocation2 + $0xb8] sm:$0xff] %vm1285_vm4, %v8885_v17 }
 0x3fd   : > { %8916 = vst.msk [vmem:[#allocation2 + $0xb0] sm:$0xff] %vm1285_vm4, %v8884_v63  ;;  %v13137_v30 = vpop.f32.mrb[168].mxu1 }
 0x3fe   : > { %v8887_v53 = vadd.f32 %v13137_v30, %v8855_v14  ;;  %v8759_v46 = vpop.f32.mrb[169].mxu1  ;;  %v10150_v30 = vld [vmem:[#allocation2 + $0x50] sm:$0xff] }
 0x3ff   : > { %v8886_v11 = vadd.f32 %v8854_v3, %v8759_v46 }
 0x400   : > { %8919 = vst.msk [vmem:[#allocation2 + $0xc8] sm:$0xff] %vm1285_vm4, %v8887_v53 }
 0x401   : > { %8918 = vst.msk [vmem:[#allocation2 + $0xc0] sm:$0xff] %vm1285_vm4, %v8886_v11  ;;  %v13140_v52 = vpop.f32.mrb[170].mxu1  ;;  %v10153_v11 = vld [vmem:[#allocation2 + $0x68] sm:$0xff] }
 0x402   : > { %v8889_v19 = vadd.f32 %v13140_v52, %v8857_v18  ;;  %v8769_v29 = vpop.f32.mrb[171].mxu1 }
 0x403   : > { %v8888_v4 = vadd.f32 %v8856_v2, %v8769_v29 }
 0x404   : > { %8921 = vst.msk [vmem:[#allocation2 + $0xd8] sm:$0xff] %vm1285_vm4, %v8889_v19  ;;  %v10152_v19 = vld [vmem:[#allocation2 + $0x60] sm:$0xff] }
 0x405   : > { %8920 = vst.msk [vmem:[#allocation2 + $0xd0] sm:$0xff] %vm1285_vm4, %v8888_v4  ;;  %v13143_v27 = vpop.f32.mrb[172].mxu1 }
 0x406   : > { %v8891_v31 = vadd.f32 %v13143_v27, %v8859_v1  ;;  %v8779_v50 = vpop.f32.mrb[173].mxu1  ;;  %v10155_v1 = vld [vmem:[#allocation2 + $0x78] sm:$0xff] }
 0x407   : > { %v8890_v61 = vadd.f32 %v8858_v58, %v8779_v50  ;;  %v10154_v58 = vld [vmem:[#allocation2 + $0x70] sm:$0xff] }
 0x408   : > { %8923 = vst.msk [vmem:[#allocation2 + $0xe8] sm:$0xff] %vm1285_vm4, %v8891_v31 }
 0x409   : > { %8922 = vst.msk [vmem:[#allocation2 + $0xe0] sm:$0xff] %vm1285_vm4, %v8890_v61  ;;  %v13146_v5 = vpop.f32.mrb[174].mxu1 }
 0x40a   : > { %v8893_v57 = vadd.f32 %v13146_v5, %v8861_v25  ;;  %v8789_v45 = vpop.f32.mrb[175].mxu1 }
 0x40b   : > { %v8892_v8 = vadd.f32 %v8860_v23, %v8789_v45  ;;  %v10157_v45 = vld [vmem:[#allocation2 + $0x88] sm:$0xff] }
 0x40c   : > { %8925 = vst.msk [vmem:[#allocation2 + $0xf8] sm:$0xff] %vm1285_vm4, %v8893_v57 }
 0x40d   : > { %8924 = vst.msk [vmem:[#allocation2 + $0xf0] sm:$0xff] %vm1285_vm4, %v8892_v8 }
 0x41c   : > { %v13251_v42 = vpop.f32.mrb[130].mxu0 }
 0x41d   : > { %v10173_v54 = vadd.f32 %v13251_v42, %v10141_v56  ;;  %v9949_v48 = vpop.f32.mrb[131].mxu0  ;;  %v10156_v42 = vld [vmem:[#allocation2 + $0x80] sm:$0xff] }
 0x41e   : > { %v10172_v43 = vadd.f32 %v10140_v51, %v9949_v48 }
 0x41f   : > { %10205 = vst.msk [vmem:[#allocation2 + $0x8] sm:$0xff] %vm1285_vm4, %v10173_v54 }
 0x420   : > { %10204 = vst.msk [vmem:[#allocation2] sm:$0xff] %vm1285_vm4, %v10172_v43  ;;  %v13254_v22 = vpop.f32.mrb[132].mxu0  ;;  %v10159_v43 = vld [vmem:[#allocation2 + $0x98] sm:$0xff] }
 0x421   : > { %v10175_v44 = vadd.f32 %v13254_v22, %v10143_v38  ;;  %v9959_v37 = vpop.f32.mrb[133].mxu0 }
 0x422   : > { %v10174_v28 = vadd.f32 %v10142_v40, %v9959_v37 }
 0x423   : > { %10207 = vst.msk [vmem:[#allocation2 + $0x18] sm:$0xff] %vm1285_vm4, %v10175_v44  ;;  %v10158_v44 = vld [vmem:[#allocation2 + $0x90] sm:$0xff] }
 0x424   : > { %10206 = vst.msk [vmem:[#allocation2 + $0x10] sm:$0xff] %vm1285_vm4, %v10174_v28  ;;  %v13257_v10 = vpop.f32.mrb[134].mxu0 }
 0x425   : > { %v10177_v60 = vadd.f32 %v13257_v10, %v10145_v55  ;;  %v9969_v13 = vpop.f32.mrb[135].mxu0  ;;  %v10161_v55 = vld [vmem:[#allocation2 + $0xa8] sm:$0xff] }
 0x426   : > { %v10237_v7 = vld [vmem:[#allocation2 + $0x8] sm:$0xff]  ;;  %v10176_v20 = vadd.f32 %v10144_v26, %v9969_v13  ;;  %v10160_v26 = vld [vmem:[#allocation2 + $0xa0] sm:$0xff] }
 0x427   : > { %10269 = vst.msk [vmem:[%s17960_s23 + $0x8] sm:$0xff] %vm1285_vm4, %v10237_v7  ;;  %v10236_v21 = vld [vmem:[#allocation2] sm:$0xff]  ;;  %10209 = vst.msk [vmem:[#allocation2 + $0x28] sm:$0xff] %vm1285_vm4, %v10177_v60 }
 0x428   : > { %10268 = vst.msk [vmem:[%s17960_s23] sm:$0xff] %vm1285_vm4, %v10236_v21  ;;  %10208 = vst.msk [vmem:[#allocation2 + $0x20] sm:$0xff] %vm1285_vm4, %v10176_v20  ;;  %v13260_v59 = vpop.f32.mrb[136].mxu0 }
 0x429   : > { %v10179_v6 = vadd.f32 %v13260_v59, %v10147_v15  ;;  %v9979_v0 = vpop.f32.mrb[137].mxu0  ;;  %v10163_v15 = vld [vmem:[#allocation2 + $0xb8] sm:$0xff] }
 0x42a   : > { %v10239_v39 = vld [vmem:[#allocation2 + $0x18] sm:$0xff]  ;;  %v10178_v34 = vadd.f32 %v10146_v32, %v9979_v0  ;;  %v10162_v32 = vld [vmem:[#allocation2 + $0xb0] sm:$0xff] }
 0x42b   : > { %10271 = vst.msk [vmem:[%s17960_s23 + $0x18] sm:$0xff] %vm1285_vm4, %v10239_v39  ;;  %v10238_v36 = vld [vmem:[#allocation2 + $0x10] sm:$0xff]  ;;  %10211 = vst.msk [vmem:[#allocation2 + $0x38] sm:$0xff] %vm1285_vm4, %v10179_v6 }
 0x42c   : > { %10270 = vst.msk [vmem:[%s17960_s23 + $0x10] sm:$0xff] %vm1285_vm4, %v10238_v36  ;;  %10210 = vst.msk [vmem:[#allocation2 + $0x30] sm:$0xff] %vm1285_vm4, %v10178_v34  ;;  %v13263_v33 = vpop.f32.mrb[138].mxu0 }
 0x42d   : > { %v10181_v35 = vadd.f32 %v13263_v33, %v10149_v16  ;;  %v9989_v41 = vpop.f32.mrb[139].mxu0  ;;  %v10165_v16 = vld [vmem:[#allocation2 + $0xc8] sm:$0xff] }
 0x42e   : > { %v10241_v62 = vld [vmem:[#allocation2 + $0x28] sm:$0xff]  ;;  %v10180_v49 = vadd.f32 %v10148_v24, %v9989_v41  ;;  %v10164_v24 = vld [vmem:[#allocation2 + $0xc0] sm:$0xff] }
 0x42f   : > { %10273 = vst.msk [vmem:[%s17960_s23 + $0x28] sm:$0xff] %vm1285_vm4, %v10241_v62  ;;  %v10240_v12 = vld [vmem:[#allocation2 + $0x20] sm:$0xff]  ;;  %10213 = vst.msk [vmem:[#allocation2 + $0x48] sm:$0xff] %vm1285_vm4, %v10181_v35 }
 0x430   : > { %10272 = vst.msk [vmem:[%s17960_s23 + $0x20] sm:$0xff] %vm1285_vm4, %v10240_v12  ;;  %10212 = vst.msk [vmem:[#allocation2 + $0x40] sm:$0xff] %vm1285_vm4, %v10180_v49  ;;  %v13266_v17 = vpop.f32.mrb[140].mxu0 }
 0x431   : > { %v10183_v9 = vadd.f32 %v13266_v17, %v10151_v47  ;;  %v9999_v63 = vpop.f32.mrb[141].mxu0  ;;  %v10167_v47 = vld [vmem:[#allocation2 + $0xd8] sm:$0xff] }
 0x432   : > { %v10243_v14 = vld [vmem:[#allocation2 + $0x38] sm:$0xff]  ;;  %v10182_v53 = vadd.f32 %v10150_v30, %v9999_v63  ;;  %v10166_v30 = vld [vmem:[#allocation2 + $0xd0] sm:$0xff] }
 0x433   : > { %10275 = vst.msk [vmem:[%s17960_s23 + $0x38] sm:$0xff] %vm1285_vm4, %v10243_v14  ;;  %v10242_v46 = vld [vmem:[#allocation2 + $0x30] sm:$0xff]  ;;  %10215 = vst.msk [vmem:[#allocation2 + $0x58] sm:$0xff] %vm1285_vm4, %v10183_v9 }
 0x434   : > { %10274 = vst.msk [vmem:[%s17960_s23 + $0x30] sm:$0xff] %vm1285_vm4, %v10242_v46  ;;  %10214 = vst.msk [vmem:[#allocation2 + $0x50] sm:$0xff] %vm1285_vm4, %v10182_v53  ;;  %v13269_v3 = vpop.f32.mrb[142].mxu0 }
 0x435   : > { %v10185_v52 = vadd.f32 %v13269_v3, %v10153_v11  ;;  %v10009_v18 = vpop.f32.mrb[143].mxu0  ;;  %v10169_v11 = vld [vmem:[#allocation2 + $0xe8] sm:$0xff] }
 0x436   : > { %v10245_v29 = vld [vmem:[#allocation2 + $0x48] sm:$0xff]  ;;  %v10184_v2 = vadd.f32 %v10152_v19, %v10009_v18  ;;  %v10168_v19 = vld [vmem:[#allocation2 + $0xe0] sm:$0xff] }
 0x437   : > { %10277 = vst.msk [vmem:[%s17960_s23 + $0x48] sm:$0xff] %vm1285_vm4, %v10245_v29  ;;  %v10244_v4 = vld [vmem:[#allocation2 + $0x40] sm:$0xff]  ;;  %10217 = vst.msk [vmem:[#allocation2 + $0x68] sm:$0xff] %vm1285_vm4, %v10185_v52 }
 0x438   : > { %10276 = vst.msk [vmem:[%s17960_s23 + $0x40] sm:$0xff] %vm1285_vm4, %v10244_v4  ;;  %10216 = vst.msk [vmem:[#allocation2 + $0x60] sm:$0xff] %vm1285_vm4, %v10184_v2  ;;  %v13272_v27 = vpop.f32.mrb[144].mxu0 }
 0x439   : > { %v10187_v31 = vadd.f32 %v13272_v27, %v10155_v1  ;;  %v10019_v50 = vpop.f32.mrb[145].mxu0  ;;  %v10171_v1 = vld [vmem:[#allocation2 + $0xf8] sm:$0xff] }
 0x43a   : > { %v10247_v61 = vld [vmem:[#allocation2 + $0x58] sm:$0xff]  ;;  %v10186_v5 = vadd.f32 %v10154_v58, %v10019_v50  ;;  %v10170_v58 = vld [vmem:[#allocation2 + $0xf0] sm:$0xff] }
 0x43b   : > { %10279 = vst.msk [vmem:[%s17960_s23 + $0x58] sm:$0xff] %vm1285_vm4, %v10247_v61  ;;  %v10246_v25 = vld [vmem:[#allocation2 + $0x50] sm:$0xff]  ;;  %10219 = vst.msk [vmem:[#allocation2 + $0x78] sm:$0xff] %vm1285_vm4, %v10187_v31 }
 0x43c   : > { %10278 = vst.msk [vmem:[%s17960_s23 + $0x50] sm:$0xff] %vm1285_vm4, %v10246_v25  ;;  %10218 = vst.msk [vmem:[#allocation2 + $0x70] sm:$0xff] %vm1285_vm4, %v10186_v5  ;;  %v13275_v57 = vpop.f32.mrb[146].mxu0 }
 0x43d   : > { %v10189_v23 = vadd.f32 %v13275_v57, %v10157_v45  ;;  %v10029_v8 = vpop.f32.mrb[147].mxu0 }
 0x43e   : > { %v10249_v56 = vld [vmem:[#allocation2 + $0x68] sm:$0xff]  ;;  %v10188_v54 = vadd.f32 %v10156_v42, %v10029_v8 }
 0x43f   : > { %10281 = vst.msk [vmem:[%s17960_s23 + $0x68] sm:$0xff] %vm1285_vm4, %v10249_v56  ;;  %v10248_v48 = vld [vmem:[#allocation2 + $0x60] sm:$0xff]  ;;  %10221 = vst.msk [vmem:[#allocation2 + $0x88] sm:$0xff] %vm1285_vm4, %v10189_v23 }
 0x440   : > { %10280 = vst.msk [vmem:[%s17960_s23 + $0x60] sm:$0xff] %vm1285_vm4, %v10248_v48  ;;  %10220 = vst.msk [vmem:[#allocation2 + $0x80] sm:$0xff] %vm1285_vm4, %v10188_v54  ;;  %v13278_v51 = vpop.f32.mrb[148].mxu0 }
 0x441   : > { %v10191_v22 = vadd.f32 %v13278_v51, %v10159_v43  ;;  %v10039_v38 = vpop.f32.mrb[149].mxu0 }
 0x442   : > { %v10251_v37 = vld [vmem:[#allocation2 + $0x78] sm:$0xff]  ;;  %v10190_v40 = vadd.f32 %v10158_v44, %v10039_v38 }
 0x443   : > { %10283 = vst.msk [vmem:[%s17960_s23 + $0x78] sm:$0xff] %vm1285_vm4, %v10251_v37  ;;  %v10250_v28 = vld [vmem:[#allocation2 + $0x70] sm:$0xff]  ;;  %10223 = vst.msk [vmem:[#allocation2 + $0x98] sm:$0xff] %vm1285_vm4, %v10191_v22 }
 0x444   : > { %10282 = vst.msk [vmem:[%s17960_s23 + $0x70] sm:$0xff] %vm1285_vm4, %v10250_v28  ;;  %10222 = vst.msk [vmem:[#allocation2 + $0x90] sm:$0xff] %vm1285_vm4, %v10190_v40  ;;  %v13281_v10 = vpop.f32.mrb[150].mxu0 }
 0x445   : > { %v10193_v60 = vadd.f32 %v13281_v10, %v10161_v55  ;;  %v10049_v13 = vpop.f32.mrb[151].mxu0 }
 0x446   : > { %v10253_v7 = vld [vmem:[#allocation2 + $0x88] sm:$0xff]  ;;  %v10192_v20 = vadd.f32 %v10160_v26, %v10049_v13 }
 0x447   : > { %10285 = vst.msk [vmem:[%s17960_s23 + $0x88] sm:$0xff] %vm1285_vm4, %v10253_v7  ;;  %v10252_v21 = vld [vmem:[#allocation2 + $0x80] sm:$0xff]  ;;  %10225 = vst.msk [vmem:[#allocation2 + $0xa8] sm:$0xff] %vm1285_vm4, %v10193_v60 }
 0x448   : > { %10284 = vst.msk [vmem:[%s17960_s23 + $0x80] sm:$0xff] %vm1285_vm4, %v10252_v21  ;;  %10224 = vst.msk [vmem:[#allocation2 + $0xa0] sm:$0xff] %vm1285_vm4, %v10192_v20  ;;  %v13284_v59 = vpop.f32.mrb[152].mxu0 }
 0x449   : > { %v10195_v6 = vadd.f32 %v13284_v59, %v10163_v15  ;;  %v10059_v0 = vpop.f32.mrb[153].mxu0 }
 0x44a   : > { %v10255_v39 = vld [vmem:[#allocation2 + $0x98] sm:$0xff]  ;;  %v10194_v34 = vadd.f32 %v10162_v32, %v10059_v0 }
 0x44b   : > { %10287 = vst.msk [vmem:[%s17960_s23 + $0x98] sm:$0xff] %vm1285_vm4, %v10255_v39  ;;  %v10254_v36 = vld [vmem:[#allocation2 + $0x90] sm:$0xff]  ;;  %10227 = vst.msk [vmem:[#allocation2 + $0xb8] sm:$0xff] %vm1285_vm4, %v10195_v6 }
 0x44c   : > { %10286 = vst.msk [vmem:[%s17960_s23 + $0x90] sm:$0xff] %vm1285_vm4, %v10254_v36  ;;  %10226 = vst.msk [vmem:[#allocation2 + $0xb0] sm:$0xff] %vm1285_vm4, %v10194_v34  ;;  %v13287_v33 = vpop.f32.mrb[154].mxu0 }
 0x44d   : > { %v10197_v35 = vadd.f32 %v13287_v33, %v10165_v16  ;;  %v10069_v41 = vpop.f32.mrb[155].mxu0 }
 0x44e   : > { %v10257_v62 = vld [vmem:[#allocation2 + $0xa8] sm:$0xff]  ;;  %v10196_v49 = vadd.f32 %v10164_v24, %v10069_v41 }
 0x44f   : > { %10289 = vst.msk [vmem:[%s17960_s23 + $0xa8] sm:$0xff] %vm1285_vm4, %v10257_v62  ;;  %v10256_v12 = vld [vmem:[#allocation2 + $0xa0] sm:$0xff]  ;;  %10229 = vst.msk [vmem:[#allocation2 + $0xc8] sm:$0xff] %vm1285_vm4, %v10197_v35 }
 0x450   : > { %10288 = vst.msk [vmem:[%s17960_s23 + $0xa0] sm:$0xff] %vm1285_vm4, %v10256_v12  ;;  %10228 = vst.msk [vmem:[#allocation2 + $0xc0] sm:$0xff] %vm1285_vm4, %v10196_v49  ;;  %v13290_v17 = vpop.f32.mrb[156].mxu0 }
 0x451   : > { %v10199_v9 = vadd.f32 %v13290_v17, %v10167_v47  ;;  %v10079_v63 = vpop.f32.mrb[157].mxu0 }
 0x452   : > { %v10259_v14 = vld [vmem:[#allocation2 + $0xb8] sm:$0xff]  ;;  %v10198_v53 = vadd.f32 %v10166_v30, %v10079_v63 }
 0x453   : > { %10291 = vst.msk [vmem:[%s17960_s23 + $0xb8] sm:$0xff] %vm1285_vm4, %v10259_v14  ;;  %v10258_v46 = vld [vmem:[#allocation2 + $0xb0] sm:$0xff]  ;;  %10231 = vst.msk [vmem:[#allocation2 + $0xd8] sm:$0xff] %vm1285_vm4, %v10199_v9 }
 0x454   : > { %10290 = vst.msk [vmem:[%s17960_s23 + $0xb0] sm:$0xff] %vm1285_vm4, %v10258_v46  ;;  %10230 = vst.msk [vmem:[#allocation2 + $0xd0] sm:$0xff] %vm1285_vm4, %v10198_v53  ;;  %v13293_v3 = vpop.f32.mrb[158].mxu0 }
 0x455   : > { %v10201_v52 = vadd.f32 %v13293_v3, %v10169_v11  ;;  %v10089_v18 = vpop.f32.mrb[159].mxu0 }
 0x456   : > { %v10261_v29 = vld [vmem:[#allocation2 + $0xc8] sm:$0xff]  ;;  %v10200_v2 = vadd.f32 %v10168_v19, %v10089_v18 }
 0x457   : > { %10293 = vst.msk [vmem:[%s17960_s23 + $0xc8] sm:$0xff] %vm1285_vm4, %v10261_v29  ;;  %v10260_v4 = vld [vmem:[#allocation2 + $0xc0] sm:$0xff]  ;;  %10233 = vst.msk [vmem:[#allocation2 + $0xe8] sm:$0xff] %vm1285_vm4, %v10201_v52 }
 0x458   : > { %10292 = vst.msk [vmem:[%s17960_s23 + $0xc0] sm:$0xff] %vm1285_vm4, %v10260_v4  ;;  %10232 = vst.msk [vmem:[#allocation2 + $0xe0] sm:$0xff] %vm1285_vm4, %v10200_v2  ;;  %v13296_v27 = vpop.f32.mrb[160].mxu0 }
 0x459   : > { %v10203_v31 = vadd.f32 %v13296_v27, %v10171_v1  ;;  %v10099_v50 = vpop.f32.mrb[161].mxu0 }
 0x45a   : > { %v10263_v61 = vld [vmem:[#allocation2 + $0xd8] sm:$0xff]  ;;  %v10202_v5 = vadd.f32 %v10170_v58, %v10099_v50 }
 0x45b   : > { %10295 = vst.msk [vmem:[%s17960_s23 + $0xd8] sm:$0xff] %vm1285_vm4, %v10263_v61  ;;  %v10262_v25 = vld [vmem:[#allocation2 + $0xd0] sm:$0xff]  ;;  %10235 = vst.msk [vmem:[#allocation2 + $0xf8] sm:$0xff] %vm1285_vm4, %v10203_v31 }
 0x45c   : > { %10294 = vst.msk [vmem:[%s17960_s23 + $0xd0] sm:$0xff] %vm1285_vm4, %v10262_v25  ;;  %10234 = vst.msk [vmem:[#allocation2 + $0xf0] sm:$0xff] %vm1285_vm4, %v10202_v5 }
 0x45e   : > { %v10265_v57 = vld [vmem:[#allocation2 + $0xe8] sm:$0xff] }
 0x45f   : > { %10297 = vst.msk [vmem:[%s17960_s23 + $0xe8] sm:$0xff] %vm1285_vm4, %v10265_v57  ;;  %v10264_v45 = vld [vmem:[#allocation2 + $0xe0] sm:$0xff] }
 0x460   : > { %10296 = vst.msk [vmem:[%s17960_s23 + $0xe0] sm:$0xff] %vm1285_vm4, %v10264_v45 }
 0x462   : > { %v10267_v23 = vld [vmem:[#allocation2 + $0xf8] sm:$0xff] }
 0x463   : > { %10299 = vst.msk [vmem:[%s17960_s23 + $0xf8] sm:$0xff] %vm1285_vm4, %v10267_v23  ;;  %v10266_v8 = vld [vmem:[#allocation2 + $0xf0] sm:$0xff] }
 0x464   : > { %10298 = vst.msk [vmem:[%s17960_s23 + $0xf0] sm:$0xff] %vm1285_vm4, %v10266_v8 }
 0x465 PF: > { %s17_s24 = sadd.s32 1, %s14132_s24  }
 0x466   : > { %p14_p4 = scmp.ge.s32.totalorder %s17_s24, 4  }
 0x468   :  { %16 = sbr.rel (!%p14_p4) target bundleno = 1 (0x1), region = 99 }

</bundles_post_ra>
